<compile_context>
chip_gen: v7x
topology: tpu7x:2x2x1
jax: 0.10.0
libtpu: 0.0.40
codegen_flags: <defaults>
</compile_context>

<pallas_src>
import numpy as np
import jax
import jax.numpy as jnp
from jax.experimental import pallas as pl
from jax.experimental.pallas import tpu as pltpu

BATCH = 20              # self.batch_size
BP = 24                 # batch padded to a multiple of 8 sublanes
CELL = 128              # self.cell_size
STEPS = 20              # self.steps
NOUT = 6                # each output_fc head: Linear(cell_size, 6)
NPAD = 128              # head width padded to a full lane register
NKEYS = 4               # ['first_conn', 'second_conn', 'first_op', 'second_op']
NGATE = 4 * CELL        # 512 gate columns
NCOMB = NGATE + NPAD    # 640 = fused [gates | logits] width
NEG = -1e30             # bias pad value -> exp() underflows to exactly 0


def _nas_policy_kernel(xflat_ref, wih_ref, b_ref, fcb_ref, wcomb_hbm,
                       out_ref, gx_ref, wcomb_ref, dma_sem):
    # Kick off the DMA of the loop-only fused weights; it overlaps phase 1.
    cp = pltpu.make_async_copy(wcomb_hbm, wcomb_ref, dma_sem)
    cp.start()

    # ---- phase 1: input projection for ALL steps as one big MXU matmul ----
    # (STEPS*BP, CELL)bf16 @ (CELL, 4*CELL)bf16 + bias(f32) -> f32 VMEM scratch
    gx_ref[...] = (
        jnp.dot(xflat_ref[...], wih_ref[...],
                preferred_element_type=jnp.float32)
        + b_ref[...])

    cp.wait()

    # ---- phase 2: serial LSTM recurrence (statically unrolled) ----
    h = jnp.zeros((BP, CELL), jnp.float32)
    c = jnp.zeros((BP, CELL), jnp.float32)

    def _softmax_store(logits, t_out):
        # pad lanes have logit ~ -1e30 -> exp == 0 exactly
        m = jnp.max(logits, axis=1, keepdims=True)
        e = jnp.exp(logits - m)
        denom = jnp.sum(e, axis=1, keepdims=True)
        r = pl.reciprocal(denom, approx=True)
        r = r * (2.0 - denom * r)          # one Newton step -> ~f32 accurate
        out_ref[t_out] = e * r             # lane-dense (BP, 128) store

    for t in range(STEPS):
        if t == 0:
            gates = gx_ref[0:BP, :]        # h_{-1} == 0: no recurrent matmul
        else:
            k_prev = (t - 1) % NKEYS
            # one fused matmul: [gates_rec_t | logits_{t-1}]
            comb = jnp.dot(h.astype(jnp.bfloat16), wcomb_ref[k_prev],
                           preferred_element_type=jnp.float32)
            _softmax_store(comb[:, NGATE:] + fcb_ref[k_prev], t - 1)
            gates = gx_ref[t * BP:(t + 1) * BP, :] + comb[:, :NGATE]

        # gate order (wrapper-packed): [i | f | o | g]
        sig = jax.nn.sigmoid(gates[:, :3 * CELL])
        i_g = sig[:, 0 * CELL:1 * CELL]
        f_g = sig[:, 1 * CELL:2 * CELL]
        o_g = sig[:, 2 * CELL:3 * CELL]
        g_g = jnp.tanh(gates[:, 3 * CELL:])

        c = f_g * c + i_g * g_g
        h = o_g * jnp.tanh(c)

    # ---- final step's head (no later step to fuse it into) ----
    k_last = (STEPS - 1) % NKEYS
    comb = jnp.dot(h.astype(jnp.bfloat16), wcomb_ref[k_last],
                   preferred_element_type=jnp.float32)
    _softmax_store(comb[:, NGATE:] + fcb_ref[k_last], STEPS - 1)


def nas_policy_forward(x_flat, w_ih_k, bias_k, fcb_pad, w_comb):
    """x_flat: (STEPS*BP, CELL) bf16 pre-embedded (batch-padded) sequence.
    Returns (STEPS, BATCH, NOUT) softmax outputs."""
    out = pl.pallas_call(
        _nas_policy_kernel,
        out_shape=jax.ShapeDtypeStruct((STEPS, BP, NPAD), jnp.float32),
        in_specs=[
            pl.BlockSpec(memory_space=pltpu.MemorySpace.VMEM),   # x_flat
            pl.BlockSpec(memory_space=pltpu.MemorySpace.VMEM),   # W_ih (bf16)
            pl.BlockSpec(memory_space=pltpu.MemorySpace.VMEM),   # gate bias
            pl.BlockSpec(memory_space=pltpu.MemorySpace.VMEM),   # head biases
            pl.BlockSpec(memory_space=pl.ANY),                   # W_comb (HBM)
        ],
        out_specs=pl.BlockSpec(memory_space=pltpu.MemorySpace.VMEM),
        scratch_shapes=[
            pltpu.VMEM((STEPS * BP, NGATE), jnp.float32),        # gates_x
            pltpu.VMEM((NKEYS, CELL, NCOMB), jnp.bfloat16),      # W_comb VMEM
            pltpu.SemaphoreType.DMA(()),
        ],
    )(x_flat, w_ih_k, bias_k, fcb_pad, w_comb)
    return out[:, :BATCH, :NOUT]


def _reference_forward(x_seq, w_ih_t, w_hh_t, bias, fc_w_t, fc_b):
    """Pure-JAX f32 reference of the same recurrence (unpadded, PyTorch order)."""
    hx = jnp.zeros((BATCH, CELL), jnp.float32)
    cx = jnp.zeros((BATCH, CELL), jnp.float32)
    outs = []
    for t in range(STEPS):
        gates = x_seq[t] @ w_ih_t + hx @ w_hh_t + bias
        i = jax.nn.sigmoid(gates[:, 0 * CELL:1 * CELL])
        f = jax.nn.sigmoid(gates[:, 1 * CELL:2 * CELL])
        g = jnp.tanh(gates[:, 2 * CELL:3 * CELL])
        o = jax.nn.sigmoid(gates[:, 3 * CELL:4 * CELL])
        cx = f * cx + i * g
        hx = o * jnp.tanh(cx)
        logits = hx @ fc_w_t[t % NKEYS] + fc_b[t % NKEYS][None, :]
        outs.append(jax.nn.softmax(logits, axis=1))
    return jnp.stack(outs)


if __name__ == "__main__":
    key = jax.random.PRNGKey(0)
    ks = jax.random.split(key, 12)
    k_scale = 1.0 / np.sqrt(CELL)

    # ---- deterministic parameter init (shapes per NASPolicy.__init__) ----
    # nn.LSTMCell(128,128): weight_ih (512,128), weight_hh (512,128), biases (512,)
    w_ih = jax.random.uniform(ks[0], (4 * CELL, CELL), jnp.float32, -k_scale, k_scale)
    w_hh = jax.random.uniform(ks[1], (4 * CELL, CELL), jnp.float32, -k_scale, k_scale)
    b_ih = jax.random.uniform(ks[2], (4 * CELL,), jnp.float32, -k_scale, k_scale)
    b_hh = jax.random.uniform(ks[3], (4 * CELL,), jnp.float32, -k_scale, k_scale)
    # 4 output heads: nn.Linear(128, 6)
    fc_w = jax.random.uniform(ks[4], (NKEYS, NOUT, CELL), jnp.float32, -k_scale, k_scale)
    fc_b = jax.random.uniform(ks[5], (NKEYS, NOUT), jnp.float32, -k_scale, k_scale)
    # embeddings: 'start' -> (1,128), each key -> (6,128)
    start_emb = jax.random.normal(ks[6], (1, CELL), jnp.float32)
    key_embs = jax.random.normal(ks[7], (NKEYS, NOUT, CELL), jnp.float32)

    # ---- example input `net`: (STEPS, BATCH) int actions in [0, 6) ----
    net = jax.random.randint(ks[8], (STEPS, BATCH), 0, NOUT, dtype=jnp.int32)

    # ---- glue: pre-embed the whole action sequence (gathers, not hot path) ----
    x0 = jnp.broadcast_to(start_emb, (BATCH, CELL))      # step 0 = 'start'(0)
    xs = [x0]
    for t in range(1, STEPS):
        k_idx = (t - 1) % NKEYS                          # key used to embed net[t-1]
        xs.append(key_embs[k_idx][net[t - 1]])           # (BATCH, CELL)
    x_seq = jnp.stack(xs).astype(jnp.float32)            # (STEPS, BATCH, CELL)

    # ---- reference-layout (PyTorch i,f,g,o order, f32) parameters ----
    w_ih_t = jnp.transpose(w_ih)                         # (CELL, 4*CELL)
    w_hh_t = jnp.transpose(w_hh)                         # (CELL, 4*CELL)
    bias = (b_ih + b_hh)[None, :]                        # (1, 4*CELL)
    fc_w_t = jnp.transpose(fc_w, (0, 2, 1))              # (NKEYS, CELL, NOUT)

    # ---- kernel-side packing: reorder gates (i,f,g,o)->(i,f,o,g), pad heads,
    #      fuse [W_hh | fc_w] per key, cast MXU operands to bf16 ----
    def to_ifog(m):
        return jnp.concatenate(
            [m[..., :2 * CELL], m[..., 3 * CELL:4 * CELL], m[..., 2 * CELL:3 * CELL]],
            axis=-1)

    w_ih_k = to_ifog(w_ih_t).astype(jnp.bfloat16)        # (128, 512) bf16
    bias_k = to_ifog(bias)                               # (1, 512)   f32
    w_hh_k = to_ifog(w_hh_t)                             # (128, 512) f32

    fc_w_pad = jnp.zeros((NKEYS, CELL, NPAD), jnp.float32).at[:, :, :NOUT].set(fc_w_t)
    w_comb = jnp.concatenate(
        [jnp.broadcast_to(w_hh_k[None], (NKEYS, CELL, NGATE)), fc_w_pad],
        axis=-1).astype(jnp.bfloat16)                    # (4, 128, 640) bf16

    fcb_pad = jnp.full((NKEYS, 1, NPAD), NEG, jnp.float32).at[:, 0, :NOUT].set(fc_b)

    x_pad = jnp.zeros((STEPS, BP, CELL), jnp.float32).at[:, :BATCH, :].set(x_seq)
    x_flat = x_pad.reshape(STEPS * BP, CELL).astype(jnp.bfloat16)   # (480, 128)

    out = nas_policy_forward(x_flat, w_ih_k, bias_k, fcb_pad, w_comb)
    out = jax.block_until_ready(out)                     # (STEPS, BATCH, NOUT)

    ref = _reference_forward(x_seq, w_ih_t, w_hh_t, bias, fc_w_t, fc_b)
    # bf16 MXU operands through a 20-step recurrence -> loosened tolerance
    np.testing.assert_allclose(np.asarray(out), np.asarray(ref),
                               rtol=2e-2, atol=2e-3)

    print("KERNEL_OK")
</pallas_src>

<mosaic_0001>
module attributes {stable_mosaic.version = 11 : i64} {
  func.func @_nas_policy_kernel(%arg0: memref<480x128xbf16, #tpu.memory_space<vmem>>, %arg1: memref<128x512xbf16, #tpu.memory_space<vmem>>, %arg2: memref<1x512xf32, #tpu.memory_space<vmem>>, %arg3: memref<4x1x128xf32, #tpu.memory_space<vmem>>, %arg4: memref<4x128x640xbf16, #tpu.memory_space<any>>, %arg5: memref<20x24x128xf32, #tpu.memory_space<vmem>>, %arg6: memref<480x512xf32, #tpu.memory_space<vmem>>, %arg7: memref<4x128x640xbf16, #tpu.memory_space<vmem>>, %arg8: memref<!tpu.dma_semaphore, #tpu.memory_space<semaphore_mem>>) attributes {dimension_semantics = [], scalar_prefetch = 0 : i64, scratch_operands = 3 : i64, tpu.core_type = #tpu.core_type<tc>} {
    tpu.enqueue_dma source(%arg4 : memref<4x128x640xbf16, #tpu.memory_space<any>>) target(%arg7 : memref<4x128x640xbf16, #tpu.memory_space<vmem>>) target_semaphore(%arg8 : memref<!tpu.dma_semaphore, #tpu.memory_space<semaphore_mem>>)
    %c0 = arith.constant 0 : index
    %c0_0 = arith.constant 0 : index
    %0 = vector.load %arg0[%c0, %c0_0] : memref<480x128xbf16, #tpu.memory_space<vmem>>, vector<480x128xbf16>
    %c0_1 = arith.constant 0 : index
    %c0_2 = arith.constant 0 : index
    %1 = vector.load %arg1[%c0_1, %c0_2] : memref<128x512xbf16, #tpu.memory_space<vmem>>, vector<128x512xbf16>
    %cst = arith.constant dense<0.000000e+00> : vector<480x512xf32>
    %2 = tpu.matmul %0, %1, %cst {dimension_numbers = #tpu.dot_dimension_numbers<[1], [0], [0], [1], [0, 0, 1, 1], [], []>} : vector<480x128xbf16>, vector<128x512xbf16>, vector<480x512xf32> -> vector<480x512xf32>
    %c0_3 = arith.constant 0 : index
    %c0_4 = arith.constant 0 : index
    %3 = vector.load %arg2[%c0_3, %c0_4] : memref<1x512xf32, #tpu.memory_space<vmem>>, vector<1x512xf32>
    %4 = vector.broadcast %3 : vector<1x512xf32> to vector<480x512xf32>
    %5 = arith.addf %2, %4 : vector<480x512xf32>
    %c0_5 = arith.constant 0 : index
    %c0_6 = arith.constant 0 : index
    %6 = vector.load %arg6[%c0_5, %c0_6] : memref<480x512xf32, #tpu.memory_space<vmem>>, vector<480x512xf32>
    tpu.vector_store %arg6[%c0_5, %c0_6], %5 {strides = array<i32>} : memref<480x512xf32, #tpu.memory_space<vmem>>, vector<480x512xf32>,
    tpu.wait_dma2 semaphore(%arg8 : memref<!tpu.dma_semaphore, #tpu.memory_space<semaphore_mem>>) src(%arg4 : memref<4x128x640xbf16, #tpu.memory_space<any>>) dst(%arg7 : memref<4x128x640xbf16, #tpu.memory_space<vmem>>)
    %cst_7 = arith.constant 0.000000e+00 : f32
    %7 = vector.broadcast %cst_7 : f32 to vector<24x128xf32>
    %c0_8 = arith.constant 0 : index
    %c0_9 = arith.constant 0 : index
    %8 = vector.load %arg6[%c0_8, %c0_9] : memref<480x512xf32, #tpu.memory_space<vmem>>, vector<24x512xf32>
    %9 = vector.extract_strided_slice %8 {offsets = [0, 0], sizes = [24, 384], strides = [1, 1]} : vector<24x512xf32> to vector<24x384xf32>
    %10 = arith.negf %9 : vector<24x384xf32>
    %11 = math.exp %10 : vector<24x384xf32>
    %cst_10 = arith.constant 1.000000e+00 : f32
    %12 = vector.broadcast %cst_10 : f32 to vector<24x384xf32>
    %13 = arith.addf %12, %11 : vector<24x384xf32>
    %14 = arith.divf %12, %13 : vector<24x384xf32>
    %15 = vector.extract_strided_slice %14 {offsets = [0, 0], sizes = [24, 128], strides = [1, 1]} : vector<24x384xf32> to vector<24x128xf32>
    %16 = vector.extract_strided_slice %14 {offsets = [0, 128], sizes = [24, 128], strides = [1, 1]} : vector<24x384xf32> to vector<24x128xf32>
    %17 = vector.extract_strided_slice %14 {offsets = [0, 256], sizes = [24, 128], strides = [1, 1]} : vector<24x384xf32> to vector<24x128xf32>
    %18 = vector.extract_strided_slice %8 {offsets = [0, 384], sizes = [24, 128], strides = [1, 1]} : vector<24x512xf32> to vector<24x128xf32>
    %19 = math.tanh %18 : vector<24x128xf32>
    %20 = arith.mulf %16, %7 : vector<24x128xf32>
    %21 = arith.mulf %15, %19 : vector<24x128xf32>
    %22 = arith.addf %20, %21 : vector<24x128xf32>
    %23 = math.tanh %22 : vector<24x128xf32>
    %24 = arith.mulf %17, %23 : vector<24x128xf32>
    %25 = arith.truncf %24 : vector<24x128xf32> to vector<24x128xbf16>
    %c0_11 = arith.constant 0 : index
    %c0_12 = arith.constant 0 : index
    %c0_13 = arith.constant 0 : index
    %26 = vector.load %arg7[%c0_11, %c0_12, %c0_13] : memref<4x128x640xbf16, #tpu.memory_space<vmem>>, vector<1x128x640xbf16>
    %27 = vector.shape_cast %26 : vector<1x128x640xbf16> to vector<128x640xbf16>
    %cst_14 = arith.constant dense<0.000000e+00> : vector<24x640xf32>
    %28 = tpu.matmul %25, %27, %cst_14 {dimension_numbers = #tpu.dot_dimension_numbers<[1], [0], [0], [1], [0, 0, 1, 1], [], []>} : vector<24x128xbf16>, vector<128x640xbf16>, vector<24x640xf32> -> vector<24x640xf32>
    %29 = vector.extract_strided_slice %28 {offsets = [0, 512], sizes = [24, 128], strides = [1, 1]} : vector<24x640xf32> to vector<24x128xf32>
    %c0_15 = arith.constant 0 : index
    %c0_16 = arith.constant 0 : index
    %c0_17 = arith.constant 0 : index
    %30 = vector.load %arg3[%c0_15, %c0_16, %c0_17] : memref<4x1x128xf32, #tpu.memory_space<vmem>>, vector<1x1x128xf32>
    %31 = vector.shape_cast %30 : vector<1x1x128xf32> to vector<1x128xf32>
    %32 = vector.broadcast %31 : vector<1x128xf32> to vector<24x128xf32>
    %33 = arith.addf %29, %32 : vector<24x128xf32>
    %cst_18 = arith.constant dense<0xFF800000> : vector<24xf32>
    %34 = vector.multi_reduction <maximumf>, %33, %cst_18 [1] : vector<24x128xf32> to vector<24xf32>
    %35 = vector.shape_cast %34 : vector<24xf32> to vector<24x1xf32>
    %36 = vector.broadcast %35 : vector<24x1xf32> to vector<24x128xf32>
    %37 = arith.subf %33, %36 : vector<24x128xf32>
    %38 = math.exp %37 : vector<24x128xf32>
    %cst_19 = arith.constant dense<0.000000e+00> : vector<24xf32>
    %39 = vector.multi_reduction <add>, %38, %cst_19 [1] : vector<24x128xf32> to vector<24xf32>
    %40 = vector.shape_cast %39 : vector<24xf32> to vector<24x1xf32>
    %41 = tpu.reciprocal %40 {approx = true} : vector<24x1xf32> -> vector<24x1xf32>
    %42 = arith.mulf %40, %41 : vector<24x1xf32>
    %cst_20 = arith.constant 2.000000e+00 : f32
    %43 = vector.broadcast %cst_20 : f32 to vector<24x1xf32>
    %44 = arith.subf %43, %42 : vector<24x1xf32>
    %45 = arith.mulf %41, %44 : vector<24x1xf32>
    %46 = vector.broadcast %45 : vector<24x1xf32> to vector<24x128xf32>
    %47 = arith.mulf %38, %46 : vector<24x128xf32>
    %c0_21 = arith.constant 0 : index
    %c0_22 = arith.constant 0 : index
    %c0_23 = arith.constant 0 : index
    %48 = vector.load %arg5[%c0_21, %c0_22, %c0_23] : memref<20x24x128xf32, #tpu.memory_space<vmem>>, vector<1x24x128xf32>
    %49 = vector.shape_cast %48 : vector<1x24x128xf32> to vector<24x128xf32>
    %50 = vector.shape_cast %47 : vector<24x128xf32> to vector<1x24x128xf32>
    tpu.vector_store %arg5[%c0_21, %c0_22, %c0_23], %50 {strides = array<i32>} : memref<20x24x128xf32, #tpu.memory_space<vmem>>, vector<1x24x128xf32>,
    %c24 = arith.constant 24 : index
    %c0_24 = arith.constant 0 : index
    %51 = vector.load %arg6[%c24, %c0_24] : memref<480x512xf32, #tpu.memory_space<vmem>>, vector<24x512xf32>
    %52 = vector.extract_strided_slice %28 {offsets = [0, 0], sizes = [24, 512], strides = [1, 1]} : vector<24x640xf32> to vector<24x512xf32>
    %53 = arith.addf %51, %52 : vector<24x512xf32>
    %54 = vector.extract_strided_slice %53 {offsets = [0, 0], sizes = [24, 384], strides = [1, 1]} : vector<24x512xf32> to vector<24x384xf32>
    %55 = arith.negf %54 : vector<24x384xf32>
    %56 = math.exp %55 : vector<24x384xf32>
    %cst_25 = arith.constant 1.000000e+00 : f32
    %57 = vector.broadcast %cst_25 : f32 to vector<24x384xf32>
    %58 = arith.addf %57, %56 : vector<24x384xf32>
    %59 = arith.divf %57, %58 : vector<24x384xf32>
    %60 = vector.extract_strided_slice %59 {offsets = [0, 0], sizes = [24, 128], strides = [1, 1]} : vector<24x384xf32> to vector<24x128xf32>
    %61 = vector.extract_strided_slice %59 {offsets = [0, 128], sizes = [24, 128], strides = [1, 1]} : vector<24x384xf32> to vector<24x128xf32>
    %62 = vector.extract_strided_slice %59 {offsets = [0, 256], sizes = [24, 128], strides = [1, 1]} : vector<24x384xf32> to vector<24x128xf32>
    %63 = vector.extract_strided_slice %53 {offsets = [0, 384], sizes = [24, 128], strides = [1, 1]} : vector<24x512xf32> to vector<24x128xf32>
    %64 = math.tanh %63 : vector<24x128xf32>
    %65 = arith.mulf %61, %22 : vector<24x128xf32>
    %66 = arith.mulf %60, %64 : vector<24x128xf32>
    %67 = arith.addf %65, %66 : vector<24x128xf32>
    %68 = math.tanh %67 : vector<24x128xf32>
    %69 = arith.mulf %62, %68 : vector<24x128xf32>
    %70 = arith.truncf %69 : vector<24x128xf32> to vector<24x128xbf16>
    %c1 = arith.constant 1 : index
    %c0_26 = arith.constant 0 : index
    %c0_27 = arith.constant 0 : index
    %71 = vector.load %arg7[%c1, %c0_26, %c0_27] : memref<4x128x640xbf16, #tpu.memory_space<vmem>>, vector<1x128x640xbf16>
    %72 = vector.shape_cast %71 : vector<1x128x640xbf16> to vector<128x640xbf16>
    %cst_28 = arith.constant dense<0.000000e+00> : vector<24x640xf32>
    %73 = tpu.matmul %70, %72, %cst_28 {dimension_numbers = #tpu.dot_dimension_numbers<[1], [0], [0], [1], [0, 0, 1, 1], [], []>} : vector<24x128xbf16>, vector<128x640xbf16>, vector<24x640xf32> -> vector<24x640xf32>
    %74 = vector.extract_strided_slice %73 {offsets = [0, 512], sizes = [24, 128], strides = [1, 1]} : vector<24x640xf32> to vector<24x128xf32>
    %c1_29 = arith.constant 1 : index
    %c0_30 = arith.constant 0 : index
    %c0_31 = arith.constant 0 : index
    %75 = vector.load %arg3[%c1_29, %c0_30, %c0_31] : memref<4x1x128xf32, #tpu.memory_space<vmem>>, vector<1x1x128xf32>
    %76 = vector.shape_cast %75 : vector<1x1x128xf32> to vector<1x128xf32>
    %77 = vector.broadcast %76 : vector<1x128xf32> to vector<24x128xf32>
    %78 = arith.addf %74, %77 : vector<24x128xf32>
    %cst_32 = arith.constant dense<0xFF800000> : vector<24xf32>
    %79 = vector.multi_reduction <maximumf>, %78, %cst_32 [1] : vector<24x128xf32> to vector<24xf32>
    %80 = vector.shape_cast %79 : vector<24xf32> to vector<24x1xf32>
    %81 = vector.broadcast %80 : vector<24x1xf32> to vector<24x128xf32>
    %82 = arith.subf %78, %81 : vector<24x128xf32>
    %83 = math.exp %82 : vector<24x128xf32>
    %cst_33 = arith.constant dense<0.000000e+00> : vector<24xf32>
    %84 = vector.multi_reduction <add>, %83, %cst_33 [1] : vector<24x128xf32> to vector<24xf32>
    %85 = vector.shape_cast %84 : vector<24xf32> to vector<24x1xf32>
    %86 = tpu.reciprocal %85 {approx = true} : vector<24x1xf32> -> vector<24x1xf32>
    %87 = arith.mulf %85, %86 : vector<24x1xf32>
    %cst_34 = arith.constant 2.000000e+00 : f32
    %88 = vector.broadcast %cst_34 : f32 to vector<24x1xf32>
    %89 = arith.subf %88, %87 : vector<24x1xf32>
    %90 = arith.mulf %86, %89 : vector<24x1xf32>
    %91 = vector.broadcast %90 : vector<24x1xf32> to vector<24x128xf32>
    %92 = arith.mulf %83, %91 : vector<24x128xf32>
    %c1_35 = arith.constant 1 : index
    %c0_36 = arith.constant 0 : index
    %c0_37 = arith.constant 0 : index
    %93 = vector.load %arg5[%c1_35, %c0_36, %c0_37] : memref<20x24x128xf32, #tpu.memory_space<vmem>>, vector<1x24x128xf32>
    %94 = vector.shape_cast %93 : vector<1x24x128xf32> to vector<24x128xf32>
    %95 = vector.shape_cast %92 : vector<24x128xf32> to vector<1x24x128xf32>
    tpu.vector_store %arg5[%c1_35, %c0_36, %c0_37], %95 {strides = array<i32>} : memref<20x24x128xf32, #tpu.memory_space<vmem>>, vector<1x24x128xf32>,
    %c48 = arith.constant 48 : index
    %c0_38 = arith.constant 0 : index
    %96 = vector.load %arg6[%c48, %c0_38] : memref<480x512xf32, #tpu.memory_space<vmem>>, vector<24x512xf32>
    %97 = vector.extract_strided_slice %73 {offsets = [0, 0], sizes = [24, 512], strides = [1, 1]} : vector<24x640xf32> to vector<24x512xf32>
    %98 = arith.addf %96, %97 : vector<24x512xf32>
    %99 = vector.extract_strided_slice %98 {offsets = [0, 0], sizes = [24, 384], strides = [1, 1]} : vector<24x512xf32> to vector<24x384xf32>
    %100 = arith.negf %99 : vector<24x384xf32>
    %101 = math.exp %100 : vector<24x384xf32>
    %cst_39 = arith.constant 1.000000e+00 : f32
    %102 = vector.broadcast %cst_39 : f32 to vector<24x384xf32>
    %103 = arith.addf %102, %101 : vector<24x384xf32>
    %104 = arith.divf %102, %103 : vector<24x384xf32>
    %105 = vector.extract_strided_slice %104 {offsets = [0, 0], sizes = [24, 128], strides = [1, 1]} : vector<24x384xf32> to vector<24x128xf32>
    %106 = vector.extract_strided_slice %104 {offsets = [0, 128], sizes = [24, 128], strides = [1, 1]} : vector<24x384xf32> to vector<24x128xf32>
    %107 = vector.extract_strided_slice %104 {offsets = [0, 256], sizes = [24, 128], strides = [1, 1]} : vector<24x384xf32> to vector<24x128xf32>
    %108 = vector.extract_strided_slice %98 {offsets = [0, 384], sizes = [24, 128], strides = [1, 1]} : vector<24x512xf32> to vector<24x128xf32>
    %109 = math.tanh %108 : vector<24x128xf32>
    %110 = arith.mulf %106, %67 : vector<24x128xf32>
    %111 = arith.mulf %105, %109 : vector<24x128xf32>
    %112 = arith.addf %110, %111 : vector<24x128xf32>
    %113 = math.tanh %112 : vector<24x128xf32>
    %114 = arith.mulf %107, %113 : vector<24x128xf32>
    %115 = arith.truncf %114 : vector<24x128xf32> to vector<24x128xbf16>
    %c2 = arith.constant 2 : index
    %c0_40 = arith.constant 0 : index
    %c0_41 = arith.constant 0 : index
    %116 = vector.load %arg7[%c2, %c0_40, %c0_41] : memref<4x128x640xbf16, #tpu.memory_space<vmem>>, vector<1x128x640xbf16>
    %117 = vector.shape_cast %116 : vector<1x128x640xbf16> to vector<128x640xbf16>
    %cst_42 = arith.constant dense<0.000000e+00> : vector<24x640xf32>
    %118 = tpu.matmul %115, %117, %cst_42 {dimension_numbers = #tpu.dot_dimension_numbers<[1], [0], [0], [1], [0, 0, 1, 1], [], []>} : vector<24x128xbf16>, vector<128x640xbf16>, vector<24x640xf32> -> vector<24x640xf32>
    %119 = vector.extract_strided_slice %118 {offsets = [0, 512], sizes = [24, 128], strides = [1, 1]} : vector<24x640xf32> to vector<24x128xf32>
    %c2_43 = arith.constant 2 : index
    %c0_44 = arith.constant 0 : index
    %c0_45 = arith.constant 0 : index
    %120 = vector.load %arg3[%c2_43, %c0_44, %c0_45] : memref<4x1x128xf32, #tpu.memory_space<vmem>>, vector<1x1x128xf32>
    %121 = vector.shape_cast %120 : vector<1x1x128xf32> to vector<1x128xf32>
    %122 = vector.broadcast %121 : vector<1x128xf32> to vector<24x128xf32>
    %123 = arith.addf %119, %122 : vector<24x128xf32>
    %cst_46 = arith.constant dense<0xFF800000> : vector<24xf32>
    %124 = vector.multi_reduction <maximumf>, %123, %cst_46 [1] : vector<24x128xf32> to vector<24xf32>
    %125 = vector.shape_cast %124 : vector<24xf32> to vector<24x1xf32>
    %126 = vector.broadcast %125 : vector<24x1xf32> to vector<24x128xf32>
    %127 = arith.subf %123, %126 : vector<24x128xf32>
    %128 = math.exp %127 : vector<24x128xf32>
    %cst_47 = arith.constant dense<0.000000e+00> : vector<24xf32>
    %129 = vector.multi_reduction <add>, %128, %cst_47 [1] : vector<24x128xf32> to vector<24xf32>
    %130 = vector.shape_cast %129 : vector<24xf32> to vector<24x1xf32>
    %131 = tpu.reciprocal %130 {approx = true} : vector<24x1xf32> -> vector<24x1xf32>
    %132 = arith.mulf %130, %131 : vector<24x1xf32>
    %cst_48 = arith.constant 2.000000e+00 : f32
    %133 = vector.broadcast %cst_48 : f32 to vector<24x1xf32>
    %134 = arith.subf %133, %132 : vector<24x1xf32>
    %135 = arith.mulf %131, %134 : vector<24x1xf32>
    %136 = vector.broadcast %135 : vector<24x1xf32> to vector<24x128xf32>
    %137 = arith.mulf %128, %136 : vector<24x128xf32>
    %c2_49 = arith.constant 2 : index
    %c0_50 = arith.constant 0 : index
    %c0_51 = arith.constant 0 : index
    %138 = vector.load %arg5[%c2_49, %c0_50, %c0_51] : memref<20x24x128xf32, #tpu.memory_space<vmem>>, vector<1x24x128xf32>
    %139 = vector.shape_cast %138 : vector<1x24x128xf32> to vector<24x128xf32>
    %140 = vector.shape_cast %137 : vector<24x128xf32> to vector<1x24x128xf32>
    tpu.vector_store %arg5[%c2_49, %c0_50, %c0_51], %140 {strides = array<i32>} : memref<20x24x128xf32, #tpu.memory_space<vmem>>, vector<1x24x128xf32>,
    %c72 = arith.constant 72 : index
    %c0_52 = arith.constant 0 : index
    %141 = vector.load %arg6[%c72, %c0_52] : memref<480x512xf32, #tpu.memory_space<vmem>>, vector<24x512xf32>
    %142 = vector.extract_strided_slice %118 {offsets = [0, 0], sizes = [24, 512], strides = [1, 1]} : vector<24x640xf32> to vector<24x512xf32>
    %143 = arith.addf %141, %142 : vector<24x512xf32>
    %144 = vector.extract_strided_slice %143 {offsets = [0, 0], sizes = [24, 384], strides = [1, 1]} : vector<24x512xf32> to vector<24x384xf32>
    %145 = arith.negf %144 : vector<24x384xf32>
    %146 = math.exp %145 : vector<24x384xf32>
    %cst_53 = arith.constant 1.000000e+00 : f32
    %147 = vector.broadcast %cst_53 : f32 to vector<24x384xf32>
    %148 = arith.addf %147, %146 : vector<24x384xf32>
    %149 = arith.divf %147, %148 : vector<24x384xf32>
    %150 = vector.extract_strided_slice %149 {offsets = [0, 0], sizes = [24, 128], strides = [1, 1]} : vector<24x384xf32> to vector<24x128xf32>
    %151 = vector.extract_strided_slice %149 {offsets = [0, 128], sizes = [24, 128], strides = [1, 1]} : vector<24x384xf32> to vector<24x128xf32>
    %152 = vector.extract_strided_slice %149 {offsets = [0, 256], sizes = [24, 128], strides = [1, 1]} : vector<24x384xf32> to vector<24x128xf32>
    %153 = vector.extract_strided_slice %143 {offsets = [0, 384], sizes = [24, 128], strides = [1, 1]} : vector<24x512xf32> to vector<24x128xf32>
    %154 = math.tanh %153 : vector<24x128xf32>
    %155 = arith.mulf %151, %112 : vector<24x128xf32>
    %156 = arith.mulf %150, %154 : vector<24x128xf32>
    %157 = arith.addf %155, %156 : vector<24x128xf32>
    %158 = math.tanh %157 : vector<24x128xf32>
    %159 = arith.mulf %152, %158 : vector<24x128xf32>
    %160 = arith.truncf %159 : vector<24x128xf32> to vector<24x128xbf16>
    %c3 = arith.constant 3 : index
    %c0_54 = arith.constant 0 : index
    %c0_55 = arith.constant 0 : index
    %161 = vector.load %arg7[%c3, %c0_54, %c0_55] : memref<4x128x640xbf16, #tpu.memory_space<vmem>>, vector<1x128x640xbf16>
    %162 = vector.shape_cast %161 : vector<1x128x640xbf16> to vector<128x640xbf16>
    %cst_56 = arith.constant dense<0.000000e+00> : vector<24x640xf32>
    %163 = tpu.matmul %160, %162, %cst_56 {dimension_numbers = #tpu.dot_dimension_numbers<[1], [0], [0], [1], [0, 0, 1, 1], [], []>} : vector<24x128xbf16>, vector<128x640xbf16>, vector<24x640xf32> -> vector<24x640xf32>
    %164 = vector.extract_strided_slice %163 {offsets = [0, 512], sizes = [24, 128], strides = [1, 1]} : vector<24x640xf32> to vector<24x128xf32>
    %c3_57 = arith.constant 3 : index
    %c0_58 = arith.constant 0 : index
    %c0_59 = arith.constant 0 : index
    %165 = vector.load %arg3[%c3_57, %c0_58, %c0_59] : memref<4x1x128xf32, #tpu.memory_space<vmem>>, vector<1x1x128xf32>
    %166 = vector.shape_cast %165 : vector<1x1x128xf32> to vector<1x128xf32>
    %167 = vector.broadcast %166 : vector<1x128xf32> to vector<24x128xf32>
    %168 = arith.addf %164, %167 : vector<24x128xf32>
    %cst_60 = arith.constant dense<0xFF800000> : vector<24xf32>
    %169 = vector.multi_reduction <maximumf>, %168, %cst_60 [1] : vector<24x128xf32> to vector<24xf32>
    %170 = vector.shape_cast %169 : vector<24xf32> to vector<24x1xf32>
    %171 = vector.broadcast %170 : vector<24x1xf32> to vector<24x128xf32>
    %172 = arith.subf %168, %171 : vector<24x128xf32>
    %173 = math.exp %172 : vector<24x128xf32>
    %cst_61 = arith.constant dense<0.000000e+00> : vector<24xf32>
    %174 = vector.multi_reduction <add>, %173, %cst_61 [1] : vector<24x128xf32> to vector<24xf32>
    %175 = vector.shape_cast %174 : vector<24xf32> to vector<24x1xf32>
    %176 = tpu.reciprocal %175 {approx = true} : vector<24x1xf32> -> vector<24x1xf32>
    %177 = arith.mulf %175, %176 : vector<24x1xf32>
    %cst_62 = arith.constant 2.000000e+00 : f32
    %178 = vector.broadcast %cst_62 : f32 to vector<24x1xf32>
    %179 = arith.subf %178, %177 : vector<24x1xf32>
    %180 = arith.mulf %176, %179 : vector<24x1xf32>
    %181 = vector.broadcast %180 : vector<24x1xf32> to vector<24x128xf32>
    %182 = arith.mulf %173, %181 : vector<24x128xf32>
    %c3_63 = arith.constant 3 : index
    %c0_64 = arith.constant 0 : index
    %c0_65 = arith.constant 0 : index
    %183 = vector.load %arg5[%c3_63, %c0_64, %c0_65] : memref<20x24x128xf32, #tpu.memory_space<vmem>>, vector<1x24x128xf32>
    %184 = vector.shape_cast %183 : vector<1x24x128xf32> to vector<24x128xf32>
    %185 = vector.shape_cast %182 : vector<24x128xf32> to vector<1x24x128xf32>
    tpu.vector_store %arg5[%c3_63, %c0_64, %c0_65], %185 {strides = array<i32>} : memref<20x24x128xf32, #tpu.memory_space<vmem>>, vector<1x24x128xf32>,
    %c96 = arith.constant 96 : index
    %c0_66 = arith.constant 0 : index
    %186 = vector.load %arg6[%c96, %c0_66] : memref<480x512xf32, #tpu.memory_space<vmem>>, vector<24x512xf32>
    %187 = vector.extract_strided_slice %163 {offsets = [0, 0], sizes = [24, 512], strides = [1, 1]} : vector<24x640xf32> to vector<24x512xf32>
    %188 = arith.addf %186, %187 : vector<24x512xf32>
    %189 = vector.extract_strided_slice %188 {offsets = [0, 0], sizes = [24, 384], strides = [1, 1]} : vector<24x512xf32> to vector<24x384xf32>
    %190 = arith.negf %189 : vector<24x384xf32>
    %191 = math.exp %190 : vector<24x384xf32>
    %cst_67 = arith.constant 1.000000e+00 : f32
    %192 = vector.broadcast %cst_67 : f32 to vector<24x384xf32>
    %193 = arith.addf %192, %191 : vector<24x384xf32>
    %194 = arith.divf %192, %193 : vector<24x384xf32>
    %195 = vector.extract_strided_slice %194 {offsets = [0, 0], sizes = [24, 128], strides = [1, 1]} : vector<24x384xf32> to vector<24x128xf32>
    %196 = vector.extract_strided_slice %194 {offsets = [0, 128], sizes = [24, 128], strides = [1, 1]} : vector<24x384xf32> to vector<24x128xf32>
    %197 = vector.extract_strided_slice %194 {offsets = [0, 256], sizes = [24, 128], strides = [1, 1]} : vector<24x384xf32> to vector<24x128xf32>
    %198 = vector.extract_strided_slice %188 {offsets = [0, 384], sizes = [24, 128], strides = [1, 1]} : vector<24x512xf32> to vector<24x128xf32>
    %199 = math.tanh %198 : vector<24x128xf32>
    %200 = arith.mulf %196, %157 : vector<24x128xf32>
    %201 = arith.mulf %195, %199 : vector<24x128xf32>
    %202 = arith.addf %200, %201 : vector<24x128xf32>
    %203 = math.tanh %202 : vector<24x128xf32>
    %204 = arith.mulf %197, %203 : vector<24x128xf32>
    %205 = arith.truncf %204 : vector<24x128xf32> to vector<24x128xbf16>
    %c0_68 = arith.constant 0 : index
    %c0_69 = arith.constant 0 : index
    %c0_70 = arith.constant 0 : index
    %206 = vector.load %arg7[%c0_68, %c0_69, %c0_70] : memref<4x128x640xbf16, #tpu.memory_space<vmem>>, vector<1x128x640xbf16>
    %207 = vector.shape_cast %206 : vector<1x128x640xbf16> to vector<128x640xbf16>
    %cst_71 = arith.constant dense<0.000000e+00> : vector<24x640xf32>
    %208 = tpu.matmul %205, %207, %cst_71 {dimension_numbers = #tpu.dot_dimension_numbers<[1], [0], [0], [1], [0, 0, 1, 1], [], []>} : vector<24x128xbf16>, vector<128x640xbf16>, vector<24x640xf32> -> vector<24x640xf32>
    %209 = vector.extract_strided_slice %208 {offsets = [0, 512], sizes = [24, 128], strides = [1, 1]} : vector<24x640xf32> to vector<24x128xf32>
    %c0_72 = arith.constant 0 : index
    %c0_73 = arith.constant 0 : index
    %c0_74 = arith.constant 0 : index
    %210 = vector.load %arg3[%c0_72, %c0_73, %c0_74] : memref<4x1x128xf32, #tpu.memory_space<vmem>>, vector<1x1x128xf32>
    %211 = vector.shape_cast %210 : vector<1x1x128xf32> to vector<1x128xf32>
    %212 = vector.broadcast %211 : vector<1x128xf32> to vector<24x128xf32>
    %213 = arith.addf %209, %212 : vector<24x128xf32>
    %cst_75 = arith.constant dense<0xFF800000> : vector<24xf32>
    %214 = vector.multi_reduction <maximumf>, %213, %cst_75 [1] : vector<24x128xf32> to vector<24xf32>
    %215 = vector.shape_cast %214 : vector<24xf32> to vector<24x1xf32>
    %216 = vector.broadcast %215 : vector<24x1xf32> to vector<24x128xf32>
    %217 = arith.subf %213, %216 : vector<24x128xf32>
    %218 = math.exp %217 : vector<24x128xf32>
    %cst_76 = arith.constant dense<0.000000e+00> : vector<24xf32>
    %219 = vector.multi_reduction <add>, %218, %cst_76 [1] : vector<24x128xf32> to vector<24xf32>
    %220 = vector.shape_cast %219 : vector<24xf32> to vector<24x1xf32>
    %221 = tpu.reciprocal %220 {approx = true} : vector<24x1xf32> -> vector<24x1xf32>
    %222 = arith.mulf %220, %221 : vector<24x1xf32>
    %cst_77 = arith.constant 2.000000e+00 : f32
    %223 = vector.broadcast %cst_77 : f32 to vector<24x1xf32>
    %224 = arith.subf %223, %222 : vector<24x1xf32>
    %225 = arith.mulf %221, %224 : vector<24x1xf32>
    %226 = vector.broadcast %225 : vector<24x1xf32> to vector<24x128xf32>
    %227 = arith.mulf %218, %226 : vector<24x128xf32>
    %c4 = arith.constant 4 : index
    %c0_78 = arith.constant 0 : index
    %c0_79 = arith.constant 0 : index
    %228 = vector.load %arg5[%c4, %c0_78, %c0_79] : memref<20x24x128xf32, #tpu.memory_space<vmem>>, vector<1x24x128xf32>
    %229 = vector.shape_cast %228 : vector<1x24x128xf32> to vector<24x128xf32>
    %230 = vector.shape_cast %227 : vector<24x128xf32> to vector<1x24x128xf32>
    tpu.vector_store %arg5[%c4, %c0_78, %c0_79], %230 {strides = array<i32>} : memref<20x24x128xf32, #tpu.memory_space<vmem>>, vector<1x24x128xf32>,
    %c120 = arith.constant 120 : index
    %c0_80 = arith.constant 0 : index
    %231 = vector.load %arg6[%c120, %c0_80] : memref<480x512xf32, #tpu.memory_space<vmem>>, vector<24x512xf32>
    %232 = vector.extract_strided_slice %208 {offsets = [0, 0], sizes = [24, 512], strides = [1, 1]} : vector<24x640xf32> to vector<24x512xf32>
    %233 = arith.addf %231, %232 : vector<24x512xf32>
    %234 = vector.extract_strided_slice %233 {offsets = [0, 0], sizes = [24, 384], strides = [1, 1]} : vector<24x512xf32> to vector<24x384xf32>
    %235 = arith.negf %234 : vector<24x384xf32>
    %236 = math.exp %235 : vector<24x384xf32>
    %cst_81 = arith.constant 1.000000e+00 : f32
    %237 = vector.broadcast %cst_81 : f32 to vector<24x384xf32>
    %238 = arith.addf %237, %236 : vector<24x384xf32>
    %239 = arith.divf %237, %238 : vector<24x384xf32>
    %240 = vector.extract_strided_slice %239 {offsets = [0, 0], sizes = [24, 128], strides = [1, 1]} : vector<24x384xf32> to vector<24x128xf32>
    %241 = vector.extract_strided_slice %239 {offsets = [0, 128], sizes = [24, 128], strides = [1, 1]} : vector<24x384xf32> to vector<24x128xf32>
    %242 = vector.extract_strided_slice %239 {offsets = [0, 256], sizes = [24, 128], strides = [1, 1]} : vector<24x384xf32> to vector<24x128xf32>
    %243 = vector.extract_strided_slice %233 {offsets = [0, 384], sizes = [24, 128], strides = [1, 1]} : vector<24x512xf32> to vector<24x128xf32>
    %244 = math.tanh %243 : vector<24x128xf32>
    %245 = arith.mulf %241, %202 : vector<24x128xf32>
    %246 = arith.mulf %240, %244 : vector<24x128xf32>
    %247 = arith.addf %245, %246 : vector<24x128xf32>
    %248 = math.tanh %247 : vector<24x128xf32>
    %249 = arith.mulf %242, %248 : vector<24x128xf32>
    %250 = arith.truncf %249 : vector<24x128xf32> to vector<24x128xbf16>
    %c1_82 = arith.constant 1 : index
    %c0_83 = arith.constant 0 : index
    %c0_84 = arith.constant 0 : index
    %251 = vector.load %arg7[%c1_82, %c0_83, %c0_84] : memref<4x128x640xbf16, #tpu.memory_space<vmem>>, vector<1x128x640xbf16>
    %252 = vector.shape_cast %251 : vector<1x128x640xbf16> to vector<128x640xbf16>
    %cst_85 = arith.constant dense<0.000000e+00> : vector<24x640xf32>
    %253 = tpu.matmul %250, %252, %cst_85 {dimension_numbers = #tpu.dot_dimension_numbers<[1], [0], [0], [1], [0, 0, 1, 1], [], []>} : vector<24x128xbf16>, vector<128x640xbf16>, vector<24x640xf32> -> vector<24x640xf32>
    %254 = vector.extract_strided_slice %253 {offsets = [0, 512], sizes = [24, 128], strides = [1, 1]} : vector<24x640xf32> to vector<24x128xf32>
    %c1_86 = arith.constant 1 : index
    %c0_87 = arith.constant 0 : index
    %c0_88 = arith.constant 0 : index
    %255 = vector.load %arg3[%c1_86, %c0_87, %c0_88] : memref<4x1x128xf32, #tpu.memory_space<vmem>>, vector<1x1x128xf32>
    %256 = vector.shape_cast %255 : vector<1x1x128xf32> to vector<1x128xf32>
    %257 = vector.broadcast %256 : vector<1x128xf32> to vector<24x128xf32>
    %258 = arith.addf %254, %257 : vector<24x128xf32>
    %cst_89 = arith.constant dense<0xFF800000> : vector<24xf32>
    %259 = vector.multi_reduction <maximumf>, %258, %cst_89 [1] : vector<24x128xf32> to vector<24xf32>
    %260 = vector.shape_cast %259 : vector<24xf32> to vector<24x1xf32>
    %261 = vector.broadcast %260 : vector<24x1xf32> to vector<24x128xf32>
    %262 = arith.subf %258, %261 : vector<24x128xf32>
    %263 = math.exp %262 : vector<24x128xf32>
    %cst_90 = arith.constant dense<0.000000e+00> : vector<24xf32>
    %264 = vector.multi_reduction <add>, %263, %cst_90 [1] : vector<24x128xf32> to vector<24xf32>
    %265 = vector.shape_cast %264 : vector<24xf32> to vector<24x1xf32>
    %266 = tpu.reciprocal %265 {approx = true} : vector<24x1xf32> -> vector<24x1xf32>
    %267 = arith.mulf %265, %266 : vector<24x1xf32>
    %cst_91 = arith.constant 2.000000e+00 : f32
    %268 = vector.broadcast %cst_91 : f32 to vector<24x1xf32>
    %269 = arith.subf %268, %267 : vector<24x1xf32>
    %270 = arith.mulf %266, %269 : vector<24x1xf32>
    %271 = vector.broadcast %270 : vector<24x1xf32> to vector<24x128xf32>
    %272 = arith.mulf %263, %271 : vector<24x128xf32>
    %c5 = arith.constant 5 : index
    %c0_92 = arith.constant 0 : index
    %c0_93 = arith.constant 0 : index
    %273 = vector.load %arg5[%c5, %c0_92, %c0_93] : memref<20x24x128xf32, #tpu.memory_space<vmem>>, vector<1x24x128xf32>
    %274 = vector.shape_cast %273 : vector<1x24x128xf32> to vector<24x128xf32>
    %275 = vector.shape_cast %272 : vector<24x128xf32> to vector<1x24x128xf32>
    tpu.vector_store %arg5[%c5, %c0_92, %c0_93], %275 {strides = array<i32>} : memref<20x24x128xf32, #tpu.memory_space<vmem>>, vector<1x24x128xf32>,
    %c144 = arith.constant 144 : index
    %c0_94 = arith.constant 0 : index
    %276 = vector.load %arg6[%c144, %c0_94] : memref<480x512xf32, #tpu.memory_space<vmem>>, vector<24x512xf32>
    %277 = vector.extract_strided_slice %253 {offsets = [0, 0], sizes = [24, 512], strides = [1, 1]} : vector<24x640xf32> to vector<24x512xf32>
    %278 = arith.addf %276, %277 : vector<24x512xf32>
    %279 = vector.extract_strided_slice %278 {offsets = [0, 0], sizes = [24, 384], strides = [1, 1]} : vector<24x512xf32> to vector<24x384xf32>
    %280 = arith.negf %279 : vector<24x384xf32>
    %281 = math.exp %280 : vector<24x384xf32>
    %cst_95 = arith.constant 1.000000e+00 : f32
    %282 = vector.broadcast %cst_95 : f32 to vector<24x384xf32>
    %283 = arith.addf %282, %281 : vector<24x384xf32>
    %284 = arith.divf %282, %283 : vector<24x384xf32>
    %285 = vector.extract_strided_slice %284 {offsets = [0, 0], sizes = [24, 128], strides = [1, 1]} : vector<24x384xf32> to vector<24x128xf32>
    %286 = vector.extract_strided_slice %284 {offsets = [0, 128], sizes = [24, 128], strides = [1, 1]} : vector<24x384xf32> to vector<24x128xf32>
    %287 = vector.extract_strided_slice %284 {offsets = [0, 256], sizes = [24, 128], strides = [1, 1]} : vector<24x384xf32> to vector<24x128xf32>
    %288 = vector.extract_strided_slice %278 {offsets = [0, 384], sizes = [24, 128], strides = [1, 1]} : vector<24x512xf32> to vector<24x128xf32>
    %289 = math.tanh %288 : vector<24x128xf32>
    %290 = arith.mulf %286, %247 : vector<24x128xf32>
    %291 = arith.mulf %285, %289 : vector<24x128xf32>
    %292 = arith.addf %290, %291 : vector<24x128xf32>
    %293 = math.tanh %292 : vector<24x128xf32>
    %294 = arith.mulf %287, %293 : vector<24x128xf32>
    %295 = arith.truncf %294 : vector<24x128xf32> to vector<24x128xbf16>
    %c2_96 = arith.constant 2 : index
    %c0_97 = arith.constant 0 : index
    %c0_98 = arith.constant 0 : index
    %296 = vector.load %arg7[%c2_96, %c0_97, %c0_98] : memref<4x128x640xbf16, #tpu.memory_space<vmem>>, vector<1x128x640xbf16>
    %297 = vector.shape_cast %296 : vector<1x128x640xbf16> to vector<128x640xbf16>
    %cst_99 = arith.constant dense<0.000000e+00> : vector<24x640xf32>
    %298 = tpu.matmul %295, %297, %cst_99 {dimension_numbers = #tpu.dot_dimension_numbers<[1], [0], [0], [1], [0, 0, 1, 1], [], []>} : vector<24x128xbf16>, vector<128x640xbf16>, vector<24x640xf32> -> vector<24x640xf32>
    %299 = vector.extract_strided_slice %298 {offsets = [0, 512], sizes = [24, 128], strides = [1, 1]} : vector<24x640xf32> to vector<24x128xf32>
    %c2_100 = arith.constant 2 : index
    %c0_101 = arith.constant 0 : index
    %c0_102 = arith.constant 0 : index
    %300 = vector.load %arg3[%c2_100, %c0_101, %c0_102] : memref<4x1x128xf32, #tpu.memory_space<vmem>>, vector<1x1x128xf32>
    %301 = vector.shape_cast %300 : vector<1x1x128xf32> to vector<1x128xf32>
    %302 = vector.broadcast %301 : vector<1x128xf32> to vector<24x128xf32>
    %303 = arith.addf %299, %302 : vector<24x128xf32>
    %cst_103 = arith.constant dense<0xFF800000> : vector<24xf32>
    %304 = vector.multi_reduction <maximumf>, %303, %cst_103 [1] : vector<24x128xf32> to vector<24xf32>
    %305 = vector.shape_cast %304 : vector<24xf32> to vector<24x1xf32>
    %306 = vector.broadcast %305 : vector<24x1xf32> to vector<24x128xf32>
    %307 = arith.subf %303, %306 : vector<24x128xf32>
    %308 = math.exp %307 : vector<24x128xf32>
    %cst_104 = arith.constant dense<0.000000e+00> : vector<24xf32>
    %309 = vector.multi_reduction <add>, %308, %cst_104 [1] : vector<24x128xf32> to vector<24xf32>
    %310 = vector.shape_cast %309 : vector<24xf32> to vector<24x1xf32>
    %311 = tpu.reciprocal %310 {approx = true} : vector<24x1xf32> -> vector<24x1xf32>
    %312 = arith.mulf %310, %311 : vector<24x1xf32>
    %cst_105 = arith.constant 2.000000e+00 : f32
    %313 = vector.broadcast %cst_105 : f32 to vector<24x1xf32>
    %314 = arith.subf %313, %312 : vector<24x1xf32>
    %315 = arith.mulf %311, %314 : vector<24x1xf32>
    %316 = vector.broadcast %315 : vector<24x1xf32> to vector<24x128xf32>
    %317 = arith.mulf %308, %316 : vector<24x128xf32>
    %c6 = arith.constant 6 : index
    %c0_106 = arith.constant 0 : index
    %c0_107 = arith.constant 0 : index
    %318 = vector.load %arg5[%c6, %c0_106, %c0_107] : memref<20x24x128xf32, #tpu.memory_space<vmem>>, vector<1x24x128xf32>
    %319 = vector.shape_cast %318 : vector<1x24x128xf32> to vector<24x128xf32>
    %320 = vector.shape_cast %317 : vector<24x128xf32> to vector<1x24x128xf32>
    tpu.vector_store %arg5[%c6, %c0_106, %c0_107], %320 {strides = array<i32>} : memref<20x24x128xf32, #tpu.memory_space<vmem>>, vector<1x24x128xf32>,
    %c168 = arith.constant 168 : index
    %c0_108 = arith.constant 0 : index
    %321 = vector.load %arg6[%c168, %c0_108] : memref<480x512xf32, #tpu.memory_space<vmem>>, vector<24x512xf32>
    %322 = vector.extract_strided_slice %298 {offsets = [0, 0], sizes = [24, 512], strides = [1, 1]} : vector<24x640xf32> to vector<24x512xf32>
    %323 = arith.addf %321, %322 : vector<24x512xf32>
    %324 = vector.extract_strided_slice %323 {offsets = [0, 0], sizes = [24, 384], strides = [1, 1]} : vector<24x512xf32> to vector<24x384xf32>
    %325 = arith.negf %324 : vector<24x384xf32>
    %326 = math.exp %325 : vector<24x384xf32>
    %cst_109 = arith.constant 1.000000e+00 : f32
    %327 = vector.broadcast %cst_109 : f32 to vector<24x384xf32>
    %328 = arith.addf %327, %326 : vector<24x384xf32>
    %329 = arith.divf %327, %328 : vector<24x384xf32>
    %330 = vector.extract_strided_slice %329 {offsets = [0, 0], sizes = [24, 128], strides = [1, 1]} : vector<24x384xf32> to vector<24x128xf32>
    %331 = vector.extract_strided_slice %329 {offsets = [0, 128], sizes = [24, 128], strides = [1, 1]} : vector<24x384xf32> to vector<24x128xf32>
    %332 = vector.extract_strided_slice %329 {offsets = [0, 256], sizes = [24, 128], strides = [1, 1]} : vector<24x384xf32> to vector<24x128xf32>
    %333 = vector.extract_strided_slice %323 {offsets = [0, 384], sizes = [24, 128], strides = [1, 1]} : vector<24x512xf32> to vector<24x128xf32>
    %334 = math.tanh %333 : vector<24x128xf32>
    %335 = arith.mulf %331, %292 : vector<24x128xf32>
    %336 = arith.mulf %330, %334 : vector<24x128xf32>
    %337 = arith.addf %335, %336 : vector<24x128xf32>
    %338 = math.tanh %337 : vector<24x128xf32>
    %339 = arith.mulf %332, %338 : vector<24x128xf32>
    %340 = arith.truncf %339 : vector<24x128xf32> to vector<24x128xbf16>
    %c3_110 = arith.constant 3 : index
    %c0_111 = arith.constant 0 : index
    %c0_112 = arith.constant 0 : index
    %341 = vector.load %arg7[%c3_110, %c0_111, %c0_112] : memref<4x128x640xbf16, #tpu.memory_space<vmem>>, vector<1x128x640xbf16>
    %342 = vector.shape_cast %341 : vector<1x128x640xbf16> to vector<128x640xbf16>
    %cst_113 = arith.constant dense<0.000000e+00> : vector<24x640xf32>
    %343 = tpu.matmul %340, %342, %cst_113 {dimension_numbers = #tpu.dot_dimension_numbers<[1], [0], [0], [1], [0, 0, 1, 1], [], []>} : vector<24x128xbf16>, vector<128x640xbf16>, vector<24x640xf32> -> vector<24x640xf32>
    %344 = vector.extract_strided_slice %343 {offsets = [0, 512], sizes = [24, 128], strides = [1, 1]} : vector<24x640xf32> to vector<24x128xf32>
    %c3_114 = arith.constant 3 : index
    %c0_115 = arith.constant 0 : index
    %c0_116 = arith.constant 0 : index
    %345 = vector.load %arg3[%c3_114, %c0_115, %c0_116] : memref<4x1x128xf32, #tpu.memory_space<vmem>>, vector<1x1x128xf32>
    %346 = vector.shape_cast %345 : vector<1x1x128xf32> to vector<1x128xf32>
    %347 = vector.broadcast %346 : vector<1x128xf32> to vector<24x128xf32>
    %348 = arith.addf %344, %347 : vector<24x128xf32>
    %cst_117 = arith.constant dense<0xFF800000> : vector<24xf32>
    %349 = vector.multi_reduction <maximumf>, %348, %cst_117 [1] : vector<24x128xf32> to vector<24xf32>
    %350 = vector.shape_cast %349 : vector<24xf32> to vector<24x1xf32>
    %351 = vector.broadcast %350 : vector<24x1xf32> to vector<24x128xf32>
    %352 = arith.subf %348, %351 : vector<24x128xf32>
    %353 = math.exp %352 : vector<24x128xf32>
    %cst_118 = arith.constant dense<0.000000e+00> : vector<24xf32>
    %354 = vector.multi_reduction <add>, %353, %cst_118 [1] : vector<24x128xf32> to vector<24xf32>
    %355 = vector.shape_cast %354 : vector<24xf32> to vector<24x1xf32>
    %356 = tpu.reciprocal %355 {approx = true} : vector<24x1xf32> -> vector<24x1xf32>
    %357 = arith.mulf %355, %356 : vector<24x1xf32>
    %cst_119 = arith.constant 2.000000e+00 : f32
    %358 = vector.broadcast %cst_119 : f32 to vector<24x1xf32>
    %359 = arith.subf %358, %357 : vector<24x1xf32>
    %360 = arith.mulf %356, %359 : vector<24x1xf32>
    %361 = vector.broadcast %360 : vector<24x1xf32> to vector<24x128xf32>
    %362 = arith.mulf %353, %361 : vector<24x128xf32>
    %c7 = arith.constant 7 : index
    %c0_120 = arith.constant 0 : index
    %c0_121 = arith.constant 0 : index
    %363 = vector.load %arg5[%c7, %c0_120, %c0_121] : memref<20x24x128xf32, #tpu.memory_space<vmem>>, vector<1x24x128xf32>
    %364 = vector.shape_cast %363 : vector<1x24x128xf32> to vector<24x128xf32>
    %365 = vector.shape_cast %362 : vector<24x128xf32> to vector<1x24x128xf32>
    tpu.vector_store %arg5[%c7, %c0_120, %c0_121], %365 {strides = array<i32>} : memref<20x24x128xf32, #tpu.memory_space<vmem>>, vector<1x24x128xf32>,
    %c192 = arith.constant 192 : index
    %c0_122 = arith.constant 0 : index
    %366 = vector.load %arg6[%c192, %c0_122] : memref<480x512xf32, #tpu.memory_space<vmem>>, vector<24x512xf32>
    %367 = vector.extract_strided_slice %343 {offsets = [0, 0], sizes = [24, 512], strides = [1, 1]} : vector<24x640xf32> to vector<24x512xf32>
    %368 = arith.addf %366, %367 : vector<24x512xf32>
    %369 = vector.extract_strided_slice %368 {offsets = [0, 0], sizes = [24, 384], strides = [1, 1]} : vector<24x512xf32> to vector<24x384xf32>
    %370 = arith.negf %369 : vector<24x384xf32>
    %371 = math.exp %370 : vector<24x384xf32>
    %cst_123 = arith.constant 1.000000e+00 : f32
    %372 = vector.broadcast %cst_123 : f32 to vector<24x384xf32>
    %373 = arith.addf %372, %371 : vector<24x384xf32>
    %374 = arith.divf %372, %373 : vector<24x384xf32>
    %375 = vector.extract_strided_slice %374 {offsets = [0, 0], sizes = [24, 128], strides = [1, 1]} : vector<24x384xf32> to vector<24x128xf32>
    %376 = vector.extract_strided_slice %374 {offsets = [0, 128], sizes = [24, 128], strides = [1, 1]} : vector<24x384xf32> to vector<24x128xf32>
    %377 = vector.extract_strided_slice %374 {offsets = [0, 256], sizes = [24, 128], strides = [1, 1]} : vector<24x384xf32> to vector<24x128xf32>
    %378 = vector.extract_strided_slice %368 {offsets = [0, 384], sizes = [24, 128], strides = [1, 1]} : vector<24x512xf32> to vector<24x128xf32>
    %379 = math.tanh %378 : vector<24x128xf32>
    %380 = arith.mulf %376, %337 : vector<24x128xf32>
    %381 = arith.mulf %375, %379 : vector<24x128xf32>
    %382 = arith.addf %380, %381 : vector<24x128xf32>
    %383 = math.tanh %382 : vector<24x128xf32>
    %384 = arith.mulf %377, %383 : vector<24x128xf32>
    %385 = arith.truncf %384 : vector<24x128xf32> to vector<24x128xbf16>
    %c0_124 = arith.constant 0 : index
    %c0_125 = arith.constant 0 : index
    %c0_126 = arith.constant 0 : index
    %386 = vector.load %arg7[%c0_124, %c0_125, %c0_126] : memref<4x128x640xbf16, #tpu.memory_space<vmem>>, vector<1x128x640xbf16>
    %387 = vector.shape_cast %386 : vector<1x128x640xbf16> to vector<128x640xbf16>
    %cst_127 = arith.constant dense<0.000000e+00> : vector<24x640xf32>
    %388 = tpu.matmul %385, %387, %cst_127 {dimension_numbers = #tpu.dot_dimension_numbers<[1], [0], [0], [1], [0, 0, 1, 1], [], []>} : vector<24x128xbf16>, vector<128x640xbf16>, vector<24x640xf32> -> vector<24x640xf32>
    %389 = vector.extract_strided_slice %388 {offsets = [0, 512], sizes = [24, 128], strides = [1, 1]} : vector<24x640xf32> to vector<24x128xf32>
    %c0_128 = arith.constant 0 : index
    %c0_129 = arith.constant 0 : index
    %c0_130 = arith.constant 0 : index
    %390 = vector.load %arg3[%c0_128, %c0_129, %c0_130] : memref<4x1x128xf32, #tpu.memory_space<vmem>>, vector<1x1x128xf32>
    %391 = vector.shape_cast %390 : vector<1x1x128xf32> to vector<1x128xf32>
    %392 = vector.broadcast %391 : vector<1x128xf32> to vector<24x128xf32>
    %393 = arith.addf %389, %392 : vector<24x128xf32>
    %cst_131 = arith.constant dense<0xFF800000> : vector<24xf32>
    %394 = vector.multi_reduction <maximumf>, %393, %cst_131 [1] : vector<24x128xf32> to vector<24xf32>
    %395 = vector.shape_cast %394 : vector<24xf32> to vector<24x1xf32>
    %396 = vector.broadcast %395 : vector<24x1xf32> to vector<24x128xf32>
    %397 = arith.subf %393, %396 : vector<24x128xf32>
    %398 = math.exp %397 : vector<24x128xf32>
    %cst_132 = arith.constant dense<0.000000e+00> : vector<24xf32>
    %399 = vector.multi_reduction <add>, %398, %cst_132 [1] : vector<24x128xf32> to vector<24xf32>
    %400 = vector.shape_cast %399 : vector<24xf32> to vector<24x1xf32>
    %401 = tpu.reciprocal %400 {approx = true} : vector<24x1xf32> -> vector<24x1xf32>
    %402 = arith.mulf %400, %401 : vector<24x1xf32>
    %cst_133 = arith.constant 2.000000e+00 : f32
    %403 = vector.broadcast %cst_133 : f32 to vector<24x1xf32>
    %404 = arith.subf %403, %402 : vector<24x1xf32>
    %405 = arith.mulf %401, %404 : vector<24x1xf32>
    %406 = vector.broadcast %405 : vector<24x1xf32> to vector<24x128xf32>
    %407 = arith.mulf %398, %406 : vector<24x128xf32>
    %c8 = arith.constant 8 : index
    %c0_134 = arith.constant 0 : index
    %c0_135 = arith.constant 0 : index
    %408 = vector.load %arg5[%c8, %c0_134, %c0_135] : memref<20x24x128xf32, #tpu.memory_space<vmem>>, vector<1x24x128xf32>
    %409 = vector.shape_cast %408 : vector<1x24x128xf32> to vector<24x128xf32>
    %410 = vector.shape_cast %407 : vector<24x128xf32> to vector<1x24x128xf32>
    tpu.vector_store %arg5[%c8, %c0_134, %c0_135], %410 {strides = array<i32>} : memref<20x24x128xf32, #tpu.memory_space<vmem>>, vector<1x24x128xf32>,
    %c216 = arith.constant 216 : index
    %c0_136 = arith.constant 0 : index
    %411 = vector.load %arg6[%c216, %c0_136] : memref<480x512xf32, #tpu.memory_space<vmem>>, vector<24x512xf32>
    %412 = vector.extract_strided_slice %388 {offsets = [0, 0], sizes = [24, 512], strides = [1, 1]} : vector<24x640xf32> to vector<24x512xf32>
    %413 = arith.addf %411, %412 : vector<24x512xf32>
    %414 = vector.extract_strided_slice %413 {offsets = [0, 0], sizes = [24, 384], strides = [1, 1]} : vector<24x512xf32> to vector<24x384xf32>
    %415 = arith.negf %414 : vector<24x384xf32>
    %416 = math.exp %415 : vector<24x384xf32>
    %cst_137 = arith.constant 1.000000e+00 : f32
    %417 = vector.broadcast %cst_137 : f32 to vector<24x384xf32>
    %418 = arith.addf %417, %416 : vector<24x384xf32>
    %419 = arith.divf %417, %418 : vector<24x384xf32>
    %420 = vector.extract_strided_slice %419 {offsets = [0, 0], sizes = [24, 128], strides = [1, 1]} : vector<24x384xf32> to vector<24x128xf32>
    %421 = vector.extract_strided_slice %419 {offsets = [0, 128], sizes = [24, 128], strides = [1, 1]} : vector<24x384xf32> to vector<24x128xf32>
    %422 = vector.extract_strided_slice %419 {offsets = [0, 256], sizes = [24, 128], strides = [1, 1]} : vector<24x384xf32> to vector<24x128xf32>
    %423 = vector.extract_strided_slice %413 {offsets = [0, 384], sizes = [24, 128], strides = [1, 1]} : vector<24x512xf32> to vector<24x128xf32>
    %424 = math.tanh %423 : vector<24x128xf32>
    %425 = arith.mulf %421, %382 : vector<24x128xf32>
    %426 = arith.mulf %420, %424 : vector<24x128xf32>
    %427 = arith.addf %425, %426 : vector<24x128xf32>
    %428 = math.tanh %427 : vector<24x128xf32>
    %429 = arith.mulf %422, %428 : vector<24x128xf32>
    %430 = arith.truncf %429 : vector<24x128xf32> to vector<24x128xbf16>
    %c1_138 = arith.constant 1 : index
    %c0_139 = arith.constant 0 : index
    %c0_140 = arith.constant 0 : index
    %431 = vector.load %arg7[%c1_138, %c0_139, %c0_140] : memref<4x128x640xbf16, #tpu.memory_space<vmem>>, vector<1x128x640xbf16>
    %432 = vector.shape_cast %431 : vector<1x128x640xbf16> to vector<128x640xbf16>
    %cst_141 = arith.constant dense<0.000000e+00> : vector<24x640xf32>
    %433 = tpu.matmul %430, %432, %cst_141 {dimension_numbers = #tpu.dot_dimension_numbers<[1], [0], [0], [1], [0, 0, 1, 1], [], []>} : vector<24x128xbf16>, vector<128x640xbf16>, vector<24x640xf32> -> vector<24x640xf32>
    %434 = vector.extract_strided_slice %433 {offsets = [0, 512], sizes = [24, 128], strides = [1, 1]} : vector<24x640xf32> to vector<24x128xf32>
    %c1_142 = arith.constant 1 : index
    %c0_143 = arith.constant 0 : index
    %c0_144 = arith.constant 0 : index
    %435 = vector.load %arg3[%c1_142, %c0_143, %c0_144] : memref<4x1x128xf32, #tpu.memory_space<vmem>>, vector<1x1x128xf32>
    %436 = vector.shape_cast %435 : vector<1x1x128xf32> to vector<1x128xf32>
    %437 = vector.broadcast %436 : vector<1x128xf32> to vector<24x128xf32>
    %438 = arith.addf %434, %437 : vector<24x128xf32>
    %cst_145 = arith.constant dense<0xFF800000> : vector<24xf32>
    %439 = vector.multi_reduction <maximumf>, %438, %cst_145 [1] : vector<24x128xf32> to vector<24xf32>
    %440 = vector.shape_cast %439 : vector<24xf32> to vector<24x1xf32>
    %441 = vector.broadcast %440 : vector<24x1xf32> to vector<24x128xf32>
    %442 = arith.subf %438, %441 : vector<24x128xf32>
    %443 = math.exp %442 : vector<24x128xf32>
    %cst_146 = arith.constant dense<0.000000e+00> : vector<24xf32>
    %444 = vector.multi_reduction <add>, %443, %cst_146 [1] : vector<24x128xf32> to vector<24xf32>
    %445 = vector.shape_cast %444 : vector<24xf32> to vector<24x1xf32>
    %446 = tpu.reciprocal %445 {approx = true} : vector<24x1xf32> -> vector<24x1xf32>
    %447 = arith.mulf %445, %446 : vector<24x1xf32>
    %cst_147 = arith.constant 2.000000e+00 : f32
    %448 = vector.broadcast %cst_147 : f32 to vector<24x1xf32>
    %449 = arith.subf %448, %447 : vector<24x1xf32>
    %450 = arith.mulf %446, %449 : vector<24x1xf32>
    %451 = vector.broadcast %450 : vector<24x1xf32> to vector<24x128xf32>
    %452 = arith.mulf %443, %451 : vector<24x128xf32>
    %c9 = arith.constant 9 : index
    %c0_148 = arith.constant 0 : index
    %c0_149 = arith.constant 0 : index
    %453 = vector.load %arg5[%c9, %c0_148, %c0_149] : memref<20x24x128xf32, #tpu.memory_space<vmem>>, vector<1x24x128xf32>
    %454 = vector.shape_cast %453 : vector<1x24x128xf32> to vector<24x128xf32>
    %455 = vector.shape_cast %452 : vector<24x128xf32> to vector<1x24x128xf32>
    tpu.vector_store %arg5[%c9, %c0_148, %c0_149], %455 {strides = array<i32>} : memref<20x24x128xf32, #tpu.memory_space<vmem>>, vector<1x24x128xf32>,
    %c240 = arith.constant 240 : index
    %c0_150 = arith.constant 0 : index
    %456 = vector.load %arg6[%c240, %c0_150] : memref<480x512xf32, #tpu.memory_space<vmem>>, vector<24x512xf32>
    %457 = vector.extract_strided_slice %433 {offsets = [0, 0], sizes = [24, 512], strides = [1, 1]} : vector<24x640xf32> to vector<24x512xf32>
    %458 = arith.addf %456, %457 : vector<24x512xf32>
    %459 = vector.extract_strided_slice %458 {offsets = [0, 0], sizes = [24, 384], strides = [1, 1]} : vector<24x512xf32> to vector<24x384xf32>
    %460 = arith.negf %459 : vector<24x384xf32>
    %461 = math.exp %460 : vector<24x384xf32>
    %cst_151 = arith.constant 1.000000e+00 : f32
    %462 = vector.broadcast %cst_151 : f32 to vector<24x384xf32>
    %463 = arith.addf %462, %461 : vector<24x384xf32>
    %464 = arith.divf %462, %463 : vector<24x384xf32>
    %465 = vector.extract_strided_slice %464 {offsets = [0, 0], sizes = [24, 128], strides = [1, 1]} : vector<24x384xf32> to vector<24x128xf32>
    %466 = vector.extract_strided_slice %464 {offsets = [0, 128], sizes = [24, 128], strides = [1, 1]} : vector<24x384xf32> to vector<24x128xf32>
    %467 = vector.extract_strided_slice %464 {offsets = [0, 256], sizes = [24, 128], strides = [1, 1]} : vector<24x384xf32> to vector<24x128xf32>
    %468 = vector.extract_strided_slice %458 {offsets = [0, 384], sizes = [24, 128], strides = [1, 1]} : vector<24x512xf32> to vector<24x128xf32>
    %469 = math.tanh %468 : vector<24x128xf32>
    %470 = arith.mulf %466, %427 : vector<24x128xf32>
    %471 = arith.mulf %465, %469 : vector<24x128xf32>
    %472 = arith.addf %470, %471 : vector<24x128xf32>
    %473 = math.tanh %472 : vector<24x128xf32>
    %474 = arith.mulf %467, %473 : vector<24x128xf32>
    %475 = arith.truncf %474 : vector<24x128xf32> to vector<24x128xbf16>
    %c2_152 = arith.constant 2 : index
    %c0_153 = arith.constant 0 : index
    %c0_154 = arith.constant 0 : index
    %476 = vector.load %arg7[%c2_152, %c0_153, %c0_154] : memref<4x128x640xbf16, #tpu.memory_space<vmem>>, vector<1x128x640xbf16>
    %477 = vector.shape_cast %476 : vector<1x128x640xbf16> to vector<128x640xbf16>
    %cst_155 = arith.constant dense<0.000000e+00> : vector<24x640xf32>
    %478 = tpu.matmul %475, %477, %cst_155 {dimension_numbers = #tpu.dot_dimension_numbers<[1], [0], [0], [1], [0, 0, 1, 1], [], []>} : vector<24x128xbf16>, vector<128x640xbf16>, vector<24x640xf32> -> vector<24x640xf32>
    %479 = vector.extract_strided_slice %478 {offsets = [0, 512], sizes = [24, 128], strides = [1, 1]} : vector<24x640xf32> to vector<24x128xf32>
    %c2_156 = arith.constant 2 : index
    %c0_157 = arith.constant 0 : index
    %c0_158 = arith.constant 0 : index
    %480 = vector.load %arg3[%c2_156, %c0_157, %c0_158] : memref<4x1x128xf32, #tpu.memory_space<vmem>>, vector<1x1x128xf32>
    %481 = vector.shape_cast %480 : vector<1x1x128xf32> to vector<1x128xf32>
    %482 = vector.broadcast %481 : vector<1x128xf32> to vector<24x128xf32>
    %483 = arith.addf %479, %482 : vector<24x128xf32>
    %cst_159 = arith.constant dense<0xFF800000> : vector<24xf32>
    %484 = vector.multi_reduction <maximumf>, %483, %cst_159 [1] : vector<24x128xf32> to vector<24xf32>
    %485 = vector.shape_cast %484 : vector<24xf32> to vector<24x1xf32>
    %486 = vector.broadcast %485 : vector<24x1xf32> to vector<24x128xf32>
    %487 = arith.subf %483, %486 : vector<24x128xf32>
    %488 = math.exp %487 : vector<24x128xf32>
    %cst_160 = arith.constant dense<0.000000e+00> : vector<24xf32>
    %489 = vector.multi_reduction <add>, %488, %cst_160 [1] : vector<24x128xf32> to vector<24xf32>
    %490 = vector.shape_cast %489 : vector<24xf32> to vector<24x1xf32>
    %491 = tpu.reciprocal %490 {approx = true} : vector<24x1xf32> -> vector<24x1xf32>
    %492 = arith.mulf %490, %491 : vector<24x1xf32>
    %cst_161 = arith.constant 2.000000e+00 : f32
    %493 = vector.broadcast %cst_161 : f32 to vector<24x1xf32>
    %494 = arith.subf %493, %492 : vector<24x1xf32>
    %495 = arith.mulf %491, %494 : vector<24x1xf32>
    %496 = vector.broadcast %495 : vector<24x1xf32> to vector<24x128xf32>
    %497 = arith.mulf %488, %496 : vector<24x128xf32>
    %c10 = arith.constant 10 : index
    %c0_162 = arith.constant 0 : index
    %c0_163 = arith.constant 0 : index
    %498 = vector.load %arg5[%c10, %c0_162, %c0_163] : memref<20x24x128xf32, #tpu.memory_space<vmem>>, vector<1x24x128xf32>
    %499 = vector.shape_cast %498 : vector<1x24x128xf32> to vector<24x128xf32>
    %500 = vector.shape_cast %497 : vector<24x128xf32> to vector<1x24x128xf32>
    tpu.vector_store %arg5[%c10, %c0_162, %c0_163], %500 {strides = array<i32>} : memref<20x24x128xf32, #tpu.memory_space<vmem>>, vector<1x24x128xf32>,
    %c264 = arith.constant 264 : index
    %c0_164 = arith.constant 0 : index
    %501 = vector.load %arg6[%c264, %c0_164] : memref<480x512xf32, #tpu.memory_space<vmem>>, vector<24x512xf32>
    %502 = vector.extract_strided_slice %478 {offsets = [0, 0], sizes = [24, 512], strides = [1, 1]} : vector<24x640xf32> to vector<24x512xf32>
    %503 = arith.addf %501, %502 : vector<24x512xf32>
    %504 = vector.extract_strided_slice %503 {offsets = [0, 0], sizes = [24, 384], strides = [1, 1]} : vector<24x512xf32> to vector<24x384xf32>
    %505 = arith.negf %504 : vector<24x384xf32>
    %506 = math.exp %505 : vector<24x384xf32>
    %cst_165 = arith.constant 1.000000e+00 : f32
    %507 = vector.broadcast %cst_165 : f32 to vector<24x384xf32>
    %508 = arith.addf %507, %506 : vector<24x384xf32>
    %509 = arith.divf %507, %508 : vector<24x384xf32>
    %510 = vector.extract_strided_slice %509 {offsets = [0, 0], sizes = [24, 128], strides = [1, 1]} : vector<24x384xf32> to vector<24x128xf32>
    %511 = vector.extract_strided_slice %509 {offsets = [0, 128], sizes = [24, 128], strides = [1, 1]} : vector<24x384xf32> to vector<24x128xf32>
    %512 = vector.extract_strided_slice %509 {offsets = [0, 256], sizes = [24, 128], strides = [1, 1]} : vector<24x384xf32> to vector<24x128xf32>
    %513 = vector.extract_strided_slice %503 {offsets = [0, 384], sizes = [24, 128], strides = [1, 1]} : vector<24x512xf32> to vector<24x128xf32>
    %514 = math.tanh %513 : vector<24x128xf32>
    %515 = arith.mulf %511, %472 : vector<24x128xf32>
    %516 = arith.mulf %510, %514 : vector<24x128xf32>
    %517 = arith.addf %515, %516 : vector<24x128xf32>
    %518 = math.tanh %517 : vector<24x128xf32>
    %519 = arith.mulf %512, %518 : vector<24x128xf32>
    %520 = arith.truncf %519 : vector<24x128xf32> to vector<24x128xbf16>
    %c3_166 = arith.constant 3 : index
    %c0_167 = arith.constant 0 : index
    %c0_168 = arith.constant 0 : index
    %521 = vector.load %arg7[%c3_166, %c0_167, %c0_168] : memref<4x128x640xbf16, #tpu.memory_space<vmem>>, vector<1x128x640xbf16>
    %522 = vector.shape_cast %521 : vector<1x128x640xbf16> to vector<128x640xbf16>
    %cst_169 = arith.constant dense<0.000000e+00> : vector<24x640xf32>
    %523 = tpu.matmul %520, %522, %cst_169 {dimension_numbers = #tpu.dot_dimension_numbers<[1], [0], [0], [1], [0, 0, 1, 1], [], []>} : vector<24x128xbf16>, vector<128x640xbf16>, vector<24x640xf32> -> vector<24x640xf32>
    %524 = vector.extract_strided_slice %523 {offsets = [0, 512], sizes = [24, 128], strides = [1, 1]} : vector<24x640xf32> to vector<24x128xf32>
    %c3_170 = arith.constant 3 : index
    %c0_171 = arith.constant 0 : index
    %c0_172 = arith.constant 0 : index
    %525 = vector.load %arg3[%c3_170, %c0_171, %c0_172] : memref<4x1x128xf32, #tpu.memory_space<vmem>>, vector<1x1x128xf32>
    %526 = vector.shape_cast %525 : vector<1x1x128xf32> to vector<1x128xf32>
    %527 = vector.broadcast %526 : vector<1x128xf32> to vector<24x128xf32>
    %528 = arith.addf %524, %527 : vector<24x128xf32>
    %cst_173 = arith.constant dense<0xFF800000> : vector<24xf32>
    %529 = vector.multi_reduction <maximumf>, %528, %cst_173 [1] : vector<24x128xf32> to vector<24xf32>
    %530 = vector.shape_cast %529 : vector<24xf32> to vector<24x1xf32>
    %531 = vector.broadcast %530 : vector<24x1xf32> to vector<24x128xf32>
    %532 = arith.subf %528, %531 : vector<24x128xf32>
    %533 = math.exp %532 : vector<24x128xf32>
    %cst_174 = arith.constant dense<0.000000e+00> : vector<24xf32>
    %534 = vector.multi_reduction <add>, %533, %cst_174 [1] : vector<24x128xf32> to vector<24xf32>
    %535 = vector.shape_cast %534 : vector<24xf32> to vector<24x1xf32>
    %536 = tpu.reciprocal %535 {approx = true} : vector<24x1xf32> -> vector<24x1xf32>
    %537 = arith.mulf %535, %536 : vector<24x1xf32>
    %cst_175 = arith.constant 2.000000e+00 : f32
    %538 = vector.broadcast %cst_175 : f32 to vector<24x1xf32>
    %539 = arith.subf %538, %537 : vector<24x1xf32>
    %540 = arith.mulf %536, %539 : vector<24x1xf32>
    %541 = vector.broadcast %540 : vector<24x1xf32> to vector<24x128xf32>
    %542 = arith.mulf %533, %541 : vector<24x128xf32>
    %c11 = arith.constant 11 : index
    %c0_176 = arith.constant 0 : index
    %c0_177 = arith.constant 0 : index
    %543 = vector.load %arg5[%c11, %c0_176, %c0_177] : memref<20x24x128xf32, #tpu.memory_space<vmem>>, vector<1x24x128xf32>
    %544 = vector.shape_cast %543 : vector<1x24x128xf32> to vector<24x128xf32>
    %545 = vector.shape_cast %542 : vector<24x128xf32> to vector<1x24x128xf32>
    tpu.vector_store %arg5[%c11, %c0_176, %c0_177], %545 {strides = array<i32>} : memref<20x24x128xf32, #tpu.memory_space<vmem>>, vector<1x24x128xf32>,
    %c288 = arith.constant 288 : index
    %c0_178 = arith.constant 0 : index
    %546 = vector.load %arg6[%c288, %c0_178] : memref<480x512xf32, #tpu.memory_space<vmem>>, vector<24x512xf32>
    %547 = vector.extract_strided_slice %523 {offsets = [0, 0], sizes = [24, 512], strides = [1, 1]} : vector<24x640xf32> to vector<24x512xf32>
    %548 = arith.addf %546, %547 : vector<24x512xf32>
    %549 = vector.extract_strided_slice %548 {offsets = [0, 0], sizes = [24, 384], strides = [1, 1]} : vector<24x512xf32> to vector<24x384xf32>
    %550 = arith.negf %549 : vector<24x384xf32>
    %551 = math.exp %550 : vector<24x384xf32>
    %cst_179 = arith.constant 1.000000e+00 : f32
    %552 = vector.broadcast %cst_179 : f32 to vector<24x384xf32>
    %553 = arith.addf %552, %551 : vector<24x384xf32>
    %554 = arith.divf %552, %553 : vector<24x384xf32>
    %555 = vector.extract_strided_slice %554 {offsets = [0, 0], sizes = [24, 128], strides = [1, 1]} : vector<24x384xf32> to vector<24x128xf32>
    %556 = vector.extract_strided_slice %554 {offsets = [0, 128], sizes = [24, 128], strides = [1, 1]} : vector<24x384xf32> to vector<24x128xf32>
    %557 = vector.extract_strided_slice %554 {offsets = [0, 256], sizes = [24, 128], strides = [1, 1]} : vector<24x384xf32> to vector<24x128xf32>
    %558 = vector.extract_strided_slice %548 {offsets = [0, 384], sizes = [24, 128], strides = [1, 1]} : vector<24x512xf32> to vector<24x128xf32>
    %559 = math.tanh %558 : vector<24x128xf32>
    %560 = arith.mulf %556, %517 : vector<24x128xf32>
    %561 = arith.mulf %555, %559 : vector<24x128xf32>
    %562 = arith.addf %560, %561 : vector<24x128xf32>
    %563 = math.tanh %562 : vector<24x128xf32>
    %564 = arith.mulf %557, %563 : vector<24x128xf32>
    %565 = arith.truncf %564 : vector<24x128xf32> to vector<24x128xbf16>
    %c0_180 = arith.constant 0 : index
    %c0_181 = arith.constant 0 : index
    %c0_182 = arith.constant 0 : index
    %566 = vector.load %arg7[%c0_180, %c0_181, %c0_182] : memref<4x128x640xbf16, #tpu.memory_space<vmem>>, vector<1x128x640xbf16>
    %567 = vector.shape_cast %566 : vector<1x128x640xbf16> to vector<128x640xbf16>
    %cst_183 = arith.constant dense<0.000000e+00> : vector<24x640xf32>
    %568 = tpu.matmul %565, %567, %cst_183 {dimension_numbers = #tpu.dot_dimension_numbers<[1], [0], [0], [1], [0, 0, 1, 1], [], []>} : vector<24x128xbf16>, vector<128x640xbf16>, vector<24x640xf32> -> vector<24x640xf32>
    %569 = vector.extract_strided_slice %568 {offsets = [0, 512], sizes = [24, 128], strides = [1, 1]} : vector<24x640xf32> to vector<24x128xf32>
    %c0_184 = arith.constant 0 : index
    %c0_185 = arith.constant 0 : index
    %c0_186 = arith.constant 0 : index
    %570 = vector.load %arg3[%c0_184, %c0_185, %c0_186] : memref<4x1x128xf32, #tpu.memory_space<vmem>>, vector<1x1x128xf32>
    %571 = vector.shape_cast %570 : vector<1x1x128xf32> to vector<1x128xf32>
    %572 = vector.broadcast %571 : vector<1x128xf32> to vector<24x128xf32>
    %573 = arith.addf %569, %572 : vector<24x128xf32>
    %cst_187 = arith.constant dense<0xFF800000> : vector<24xf32>
    %574 = vector.multi_reduction <maximumf>, %573, %cst_187 [1] : vector<24x128xf32> to vector<24xf32>
    %575 = vector.shape_cast %574 : vector<24xf32> to vector<24x1xf32>
    %576 = vector.broadcast %575 : vector<24x1xf32> to vector<24x128xf32>
    %577 = arith.subf %573, %576 : vector<24x128xf32>
    %578 = math.exp %577 : vector<24x128xf32>
    %cst_188 = arith.constant dense<0.000000e+00> : vector<24xf32>
    %579 = vector.multi_reduction <add>, %578, %cst_188 [1] : vector<24x128xf32> to vector<24xf32>
    %580 = vector.shape_cast %579 : vector<24xf32> to vector<24x1xf32>
    %581 = tpu.reciprocal %580 {approx = true} : vector<24x1xf32> -> vector<24x1xf32>
    %582 = arith.mulf %580, %581 : vector<24x1xf32>
    %cst_189 = arith.constant 2.000000e+00 : f32
    %583 = vector.broadcast %cst_189 : f32 to vector<24x1xf32>
    %584 = arith.subf %583, %582 : vector<24x1xf32>
    %585 = arith.mulf %581, %584 : vector<24x1xf32>
    %586 = vector.broadcast %585 : vector<24x1xf32> to vector<24x128xf32>
    %587 = arith.mulf %578, %586 : vector<24x128xf32>
    %c12 = arith.constant 12 : index
    %c0_190 = arith.constant 0 : index
    %c0_191 = arith.constant 0 : index
    %588 = vector.load %arg5[%c12, %c0_190, %c0_191] : memref<20x24x128xf32, #tpu.memory_space<vmem>>, vector<1x24x128xf32>
    %589 = vector.shape_cast %588 : vector<1x24x128xf32> to vector<24x128xf32>
    %590 = vector.shape_cast %587 : vector<24x128xf32> to vector<1x24x128xf32>
    tpu.vector_store %arg5[%c12, %c0_190, %c0_191], %590 {strides = array<i32>} : memref<20x24x128xf32, #tpu.memory_space<vmem>>, vector<1x24x128xf32>,
    %c312 = arith.constant 312 : index
    %c0_192 = arith.constant 0 : index
    %591 = vector.load %arg6[%c312, %c0_192] : memref<480x512xf32, #tpu.memory_space<vmem>>, vector<24x512xf32>
    %592 = vector.extract_strided_slice %568 {offsets = [0, 0], sizes = [24, 512], strides = [1, 1]} : vector<24x640xf32> to vector<24x512xf32>
    %593 = arith.addf %591, %592 : vector<24x512xf32>
    %594 = vector.extract_strided_slice %593 {offsets = [0, 0], sizes = [24, 384], strides = [1, 1]} : vector<24x512xf32> to vector<24x384xf32>
    %595 = arith.negf %594 : vector<24x384xf32>
    %596 = math.exp %595 : vector<24x384xf32>
    %cst_193 = arith.constant 1.000000e+00 : f32
    %597 = vector.broadcast %cst_193 : f32 to vector<24x384xf32>
    %598 = arith.addf %597, %596 : vector<24x384xf32>
    %599 = arith.divf %597, %598 : vector<24x384xf32>
    %600 = vector.extract_strided_slice %599 {offsets = [0, 0], sizes = [24, 128], strides = [1, 1]} : vector<24x384xf32> to vector<24x128xf32>
    %601 = vector.extract_strided_slice %599 {offsets = [0, 128], sizes = [24, 128], strides = [1, 1]} : vector<24x384xf32> to vector<24x128xf32>
    %602 = vector.extract_strided_slice %599 {offsets = [0, 256], sizes = [24, 128], strides = [1, 1]} : vector<24x384xf32> to vector<24x128xf32>
    %603 = vector.extract_strided_slice %593 {offsets = [0, 384], sizes = [24, 128], strides = [1, 1]} : vector<24x512xf32> to vector<24x128xf32>
    %604 = math.tanh %603 : vector<24x128xf32>
    %605 = arith.mulf %601, %562 : vector<24x128xf32>
    %606 = arith.mulf %600, %604 : vector<24x128xf32>
    %607 = arith.addf %605, %606 : vector<24x128xf32>
    %608 = math.tanh %607 : vector<24x128xf32>
    %609 = arith.mulf %602, %608 : vector<24x128xf32>
    %610 = arith.truncf %609 : vector<24x128xf32> to vector<24x128xbf16>
    %c1_194 = arith.constant 1 : index
    %c0_195 = arith.constant 0 : index
    %c0_196 = arith.constant 0 : index
    %611 = vector.load %arg7[%c1_194, %c0_195, %c0_196] : memref<4x128x640xbf16, #tpu.memory_space<vmem>>, vector<1x128x640xbf16>
    %612 = vector.shape_cast %611 : vector<1x128x640xbf16> to vector<128x640xbf16>
    %cst_197 = arith.constant dense<0.000000e+00> : vector<24x640xf32>
    %613 = tpu.matmul %610, %612, %cst_197 {dimension_numbers = #tpu.dot_dimension_numbers<[1], [0], [0], [1], [0, 0, 1, 1], [], []>} : vector<24x128xbf16>, vector<128x640xbf16>, vector<24x640xf32> -> vector<24x640xf32>
    %614 = vector.extract_strided_slice %613 {offsets = [0, 512], sizes = [24, 128], strides = [1, 1]} : vector<24x640xf32> to vector<24x128xf32>
    %c1_198 = arith.constant 1 : index
    %c0_199 = arith.constant 0 : index
    %c0_200 = arith.constant 0 : index
    %615 = vector.load %arg3[%c1_198, %c0_199, %c0_200] : memref<4x1x128xf32, #tpu.memory_space<vmem>>, vector<1x1x128xf32>
    %616 = vector.shape_cast %615 : vector<1x1x128xf32> to vector<1x128xf32>
    %617 = vector.broadcast %616 : vector<1x128xf32> to vector<24x128xf32>
    %618 = arith.addf %614, %617 : vector<24x128xf32>
    %cst_201 = arith.constant dense<0xFF800000> : vector<24xf32>
    %619 = vector.multi_reduction <maximumf>, %618, %cst_201 [1] : vector<24x128xf32> to vector<24xf32>
    %620 = vector.shape_cast %619 : vector<24xf32> to vector<24x1xf32>
    %621 = vector.broadcast %620 : vector<24x1xf32> to vector<24x128xf32>
    %622 = arith.subf %618, %621 : vector<24x128xf32>
    %623 = math.exp %622 : vector<24x128xf32>
    %cst_202 = arith.constant dense<0.000000e+00> : vector<24xf32>
    %624 = vector.multi_reduction <add>, %623, %cst_202 [1] : vector<24x128xf32> to vector<24xf32>
    %625 = vector.shape_cast %624 : vector<24xf32> to vector<24x1xf32>
    %626 = tpu.reciprocal %625 {approx = true} : vector<24x1xf32> -> vector<24x1xf32>
    %627 = arith.mulf %625, %626 : vector<24x1xf32>
    %cst_203 = arith.constant 2.000000e+00 : f32
    %628 = vector.broadcast %cst_203 : f32 to vector<24x1xf32>
    %629 = arith.subf %628, %627 : vector<24x1xf32>
    %630 = arith.mulf %626, %629 : vector<24x1xf32>
    %631 = vector.broadcast %630 : vector<24x1xf32> to vector<24x128xf32>
    %632 = arith.mulf %623, %631 : vector<24x128xf32>
    %c13 = arith.constant 13 : index
    %c0_204 = arith.constant 0 : index
    %c0_205 = arith.constant 0 : index
    %633 = vector.load %arg5[%c13, %c0_204, %c0_205] : memref<20x24x128xf32, #tpu.memory_space<vmem>>, vector<1x24x128xf32>
    %634 = vector.shape_cast %633 : vector<1x24x128xf32> to vector<24x128xf32>
    %635 = vector.shape_cast %632 : vector<24x128xf32> to vector<1x24x128xf32>
    tpu.vector_store %arg5[%c13, %c0_204, %c0_205], %635 {strides = array<i32>} : memref<20x24x128xf32, #tpu.memory_space<vmem>>, vector<1x24x128xf32>,
    %c336 = arith.constant 336 : index
    %c0_206 = arith.constant 0 : index
    %636 = vector.load %arg6[%c336, %c0_206] : memref<480x512xf32, #tpu.memory_space<vmem>>, vector<24x512xf32>
    %637 = vector.extract_strided_slice %613 {offsets = [0, 0], sizes = [24, 512], strides = [1, 1]} : vector<24x640xf32> to vector<24x512xf32>
    %638 = arith.addf %636, %637 : vector<24x512xf32>
    %639 = vector.extract_strided_slice %638 {offsets = [0, 0], sizes = [24, 384], strides = [1, 1]} : vector<24x512xf32> to vector<24x384xf32>
    %640 = arith.negf %639 : vector<24x384xf32>
    %641 = math.exp %640 : vector<24x384xf32>
    %cst_207 = arith.constant 1.000000e+00 : f32
    %642 = vector.broadcast %cst_207 : f32 to vector<24x384xf32>
    %643 = arith.addf %642, %641 : vector<24x384xf32>
    %644 = arith.divf %642, %643 : vector<24x384xf32>
    %645 = vector.extract_strided_slice %644 {offsets = [0, 0], sizes = [24, 128], strides = [1, 1]} : vector<24x384xf32> to vector<24x128xf32>
    %646 = vector.extract_strided_slice %644 {offsets = [0, 128], sizes = [24, 128], strides = [1, 1]} : vector<24x384xf32> to vector<24x128xf32>
    %647 = vector.extract_strided_slice %644 {offsets = [0, 256], sizes = [24, 128], strides = [1, 1]} : vector<24x384xf32> to vector<24x128xf32>
    %648 = vector.extract_strided_slice %638 {offsets = [0, 384], sizes = [24, 128], strides = [1, 1]} : vector<24x512xf32> to vector<24x128xf32>
    %649 = math.tanh %648 : vector<24x128xf32>
    %650 = arith.mulf %646, %607 : vector<24x128xf32>
    %651 = arith.mulf %645, %649 : vector<24x128xf32>
    %652 = arith.addf %650, %651 : vector<24x128xf32>
    %653 = math.tanh %652 : vector<24x128xf32>
    %654 = arith.mulf %647, %653 : vector<24x128xf32>
    %655 = arith.truncf %654 : vector<24x128xf32> to vector<24x128xbf16>
    %c2_208 = arith.constant 2 : index
    %c0_209 = arith.constant 0 : index
    %c0_210 = arith.constant 0 : index
    %656 = vector.load %arg7[%c2_208, %c0_209, %c0_210] : memref<4x128x640xbf16, #tpu.memory_space<vmem>>, vector<1x128x640xbf16>
    %657 = vector.shape_cast %656 : vector<1x128x640xbf16> to vector<128x640xbf16>
    %cst_211 = arith.constant dense<0.000000e+00> : vector<24x640xf32>
    %658 = tpu.matmul %655, %657, %cst_211 {dimension_numbers = #tpu.dot_dimension_numbers<[1], [0], [0], [1], [0, 0, 1, 1], [], []>} : vector<24x128xbf16>, vector<128x640xbf16>, vector<24x640xf32> -> vector<24x640xf32>
    %659 = vector.extract_strided_slice %658 {offsets = [0, 512], sizes = [24, 128], strides = [1, 1]} : vector<24x640xf32> to vector<24x128xf32>
    %c2_212 = arith.constant 2 : index
    %c0_213 = arith.constant 0 : index
    %c0_214 = arith.constant 0 : index
    %660 = vector.load %arg3[%c2_212, %c0_213, %c0_214] : memref<4x1x128xf32, #tpu.memory_space<vmem>>, vector<1x1x128xf32>
    %661 = vector.shape_cast %660 : vector<1x1x128xf32> to vector<1x128xf32>
    %662 = vector.broadcast %661 : vector<1x128xf32> to vector<24x128xf32>
    %663 = arith.addf %659, %662 : vector<24x128xf32>
    %cst_215 = arith.constant dense<0xFF800000> : vector<24xf32>
    %664 = vector.multi_reduction <maximumf>, %663, %cst_215 [1] : vector<24x128xf32> to vector<24xf32>
    %665 = vector.shape_cast %664 : vector<24xf32> to vector<24x1xf32>
    %666 = vector.broadcast %665 : vector<24x1xf32> to vector<24x128xf32>
    %667 = arith.subf %663, %666 : vector<24x128xf32>
    %668 = math.exp %667 : vector<24x128xf32>
    %cst_216 = arith.constant dense<0.000000e+00> : vector<24xf32>
    %669 = vector.multi_reduction <add>, %668, %cst_216 [1] : vector<24x128xf32> to vector<24xf32>
    %670 = vector.shape_cast %669 : vector<24xf32> to vector<24x1xf32>
    %671 = tpu.reciprocal %670 {approx = true} : vector<24x1xf32> -> vector<24x1xf32>
    %672 = arith.mulf %670, %671 : vector<24x1xf32>
    %cst_217 = arith.constant 2.000000e+00 : f32
    %673 = vector.broadcast %cst_217 : f32 to vector<24x1xf32>
    %674 = arith.subf %673, %672 : vector<24x1xf32>
    %675 = arith.mulf %671, %674 : vector<24x1xf32>
    %676 = vector.broadcast %675 : vector<24x1xf32> to vector<24x128xf32>
    %677 = arith.mulf %668, %676 : vector<24x128xf32>
    %c14 = arith.constant 14 : index
    %c0_218 = arith.constant 0 : index
    %c0_219 = arith.constant 0 : index
    %678 = vector.load %arg5[%c14, %c0_218, %c0_219] : memref<20x24x128xf32, #tpu.memory_space<vmem>>, vector<1x24x128xf32>
    %679 = vector.shape_cast %678 : vector<1x24x128xf32> to vector<24x128xf32>
    %680 = vector.shape_cast %677 : vector<24x128xf32> to vector<1x24x128xf32>
    tpu.vector_store %arg5[%c14, %c0_218, %c0_219], %680 {strides = array<i32>} : memref<20x24x128xf32, #tpu.memory_space<vmem>>, vector<1x24x128xf32>,
    %c360 = arith.constant 360 : index
    %c0_220 = arith.constant 0 : index
    %681 = vector.load %arg6[%c360, %c0_220] : memref<480x512xf32, #tpu.memory_space<vmem>>, vector<24x512xf32>
    %682 = vector.extract_strided_slice %658 {offsets = [0, 0], sizes = [24, 512], strides = [1, 1]} : vector<24x640xf32> to vector<24x512xf32>
    %683 = arith.addf %681, %682 : vector<24x512xf32>
    %684 = vector.extract_strided_slice %683 {offsets = [0, 0], sizes = [24, 384], strides = [1, 1]} : vector<24x512xf32> to vector<24x384xf32>
    %685 = arith.negf %684 : vector<24x384xf32>
    %686 = math.exp %685 : vector<24x384xf32>
    %cst_221 = arith.constant 1.000000e+00 : f32
    %687 = vector.broadcast %cst_221 : f32 to vector<24x384xf32>
    %688 = arith.addf %687, %686 : vector<24x384xf32>
    %689 = arith.divf %687, %688 : vector<24x384xf32>
    %690 = vector.extract_strided_slice %689 {offsets = [0, 0], sizes = [24, 128], strides = [1, 1]} : vector<24x384xf32> to vector<24x128xf32>
    %691 = vector.extract_strided_slice %689 {offsets = [0, 128], sizes = [24, 128], strides = [1, 1]} : vector<24x384xf32> to vector<24x128xf32>
    %692 = vector.extract_strided_slice %689 {offsets = [0, 256], sizes = [24, 128], strides = [1, 1]} : vector<24x384xf32> to vector<24x128xf32>
    %693 = vector.extract_strided_slice %683 {offsets = [0, 384], sizes = [24, 128], strides = [1, 1]} : vector<24x512xf32> to vector<24x128xf32>
    %694 = math.tanh %693 : vector<24x128xf32>
    %695 = arith.mulf %691, %652 : vector<24x128xf32>
    %696 = arith.mulf %690, %694 : vector<24x128xf32>
    %697 = arith.addf %695, %696 : vector<24x128xf32>
    %698 = math.tanh %697 : vector<24x128xf32>
    %699 = arith.mulf %692, %698 : vector<24x128xf32>
    %700 = arith.truncf %699 : vector<24x128xf32> to vector<24x128xbf16>
    %c3_222 = arith.constant 3 : index
    %c0_223 = arith.constant 0 : index
    %c0_224 = arith.constant 0 : index
    %701 = vector.load %arg7[%c3_222, %c0_223, %c0_224] : memref<4x128x640xbf16, #tpu.memory_space<vmem>>, vector<1x128x640xbf16>
    %702 = vector.shape_cast %701 : vector<1x128x640xbf16> to vector<128x640xbf16>
    %cst_225 = arith.constant dense<0.000000e+00> : vector<24x640xf32>
    %703 = tpu.matmul %700, %702, %cst_225 {dimension_numbers = #tpu.dot_dimension_numbers<[1], [0], [0], [1], [0, 0, 1, 1], [], []>} : vector<24x128xbf16>, vector<128x640xbf16>, vector<24x640xf32> -> vector<24x640xf32>
    %704 = vector.extract_strided_slice %703 {offsets = [0, 512], sizes = [24, 128], strides = [1, 1]} : vector<24x640xf32> to vector<24x128xf32>
    %c3_226 = arith.constant 3 : index
    %c0_227 = arith.constant 0 : index
    %c0_228 = arith.constant 0 : index
    %705 = vector.load %arg3[%c3_226, %c0_227, %c0_228] : memref<4x1x128xf32, #tpu.memory_space<vmem>>, vector<1x1x128xf32>
    %706 = vector.shape_cast %705 : vector<1x1x128xf32> to vector<1x128xf32>
    %707 = vector.broadcast %706 : vector<1x128xf32> to vector<24x128xf32>
    %708 = arith.addf %704, %707 : vector<24x128xf32>
    %cst_229 = arith.constant dense<0xFF800000> : vector<24xf32>
    %709 = vector.multi_reduction <maximumf>, %708, %cst_229 [1] : vector<24x128xf32> to vector<24xf32>
    %710 = vector.shape_cast %709 : vector<24xf32> to vector<24x1xf32>
    %711 = vector.broadcast %710 : vector<24x1xf32> to vector<24x128xf32>
    %712 = arith.subf %708, %711 : vector<24x128xf32>
    %713 = math.exp %712 : vector<24x128xf32>
    %cst_230 = arith.constant dense<0.000000e+00> : vector<24xf32>
    %714 = vector.multi_reduction <add>, %713, %cst_230 [1] : vector<24x128xf32> to vector<24xf32>
    %715 = vector.shape_cast %714 : vector<24xf32> to vector<24x1xf32>
    %716 = tpu.reciprocal %715 {approx = true} : vector<24x1xf32> -> vector<24x1xf32>
    %717 = arith.mulf %715, %716 : vector<24x1xf32>
    %cst_231 = arith.constant 2.000000e+00 : f32
    %718 = vector.broadcast %cst_231 : f32 to vector<24x1xf32>
    %719 = arith.subf %718, %717 : vector<24x1xf32>
    %720 = arith.mulf %716, %719 : vector<24x1xf32>
    %721 = vector.broadcast %720 : vector<24x1xf32> to vector<24x128xf32>
    %722 = arith.mulf %713, %721 : vector<24x128xf32>
    %c15 = arith.constant 15 : index
    %c0_232 = arith.constant 0 : index
    %c0_233 = arith.constant 0 : index
    %723 = vector.load %arg5[%c15, %c0_232, %c0_233] : memref<20x24x128xf32, #tpu.memory_space<vmem>>, vector<1x24x128xf32>
    %724 = vector.shape_cast %723 : vector<1x24x128xf32> to vector<24x128xf32>
    %725 = vector.shape_cast %722 : vector<24x128xf32> to vector<1x24x128xf32>
    tpu.vector_store %arg5[%c15, %c0_232, %c0_233], %725 {strides = array<i32>} : memref<20x24x128xf32, #tpu.memory_space<vmem>>, vector<1x24x128xf32>,
    %c384 = arith.constant 384 : index
    %c0_234 = arith.constant 0 : index
    %726 = vector.load %arg6[%c384, %c0_234] : memref<480x512xf32, #tpu.memory_space<vmem>>, vector<24x512xf32>
    %727 = vector.extract_strided_slice %703 {offsets = [0, 0], sizes = [24, 512], strides = [1, 1]} : vector<24x640xf32> to vector<24x512xf32>
    %728 = arith.addf %726, %727 : vector<24x512xf32>
    %729 = vector.extract_strided_slice %728 {offsets = [0, 0], sizes = [24, 384], strides = [1, 1]} : vector<24x512xf32> to vector<24x384xf32>
    %730 = arith.negf %729 : vector<24x384xf32>
    %731 = math.exp %730 : vector<24x384xf32>
    %cst_235 = arith.constant 1.000000e+00 : f32
    %732 = vector.broadcast %cst_235 : f32 to vector<24x384xf32>
    %733 = arith.addf %732, %731 : vector<24x384xf32>
    %734 = arith.divf %732, %733 : vector<24x384xf32>
    %735 = vector.extract_strided_slice %734 {offsets = [0, 0], sizes = [24, 128], strides = [1, 1]} : vector<24x384xf32> to vector<24x128xf32>
    %736 = vector.extract_strided_slice %734 {offsets = [0, 128], sizes = [24, 128], strides = [1, 1]} : vector<24x384xf32> to vector<24x128xf32>
    %737 = vector.extract_strided_slice %734 {offsets = [0, 256], sizes = [24, 128], strides = [1, 1]} : vector<24x384xf32> to vector<24x128xf32>
    %738 = vector.extract_strided_slice %728 {offsets = [0, 384], sizes = [24, 128], strides = [1, 1]} : vector<24x512xf32> to vector<24x128xf32>
    %739 = math.tanh %738 : vector<24x128xf32>
    %740 = arith.mulf %736, %697 : vector<24x128xf32>
    %741 = arith.mulf %735, %739 : vector<24x128xf32>
    %742 = arith.addf %740, %741 : vector<24x128xf32>
    %743 = math.tanh %742 : vector<24x128xf32>
    %744 = arith.mulf %737, %743 : vector<24x128xf32>
    %745 = arith.truncf %744 : vector<24x128xf32> to vector<24x128xbf16>
    %c0_236 = arith.constant 0 : index
    %c0_237 = arith.constant 0 : index
    %c0_238 = arith.constant 0 : index
    %746 = vector.load %arg7[%c0_236, %c0_237, %c0_238] : memref<4x128x640xbf16, #tpu.memory_space<vmem>>, vector<1x128x640xbf16>
    %747 = vector.shape_cast %746 : vector<1x128x640xbf16> to vector<128x640xbf16>
    %cst_239 = arith.constant dense<0.000000e+00> : vector<24x640xf32>
    %748 = tpu.matmul %745, %747, %cst_239 {dimension_numbers = #tpu.dot_dimension_numbers<[1], [0], [0], [1], [0, 0, 1, 1], [], []>} : vector<24x128xbf16>, vector<128x640xbf16>, vector<24x640xf32> -> vector<24x640xf32>
    %749 = vector.extract_strided_slice %748 {offsets = [0, 512], sizes = [24, 128], strides = [1, 1]} : vector<24x640xf32> to vector<24x128xf32>
    %c0_240 = arith.constant 0 : index
    %c0_241 = arith.constant 0 : index
    %c0_242 = arith.constant 0 : index
    %750 = vector.load %arg3[%c0_240, %c0_241, %c0_242] : memref<4x1x128xf32, #tpu.memory_space<vmem>>, vector<1x1x128xf32>
    %751 = vector.shape_cast %750 : vector<1x1x128xf32> to vector<1x128xf32>
    %752 = vector.broadcast %751 : vector<1x128xf32> to vector<24x128xf32>
    %753 = arith.addf %749, %752 : vector<24x128xf32>
    %cst_243 = arith.constant dense<0xFF800000> : vector<24xf32>
    %754 = vector.multi_reduction <maximumf>, %753, %cst_243 [1] : vector<24x128xf32> to vector<24xf32>
    %755 = vector.shape_cast %754 : vector<24xf32> to vector<24x1xf32>
    %756 = vector.broadcast %755 : vector<24x1xf32> to vector<24x128xf32>
    %757 = arith.subf %753, %756 : vector<24x128xf32>
    %758 = math.exp %757 : vector<24x128xf32>
    %cst_244 = arith.constant dense<0.000000e+00> : vector<24xf32>
    %759 = vector.multi_reduction <add>, %758, %cst_244 [1] : vector<24x128xf32> to vector<24xf32>
    %760 = vector.shape_cast %759 : vector<24xf32> to vector<24x1xf32>
    %761 = tpu.reciprocal %760 {approx = true} : vector<24x1xf32> -> vector<24x1xf32>
    %762 = arith.mulf %760, %761 : vector<24x1xf32>
    %cst_245 = arith.constant 2.000000e+00 : f32
    %763 = vector.broadcast %cst_245 : f32 to vector<24x1xf32>
    %764 = arith.subf %763, %762 : vector<24x1xf32>
    %765 = arith.mulf %761, %764 : vector<24x1xf32>
    %766 = vector.broadcast %765 : vector<24x1xf32> to vector<24x128xf32>
    %767 = arith.mulf %758, %766 : vector<24x128xf32>
    %c16 = arith.constant 16 : index
    %c0_246 = arith.constant 0 : index
    %c0_247 = arith.constant 0 : index
    %768 = vector.load %arg5[%c16, %c0_246, %c0_247] : memref<20x24x128xf32, #tpu.memory_space<vmem>>, vector<1x24x128xf32>
    %769 = vector.shape_cast %768 : vector<1x24x128xf32> to vector<24x128xf32>
    %770 = vector.shape_cast %767 : vector<24x128xf32> to vector<1x24x128xf32>
    tpu.vector_store %arg5[%c16, %c0_246, %c0_247], %770 {strides = array<i32>} : memref<20x24x128xf32, #tpu.memory_space<vmem>>, vector<1x24x128xf32>,
    %c408 = arith.constant 408 : index
    %c0_248 = arith.constant 0 : index
    %771 = vector.load %arg6[%c408, %c0_248] : memref<480x512xf32, #tpu.memory_space<vmem>>, vector<24x512xf32>
    %772 = vector.extract_strided_slice %748 {offsets = [0, 0], sizes = [24, 512], strides = [1, 1]} : vector<24x640xf32> to vector<24x512xf32>
    %773 = arith.addf %771, %772 : vector<24x512xf32>
    %774 = vector.extract_strided_slice %773 {offsets = [0, 0], sizes = [24, 384], strides = [1, 1]} : vector<24x512xf32> to vector<24x384xf32>
    %775 = arith.negf %774 : vector<24x384xf32>
    %776 = math.exp %775 : vector<24x384xf32>
    %cst_249 = arith.constant 1.000000e+00 : f32
    %777 = vector.broadcast %cst_249 : f32 to vector<24x384xf32>
    %778 = arith.addf %777, %776 : vector<24x384xf32>
    %779 = arith.divf %777, %778 : vector<24x384xf32>
    %780 = vector.extract_strided_slice %779 {offsets = [0, 0], sizes = [24, 128], strides = [1, 1]} : vector<24x384xf32> to vector<24x128xf32>
    %781 = vector.extract_strided_slice %779 {offsets = [0, 128], sizes = [24, 128], strides = [1, 1]} : vector<24x384xf32> to vector<24x128xf32>
    %782 = vector.extract_strided_slice %779 {offsets = [0, 256], sizes = [24, 128], strides = [1, 1]} : vector<24x384xf32> to vector<24x128xf32>
    %783 = vector.extract_strided_slice %773 {offsets = [0, 384], sizes = [24, 128], strides = [1, 1]} : vector<24x512xf32> to vector<24x128xf32>
    %784 = math.tanh %783 : vector<24x128xf32>
    %785 = arith.mulf %781, %742 : vector<24x128xf32>
    %786 = arith.mulf %780, %784 : vector<24x128xf32>
    %787 = arith.addf %785, %786 : vector<24x128xf32>
    %788 = math.tanh %787 : vector<24x128xf32>
    %789 = arith.mulf %782, %788 : vector<24x128xf32>
    %790 = arith.truncf %789 : vector<24x128xf32> to vector<24x128xbf16>
    %c1_250 = arith.constant 1 : index
    %c0_251 = arith.constant 0 : index
    %c0_252 = arith.constant 0 : index
    %791 = vector.load %arg7[%c1_250, %c0_251, %c0_252] : memref<4x128x640xbf16, #tpu.memory_space<vmem>>, vector<1x128x640xbf16>
    %792 = vector.shape_cast %791 : vector<1x128x640xbf16> to vector<128x640xbf16>
    %cst_253 = arith.constant dense<0.000000e+00> : vector<24x640xf32>
    %793 = tpu.matmul %790, %792, %cst_253 {dimension_numbers = #tpu.dot_dimension_numbers<[1], [0], [0], [1], [0, 0, 1, 1], [], []>} : vector<24x128xbf16>, vector<128x640xbf16>, vector<24x640xf32> -> vector<24x640xf32>
    %794 = vector.extract_strided_slice %793 {offsets = [0, 512], sizes = [24, 128], strides = [1, 1]} : vector<24x640xf32> to vector<24x128xf32>
    %c1_254 = arith.constant 1 : index
    %c0_255 = arith.constant 0 : index
    %c0_256 = arith.constant 0 : index
    %795 = vector.load %arg3[%c1_254, %c0_255, %c0_256] : memref<4x1x128xf32, #tpu.memory_space<vmem>>, vector<1x1x128xf32>
    %796 = vector.shape_cast %795 : vector<1x1x128xf32> to vector<1x128xf32>
    %797 = vector.broadcast %796 : vector<1x128xf32> to vector<24x128xf32>
    %798 = arith.addf %794, %797 : vector<24x128xf32>
    %cst_257 = arith.constant dense<0xFF800000> : vector<24xf32>
    %799 = vector.multi_reduction <maximumf>, %798, %cst_257 [1] : vector<24x128xf32> to vector<24xf32>
    %800 = vector.shape_cast %799 : vector<24xf32> to vector<24x1xf32>
    %801 = vector.broadcast %800 : vector<24x1xf32> to vector<24x128xf32>
    %802 = arith.subf %798, %801 : vector<24x128xf32>
    %803 = math.exp %802 : vector<24x128xf32>
    %cst_258 = arith.constant dense<0.000000e+00> : vector<24xf32>
    %804 = vector.multi_reduction <add>, %803, %cst_258 [1] : vector<24x128xf32> to vector<24xf32>
    %805 = vector.shape_cast %804 : vector<24xf32> to vector<24x1xf32>
    %806 = tpu.reciprocal %805 {approx = true} : vector<24x1xf32> -> vector<24x1xf32>
    %807 = arith.mulf %805, %806 : vector<24x1xf32>
    %cst_259 = arith.constant 2.000000e+00 : f32
    %808 = vector.broadcast %cst_259 : f32 to vector<24x1xf32>
    %809 = arith.subf %808, %807 : vector<24x1xf32>
    %810 = arith.mulf %806, %809 : vector<24x1xf32>
    %811 = vector.broadcast %810 : vector<24x1xf32> to vector<24x128xf32>
    %812 = arith.mulf %803, %811 : vector<24x128xf32>
    %c17 = arith.constant 17 : index
    %c0_260 = arith.constant 0 : index
    %c0_261 = arith.constant 0 : index
    %813 = vector.load %arg5[%c17, %c0_260, %c0_261] : memref<20x24x128xf32, #tpu.memory_space<vmem>>, vector<1x24x128xf32>
    %814 = vector.shape_cast %813 : vector<1x24x128xf32> to vector<24x128xf32>
    %815 = vector.shape_cast %812 : vector<24x128xf32> to vector<1x24x128xf32>
    tpu.vector_store %arg5[%c17, %c0_260, %c0_261], %815 {strides = array<i32>} : memref<20x24x128xf32, #tpu.memory_space<vmem>>, vector<1x24x128xf32>,
    %c432 = arith.constant 432 : index
    %c0_262 = arith.constant 0 : index
    %816 = vector.load %arg6[%c432, %c0_262] : memref<480x512xf32, #tpu.memory_space<vmem>>, vector<24x512xf32>
    %817 = vector.extract_strided_slice %793 {offsets = [0, 0], sizes = [24, 512], strides = [1, 1]} : vector<24x640xf32> to vector<24x512xf32>
    %818 = arith.addf %816, %817 : vector<24x512xf32>
    %819 = vector.extract_strided_slice %818 {offsets = [0, 0], sizes = [24, 384], strides = [1, 1]} : vector<24x512xf32> to vector<24x384xf32>
    %820 = arith.negf %819 : vector<24x384xf32>
    %821 = math.exp %820 : vector<24x384xf32>
    %cst_263 = arith.constant 1.000000e+00 : f32
    %822 = vector.broadcast %cst_263 : f32 to vector<24x384xf32>
    %823 = arith.addf %822, %821 : vector<24x384xf32>
    %824 = arith.divf %822, %823 : vector<24x384xf32>
    %825 = vector.extract_strided_slice %824 {offsets = [0, 0], sizes = [24, 128], strides = [1, 1]} : vector<24x384xf32> to vector<24x128xf32>
    %826 = vector.extract_strided_slice %824 {offsets = [0, 128], sizes = [24, 128], strides = [1, 1]} : vector<24x384xf32> to vector<24x128xf32>
    %827 = vector.extract_strided_slice %824 {offsets = [0, 256], sizes = [24, 128], strides = [1, 1]} : vector<24x384xf32> to vector<24x128xf32>
    %828 = vector.extract_strided_slice %818 {offsets = [0, 384], sizes = [24, 128], strides = [1, 1]} : vector<24x512xf32> to vector<24x128xf32>
    %829 = math.tanh %828 : vector<24x128xf32>
    %830 = arith.mulf %826, %787 : vector<24x128xf32>
    %831 = arith.mulf %825, %829 : vector<24x128xf32>
    %832 = arith.addf %830, %831 : vector<24x128xf32>
    %833 = math.tanh %832 : vector<24x128xf32>
    %834 = arith.mulf %827, %833 : vector<24x128xf32>
    %835 = arith.truncf %834 : vector<24x128xf32> to vector<24x128xbf16>
    %c2_264 = arith.constant 2 : index
    %c0_265 = arith.constant 0 : index
    %c0_266 = arith.constant 0 : index
    %836 = vector.load %arg7[%c2_264, %c0_265, %c0_266] : memref<4x128x640xbf16, #tpu.memory_space<vmem>>, vector<1x128x640xbf16>
    %837 = vector.shape_cast %836 : vector<1x128x640xbf16> to vector<128x640xbf16>
    %cst_267 = arith.constant dense<0.000000e+00> : vector<24x640xf32>
    %838 = tpu.matmul %835, %837, %cst_267 {dimension_numbers = #tpu.dot_dimension_numbers<[1], [0], [0], [1], [0, 0, 1, 1], [], []>} : vector<24x128xbf16>, vector<128x640xbf16>, vector<24x640xf32> -> vector<24x640xf32>
    %839 = vector.extract_strided_slice %838 {offsets = [0, 512], sizes = [24, 128], strides = [1, 1]} : vector<24x640xf32> to vector<24x128xf32>
    %c2_268 = arith.constant 2 : index
    %c0_269 = arith.constant 0 : index
    %c0_270 = arith.constant 0 : index
    %840 = vector.load %arg3[%c2_268, %c0_269, %c0_270] : memref<4x1x128xf32, #tpu.memory_space<vmem>>, vector<1x1x128xf32>
    %841 = vector.shape_cast %840 : vector<1x1x128xf32> to vector<1x128xf32>
    %842 = vector.broadcast %841 : vector<1x128xf32> to vector<24x128xf32>
    %843 = arith.addf %839, %842 : vector<24x128xf32>
    %cst_271 = arith.constant dense<0xFF800000> : vector<24xf32>
    %844 = vector.multi_reduction <maximumf>, %843, %cst_271 [1] : vector<24x128xf32> to vector<24xf32>
    %845 = vector.shape_cast %844 : vector<24xf32> to vector<24x1xf32>
    %846 = vector.broadcast %845 : vector<24x1xf32> to vector<24x128xf32>
    %847 = arith.subf %843, %846 : vector<24x128xf32>
    %848 = math.exp %847 : vector<24x128xf32>
    %cst_272 = arith.constant dense<0.000000e+00> : vector<24xf32>
    %849 = vector.multi_reduction <add>, %848, %cst_272 [1] : vector<24x128xf32> to vector<24xf32>
    %850 = vector.shape_cast %849 : vector<24xf32> to vector<24x1xf32>
    %851 = tpu.reciprocal %850 {approx = true} : vector<24x1xf32> -> vector<24x1xf32>
    %852 = arith.mulf %850, %851 : vector<24x1xf32>
    %cst_273 = arith.constant 2.000000e+00 : f32
    %853 = vector.broadcast %cst_273 : f32 to vector<24x1xf32>
    %854 = arith.subf %853, %852 : vector<24x1xf32>
    %855 = arith.mulf %851, %854 : vector<24x1xf32>
    %856 = vector.broadcast %855 : vector<24x1xf32> to vector<24x128xf32>
    %857 = arith.mulf %848, %856 : vector<24x128xf32>
    %c18 = arith.constant 18 : index
    %c0_274 = arith.constant 0 : index
    %c0_275 = arith.constant 0 : index
    %858 = vector.load %arg5[%c18, %c0_274, %c0_275] : memref<20x24x128xf32, #tpu.memory_space<vmem>>, vector<1x24x128xf32>
    %859 = vector.shape_cast %858 : vector<1x24x128xf32> to vector<24x128xf32>
    %860 = vector.shape_cast %857 : vector<24x128xf32> to vector<1x24x128xf32>
    tpu.vector_store %arg5[%c18, %c0_274, %c0_275], %860 {strides = array<i32>} : memref<20x24x128xf32, #tpu.memory_space<vmem>>, vector<1x24x128xf32>,
    %c456 = arith.constant 456 : index
    %c0_276 = arith.constant 0 : index
    %861 = vector.load %arg6[%c456, %c0_276] : memref<480x512xf32, #tpu.memory_space<vmem>>, vector<24x512xf32>
    %862 = vector.extract_strided_slice %838 {offsets = [0, 0], sizes = [24, 512], strides = [1, 1]} : vector<24x640xf32> to vector<24x512xf32>
    %863 = arith.addf %861, %862 : vector<24x512xf32>
    %864 = vector.extract_strided_slice %863 {offsets = [0, 0], sizes = [24, 384], strides = [1, 1]} : vector<24x512xf32> to vector<24x384xf32>
    %865 = arith.negf %864 : vector<24x384xf32>
    %866 = math.exp %865 : vector<24x384xf32>
    %cst_277 = arith.constant 1.000000e+00 : f32
    %867 = vector.broadcast %cst_277 : f32 to vector<24x384xf32>
    %868 = arith.addf %867, %866 : vector<24x384xf32>
    %869 = arith.divf %867, %868 : vector<24x384xf32>
    %870 = vector.extract_strided_slice %869 {offsets = [0, 0], sizes = [24, 128], strides = [1, 1]} : vector<24x384xf32> to vector<24x128xf32>
    %871 = vector.extract_strided_slice %869 {offsets = [0, 128], sizes = [24, 128], strides = [1, 1]} : vector<24x384xf32> to vector<24x128xf32>
    %872 = vector.extract_strided_slice %869 {offsets = [0, 256], sizes = [24, 128], strides = [1, 1]} : vector<24x384xf32> to vector<24x128xf32>
    %873 = vector.extract_strided_slice %863 {offsets = [0, 384], sizes = [24, 128], strides = [1, 1]} : vector<24x512xf32> to vector<24x128xf32>
    %874 = math.tanh %873 : vector<24x128xf32>
    %875 = arith.mulf %871, %832 : vector<24x128xf32>
    %876 = arith.mulf %870, %874 : vector<24x128xf32>
    %877 = arith.addf %875, %876 : vector<24x128xf32>
    %878 = math.tanh %877 : vector<24x128xf32>
    %879 = arith.mulf %872, %878 : vector<24x128xf32>
    %880 = arith.truncf %879 : vector<24x128xf32> to vector<24x128xbf16>
    %c3_278 = arith.constant 3 : index
    %c0_279 = arith.constant 0 : index
    %c0_280 = arith.constant 0 : index
    %881 = vector.load %arg7[%c3_278, %c0_279, %c0_280] : memref<4x128x640xbf16, #tpu.memory_space<vmem>>, vector<1x128x640xbf16>
    %882 = vector.shape_cast %881 : vector<1x128x640xbf16> to vector<128x640xbf16>
    %cst_281 = arith.constant dense<0.000000e+00> : vector<24x640xf32>
    %883 = tpu.matmul %880, %882, %cst_281 {dimension_numbers = #tpu.dot_dimension_numbers<[1], [0], [0], [1], [0, 0, 1, 1], [], []>} : vector<24x128xbf16>, vector<128x640xbf16>, vector<24x640xf32> -> vector<24x640xf32>
    %884 = vector.extract_strided_slice %883 {offsets = [0, 512], sizes = [24, 128], strides = [1, 1]} : vector<24x640xf32> to vector<24x128xf32>
    %c3_282 = arith.constant 3 : index
    %c0_283 = arith.constant 0 : index
    %c0_284 = arith.constant 0 : index
    %885 = vector.load %arg3[%c3_282, %c0_283, %c0_284] : memref<4x1x128xf32, #tpu.memory_space<vmem>>, vector<1x1x128xf32>
    %886 = vector.shape_cast %885 : vector<1x1x128xf32> to vector<1x128xf32>
    %887 = vector.broadcast %886 : vector<1x128xf32> to vector<24x128xf32>
    %888 = arith.addf %884, %887 : vector<24x128xf32>
    %cst_285 = arith.constant dense<0xFF800000> : vector<24xf32>
    %889 = vector.multi_reduction <maximumf>, %888, %cst_285 [1] : vector<24x128xf32> to vector<24xf32>
    %890 = vector.shape_cast %889 : vector<24xf32> to vector<24x1xf32>
    %891 = vector.broadcast %890 : vector<24x1xf32> to vector<24x128xf32>
    %892 = arith.subf %888, %891 : vector<24x128xf32>
    %893 = math.exp %892 : vector<24x128xf32>
    %cst_286 = arith.constant dense<0.000000e+00> : vector<24xf32>
    %894 = vector.multi_reduction <add>, %893, %cst_286 [1] : vector<24x128xf32> to vector<24xf32>
    %895 = vector.shape_cast %894 : vector<24xf32> to vector<24x1xf32>
    %896 = tpu.reciprocal %895 {approx = true} : vector<24x1xf32> -> vector<24x1xf32>
    %897 = arith.mulf %895, %896 : vector<24x1xf32>
    %cst_287 = arith.constant 2.000000e+00 : f32
    %898 = vector.broadcast %cst_287 : f32 to vector<24x1xf32>
    %899 = arith.subf %898, %897 : vector<24x1xf32>
    %900 = arith.mulf %896, %899 : vector<24x1xf32>
    %901 = vector.broadcast %900 : vector<24x1xf32> to vector<24x128xf32>
    %902 = arith.mulf %893, %901 : vector<24x128xf32>
    %c19 = arith.constant 19 : index
    %c0_288 = arith.constant 0 : index
    %c0_289 = arith.constant 0 : index
    %903 = vector.load %arg5[%c19, %c0_288, %c0_289] : memref<20x24x128xf32, #tpu.memory_space<vmem>>, vector<1x24x128xf32>
    %904 = vector.shape_cast %903 : vector<1x24x128xf32> to vector<24x128xf32>
    %905 = vector.shape_cast %902 : vector<24x128xf32> to vector<1x24x128xf32>
    tpu.vector_store %arg5[%c19, %c0_288, %c0_289], %905 {strides = array<i32>} : memref<20x24x128xf32, #tpu.memory_space<vmem>>, vector<1x24x128xf32>,
    return
  }
}

</mosaic_0001>

<bundles_post_ra>
// kernel: tpu_custom_call.1
= control target key start
LH: loop header
LB: loop body
LE: loop exit
PB: predicated region body
PF: predicated region fallthrough
CT: control target
= control target key end

     0   :  { %10 = vsyncpa [#allocation6], 0  ;;  %s12334_s0 = inlined_call_operand.hbm [shape: bf16[480,128], index: 0, kind: input, shape index: {}]   ;;  %s12335_s1 = inlined_call_operand.hbm [shape: bf16[128,512], index: 1, kind: input, shape index: {}]   ;;  %s12336_s2 = inlined_call_operand.vmem [shape: f32[1,512], index: 2, kind: input, shape index: {}]   ;;  %s12337_s3 = inlined_call_operand.vmem [shape: f32[4,1,128], index: 3, kind: input, shape index: {}]   ;;  %s12338_s4 = inlined_call_operand.hbm [shape: bf16[4,128,640], index: 4, kind: input, shape index: {}]   ;;  %s12339_s5 = inlined_call_operand.hbm [shape: f32[20,24,128], index: 5, kind: output, shape index: {}]  }
   0x1   :  { %11 = vsyncpa [#allocation9], 0 }
   0x2   :  { %12 = vsyncpa [#allocation7], 0  ;;  %s10484_s18 = smov [#allocation5]   ;;  %s10410_s22 = scalar_lea.hbm %s12334_s0, 3840 }
   0x3   :  { %s18_s19 = sshll.u32 %s10484_s18, 4  ;;  %p10411_p0 = scmp.ne.s32.totalorder %s12334_s0, %s10410_s22  ;;  %s19_s19 = int_to_ptr.vmem [resolvable:$true] %s18_s19 }
   0x4   :  { %p10414_p1 = scmp.lt.u32.totalorder %s10410_s22, %s12334_s0 }
   0x6   :  { %p10416_p2 = pnand %p10414_p1, %p10411_p0 }
   0x8   :  { %10419 = shalt.err (!%p10416_p2)
}
   0x9   :  { %s10420_s27 = scalar_lea.vmem %s19_s19, 3840  ;;  %p10425_p4 = scmp.lt.s32.totalorder %s19_s19, %s19_s19 }
   0xa   :  { %p10421_p3 = scmp.ne.s32.totalorder %s19_s19, %s10420_s27  ;;  %p10426_p5 = scmp.lt.s32.totalorder %s10420_s27, %s10420_s27 }
   0xc   :  { %p10427_p6 = por %p10426_p5, %p10425_p4 }
   0xe   :  { %p10428_p7 = pnand %p10427_p6, %p10421_p3 }
  0x10   :  { %10431 = shalt.err (!%p10428_p7)
}
  0x11   :  { %s10485_s28 = smov 64   ;;  %s10486_s29 = smov 4  }
  0x12   :  { %24 = dma.hbm_to_vmem [thread:$0]  %s12334_s0, 3840, %s19_s19, [#allocation6], %s10485_s28, %s10485_s28, %s10486_s29  }
  0x13   :  { %s10487_s7 = smov [#allocation8]   ;;  %s10432_s11 = scalar_lea.hbm %s12335_s1, 4096 }
  0x14   :  { %s30_s8 = sshll.u32 %s10487_s7, 4  ;;  %p10433_p8 = scmp.ne.s32.totalorder %s12335_s1, %s10432_s11  ;;  %s31_s8 = int_to_ptr.vmem [resolvable:$true] %s30_s8 }
  0x15   :  { %p10436_p9 = scmp.lt.u32.totalorder %s10432_s11, %s12335_s1 }
  0x17   :  { %p10438_p10 = pnand %p10436_p9, %p10433_p8 }
  0x19   :  { %10441 = shalt.err (!%p10438_p10)
}
  0x1a   :  { %s10442_s16 = scalar_lea.vmem %s31_s8, 4096  ;;  %p10447_p12 = scmp.lt.s32.totalorder %s31_s8, %s31_s8 }
  0x1b   :  { %p10443_p11 = scmp.ne.s32.totalorder %s31_s8, %s10442_s16  ;;  %p10448_p13 = scmp.lt.s32.totalorder %s10442_s16, %s10442_s16 }
  0x1d   :  { %p10449_p0 = por %p10448_p13, %p10447_p12 }
  0x1f   :  { %p10450_p1 = pnand %p10449_p0, %p10443_p11 }
  0x21   :  { %10453 = shalt.err (!%p10450_p1)
}
  0x22   :  { %s10488_s0 = smov 256   ;;  %s10489_s17 = smov 16  }
  0x23   :  { %36 = dma.hbm_to_vmem [thread:$0]  %s12335_s1, 4096, %s31_s8, [#allocation9], %s10488_s0, %s10488_s0, %s10489_s17  }
  0x24   :  { %10476 = dma.done.wait [#allocation6], 3840  }
  0x25   :  { %10477 = vsyncadd [#allocation6], 4294963456 }
  0x26   :  { %10478 = dma.done.wait [#allocation9], 4096  }
  0x27   :  { %10479 = vsyncadd [#allocation9], 4294963200  ;;  %s52_s20 = sld [smem:[#allocation0]]   ;;  %s10490_s21 = smov 640   ;;  %v12340_v0 = vmov 0   ;;  %v177_v59 = vlaneseq }
  0x28   :  { %64 = sst [smem:[#allocation12]] %s10490_s21  ;;  %569 = vmatprep.mubr.bf16.mxu0 %v12340_v0  ;;  %902 = vmatprep.mubr.bf16.mxu1 %v12340_v0  ;;  %s10492_s22 = smov 5  }
  0x29   :  { %66 = sst [smem:[#allocation12 + $0x1]] %s10490_s21  ;;  %s10493_s23 = smov 128   ;;  %v178_v60 = vshrl.u32 %v177_v59, 7 }
  0x2a   :  { %68 = sst [smem:[#allocation12 + $0x2]] %s10492_s22  ;;  %s10494_s1 = smov 2  }
  0x2b   :  { %70 = sst [smem:[#allocation12 + $0x3]] %s10485_s28  ;;  %s10495_s24 = smov [#allocation3]   ;;  %v179_v62 = vsub.s32 0, %v178_v60  ;;  %v187_v63 = vsub.s32 2, %v178_v60 }
  0x2c   :  { %72 = sst [smem:[#allocation12 + $0x4]] %s10493_s23  ;;  %s60_s25 = sshll.u32 %s10495_s24, 4  ;;  %s61_s25 = int_to_ptr.vmem [resolvable:$true] %s60_s25 }
  0x2d   :  { %74 = sst [smem:[#allocation12 + $0x5]] %s10494_s1  ;;  %s8091_s26 = sshll.u32 %s52_s20, 26 }
  0x2e   :  { %s10496_s27 = smov 320   ;;  %s8092_s30 = sadd.s32 134217728, %s8091_s26 }
  0x2f   :  { %76 = sst [smem:[#allocation12 + $0x6]] %s10496_s27  ;;  %s10497_s6 = smov [#allocation4]  }
  0x30   :  { %78 = sst [smem:[#allocation12 + $0x7]] %s10485_s28  ;;  %s10498_s7 = smov [#allocation11]  }
  0x31   :  { %80 = sst [smem:[#allocation12 + $0x8]] %s10486_s29 }
  0x32   :  { %82 = dma.general %s12338_s4, 20480, %s61_s25, %s10497_s6, %s10498_s7, [#allocation12], %s8092_s30, 0  }
  0x33   :  { %v9132_v1 = vld [vmem:[#allocation8 + $0x4] ss:$16 sps:$4 sm:$0xff]   ;;  %v9134_v2 = vld [vmem:[#allocation8 + $0xc] ss:$16 sps:$4 sm:$0xff]   ;;  %v9136_v3 = vld [vmem:[#allocation8] ss:$16 sps:$4 sm:$0xff]  }
  0x34   :  { %537 = vmatprep.subr.bf16.mxu0 %v9132_v1  ;;  %v9137_v4 = vld [vmem:[#allocation8 + $0x8] ss:$16 sps:$4 sm:$0xff]   ;;  %870 = vmatprep.subr.bf16.mxu1 %v9134_v2  ;;  %v9138_v5 = vld [vmem:[#allocation8 + $0x24] ss:$16 sps:$4 sm:$0xff]   ;;  %v9140_v6 = vld [vmem:[#allocation8 + $0x2c] ss:$16 sps:$4 sm:$0xff]  }
  0x35   :  { %538 = vmatpush1.bf16.msra.mxu0 %v9136_v3  ;;  %871 = vmatpush1.bf16.msra.mxu1 %v9137_v4  ;;  %v9142_v7 = vld [vmem:[#allocation8 + $0x20] ss:$16 sps:$4 sm:$0xff]   ;;  %v9143_v8 = vld [vmem:[#allocation8 + $0x28] ss:$16 sps:$4 sm:$0xff]   ;;  %v9144_v9 = vld [vmem:[#allocation8 + $0x44] ss:$16 sps:$4 sm:$0xff]  }
  0x36   :  { %539 = vmatprep.subr.bf16.mxu0 %v9138_v5  ;;  %872 = vmatprep.subr.bf16.mxu1 %v9140_v6  ;;  %v9146_v10 = vld [vmem:[#allocation8 + $0x4c] ss:$16 sps:$4 sm:$0xff]   ;;  %v9148_v11 = vld [vmem:[#allocation8 + $0x40] ss:$16 sps:$4 sm:$0xff]   ;;  %v9149_v12 = vld [vmem:[#allocation8 + $0x48] ss:$16 sps:$4 sm:$0xff]  }
  0x37   :  { %v9150_v13 = vld [vmem:[#allocation8 + $0x64] ss:$16 sps:$4 sm:$0xff]   ;;  %v9152_v14 = vld [vmem:[#allocation8 + $0x6c] ss:$16 sps:$4 sm:$0xff]   ;;  %v9154_v15 = vld [vmem:[#allocation8 + $0x60] ss:$16 sps:$4 sm:$0xff]  }
  0x38   :  { %v9155_v16 = vld [vmem:[#allocation8 + $0x68] ss:$16 sps:$4 sm:$0xff]   ;;  %v9156_v17 = vld [vmem:[#allocation8 + $0x84] ss:$16 sps:$4 sm:$0xff]   ;;  %v9158_v18 = vld [vmem:[#allocation8 + $0x8c] ss:$16 sps:$4 sm:$0xff]  }
  0x39   :  { %540 = vmatpush1.bf16.msra.mxu0 %v9142_v7  ;;  %873 = vmatpush1.bf16.msra.mxu1 %v9143_v8  ;;  %v9160_v19 = vld [vmem:[#allocation8 + $0x80] ss:$16 sps:$4 sm:$0xff]   ;;  %v9161_v20 = vld [vmem:[#allocation8 + $0x88] ss:$16 sps:$4 sm:$0xff]   ;;  %v9162_v21 = vld [vmem:[#allocation8 + $0xa4] ss:$16 sps:$4 sm:$0xff]  }
  0x3a   :  { %541 = vmatprep.subr.bf16.mxu0 %v9144_v9  ;;  %874 = vmatprep.subr.bf16.mxu1 %v9146_v10  ;;  %v9164_v22 = vld [vmem:[#allocation8 + $0xac] ss:$16 sps:$4 sm:$0xff]   ;;  %v9166_v23 = vld [vmem:[#allocation8 + $0xa0] ss:$16 sps:$4 sm:$0xff]   ;;  %v9167_v24 = vld [vmem:[#allocation8 + $0xa8] ss:$16 sps:$4 sm:$0xff]  }
  0x3b   :  { %v9168_v25 = vld [vmem:[#allocation8 + $0xc4] ss:$16 sps:$4 sm:$0xff]   ;;  %v9170_v26 = vld [vmem:[#allocation8 + $0xcc] ss:$16 sps:$4 sm:$0xff]   ;;  %v9172_v27 = vld [vmem:[#allocation8 + $0xc0] ss:$16 sps:$4 sm:$0xff]  }
  0x3c   :  { %v9173_v28 = vld [vmem:[#allocation8 + $0xc8] ss:$16 sps:$4 sm:$0xff]   ;;  %v9174_v29 = vld [vmem:[#allocation8 + $0xe4] ss:$16 sps:$4 sm:$0xff]   ;;  %v9176_v30 = vld [vmem:[#allocation8 + $0xec] ss:$16 sps:$4 sm:$0xff]  }
  0x3d   :  { %542 = vmatpush1.bf16.msra.mxu0 %v9148_v11  ;;  %875 = vmatpush1.bf16.msra.mxu1 %v9149_v12  ;;  %v9178_v31 = vld [vmem:[#allocation8 + $0xe0] ss:$16 sps:$4 sm:$0xff]   ;;  %v9179_v32 = vld [vmem:[#allocation8 + $0xe8] ss:$16 sps:$4 sm:$0xff]   ;;  %v183_v2 = vsub.s32 1, %v178_v60  ;;  %v191_v3 = vsub.s32 3, %v178_v60 }
  0x3e   :  { %543 = vmatprep.subr.bf16.mxu0 %v9150_v13  ;;  %876 = vmatprep.subr.bf16.mxu1 %v9152_v14  ;;  %v9180_v33 = vld [vmem:[#allocation5] sm:$0xff]   ;;  %v9181_v34 = vld [vmem:[#allocation5 + $0x8] sm:$0xff]   ;;  %v9182_v35 = vld [vmem:[#allocation5 + $0x10] sm:$0xff]  }
  0x3f   :  { %v9183_v36 = vld [vmem:[#allocation5 + $0x18] sm:$0xff]   ;;  %v9184_v37 = vld [vmem:[#allocation5 + $0x20] sm:$0xff]   ;;  %v9185_v38 = vld [vmem:[#allocation5 + $0x28] sm:$0xff]  }
  0x40   :  { %v9186_v39 = vld [vmem:[#allocation5 + $0x30] sm:$0xff]   ;;  %v9187_v40 = vld [vmem:[#allocation5 + $0x38] sm:$0xff]   ;;  %v9188_v41 = vld [vmem:[#allocation5 + $0x40] sm:$0xff]  }
  0x41   :  { %544 = vmatpush1.bf16.msra.mxu0 %v9154_v15  ;;  %877 = vmatpush1.bf16.msra.mxu1 %v9155_v16  ;;  %v9189_v42 = vld [vmem:[#allocation5 + $0x48] sm:$0xff]   ;;  %v9190_v43 = vld [vmem:[#allocation5 + $0x50] sm:$0xff]   ;;  %v9191_v44 = vld [vmem:[#allocation5 + $0x58] sm:$0xff]  }
  0x42   :  { %545 = vmatprep.subr.bf16.mxu0 %v9156_v17  ;;  %878 = vmatprep.subr.bf16.mxu1 %v9158_v18  ;;  %v9192_v45 = vld [vmem:[#allocation5 + $0x60] sm:$0xff]   ;;  %v9193_v46 = vld [vmem:[#allocation5 + $0x68] sm:$0xff]   ;;  %v9194_v47 = vld [vmem:[#allocation5 + $0x70] sm:$0xff]  }
  0x43   :  { %v9195_v48 = vld [vmem:[#allocation5 + $0x78] sm:$0xff]   ;;  %v9196_v49 = vld [vmem:[#allocation5 + $0x80] sm:$0xff]   ;;  %v9197_v50 = vld [vmem:[#allocation5 + $0x88] sm:$0xff]  }
  0x44   :  { %v9198_v51 = vld [vmem:[#allocation5 + $0x90] sm:$0xff]   ;;  %v9199_v52 = vld [vmem:[#allocation5 + $0x98] sm:$0xff]   ;;  %v9200_v53 = vld [vmem:[#allocation5 + $0xa0] sm:$0xff]  }
  0x45   :  { %546 = vmatpush1.bf16.msra.mxu0 %v9160_v19  ;;  %879 = vmatpush1.bf16.msra.mxu1 %v9161_v20  ;;  %v9201_v54 = vld [vmem:[#allocation5 + $0xa8] sm:$0xff]   ;;  %v9202_v55 = vld [vmem:[#allocation5 + $0xb0] sm:$0xff]   ;;  %v9203_v56 = vld [vmem:[#allocation5 + $0xb8] sm:$0xff]  }
  0x46   :  { %547 = vmatprep.subr.bf16.mxu0 %v9162_v21  ;;  %880 = vmatprep.subr.bf16.mxu1 %v9164_v22  ;;  %v9204_v57 = vld [vmem:[#allocation5 + $0xc0] sm:$0xff]   ;;  %v9205_v58 = vld [vmem:[#allocation5 + $0xc8] sm:$0xff]   ;;  %v9206_v61 = vld [vmem:[#allocation5 + $0xd0] sm:$0xff]  }
  0x47   :  { %v175_v1 = vld [vmem:[%s12336_s2] sm:$0xf]  ;;  %v9207_v14 = vld [vmem:[#allocation5 + $0xd8] sm:$0xff]  }
  0x48   :  { %v10622_v4 = vrot.slane %v175_v1, %v179_v62  ;;  %v10624_v5 = vrot.slane %v175_v1, %v187_v63  ;;  %v10626_v6 = vrot.slane %v175_v1, %v183_v2  ;;  %v10628_v7 = vrot.slane %v175_v1, %v191_v3 }
  0x49   :  { %548 = vmatpush1.bf16.msra.mxu0 %v9166_v23  ;;  %881 = vmatpush1.bf16.msra.mxu1 %v9167_v24 }
  0x4a   :  { %549 = vmatprep.subr.bf16.mxu0 %v9168_v25  ;;  %882 = vmatprep.subr.bf16.mxu1 %v9170_v26 }
  0x4d   :  { %550 = vmatpush1.bf16.msra.mxu0 %v9172_v27  ;;  %883 = vmatpush1.bf16.msra.mxu1 %v9173_v28 }
  0x4e   :  { %551 = vmatprep.subr.bf16.mxu0 %v9174_v29  ;;  %884 = vmatprep.subr.bf16.mxu1 %v9176_v30 }
  0x51   :  { %552 = vmatpush1.bf16.msra.mxu0 %v9178_v31  ;;  %885 = vmatpush1.bf16.msra.mxu1 %v9179_v32  ;;  %v9208_v31 = vld [vmem:[#allocation5 + $0xe0] sm:$0xff]  }
  0x54   :  { %570 = vmatmul.mubr.bf16.vlgmr.msra.gmra.mrb[0].mxu0 %v9180_v33  ;;  %903 = vmatmul.mubr.bf16.vlgmr.msra.gmra.mrb[0].mxu1 %v9180_v33 }
  0x55   :  { %579 = vmatprep.mubr.bf16.mxu0 %v12340_v0  ;;  %912 = vmatprep.mubr.bf16.mxu1 %v12340_v0 }
  0x5c   :  { %580 = vmatmul.mubr.bf16.gmra.mrb[4].mxu0 %v9181_v34  ;;  %913 = vmatmul.mubr.bf16.gmra.mrb[4].mxu1 %v9181_v34 }
  0x5d   :  { %589 = vmatprep.mubr.bf16.mxu0 %v12340_v0  ;;  %922 = vmatprep.mubr.bf16.mxu1 %v12340_v0 }
  0x64   :  { %590 = vmatmul.mubr.bf16.gmra.mrb[8].mxu0 %v9182_v35  ;;  %923 = vmatmul.mubr.bf16.gmra.mrb[8].mxu1 %v9182_v35 }
  0x65   :  { %599 = vmatprep.mubr.bf16.mxu0 %v12340_v0  ;;  %932 = vmatprep.mubr.bf16.mxu1 %v12340_v0 }
  0x6c   :  { %600 = vmatmul.mubr.bf16.gmra.mrb[12].mxu0 %v9183_v36  ;;  %933 = vmatmul.mubr.bf16.gmra.mrb[12].mxu1 %v9183_v36 }
  0x6d   :  { %609 = vmatprep.mubr.bf16.mxu0 %v12340_v0  ;;  %942 = vmatprep.mubr.bf16.mxu1 %v12340_v0 }
  0x74   :  { %610 = vmatmul.mubr.bf16.gmra.mrb[16].mxu0 %v9184_v37  ;;  %943 = vmatmul.mubr.bf16.gmra.mrb[16].mxu1 %v9184_v37 }
  0x75   :  { %619 = vmatprep.mubr.bf16.mxu0 %v12340_v0  ;;  %952 = vmatprep.mubr.bf16.mxu1 %v12340_v0 }
  0x7c   :  { %620 = vmatmul.mubr.bf16.gmra.mrb[20].mxu0 %v9185_v38  ;;  %953 = vmatmul.mubr.bf16.gmra.mrb[20].mxu1 %v9185_v38 }
  0x7d   :  { %629 = vmatprep.mubr.bf16.mxu0 %v12340_v0  ;;  %962 = vmatprep.mubr.bf16.mxu1 %v12340_v0 }
  0x84   :  { %630 = vmatmul.mubr.bf16.gmra.mrb[24].mxu0 %v9186_v39  ;;  %963 = vmatmul.mubr.bf16.gmra.mrb[24].mxu1 %v9186_v39 }
  0x85   :  { %639 = vmatprep.mubr.bf16.mxu0 %v12340_v0  ;;  %972 = vmatprep.mubr.bf16.mxu1 %v12340_v0 }
  0x8c   :  { %640 = vmatmul.mubr.bf16.gmra.mrb[28].mxu0 %v9187_v40  ;;  %973 = vmatmul.mubr.bf16.gmra.mrb[28].mxu1 %v9187_v40 }
  0x8d   :  { %649 = vmatprep.mubr.bf16.mxu0 %v12340_v0  ;;  %982 = vmatprep.mubr.bf16.mxu1 %v12340_v0 }
  0x94   :  { %650 = vmatmul.mubr.bf16.gmra.mrb[32].mxu0 %v9188_v41  ;;  %983 = vmatmul.mubr.bf16.gmra.mrb[32].mxu1 %v9188_v41 }
  0x95   :  { %659 = vmatprep.mubr.bf16.mxu0 %v12340_v0  ;;  %992 = vmatprep.mubr.bf16.mxu1 %v12340_v0 }
  0x9c   :  { %660 = vmatmul.mubr.bf16.gmra.mrb[36].mxu0 %v9189_v42  ;;  %993 = vmatmul.mubr.bf16.gmra.mrb[36].mxu1 %v9189_v42 }
  0x9d   :  { %669 = vmatprep.mubr.bf16.mxu0 %v12340_v0  ;;  %1002 = vmatprep.mubr.bf16.mxu1 %v12340_v0 }
  0xa4   :  { %670 = vmatmul.mubr.bf16.gmra.mrb[40].mxu0 %v9190_v43  ;;  %1003 = vmatmul.mubr.bf16.gmra.mrb[40].mxu1 %v9190_v43 }
  0xa5   :  { %679 = vmatprep.mubr.bf16.mxu0 %v12340_v0  ;;  %1012 = vmatprep.mubr.bf16.mxu1 %v12340_v0 }
  0xac   :  { %680 = vmatmul.mubr.bf16.gmra.mrb[44].mxu0 %v9191_v44  ;;  %1013 = vmatmul.mubr.bf16.gmra.mrb[44].mxu1 %v9191_v44 }
  0xad   :  { %689 = vmatprep.mubr.bf16.mxu0 %v12340_v0  ;;  %1022 = vmatprep.mubr.bf16.mxu1 %v12340_v0 }
  0xb4   :  { %690 = vmatmul.mubr.bf16.gmra.mrb[48].mxu0 %v9192_v45  ;;  %1023 = vmatmul.mubr.bf16.gmra.mrb[48].mxu1 %v9192_v45 }
  0xb5   :  { %699 = vmatprep.mubr.bf16.mxu0 %v12340_v0  ;;  %1032 = vmatprep.mubr.bf16.mxu1 %v12340_v0 }
  0xbc   :  { %700 = vmatmul.mubr.bf16.gmra.mrb[52].mxu0 %v9193_v46  ;;  %1033 = vmatmul.mubr.bf16.gmra.mrb[52].mxu1 %v9193_v46 }
  0xbd   :  { %709 = vmatprep.mubr.bf16.mxu0 %v12340_v0  ;;  %1042 = vmatprep.mubr.bf16.mxu1 %v12340_v0 }
  0xc4   :  { %710 = vmatmul.mubr.bf16.gmra.mrb[56].mxu0 %v9194_v47  ;;  %1043 = vmatmul.mubr.bf16.gmra.mrb[56].mxu1 %v9194_v47 }
  0xc5   :  { %719 = vmatprep.mubr.bf16.mxu0 %v12340_v0  ;;  %1052 = vmatprep.mubr.bf16.mxu1 %v12340_v0 }
  0xcc   :  { %720 = vmatmul.mubr.bf16.gmra.mrb[60].mxu0 %v9195_v48  ;;  %1053 = vmatmul.mubr.bf16.gmra.mrb[60].mxu1 %v9195_v48  ;;  %v9209_v48 = vld [vmem:[#allocation5 + $0xe8] sm:$0xff]  }
  0xcd   :  { %729 = vmatprep.mubr.bf16.mxu0 %v12340_v0  ;;  %1062 = vmatprep.mubr.bf16.mxu1 %v12340_v0 }
  0xd4   :  { %730 = vmatmul.mubr.bf16.gmra.mrb[64].mxu0 %v9196_v49  ;;  %1063 = vmatmul.mubr.bf16.gmra.mrb[64].mxu1 %v9196_v49 }
  0xd5   :  { %739 = vmatprep.mubr.bf16.mxu0 %v12340_v0  ;;  %1072 = vmatprep.mubr.bf16.mxu1 %v12340_v0 }
  0xdc   :  { %740 = vmatmul.mubr.bf16.gmra.mrb[68].mxu0 %v9197_v50  ;;  %1073 = vmatmul.mubr.bf16.gmra.mrb[68].mxu1 %v9197_v50 }
  0xdd   :  { %749 = vmatprep.mubr.bf16.mxu0 %v12340_v0  ;;  %1082 = vmatprep.mubr.bf16.mxu1 %v12340_v0 }
  0xe4   :  { %750 = vmatmul.mubr.bf16.gmra.mrb[72].mxu0 %v9198_v51  ;;  %1083 = vmatmul.mubr.bf16.gmra.mrb[72].mxu1 %v9198_v51 }
  0xe5   :  { %759 = vmatprep.mubr.bf16.mxu0 %v12340_v0  ;;  %1092 = vmatprep.mubr.bf16.mxu1 %v12340_v0 }
  0xec   :  { %760 = vmatmul.mubr.bf16.gmra.mrb[76].mxu0 %v9199_v52  ;;  %1093 = vmatmul.mubr.bf16.gmra.mrb[76].mxu1 %v9199_v52 }
  0xed   :  { %769 = vmatprep.mubr.bf16.mxu0 %v12340_v0  ;;  %1102 = vmatprep.mubr.bf16.mxu1 %v12340_v0 }
  0xf4   :  { %770 = vmatmul.mubr.bf16.gmra.mrb[80].mxu0 %v9200_v53  ;;  %1103 = vmatmul.mubr.bf16.gmra.mrb[80].mxu1 %v9200_v53 }
  0xf5   :  { %779 = vmatprep.mubr.bf16.mxu0 %v12340_v0  ;;  %1112 = vmatprep.mubr.bf16.mxu1 %v12340_v0 }
  0xfc   :  { %780 = vmatmul.mubr.bf16.gmra.mrb[84].mxu0 %v9201_v54  ;;  %1113 = vmatmul.mubr.bf16.gmra.mrb[84].mxu1 %v9201_v54 }
  0xfd   :  { %789 = vmatprep.mubr.bf16.mxu0 %v12340_v0  ;;  %1122 = vmatprep.mubr.bf16.mxu1 %v12340_v0 }
 0x104   :  { %790 = vmatmul.mubr.bf16.gmra.mrb[88].mxu0 %v9202_v55  ;;  %1123 = vmatmul.mubr.bf16.gmra.mrb[88].mxu1 %v9202_v55 }
 0x105   :  { %799 = vmatprep.mubr.bf16.mxu0 %v12340_v0  ;;  %1132 = vmatprep.mubr.bf16.mxu1 %v12340_v0 }
 0x10c   :  { %800 = vmatmul.mubr.bf16.gmra.mrb[92].mxu0 %v9203_v56  ;;  %1133 = vmatmul.mubr.bf16.gmra.mrb[92].mxu1 %v9203_v56 }
 0x10d   :  { %809 = vmatprep.mubr.bf16.mxu0 %v12340_v0  ;;  %1142 = vmatprep.mubr.bf16.mxu1 %v12340_v0 }
 0x114   :  { %810 = vmatmul.mubr.bf16.gmra.mrb[96].mxu0 %v9204_v57  ;;  %1143 = vmatmul.mubr.bf16.gmra.mrb[96].mxu1 %v9204_v57 }
 0x115   :  { %819 = vmatprep.mubr.bf16.mxu0 %v12340_v0  ;;  %1152 = vmatprep.mubr.bf16.mxu1 %v12340_v0 }
 0x11c   :  { %820 = vmatmul.mubr.bf16.gmra.mrb[100].mxu0 %v9205_v58  ;;  %1153 = vmatmul.mubr.bf16.gmra.mrb[100].mxu1 %v9205_v58 }
 0x11d   :  { %829 = vmatprep.mubr.bf16.mxu0 %v12340_v0  ;;  %1162 = vmatprep.mubr.bf16.mxu1 %v12340_v0 }
 0x124   :  { %830 = vmatmul.mubr.bf16.gmra.mrb[104].mxu0 %v9206_v61  ;;  %1163 = vmatmul.mubr.bf16.gmra.mrb[104].mxu1 %v9206_v61 }
 0x125   :  { %839 = vmatprep.mubr.bf16.mxu0 %v12340_v0  ;;  %1172 = vmatprep.mubr.bf16.mxu1 %v12340_v0 }
 0x127   :  { %v571_v8 = vpop.f32.mrb[0].mxu0  ;;  %v904_v9 = vpop.f32.mrb[0].mxu1 }
 0x128   :  { %v10633_v10 = vadd.f32 %v571_v8, %v10622_v4  ;;  %v10636_v11 = vadd.f32 %v904_v9, %v10624_v5  ;;  %v573_v12 = vpop.f32.mrb[1].mxu0  ;;  %v906_v13 = vpop.f32.mrb[1].mxu1 }
 0x129   :  { %v10639_v15 = vadd.f32 %v573_v12, %v10626_v6  ;;  %v10642_v16 = vadd.f32 %v906_v13, %v10628_v7  ;;  %v575_v17 = vpop.f32.mrb[2].mxu0  ;;  %v908_v18 = vpop.f32.mrb[2].mxu1 }
 0x12a   :  { %v10645_v19 = vadd.f32 %v575_v17, %v10622_v4  ;;  %v10648_v20 = vadd.f32 %v908_v18, %v10624_v5  ;;  %v577_v21 = vpop.f32.mrb[3].mxu0  ;;  %v910_v22 = vpop.f32.mrb[3].mxu1 }
 0x12b   :  { %v10651_v23 = vadd.f32 %v577_v21, %v10626_v6  ;;  %v10654_v24 = vadd.f32 %v910_v22, %v10628_v7 }
 0x12c   :  { %840 = vmatmul.mubr.bf16.gmra.mrb[108].mxu0 %v9207_v14  ;;  %1173 = vmatmul.mubr.bf16.gmra.mrb[108].mxu1 %v9207_v14 }
 0x12d   :  { %849 = vmatprep.mubr.bf16.mxu0 %v12340_v0  ;;  %1182 = vmatprep.mubr.bf16.mxu1 %v12340_v0 }
 0x12f   :  { %v581_v25 = vpop.f32.mrb[4].mxu0  ;;  %v914_v26 = vpop.f32.mrb[4].mxu1 }
 0x130   :  { %v10659_v27 = vadd.f32 %v581_v25, %v10622_v4  ;;  %v10662_v28 = vadd.f32 %v914_v26, %v10624_v5  ;;  %v583_v29 = vpop.f32.mrb[5].mxu0  ;;  %v916_v30 = vpop.f32.mrb[5].mxu1 }
 0x131   :  { %v10665_v32 = vadd.f32 %v583_v29, %v10626_v6  ;;  %v10668_v33 = vadd.f32 %v916_v30, %v10628_v7  ;;  %v585_v34 = vpop.f32.mrb[6].mxu0  ;;  %v918_v35 = vpop.f32.mrb[6].mxu1 }
 0x132   :  { %v10671_v36 = vadd.f32 %v585_v34, %v10622_v4  ;;  %v10674_v37 = vadd.f32 %v918_v35, %v10624_v5  ;;  %v587_v38 = vpop.f32.mrb[7].mxu0  ;;  %v920_v39 = vpop.f32.mrb[7].mxu1 }
 0x133   :  { %v10677_v40 = vadd.f32 %v587_v38, %v10626_v6  ;;  %v10680_v41 = vadd.f32 %v920_v39, %v10628_v7 }
 0x134   :  { %850 = vmatmul.mubr.bf16.gmra.mrb[112].mxu0 %v9208_v31  ;;  %1183 = vmatmul.mubr.bf16.gmra.mrb[112].mxu1 %v9208_v31 }
 0x135   :  { %859 = vmatprep.mubr.bf16.mxu0 %v12340_v0  ;;  %1192 = vmatprep.mubr.bf16.mxu1 %v12340_v0 }
 0x137   :  { %v591_v42 = vpop.f32.mrb[8].mxu0  ;;  %v924_v43 = vpop.f32.mrb[8].mxu1 }
 0x138   :  { %v10685_v44 = vadd.f32 %v591_v42, %v10622_v4  ;;  %v10688_v45 = vadd.f32 %v924_v43, %v10624_v5  ;;  %v593_v46 = vpop.f32.mrb[9].mxu0  ;;  %v926_v47 = vpop.f32.mrb[9].mxu1 }
 0x139   :  { %v10691_v49 = vadd.f32 %v593_v46, %v10626_v6  ;;  %v10694_v50 = vadd.f32 %v926_v47, %v10628_v7  ;;  %v595_v51 = vpop.f32.mrb[10].mxu0  ;;  %v928_v52 = vpop.f32.mrb[10].mxu1 }
 0x13a   :  { %v10697_v53 = vadd.f32 %v595_v51, %v10622_v4  ;;  %v10700_v54 = vadd.f32 %v928_v52, %v10624_v5  ;;  %v597_v55 = vpop.f32.mrb[11].mxu0  ;;  %v930_v56 = vpop.f32.mrb[11].mxu1 }
 0x13b   :  { %v10703_v57 = vadd.f32 %v597_v55, %v10626_v6  ;;  %v10706_v58 = vadd.f32 %v930_v56, %v10628_v7 }
 0x13c   :  { %860 = vmatmul.mubr.bf16.gmra.mrb[116].mxu0 %v9209_v48  ;;  %1193 = vmatmul.mubr.bf16.gmra.mrb[116].mxu1 %v9209_v48 }
 0x147   :  { %v611_v59 = vpop.f32.mrb[16].mxu0  ;;  %v944_v60 = vpop.f32.mrb[16].mxu1 }
 0x148   :  { %v10709_v61 = vadd.f32 %v611_v59, %v10622_v4  ;;  %v10712_v62 = vadd.f32 %v944_v60, %v10624_v5  ;;  %v613_v63 = vpop.f32.mrb[17].mxu0  ;;  %v946_v1 = vpop.f32.mrb[17].mxu1 }
 0x149   :  { %v10715_v2 = vadd.f32 %v613_v63, %v10626_v6  ;;  %v10718_v3 = vadd.f32 %v946_v1, %v10628_v7  ;;  %v615_v8 = vpop.f32.mrb[18].mxu0  ;;  %v948_v9 = vpop.f32.mrb[18].mxu1 }
 0x14a   :  { %v10721_v12 = vadd.f32 %v615_v8, %v10622_v4  ;;  %v10724_v13 = vadd.f32 %v948_v9, %v10624_v5  ;;  %v617_v14 = vpop.f32.mrb[19].mxu0  ;;  %v950_v17 = vpop.f32.mrb[19].mxu1 }
 0x14b   :  { %v10727_v18 = vadd.f32 %v617_v14, %v10626_v6  ;;  %v10730_v21 = vadd.f32 %v950_v17, %v10628_v7 }
 0x14f   :  { %v621_v22 = vpop.f32.mrb[20].mxu0  ;;  %v954_v25 = vpop.f32.mrb[20].mxu1 }
 0x150   :  { %v10733_v26 = vadd.f32 %v621_v22, %v10622_v4  ;;  %v10736_v29 = vadd.f32 %v954_v25, %v10624_v5  ;;  %v623_v30 = vpop.f32.mrb[21].mxu0  ;;  %v956_v31 = vpop.f32.mrb[21].mxu1 }
 0x151   :  { %v10739_v34 = vadd.f32 %v623_v30, %v10626_v6  ;;  %v10742_v35 = vadd.f32 %v956_v31, %v10628_v7  ;;  %v625_v38 = vpop.f32.mrb[22].mxu0  ;;  %v958_v39 = vpop.f32.mrb[22].mxu1 }
 0x152   :  { %v10745_v42 = vadd.f32 %v625_v38, %v10622_v4  ;;  %v10748_v43 = vadd.f32 %v958_v39, %v10624_v5  ;;  %v627_v46 = vpop.f32.mrb[23].mxu0  ;;  %v960_v47 = vpop.f32.mrb[23].mxu1 }
 0x153   :  { %v10751_v48 = vadd.f32 %v627_v46, %v10626_v6  ;;  %v10754_v51 = vadd.f32 %v960_v47, %v10628_v7 }
 0x15f   :  { %v641_v52 = vpop.f32.mrb[28].mxu0  ;;  %v974_v55 = vpop.f32.mrb[28].mxu1 }
 0x160   :  { %v10757_v56 = vadd.f32 %v641_v52, %v10622_v4  ;;  %v10760_v59 = vadd.f32 %v974_v55, %v10624_v5  ;;  %v643_v60 = vpop.f32.mrb[29].mxu0  ;;  %v976_v63 = vpop.f32.mrb[29].mxu1 }
 0x161   :  { %v10763_v1 = vadd.f32 %v643_v60, %v10626_v6  ;;  %v10766_v8 = vadd.f32 %v976_v63, %v10628_v7  ;;  %v645_v9 = vpop.f32.mrb[30].mxu0  ;;  %v978_v14 = vpop.f32.mrb[30].mxu1 }
 0x162   :  { %v10769_v17 = vadd.f32 %v645_v9, %v10622_v4  ;;  %v10772_v22 = vadd.f32 %v978_v14, %v10624_v5  ;;  %v647_v25 = vpop.f32.mrb[31].mxu0  ;;  %v980_v30 = vpop.f32.mrb[31].mxu1 }
 0x163   :  { %v10775_v31 = vadd.f32 %v647_v25, %v10626_v6  ;;  %v10778_v38 = vadd.f32 %v980_v30, %v10628_v7 }
 0x164   :  { %12354 = vst [vmem:[#allocation17_spill] sm:$0xff] %v10772_v22 }
 0x165   :  { %12355 = vst [vmem:[#allocation18_spill] sm:$0xff] %v10778_v38 }
 0x167   :  { %v651_v39 = vpop.f32.mrb[32].mxu0  ;;  %v984_v46 = vpop.f32.mrb[32].mxu1 }
 0x168   :  { %v10781_v47 = vadd.f32 %v651_v39, %v10622_v4  ;;  %v10784_v52 = vadd.f32 %v984_v46, %v10624_v5  ;;  %v653_v55 = vpop.f32.mrb[33].mxu0  ;;  %v986_v60 = vpop.f32.mrb[33].mxu1 }
 0x169   :  { %v10787_v63 = vadd.f32 %v653_v55, %v10626_v6  ;;  %v10790_v9 = vadd.f32 %v986_v60, %v10628_v7  ;;  %v655_v14 = vpop.f32.mrb[34].mxu0  ;;  %v988_v25 = vpop.f32.mrb[34].mxu1 }
 0x16a   :  { %12356 = vst [vmem:[#allocation19_spill] sm:$0xff] %v10784_v52  ;;  %v10793_v30 = vadd.f32 %v655_v14, %v10622_v4  ;;  %v10796_v0 = vadd.f32 %v988_v25, %v10624_v5  ;;  %v657_v39 = vpop.f32.mrb[35].mxu0  ;;  %v990_v38 = vpop.f32.mrb[35].mxu1 }
 0x16b   :  { %12357 = vst [vmem:[#allocation20_spill] sm:$0xff] %v10787_v63  ;;  %12358 = vst [vmem:[#allocation21_spill] sm:$0xff] %v10790_v9  ;;  %v10799_v46 = vadd.f32 %v657_v39, %v10626_v6  ;;  %v10802_v52 = vadd.f32 %v990_v38, %v10628_v7 }
 0x16c   :  { %12359 = vst [vmem:[#allocation22_spill] sm:$0xff] %v10793_v30  ;;  %12360 = vst [vmem:[#allocation23_spill] sm:$0xff] %v10796_v0 }
 0x16d   :  { %12361 = vst [vmem:[#allocation24_spill] sm:$0xff] %v10799_v46  ;;  %12362 = vst [vmem:[#allocation25_spill] sm:$0xff] %v10802_v52 }
 0x177   :  { %v671_v55 = vpop.f32.mrb[40].mxu0  ;;  %v1004_v22 = vpop.f32.mrb[40].mxu1 }
 0x178   :  { %v10805_v60 = vadd.f32 %v671_v55, %v10622_v4  ;;  %v10808_v9 = vadd.f32 %v1004_v22, %v10624_v5  ;;  %v673_v14 = vpop.f32.mrb[41].mxu0  ;;  %v1006_v30 = vpop.f32.mrb[41].mxu1 }
 0x179   :  { %v10811_v25 = vadd.f32 %v673_v14, %v10626_v6  ;;  %v10814_v0 = vadd.f32 %v1006_v30, %v10628_v7  ;;  %v675_v39 = vpop.f32.mrb[42].mxu0  ;;  %v1008_v46 = vpop.f32.mrb[42].mxu1 }
 0x17a   :  { %12363 = vst [vmem:[#allocation26_spill] sm:$0xff] %v10805_v60  ;;  %12364 = vst [vmem:[#allocation27_spill] sm:$0xff] %v10808_v9  ;;  %v10817_v38 = vadd.f32 %v675_v39, %v10622_v4  ;;  %v10820_v52 = vadd.f32 %v1008_v46, %v10624_v5  ;;  %v677_v55 = vpop.f32.mrb[43].mxu0  ;;  %v1010_v60 = vpop.f32.mrb[43].mxu1 }
 0x17b   :  { %12365 = vst [vmem:[#allocation28_spill] sm:$0xff] %v10811_v25  ;;  %12366 = vst [vmem:[#allocation29_spill] sm:$0xff] %v10814_v0  ;;  %v10823_v22 = vadd.f32 %v677_v55, %v10626_v6  ;;  %v10826_v9 = vadd.f32 %v1010_v60, %v10628_v7 }
 0x17c   :  { %12367 = vst [vmem:[#allocation30_spill] sm:$0xff] %v10817_v38  ;;  %12368 = vst [vmem:[#allocation31_spill] sm:$0xff] %v10820_v52 }
 0x17d   :  { %12369 = vst [vmem:[#allocation32_spill] sm:$0xff] %v10823_v22  ;;  %12370 = vst [vmem:[#allocation33_spill] sm:$0xff] %v10826_v9 }
 0x17f   :  { %v681_v14 = vpop.f32.mrb[44].mxu0  ;;  %v1014_v25 = vpop.f32.mrb[44].mxu1 }
 0x180   :  { %v10829_v30 = vadd.f32 %v681_v14, %v10622_v4  ;;  %v10832_v0 = vadd.f32 %v1014_v25, %v10624_v5  ;;  %v683_v39 = vpop.f32.mrb[45].mxu0  ;;  %v1016_v38 = vpop.f32.mrb[45].mxu1 }
 0x181   :  { %v10835_v46 = vadd.f32 %v683_v39, %v10626_v6  ;;  %v10838_v52 = vadd.f32 %v1016_v38, %v10628_v7  ;;  %v685_v55 = vpop.f32.mrb[46].mxu0  ;;  %v1018_v22 = vpop.f32.mrb[46].mxu1 }
 0x182   :  { %12371 = vst [vmem:[#allocation34_spill] sm:$0xff] %v10829_v30  ;;  %12372 = vst [vmem:[#allocation35_spill] sm:$0xff] %v10832_v0  ;;  %v10841_v60 = vadd.f32 %v685_v55, %v10622_v4  ;;  %v10844_v9 = vadd.f32 %v1018_v22, %v10624_v5  ;;  %v687_v14 = vpop.f32.mrb[47].mxu0  ;;  %v1020_v30 = vpop.f32.mrb[47].mxu1 }
 0x183   :  { %12373 = vst [vmem:[#allocation36_spill] sm:$0xff] %v10835_v46  ;;  %12374 = vst [vmem:[#allocation37_spill] sm:$0xff] %v10838_v52  ;;  %v10847_v25 = vadd.f32 %v687_v14, %v10626_v6  ;;  %v10850_v0 = vadd.f32 %v1020_v30, %v10628_v7 }
 0x184   :  { %12375 = vst [vmem:[#allocation38_spill] sm:$0xff] %v10841_v60  ;;  %12376 = vst [vmem:[#allocation39_spill] sm:$0xff] %v10844_v9 }
 0x185   :  { %12377 = vst [vmem:[#allocation40_spill] sm:$0xff] %v10847_v25  ;;  %12378 = vst [vmem:[#allocation41_spill] sm:$0xff] %v10850_v0 }
 0x18f   :  { %v701_v39 = vpop.f32.mrb[52].mxu0  ;;  %v1034_v46 = vpop.f32.mrb[52].mxu1 }
 0x190   :  { %v10853_v38 = vadd.f32 %v701_v39, %v10622_v4  ;;  %v10856_v52 = vadd.f32 %v1034_v46, %v10624_v5  ;;  %v703_v55 = vpop.f32.mrb[53].mxu0  ;;  %v1036_v60 = vpop.f32.mrb[53].mxu1 }
 0x191   :  { %v10859_v22 = vadd.f32 %v703_v55, %v10626_v6  ;;  %v10862_v9 = vadd.f32 %v1036_v60, %v10628_v7  ;;  %v705_v14 = vpop.f32.mrb[54].mxu0  ;;  %v1038_v25 = vpop.f32.mrb[54].mxu1 }
 0x192   :  { %12379 = vst [vmem:[#allocation42_spill] sm:$0xff] %v10853_v38  ;;  %12380 = vst [vmem:[#allocation43_spill] sm:$0xff] %v10856_v52  ;;  %v10865_v30 = vadd.f32 %v705_v14, %v10622_v4  ;;  %v10868_v0 = vadd.f32 %v1038_v25, %v10624_v5  ;;  %v707_v39 = vpop.f32.mrb[55].mxu0  ;;  %v1040_v38 = vpop.f32.mrb[55].mxu1 }
 0x193   :  { %12381 = vst [vmem:[#allocation44_spill] sm:$0xff] %v10859_v22  ;;  %12382 = vst [vmem:[#allocation45_spill] sm:$0xff] %v10862_v9  ;;  %v10871_v46 = vadd.f32 %v707_v39, %v10626_v6  ;;  %v10874_v52 = vadd.f32 %v1040_v38, %v10628_v7 }
 0x194   :  { %12383 = vst [vmem:[#allocation46_spill] sm:$0xff] %v10865_v30  ;;  %12384 = vst [vmem:[#allocation47_spill] sm:$0xff] %v10868_v0 }
 0x195   :  { %12385 = vst [vmem:[#allocation48_spill] sm:$0xff] %v10871_v46  ;;  %12386 = vst [vmem:[#allocation49_spill] sm:$0xff] %v10874_v52 }
 0x197   :  { %v711_v55 = vpop.f32.mrb[56].mxu0  ;;  %v1044_v22 = vpop.f32.mrb[56].mxu1 }
 0x198   :  { %v10877_v60 = vadd.f32 %v711_v55, %v10622_v4  ;;  %v10880_v9 = vadd.f32 %v1044_v22, %v10624_v5  ;;  %v713_v14 = vpop.f32.mrb[57].mxu0  ;;  %v1046_v30 = vpop.f32.mrb[57].mxu1 }
 0x199   :  { %v10883_v25 = vadd.f32 %v713_v14, %v10626_v6  ;;  %v10886_v0 = vadd.f32 %v1046_v30, %v10628_v7  ;;  %v715_v39 = vpop.f32.mrb[58].mxu0  ;;  %v1048_v46 = vpop.f32.mrb[58].mxu1 }
 0x19a   :  { %12387 = vst [vmem:[#allocation50_spill] sm:$0xff] %v10877_v60  ;;  %12388 = vst [vmem:[#allocation51_spill] sm:$0xff] %v10880_v9  ;;  %v10889_v38 = vadd.f32 %v715_v39, %v10622_v4  ;;  %v10892_v52 = vadd.f32 %v1048_v46, %v10624_v5  ;;  %v717_v55 = vpop.f32.mrb[59].mxu0  ;;  %v1050_v60 = vpop.f32.mrb[59].mxu1 }
 0x19b   :  { %12389 = vst [vmem:[#allocation52_spill] sm:$0xff] %v10883_v25  ;;  %12390 = vst [vmem:[#allocation53_spill] sm:$0xff] %v10886_v0  ;;  %v10895_v22 = vadd.f32 %v717_v55, %v10626_v6  ;;  %v10898_v9 = vadd.f32 %v1050_v60, %v10628_v7 }
 0x19c   :  { %12391 = vst [vmem:[#allocation54_spill] sm:$0xff] %v10889_v38  ;;  %12392 = vst [vmem:[#allocation55_spill] sm:$0xff] %v10892_v52 }
 0x19d   :  { %12393 = vst [vmem:[#allocation56_spill] sm:$0xff] %v10895_v22  ;;  %12394 = vst [vmem:[#allocation57_spill] sm:$0xff] %v10898_v9 }
 0x1a7   :  { %v731_v14 = vpop.f32.mrb[64].mxu0  ;;  %v1064_v25 = vpop.f32.mrb[64].mxu1 }
 0x1a8   :  { %v10901_v30 = vadd.f32 %v731_v14, %v10622_v4  ;;  %v10904_v0 = vadd.f32 %v1064_v25, %v10624_v5  ;;  %v733_v39 = vpop.f32.mrb[65].mxu0  ;;  %v1066_v38 = vpop.f32.mrb[65].mxu1 }
 0x1a9   :  { %v10907_v46 = vadd.f32 %v733_v39, %v10626_v6  ;;  %v10910_v52 = vadd.f32 %v1066_v38, %v10628_v7  ;;  %v735_v55 = vpop.f32.mrb[66].mxu0  ;;  %v1068_v22 = vpop.f32.mrb[66].mxu1 }
 0x1aa   :  { %12395 = vst [vmem:[#allocation58_spill] sm:$0xff] %v10901_v30  ;;  %12396 = vst [vmem:[#allocation59_spill] sm:$0xff] %v10904_v0  ;;  %v10913_v60 = vadd.f32 %v735_v55, %v10622_v4  ;;  %v10916_v9 = vadd.f32 %v1068_v22, %v10624_v5  ;;  %v737_v14 = vpop.f32.mrb[67].mxu0  ;;  %v1070_v30 = vpop.f32.mrb[67].mxu1 }
 0x1ab   :  { %12397 = vst [vmem:[#allocation60_spill] sm:$0xff] %v10907_v46  ;;  %12398 = vst [vmem:[#allocation61_spill] sm:$0xff] %v10910_v52  ;;  %v10919_v25 = vadd.f32 %v737_v14, %v10626_v6  ;;  %v10922_v0 = vadd.f32 %v1070_v30, %v10628_v7 }
 0x1ac   :  { %12399 = vst [vmem:[#allocation62_spill] sm:$0xff] %v10913_v60  ;;  %12400 = vst [vmem:[#allocation63_spill] sm:$0xff] %v10916_v9 }
 0x1ad   :  { %12401 = vst [vmem:[#allocation64_spill] sm:$0xff] %v10919_v25  ;;  %12402 = vst [vmem:[#allocation65_spill] sm:$0xff] %v10922_v0 }
 0x1af   :  { %v741_v39 = vpop.f32.mrb[68].mxu0  ;;  %v1074_v46 = vpop.f32.mrb[68].mxu1 }
 0x1b0   :  { %v10925_v38 = vadd.f32 %v741_v39, %v10622_v4  ;;  %v10928_v52 = vadd.f32 %v1074_v46, %v10624_v5  ;;  %v743_v55 = vpop.f32.mrb[69].mxu0  ;;  %v1076_v60 = vpop.f32.mrb[69].mxu1 }
 0x1b1   :  { %v10931_v22 = vadd.f32 %v743_v55, %v10626_v6  ;;  %v10934_v9 = vadd.f32 %v1076_v60, %v10628_v7  ;;  %v745_v14 = vpop.f32.mrb[70].mxu0  ;;  %v1078_v25 = vpop.f32.mrb[70].mxu1 }
 0x1b2   :  { %12403 = vst [vmem:[#allocation66_spill] sm:$0xff] %v10925_v38  ;;  %12404 = vst [vmem:[#allocation67_spill] sm:$0xff] %v10928_v52  ;;  %v10937_v30 = vadd.f32 %v745_v14, %v10622_v4  ;;  %v10940_v0 = vadd.f32 %v1078_v25, %v10624_v5  ;;  %v747_v39 = vpop.f32.mrb[71].mxu0  ;;  %v1080_v38 = vpop.f32.mrb[71].mxu1 }
 0x1b3   :  { %12405 = vst [vmem:[#allocation68_spill] sm:$0xff] %v10931_v22  ;;  %12406 = vst [vmem:[#allocation69_spill] sm:$0xff] %v10934_v9  ;;  %v10943_v46 = vadd.f32 %v747_v39, %v10626_v6  ;;  %v10946_v52 = vadd.f32 %v1080_v38, %v10628_v7 }
 0x1b4   :  { %12407 = vst [vmem:[#allocation70_spill] sm:$0xff] %v10937_v30  ;;  %12408 = vst [vmem:[#allocation71_spill] sm:$0xff] %v10940_v0 }
 0x1b5   :  { %12409 = vst [vmem:[#allocation72_spill] sm:$0xff] %v10943_v46  ;;  %12410 = vst [vmem:[#allocation73_spill] sm:$0xff] %v10946_v52 }
 0x1bf   :  { %v761_v55 = vpop.f32.mrb[76].mxu0  ;;  %v1094_v22 = vpop.f32.mrb[76].mxu1 }
 0x1c0   :  { %v10949_v60 = vadd.f32 %v761_v55, %v10622_v4  ;;  %v10952_v9 = vadd.f32 %v1094_v22, %v10624_v5  ;;  %v763_v14 = vpop.f32.mrb[77].mxu0  ;;  %v1096_v30 = vpop.f32.mrb[77].mxu1 }
 0x1c1   :  { %v10955_v25 = vadd.f32 %v763_v14, %v10626_v6  ;;  %v10958_v0 = vadd.f32 %v1096_v30, %v10628_v7  ;;  %v765_v39 = vpop.f32.mrb[78].mxu0  ;;  %v1098_v46 = vpop.f32.mrb[78].mxu1 }
 0x1c2   :  { %12411 = vst [vmem:[#allocation74_spill] sm:$0xff] %v10949_v60  ;;  %12412 = vst [vmem:[#allocation75_spill] sm:$0xff] %v10952_v9  ;;  %v10961_v38 = vadd.f32 %v765_v39, %v10622_v4  ;;  %v10964_v52 = vadd.f32 %v1098_v46, %v10624_v5  ;;  %v767_v55 = vpop.f32.mrb[79].mxu0  ;;  %v1100_v60 = vpop.f32.mrb[79].mxu1 }
 0x1c3   :  { %12413 = vst [vmem:[#allocation76_spill] sm:$0xff] %v10955_v25  ;;  %12414 = vst [vmem:[#allocation77_spill] sm:$0xff] %v10958_v0  ;;  %v10967_v22 = vadd.f32 %v767_v55, %v10626_v6  ;;  %v10970_v9 = vadd.f32 %v1100_v60, %v10628_v7 }
 0x1c4   :  { %12415 = vst [vmem:[#allocation78_spill] sm:$0xff] %v10961_v38  ;;  %12416 = vst [vmem:[#allocation79_spill] sm:$0xff] %v10964_v52 }
 0x1c5   :  { %12417 = vst [vmem:[#allocation80_spill] sm:$0xff] %v10967_v22  ;;  %12418 = vst [vmem:[#allocation81_spill] sm:$0xff] %v10970_v9 }
 0x1c7   :  { %v771_v14 = vpop.f32.mrb[80].mxu0  ;;  %v1104_v25 = vpop.f32.mrb[80].mxu1 }
 0x1c8   :  { %v10973_v30 = vadd.f32 %v771_v14, %v10622_v4  ;;  %v10976_v0 = vadd.f32 %v1104_v25, %v10624_v5  ;;  %v773_v39 = vpop.f32.mrb[81].mxu0  ;;  %v1106_v38 = vpop.f32.mrb[81].mxu1 }
 0x1c9   :  { %v10979_v46 = vadd.f32 %v773_v39, %v10626_v6  ;;  %v10982_v52 = vadd.f32 %v1106_v38, %v10628_v7  ;;  %v775_v55 = vpop.f32.mrb[82].mxu0  ;;  %v1108_v22 = vpop.f32.mrb[82].mxu1 }
 0x1ca   :  { %12419 = vst [vmem:[#allocation82_spill] sm:$0xff] %v10973_v30  ;;  %12420 = vst [vmem:[#allocation83_spill] sm:$0xff] %v10976_v0  ;;  %v10985_v60 = vadd.f32 %v775_v55, %v10622_v4  ;;  %v10988_v9 = vadd.f32 %v1108_v22, %v10624_v5  ;;  %v777_v14 = vpop.f32.mrb[83].mxu0  ;;  %v1110_v30 = vpop.f32.mrb[83].mxu1 }
 0x1cb   :  { %12421 = vst [vmem:[#allocation84_spill] sm:$0xff] %v10979_v46  ;;  %12422 = vst [vmem:[#allocation85_spill] sm:$0xff] %v10982_v52  ;;  %v10991_v25 = vadd.f32 %v777_v14, %v10626_v6  ;;  %v10994_v0 = vadd.f32 %v1110_v30, %v10628_v7 }
 0x1cc   :  { %12423 = vst [vmem:[#allocation86_spill] sm:$0xff] %v10985_v60  ;;  %12424 = vst [vmem:[#allocation87_spill] sm:$0xff] %v10988_v9 }
 0x1cd   :  { %12425 = vst [vmem:[#allocation88_spill] sm:$0xff] %v10991_v25  ;;  %12426 = vst [vmem:[#allocation89_spill] sm:$0xff] %v10994_v0 }
 0x1d7   :  { %v791_v39 = vpop.f32.mrb[88].mxu0  ;;  %v1124_v46 = vpop.f32.mrb[88].mxu1 }
 0x1d8   :  { %v10997_v38 = vadd.f32 %v791_v39, %v10622_v4  ;;  %v11000_v52 = vadd.f32 %v1124_v46, %v10624_v5  ;;  %v793_v55 = vpop.f32.mrb[89].mxu0  ;;  %v1126_v60 = vpop.f32.mrb[89].mxu1 }
 0x1d9   :  { %v11003_v22 = vadd.f32 %v793_v55, %v10626_v6  ;;  %v11006_v9 = vadd.f32 %v1126_v60, %v10628_v7  ;;  %v795_v14 = vpop.f32.mrb[90].mxu0  ;;  %v1128_v25 = vpop.f32.mrb[90].mxu1 }
 0x1da   :  { %12427 = vst [vmem:[#allocation90_spill] sm:$0xff] %v10997_v38  ;;  %12428 = vst [vmem:[#allocation91_spill] sm:$0xff] %v11000_v52  ;;  %v11009_v30 = vadd.f32 %v795_v14, %v10622_v4  ;;  %v11012_v0 = vadd.f32 %v1128_v25, %v10624_v5  ;;  %v797_v39 = vpop.f32.mrb[91].mxu0  ;;  %v1130_v38 = vpop.f32.mrb[91].mxu1 }
 0x1db   :  { %12429 = vst [vmem:[#allocation92_spill] sm:$0xff] %v11003_v22  ;;  %12430 = vst [vmem:[#allocation93_spill] sm:$0xff] %v11006_v9  ;;  %v11015_v46 = vadd.f32 %v797_v39, %v10626_v6  ;;  %v11018_v52 = vadd.f32 %v1130_v38, %v10628_v7 }
 0x1dc   :  { %12431 = vst [vmem:[#allocation94_spill] sm:$0xff] %v11009_v30  ;;  %12432 = vst [vmem:[#allocation95_spill] sm:$0xff] %v11012_v0 }
 0x1dd   :  { %12433 = vst [vmem:[#allocation96_spill] sm:$0xff] %v11015_v46  ;;  %12434 = vst [vmem:[#allocation97_spill] sm:$0xff] %v11018_v52 }
 0x1df   :  { %v801_v55 = vpop.f32.mrb[92].mxu0  ;;  %v1134_v22 = vpop.f32.mrb[92].mxu1 }
 0x1e0   :  { %v11021_v60 = vadd.f32 %v801_v55, %v10622_v4  ;;  %v11024_v9 = vadd.f32 %v1134_v22, %v10624_v5  ;;  %v803_v14 = vpop.f32.mrb[93].mxu0  ;;  %v1136_v30 = vpop.f32.mrb[93].mxu1 }
 0x1e1   :  { %v11027_v25 = vadd.f32 %v803_v14, %v10626_v6  ;;  %v11030_v0 = vadd.f32 %v1136_v30, %v10628_v7  ;;  %v805_v39 = vpop.f32.mrb[94].mxu0  ;;  %v1138_v46 = vpop.f32.mrb[94].mxu1 }
 0x1e2   :  { %12435 = vst [vmem:[#allocation98_spill] sm:$0xff] %v11021_v60  ;;  %12436 = vst [vmem:[#allocation99_spill] sm:$0xff] %v11024_v9  ;;  %v11033_v38 = vadd.f32 %v805_v39, %v10622_v4  ;;  %v11036_v52 = vadd.f32 %v1138_v46, %v10624_v5  ;;  %v807_v55 = vpop.f32.mrb[95].mxu0  ;;  %v1140_v60 = vpop.f32.mrb[95].mxu1 }
 0x1e3   :  { %12437 = vst [vmem:[#allocation100_spill] sm:$0xff] %v11027_v25  ;;  %12438 = vst [vmem:[#allocation101_spill] sm:$0xff] %v11030_v0  ;;  %v11039_v22 = vadd.f32 %v807_v55, %v10626_v6  ;;  %v11042_v9 = vadd.f32 %v1140_v60, %v10628_v7 }
 0x1e4   :  { %12439 = vst [vmem:[#allocation102_spill] sm:$0xff] %v11033_v38  ;;  %12440 = vst [vmem:[#allocation103_spill] sm:$0xff] %v11036_v52 }
 0x1e5   :  { %12441 = vst [vmem:[#allocation104_spill] sm:$0xff] %v11039_v22  ;;  %12442 = vst [vmem:[#allocation105_spill] sm:$0xff] %v11042_v9 }
 0x1ef   :  { %v821_v14 = vpop.f32.mrb[100].mxu0  ;;  %v1154_v25 = vpop.f32.mrb[100].mxu1 }
 0x1f0   :  { %v11045_v30 = vadd.f32 %v821_v14, %v10622_v4  ;;  %v11048_v0 = vadd.f32 %v1154_v25, %v10624_v5  ;;  %v823_v39 = vpop.f32.mrb[101].mxu0  ;;  %v1156_v38 = vpop.f32.mrb[101].mxu1 }
 0x1f1   :  { %v11051_v46 = vadd.f32 %v823_v39, %v10626_v6  ;;  %v11054_v52 = vadd.f32 %v1156_v38, %v10628_v7  ;;  %v825_v55 = vpop.f32.mrb[102].mxu0  ;;  %v1158_v22 = vpop.f32.mrb[102].mxu1 }
 0x1f2   :  { %12443 = vst [vmem:[#allocation106_spill] sm:$0xff] %v11045_v30  ;;  %12444 = vst [vmem:[#allocation107_spill] sm:$0xff] %v11048_v0  ;;  %v11057_v60 = vadd.f32 %v825_v55, %v10622_v4  ;;  %v11060_v9 = vadd.f32 %v1158_v22, %v10624_v5  ;;  %v827_v14 = vpop.f32.mrb[103].mxu0  ;;  %v1160_v30 = vpop.f32.mrb[103].mxu1 }
 0x1f3   :  { %12445 = vst [vmem:[#allocation108_spill] sm:$0xff] %v11051_v46  ;;  %12446 = vst [vmem:[#allocation109_spill] sm:$0xff] %v11054_v52  ;;  %v11063_v25 = vadd.f32 %v827_v14, %v10626_v6  ;;  %v11066_v0 = vadd.f32 %v1160_v30, %v10628_v7 }
 0x1f4   :  { %12447 = vst [vmem:[#allocation110_spill] sm:$0xff] %v11057_v60  ;;  %12448 = vst [vmem:[#allocation111_spill] sm:$0xff] %v11060_v9 }
 0x1f5   :  { %12449 = vst [vmem:[#allocation112_spill] sm:$0xff] %v11063_v25  ;;  %12450 = vst [vmem:[#allocation113_spill] sm:$0xff] %v11066_v0 }
 0x1f7   :  { %v831_v39 = vpop.f32.mrb[104].mxu0  ;;  %v1164_v46 = vpop.f32.mrb[104].mxu1 }
 0x1f8   :  { %v11069_v38 = vadd.f32 %v831_v39, %v10622_v4  ;;  %v11072_v52 = vadd.f32 %v1164_v46, %v10624_v5  ;;  %v833_v55 = vpop.f32.mrb[105].mxu0  ;;  %v1166_v60 = vpop.f32.mrb[105].mxu1 }
 0x1f9   :  { %v11075_v22 = vadd.f32 %v833_v55, %v10626_v6  ;;  %v11078_v9 = vadd.f32 %v1166_v60, %v10628_v7  ;;  %v835_v14 = vpop.f32.mrb[106].mxu0  ;;  %v1168_v25 = vpop.f32.mrb[106].mxu1 }
 0x1fa   :  { %12451 = vst [vmem:[#allocation114_spill] sm:$0xff] %v11069_v38  ;;  %12452 = vst [vmem:[#allocation115_spill] sm:$0xff] %v11072_v52  ;;  %v11081_v30 = vadd.f32 %v835_v14, %v10622_v4  ;;  %v11084_v0 = vadd.f32 %v1168_v25, %v10624_v5  ;;  %v837_v39 = vpop.f32.mrb[107].mxu0  ;;  %v1170_v38 = vpop.f32.mrb[107].mxu1 }
 0x1fb   :  { %12453 = vst [vmem:[#allocation116_spill] sm:$0xff] %v11075_v22  ;;  %12454 = vst [vmem:[#allocation117_spill] sm:$0xff] %v11078_v9  ;;  %v11087_v46 = vadd.f32 %v837_v39, %v10626_v6  ;;  %v11090_v52 = vadd.f32 %v1170_v38, %v10628_v7 }
 0x1fc   :  { %12455 = vst [vmem:[#allocation118_spill] sm:$0xff] %v11081_v30  ;;  %12456 = vst [vmem:[#allocation119_spill] sm:$0xff] %v11084_v0 }
 0x1fd   :  { %12457 = vst [vmem:[#allocation120_spill] sm:$0xff] %v11087_v46  ;;  %12458 = vst [vmem:[#allocation121_spill] sm:$0xff] %v11090_v52 }
 0x207   :  { %v851_v55 = vpop.f32.mrb[112].mxu0  ;;  %v1184_v22 = vpop.f32.mrb[112].mxu1 }
 0x208   :  { %v11093_v60 = vadd.f32 %v851_v55, %v10622_v4  ;;  %v11096_v9 = vadd.f32 %v1184_v22, %v10624_v5  ;;  %v853_v14 = vpop.f32.mrb[113].mxu0  ;;  %v1186_v30 = vpop.f32.mrb[113].mxu1 }
 0x209   :  { %v11099_v25 = vadd.f32 %v853_v14, %v10626_v6  ;;  %v11102_v0 = vadd.f32 %v1186_v30, %v10628_v7  ;;  %v855_v39 = vpop.f32.mrb[114].mxu0  ;;  %v1188_v46 = vpop.f32.mrb[114].mxu1 }
 0x20a   :  { %12459 = vst [vmem:[#allocation122_spill] sm:$0xff] %v11093_v60  ;;  %12460 = vst [vmem:[#allocation123_spill] sm:$0xff] %v11096_v9  ;;  %v11105_v38 = vadd.f32 %v855_v39, %v10622_v4  ;;  %v11108_v52 = vadd.f32 %v1188_v46, %v10624_v5  ;;  %v857_v55 = vpop.f32.mrb[115].mxu0  ;;  %v1190_v60 = vpop.f32.mrb[115].mxu1 }
 0x20b   :  { %12461 = vst [vmem:[#allocation124_spill] sm:$0xff] %v11099_v25  ;;  %12462 = vst [vmem:[#allocation125_spill] sm:$0xff] %v11102_v0  ;;  %v11111_v22 = vadd.f32 %v857_v55, %v10626_v6  ;;  %v11114_v9 = vadd.f32 %v1190_v60, %v10628_v7 }
 0x20c   :  { %12463 = vst [vmem:[#allocation126_spill] sm:$0xff] %v11105_v38  ;;  %12464 = vst [vmem:[#allocation127_spill] sm:$0xff] %v11108_v52 }
 0x20d   :  { %12465 = vst [vmem:[#allocation128_spill] sm:$0xff] %v11111_v22  ;;  %12466 = vst [vmem:[#allocation129_spill] sm:$0xff] %v11114_v9 }
 0x20f   :  { %v861_v14 = vpop.f32.mrb[116].mxu0  ;;  %v1194_v25 = vpop.f32.mrb[116].mxu1 }
 0x210   :  { %v11117_v30 = vadd.f32 %v861_v14, %v10622_v4  ;;  %v11120_v0 = vadd.f32 %v1194_v25, %v10624_v5  ;;  %v863_v39 = vpop.f32.mrb[117].mxu0  ;;  %v1196_v38 = vpop.f32.mrb[117].mxu1 }
 0x211   :  { %v11123_v46 = vadd.f32 %v863_v39, %v10626_v6  ;;  %v11126_v52 = vadd.f32 %v1196_v38, %v10628_v7  ;;  %v865_v55 = vpop.f32.mrb[118].mxu0  ;;  %v1198_v22 = vpop.f32.mrb[118].mxu1 }
 0x212   :  { %12467 = vst [vmem:[#allocation130_spill] sm:$0xff] %v11117_v30  ;;  %12468 = vst [vmem:[#allocation131_spill] sm:$0xff] %v11120_v0  ;;  %v11129_v60 = vadd.f32 %v865_v55, %v10622_v4  ;;  %v11132_v9 = vadd.f32 %v1198_v22, %v10624_v5  ;;  %v867_v14 = vpop.f32.mrb[119].mxu0  ;;  %v1200_v30 = vpop.f32.mrb[119].mxu1 }
 0x213   :  { %12469 = vst [vmem:[#allocation132_spill] sm:$0xff] %v11123_v46  ;;  %12470 = vst [vmem:[#allocation133_spill] sm:$0xff] %v11126_v52  ;;  %v11135_v25 = vadd.f32 %v867_v14, %v10626_v6  ;;  %v11138_v0 = vadd.f32 %v1200_v30, %v10628_v7 }
 0x214   :  { %12471 = vst [vmem:[#allocation134_spill] sm:$0xff] %v11129_v60  ;;  %12472 = vst [vmem:[#allocation135_spill] sm:$0xff] %v11132_v9 }
 0x215   :  { %12473 = vst [vmem:[#allocation136_spill] sm:$0xff] %v11135_v25  ;;  %12474 = vst [vmem:[#allocation137_spill] sm:$0xff] %v11138_v0 }
 0x216   :  { %10480 = dma.done.wait [#allocation4], 20480 }
 0x217   :  { %10481 = vsyncadd [#allocation4], 4294946816  ;;  %v12475_v38 = vmov 0   ;;  %v8155_v39 = vmul.f32 -1.442695, %v10633_v10  ;;  %v1535_v0 = vld [vmem:[#allocation3 + $0x8] sm:$0xff] }
 0x218   :  { %1606 = vmatprep.mubr.bf16.mxu0 %v12475_v38  ;;  %v8156_v55 = vmul.f32 -1.442695, %v10639_v15  ;;  %1657 = vmatprep.mubr.bf16.mxu1 %v12475_v38  ;;  %v8158_v22 = vmul.f32 -1.442695, %v10645_v19  ;;  %v8159_v9 = vmul.f32 -1.442695, %v10651_v23 }
 0x219   :  { %9210 = vpow2.f32 %v8155_v39  ;;  %v8161_v14 = vmul.f32 -1.442695, %v10659_v27  ;;  %v8162_v30 = vmul.f32 -1.442695, %v10665_v32  ;;  %v1534_v52 = vld [vmem:[#allocation3] sm:$0xff]  ;;  %v1540_v25 = vld [vmem:[#allocation3 + $0x30] sm:$0xff]  ;;  %1574 = vmatprep.subr.bf16.mxu0 %v1535_v0 }
 0x21a   :  { %9212 = vpow2.f32 %v8156_v55  ;;  %v8157_v10 = vmul.f32 -1.442695, %v10636_v11  ;;  %1575 = vmatpush1.bf16.msra.mxu0 %v1534_v52  ;;  %v1537_v15 = vld [vmem:[#allocation3 + $0x18] sm:$0xff]  ;;  %v8160_v19 = vmul.f32 -1.442695, %v10648_v20  ;;  %v1539_v23 = vld [vmem:[#allocation3 + $0x28] sm:$0xff] }
 0x21b   :  { %9214 = vpow2.f32 %v8158_v22  ;;  %1576 = vmatprep.subr.bf16.mxu0 %v1540_v25  ;;  %1625 = vmatprep.subr.bf16.mxu1 %v1537_v15  ;;  %v1536_v27 = vld [vmem:[#allocation3 + $0x10] sm:$0xff]  ;;  %v8163_v32 = vmul.f32 -1.442695, %v10662_v28  ;;  %v1542_v39 = vld [vmem:[#allocation3 + $0x40] sm:$0xff]  ;;  %v1541_v11 = vld [vmem:[#allocation3 + $0x38] sm:$0xff] }
 0x21c   :  { %9216 = vpow2.f32 %v8159_v9  ;;  %v1545_v9 = vld [vmem:[#allocation3 + $0x58] sm:$0xff]  ;;  %1626 = vmatpush1.bf16.msra.mxu1 %v1536_v27  ;;  %v1547_v20 = vld [vmem:[#allocation3 + $0x68] sm:$0xff]  ;;  %v1544_v55 = vld [vmem:[#allocation3 + $0x50] sm:$0xff] }
 0x21d   :  { %9218 = vpow2.f32 %v8161_v14  ;;  %1627 = vmatprep.subr.bf16.mxu1 %v1542_v39  ;;  %v1550_v28 = vld [vmem:[#allocation3 + $0x80] sm:$0xff]  ;;  %v1561_v60 = vld [vmem:[#allocation3 + $0xd8] sm:$0xff]  ;;  %v1564_v63 = vld [vmem:[#allocation3 + $0xf0] sm:$0xff] }
 0x21e   :  { %9220 = vpow2.f32 %v8162_v30  ;;  %1577 = vmatpush1.bf16.msra.mxu0 %v1539_v23  ;;  %v1549_v23 = vld [vmem:[#allocation3 + $0x78] sm:$0xff] }
 0x21f   :  { %9222 = vtanh.f32 %v10642_v16  ;;  %1578 = vmatprep.subr.bf16.mxu0 %v1545_v9 }
 0x220   :  { %9224 = vtanh.f32 %v10654_v24  ;;  %1628 = vmatpush1.bf16.msra.mxu1 %v1541_v11  ;;  %v1546_v24 = vld [vmem:[#allocation3 + $0x60] sm:$0xff] }
 0x221   :  { %9226 = vpow2.f32 %v8157_v10  ;;  %1629 = vmatprep.subr.bf16.mxu1 %v1547_v20  ;;  %v1552_v10 = vld [vmem:[#allocation3 + $0x90] sm:$0xff]  ;;  %v1557_v20 = vld [vmem:[#allocation3 + $0xb8] sm:$0xff] }
 0x222   :  { %9228 = vpow2.f32 %v8160_v19  ;;  %1579 = vmatpush1.bf16.msra.mxu0 %v1544_v55 }
 0x223   :  { %v9211_v0 = vpop.eup %9210  ;;  %9230 = vpow2.f32 %v8163_v32  ;;  %1580 = vmatprep.subr.bf16.mxu0 %v1550_v28  ;;  %v1555_v32 = vld [vmem:[#allocation3 + $0xa8] sm:$0xff]  ;;  %v1556_v28 = vld [vmem:[#allocation3 + $0xb0] sm:$0xff] }
 0x224   :  { %v9213_v52 = vpop.eup %9212  ;;  %v1487_v25 = vadd.f32 1.0, %v9211_v0  ;;  %1630 = vmatpush1.bf16.msra.mxu1 %v1546_v24  ;;  %v1551_v0 = vld [vmem:[#allocation3 + $0x88] sm:$0xff]  ;;  %v1562_v24 = vld [vmem:[#allocation3 + $0xe0] sm:$0xff] }
 0x225   :  { %v1488_v22 = vadd.f32 1.0, %v9213_v52  ;;  %v9215_v16 = vpop.eup %9214  ;;  %1631 = vmatprep.subr.bf16.mxu1 %v1552_v10  ;;  %v1559_v10 = vld [vmem:[#allocation3 + $0xc8] sm:$0xff] }
 0x226   :  { %9232 = vrcp.f32 %v1487_v25  ;;  %v9217_v14 = vpop.eup %9216  ;;  %v1490_v30 = vadd.f32 1.0, %v9215_v16  ;;  %1581 = vmatpush1.bf16.msra.mxu0 %v1549_v23 }
 0x227   :  { %9234 = vrcp.f32 %v1488_v22  ;;  %v1491_v15 = vadd.f32 1.0, %v9217_v14  ;;  %v9219_v19 = vpop.eup %9218  ;;  %1582 = vmatprep.subr.bf16.mxu0 %v1555_v32  ;;  %v1560_v22 = vld [vmem:[#allocation3 + $0xd0] sm:$0xff] }
 0x228   :  { %9236 = vtanh.f32 %v10668_v33  ;;  %v9221_v27 = vpop.eup %9220  ;;  %v1493_v9 = vadd.f32 1.0, %v9219_v19  ;;  %v1554_v33 = vld [vmem:[#allocation3 + $0xa0] sm:$0xff]  ;;  %1632 = vmatpush1.bf16.msra.mxu1 %v1551_v0 }
 0x229   :  { %9238 = vrcp.f32 %v1490_v30  ;;  %v9223_v39 = vpop.eup %9222  ;;  %v1494_v11 = vadd.f32 1.0, %v9221_v27  ;;  %1633 = vmatprep.subr.bf16.mxu1 %v1557_v20  ;;  %v1565_v27 = vld [vmem:[#allocation3 + $0xf8] sm:$0xff] }
 0x22a   :  { %9240 = vrcp.f32 %v1491_v15  ;;  %v9225_v52 = vpop.eup %9224  ;;  %1583 = vmatpush1.bf16.msra.mxu0 %v1554_v33  ;;  %v1567_v33 = vld [vmem:[#allocation3 + $0x108] sm:$0xff] }
 0x22b   :  { %9242 = vrcp.f32 %v1493_v9  ;;  %v9227_v25 = vpop.eup %9226  ;;  %1584 = vmatprep.subr.bf16.mxu0 %v1560_v22 }
 0x22c   :  { %9244 = vrcp.f32 %v1494_v11  ;;  %v9229_v55 = vpop.eup %9228  ;;  %v1489_v15 = vadd.f32 1.0, %v9227_v25  ;;  %1634 = vmatpush1.bf16.msra.mxu1 %v1556_v28 }
 0x22d   :  { %v9231_v16 = vpop.eup %9230  ;;  %v1492_v11 = vadd.f32 1.0, %v9229_v55  ;;  %1635 = vmatprep.subr.bf16.mxu1 %v1562_v24 }
 0x22e   :  { %1585 = vmatpush1.bf16.msra.mxu0 %v1559_v10  ;;  %9246 = vrcp.f32 %v1489_v15  ;;  %v1495_v24 = vadd.f32 1.0, %v9231_v16  ;;  %v1538_v15 = vld [vmem:[#allocation3 + $0x20] sm:$0xff] }
 0x22f   :  { %1586 = vmatprep.subr.bf16.mxu0 %v1565_v27 }
 0x230   :  { %v9233_v14 = vpop.eup %9232  ;;  %1636 = vmatpush1.bf16.msra.mxu1 %v1561_v60  ;;  %v1571_v60 = vld [vmem:[#allocation3 + $0x128] sm:$0xff] }
 0x231   :  { %v9235_v30 = vpop.eup %9234  ;;  %v1520_v19 = vmul.f32 %v9233_v14, %v9223_v39  ;;  %v1570_v39 = vld [vmem:[#allocation3 + $0x120] sm:$0xff]  ;;  %1637 = vmatprep.subr.bf16.mxu1 %v1567_v33 }
 0x232   :  { %v9237_v23 = vpop.eup %9236  ;;  %v1517_v32 = vmul.f32 0.0, %v9235_v30  ;;  %v1566_v14 = vld [vmem:[#allocation3 + $0x100] sm:$0xff]  ;;  %1587 = vmatpush1.bf16.msra.mxu0 %v1564_v63  ;;  %v1572_v30 = vld [vmem:[#allocation3 + $0x130] sm:$0xff] }
 0x233   :  { %v9239_v9 = vpop.eup %9238  ;;  %1588 = vmatprep.subr.bf16.mxu0 %v1570_v39  ;;  %v1548_v39 = vld [vmem:[#allocation3 + $0x70] sm:$0xff] }
 0x234   :  { %v9241_v0 = vpop.eup %9240  ;;  %v1521_v20 = vmul.f32 %v9239_v9, %v9225_v52  ;;  %v11154_v46 = vadd.f32 %v1520_v19, %v1517_v32  ;;  %v1569_v19 = vld [vmem:[#allocation3 + $0x118] sm:$0xff]  ;;  %1638 = vmatpush1.bf16.msra.mxu1 %v1566_v14 }
 0x235   :  { %v1518_v22 = vmul.f32 0.0, %v9241_v0  ;;  %v9243_v25 = vpop.eup %9242  ;;  %1639 = vmatprep.subr.bf16.mxu1 %v1572_v30  ;;  %v1553_v14 = vld [vmem:[#allocation3 + $0x98] sm:$0xff]  ;;  %v1568_v30 = vld [vmem:[#allocation3 + $0x110] sm:$0xff] }
 0x236   :  { %9248 = vtanh.f32 %v11154_v46  ;;  %v9245_v28 = vpop.eup %9244  ;;  %v1522_v52 = vmul.f32 %v9243_v25, %v9237_v23  ;;  %1589 = vmatpush1.bf16.msra.mxu0 %v1569_v19  ;;  %v1875_v19 = vld [vmem:[#allocation3 + $0x158] sm:$0xff] }
 0x237   :  { %9250 = vrcp.f32 %v1492_v11  ;;  %v11157_v55 = vadd.f32 %v1521_v20, %v1518_v22  ;;  %v1519_v10 = vmul.f32 0.0, %v9245_v28  ;;  %8571 = vmatprep.subr.bf16.mxu0 %v1538_v15  ;;  %v1543_v22 = vld [vmem:[#allocation3 + $0x48] sm:$0xff] }
 0x238   :  { %1640 = vmatpush1.bf16.msra.mxu1 %v1571_v60  ;;  %v9247_v16 = vpop.eup %9246  ;;  %v1874_v60 = vld [vmem:[#allocation3 + $0x150] sm:$0xff] }
 0x239   :  { %9252 = vtanh.f32 %v11157_v55  ;;  %v11160_v27 = vadd.f32 %v1522_v52, %v1519_v10  ;;  %v1563_v52 = vld [vmem:[#allocation3 + $0xe8] sm:$0xff]  ;;  %v1573_v10 = vld [vmem:[#allocation3 + $0x138] sm:$0xff]  ;;  %1963 = vmatprep.subr.bf16.mxu1 %v1875_v19  ;;  %v1898_v19 = vld [vmem:[#allocation3 + $0x210] sm:$0xff] }
 0x23a   :  { %9254 = vrcp.f32 %v1495_v24  ;;  %v1558_v24 = vld [vmem:[#allocation3 + $0xc0] sm:$0xff] }
 0x23b   :  { %9256 = vtanh.f32 %v11160_v27 }
 0x240   :  { %v9249_v63 = vpop.eup %9248 }
 0x241   :  { %v9251_v23 = vpop.eup %9250  ;;  %v1529_v32 = vmul.f32 %v9249_v63, %v9247_v16  ;;  %v1872_v16 = vld [vmem:[#allocation3 + $0x140] sm:$0xff] }
 0x242   :  { %v1880_v63 = vld [vmem:[#allocation3 + $0x180] sm:$0xff] }
 0x243   :  { %v9253_v9 = vpop.eup %9252 }
 0x244   :  { %v1530_v11 = vmul.f32 %v9253_v9, %v9251_v23  ;;  %v9255_v0 = vpop.eup %9254  ;;  %v1878_v23 = vld [vmem:[#allocation3 + $0x170] sm:$0xff]  ;;  %v1877_v9 = vld [vmem:[#allocation3 + $0x168] sm:$0xff] }
 0x245   :  { %v9257_v20 = vpop.eup %9256 }
 0x246   :  { %v1532_v33 = vpack.c.bf16 %v1530_v11, %v1529_v32  ;;  %v1531_v25 = vmul.f32 %v9257_v20, %v9255_v0  ;;  %v1879_v32 = vld [vmem:[#allocation3 + $0x178] sm:$0xff]  ;;  %v1885_v11 = vld [vmem:[#allocation3 + $0x1a8] sm:$0xff]  ;;  %v1884_v20 = vld [vmem:[#allocation3 + $0x1a0] sm:$0xff] }
 0x247   :  { %v1883_v0 = vld [vmem:[#allocation3 + $0x198] sm:$0xff] }
 0x248   :  { %1607 = vmatmul.mubr.bf16.vlgmr.msra.gmra.mrb[120].mxu0 %v1532_v33  ;;  %1658 = vmatmul.mubr.bf16.vlgmr.msra.gmra.mrb[120].mxu1 %v1532_v33  ;;  %v1533_v28 = vpack.c.bf16 %v1531_v25, %v1531_v25  ;;  %v1888_v25 = vld [vmem:[#allocation3 + $0x1c0] sm:$0xff] }
 0x249   :  { %8572 = vmatpush3.bf16.msra.mxu0 %v1538_v15  ;;  %1616 = vmatprep.mubr.bf16.mxu0 %v12475_v38  ;;  %v1873_v15 = vld [vmem:[#allocation3 + $0x148] sm:$0xff] }
 0x24a   :  { %8573 = vmatprep.subr.bf16.mxu0 %v1543_v22  ;;  %1667 = vmatprep.mubr.bf16.mxu1 %v12475_v38 }
 0x24b   :  { %1964 = vmatpush1.bf16.msra.mxu1 %v1874_v60  ;;  %v1897_v60 = vld [vmem:[#allocation3 + $0x208] sm:$0xff] }
 0x24c   :  { %1965 = vmatprep.subr.bf16.mxu1 %v1880_v63  ;;  %v1903_v63 = vld [vmem:[#allocation3 + $0x238] sm:$0xff] }
 0x24d   :  { %8574 = vmatpush3.bf16.msra.mxu0 %v1543_v22  ;;  %v1890_v22 = vld [vmem:[#allocation3 + $0x1d0] sm:$0xff] }
 0x24e   :  { %8575 = vmatprep.subr.bf16.mxu0 %v1548_v39 }
 0x24f   :  { %1966 = vmatpush1.bf16.msra.mxu1 %v1879_v32  ;;  %v1902_v32 = vld [vmem:[#allocation3 + $0x230] sm:$0xff] }
 0x250   :  { %1617 = vmatmul.mubr.bf16.gmra.mrb[124].mxu0 %v1533_v28  ;;  %1668 = vmatmul.mubr.bf16.gmra.mrb[124].mxu1 %v1533_v28 }
 0x251   :  { %8576 = vmatpush3.bf16.msra.mxu0 %v1548_v39  ;;  %8587 = vmatprep.mubr.bf16.mxu0 %v1532_v33  ;;  %v1882_v33 = vld [vmem:[#allocation3 + $0x190] sm:$0xff]  ;;  %v1889_v39 = vld [vmem:[#allocation3 + $0x1c8] sm:$0xff] }
 0x252   :  { %8577 = vmatprep.subr.bf16.mxu0 %v1553_v14  ;;  %1995 = vmatprep.mubr.bf16.mxu1 %v12475_v38 }
 0x253   :  { %1967 = vmatprep.subr.bf16.mxu1 %v1885_v11  ;;  %v1908_v11 = vld [vmem:[#allocation3 + $0x260] sm:$0xff] }
 0x254   :  { %1968 = vmatpush1.bf16.msra.mxu1 %v1884_v20  ;;  %v1907_v20 = vld [vmem:[#allocation3 + $0x258] sm:$0xff] }
 0x255   :  { %8578 = vmatpush3.bf16.msra.mxu0 %v1553_v14  ;;  %1969 = vmatprep.subr.bf16.mxu1 %v1890_v22  ;;  %v1895_v14 = vld [vmem:[#allocation3 + $0x1f8] sm:$0xff] }
 0x256   :  { %8579 = vmatprep.subr.bf16.mxu0 %v1558_v24 }
 0x258   :  { %1970 = vmatpush1.bf16.msra.mxu1 %v1889_v39 }
 0x259   :  { %8580 = vmatpush3.bf16.msra.mxu0 %v1558_v24  ;;  %1971 = vmatprep.subr.bf16.mxu1 %v1895_v14  ;;  %v1893_v24 = vld [vmem:[#allocation3 + $0x1e8] sm:$0xff] }
 0x25a   :  { %8581 = vmatprep.subr.bf16.mxu0 %v1563_v52 }
 0x25d   :  { %8582 = vmatpush3.bf16.msra.mxu0 %v1563_v52  ;;  %v1894_v52 = vld [vmem:[#allocation3 + $0x1f0] sm:$0xff] }
 0x25e   :  { %8583 = vmatprep.subr.bf16.mxu0 %v1568_v30  ;;  %1972 = vmatpush1.bf16.msra.mxu1 %v1894_v52 }
 0x261   :  { %8584 = vmatpush3.bf16.msra.mxu0 %v1568_v30  ;;  %v1892_v30 = vld [vmem:[#allocation3 + $0x1e0] sm:$0xff] }
 0x262   :  { %8585 = vmatprep.subr.bf16.mxu0 %v1573_v10 }
 0x265   :  { %8586 = vmatpush3.bf16.msra.mxu0 %v1573_v10  ;;  %v1900_v10 = vld [vmem:[#allocation3 + $0x220] sm:$0xff] }
 0x266   :  { %1912 = vmatprep.subr.bf16.mxu0 %v1873_v15  ;;  %1973 = vmatprep.subr.bf16.mxu1 %v1900_v10  ;;  %v1899_v15 = vld [vmem:[#allocation3 + $0x218] sm:$0xff] }
 0x267   :  { %1974 = vmatpush1.bf16.msra.mxu1 %v1899_v15 }
 0x268   :  { %8588 = vmatmul.mubr.bf16.vlgmr.msra.gmra.mrb[128].mxu0 %v1533_v28  ;;  %v1887_v28 = vld [vmem:[#allocation3 + $0x1b8] sm:$0xff] }
 0x269   :  { %1944 = vmatprep.mubr.bf16.mxu0 %v12475_v38  ;;  %1913 = vmatpush1.bf16.msra.mxu0 %v1872_v16  ;;  %v1905_v16 = vld [vmem:[#allocation3 + $0x248] sm:$0xff] }
 0x26a   :  { %1914 = vmatprep.subr.bf16.mxu0 %v1878_v23  ;;  %1975 = vmatprep.subr.bf16.mxu1 %v1905_v16  ;;  %v1904_v23 = vld [vmem:[#allocation3 + $0x240] sm:$0xff] }
 0x26b   :  { %1976 = vmatpush1.bf16.msra.mxu1 %v1904_v23 }
 0x26d   :  { %1915 = vmatpush1.bf16.msra.mxu0 %v1877_v9  ;;  %v1910_v9 = vld [vmem:[#allocation3 + $0x270] sm:$0xff] }
 0x26e   :  { %1916 = vmatprep.subr.bf16.mxu0 %v1883_v0  ;;  %1977 = vmatprep.subr.bf16.mxu1 %v1910_v9  ;;  %v1909_v0 = vld [vmem:[#allocation3 + $0x268] sm:$0xff] }
 0x26f   :  { %1978 = vmatpush1.bf16.msra.mxu1 %v1909_v0 }
 0x271   :  { %1917 = vmatpush1.bf16.msra.mxu0 %v1882_v33  ;;  %v11167_v33 = vld [vmem:[#allocation3 + $0x160] sm:$0xff] }
 0x272   :  { %1918 = vmatprep.subr.bf16.mxu0 %v1888_v25  ;;  %8591 = vmatprep.subr.bf16.mxu1 %v11167_v33 }
 0x275   :  { %1919 = vmatpush1.bf16.msra.mxu0 %v1887_v28 }
 0x276   :  { %1920 = vmatprep.subr.bf16.mxu0 %v1893_v24 }
 0x279   :  { %1921 = vmatpush1.bf16.msra.mxu0 %v1892_v30 }
 0x27a   :  { %1922 = vmatprep.subr.bf16.mxu0 %v1898_v19 }
 0x27d   :  { %1923 = vmatpush1.bf16.msra.mxu0 %v1897_v60 }
 0x27e   :  { %1924 = vmatprep.subr.bf16.mxu0 %v1903_v63 }
 0x281   :  { %1925 = vmatpush1.bf16.msra.mxu0 %v1902_v32 }
 0x282   :  { %1926 = vmatprep.subr.bf16.mxu0 %v1908_v11 }
 0x285   :  { %1927 = vmatpush1.bf16.msra.mxu0 %v1907_v20 }
 0x31b   :  { %v1608_v22 = vpop.f32.mrb[120].mxu0  ;;  %v1659_v25 = vpop.f32.mrb[120].mxu1 }
 0x31c   :  { %v1785_v39 = vadd.f32 %v1608_v22, %v10671_v36  ;;  %v1610_v28 = vpop.f32.mrb[121].mxu0  ;;  %v1661_v14 = vpop.f32.mrb[121].mxu1  ;;  %v1787_v36 = vadd.f32 %v1659_v25, %v10674_v37 }
 0x31d   :  { %v1786_v24 = vadd.f32 %v1610_v28, %v10677_v40  ;;  %v1612_v52 = vpop.f32.mrb[122].mxu0  ;;  %v1663_v30 = vpop.f32.mrb[122].mxu1  ;;  %v1788_v40 = vadd.f32 %v1661_v14, %v10680_v41 }
 0x31e   :  { %v8165_v10 = vmul.f32 -1.442695, %v1785_v39  ;;  %v1789_v19 = vadd.f32 %v1612_v52, %v10685_v44  ;;  %v1614_v15 = vpop.f32.mrb[123].mxu0  ;;  %v1665_v60 = vpop.f32.mrb[123].mxu1  ;;  %v1791_v11 = vadd.f32 %v1663_v30, %v10688_v45  ;;  %v8167_v52 = vmul.f32 -1.442695, %v1787_v36 }
 0x31f   :  { %v8166_v16 = vmul.f32 -1.442695, %v1786_v24  ;;  %v1790_v63 = vadd.f32 %v1614_v15, %v10691_v49  ;;  %v1792_v41 = vadd.f32 %v1665_v60, %v10694_v50 }
 0x320   :  { %9258 = vpow2.f32 %v8165_v10  ;;  %v8168_v23 = vmul.f32 -1.442695, %v1789_v19  ;;  %v8170_v25 = vmul.f32 -1.442695, %v1791_v11 }
 0x321   :  { %9260 = vpow2.f32 %v8166_v16  ;;  %v8169_v32 = vmul.f32 -1.442695, %v1790_v63 }
 0x322   :  { %9262 = vpow2.f32 %v8168_v23 }
 0x323   :  { %9264 = vpow2.f32 %v8169_v32  ;;  %v1618_v9 = vpop.f32.mrb[124].mxu0  ;;  %v1669_v0 = vpop.f32.mrb[124].mxu1 }
 0x324   :  { %v1793_v44 = vadd.f32 %v1618_v9, %v10697_v53  ;;  %v1620_v20 = vpop.f32.mrb[125].mxu0  ;;  %v1671_v22 = vpop.f32.mrb[125].mxu1  ;;  %9266 = vtanh.f32 %v1788_v40  ;;  %v1795_v53 = vadd.f32 %v1669_v0, %v10700_v54 }
 0x325   :  { %v1794_v49 = vadd.f32 %v1620_v20, %v10703_v57  ;;  %v1622_v39 = vpop.f32.mrb[126].mxu0  ;;  %v1673_v28 = vpop.f32.mrb[126].mxu1  ;;  %v1796_v50 = vadd.f32 %v1671_v22, %v10706_v58  ;;  %v8164_v22 = vld [vmem:[%s12337_s3] ss:$0 sm:$0xff] }
 0x326   :  { %v8171_v24 = vmul.f32 -1.442695, %v1793_v44  ;;  %v1623_v10 = vpop.f32.mrb[127].mxu0  ;;  %v1674_v19 = vpop.f32.mrb[127].mxu1  ;;  %v8173_v32 = vmul.f32 -1.442695, %v1795_v53 }
 0x327   :  { %v8172_v37 = vmul.f32 -1.442695, %v1794_v49 }
 0x328   :  { %9268 = vpow2.f32 %v8171_v24 }
 0x329   :  { %9270 = vpow2.f32 %v8172_v37 }
 0x32a   :  { %v9259_v45 = vpop.eup %9258  ;;  %9272 = vpow2.f32 %v8167_v52 }
 0x32b   :  { %v9261_v14 = vpop.eup %9260  ;;  %v1824_v30 = vadd.f32 1.0, %v9259_v45  ;;  %9274 = vpow2.f32 %v8170_v25 }
 0x32c   :  { %v9263_v57 = vpop.eup %9262  ;;  %v1825_v15 = vadd.f32 1.0, %v9261_v14  ;;  %9276 = vtanh.f32 %v1792_v41 }
 0x32d   :  { %v9265_v16 = vpop.eup %9264  ;;  %9278 = vrcp.f32 %v1824_v30  ;;  %v1827_v63 = vadd.f32 1.0, %v9263_v57 }
 0x32e   :  { %9280 = vrcp.f32 %v1825_v15  ;;  %v1828_v23 = vadd.f32 1.0, %v9265_v16  ;;  %v9267_v60 = vpop.eup %9266 }
 0x32f   :  { %9282 = vrcp.f32 %v1827_v63 }
 0x330   :  { %9284 = vrcp.f32 %v1828_v23 }
 0x331   :  { %9286 = vpow2.f32 %v8173_v32 }
 0x332   :  { %v9269_v36 = vpop.eup %9268  ;;  %9288 = vtanh.f32 %v1796_v50 }
 0x333   :  { %v9271_v54 = vpop.eup %9270  ;;  %v1830_v9 = vadd.f32 1.0, %v9269_v36 }
 0x334   :  { %v9273_v40 = vpop.eup %9272  ;;  %v1831_v11 = vadd.f32 1.0, %v9271_v54 }
 0x335   :  { %v9275_v0 = vpop.eup %9274  ;;  %9290 = vrcp.f32 %v1830_v9  ;;  %v1826_v39 = vadd.f32 1.0, %v9273_v40 }
 0x336   :  { %v9277_v44 = vpop.eup %9276  ;;  %9292 = vrcp.f32 %v1831_v11  ;;  %v1829_v10 = vadd.f32 1.0, %v9275_v0 }
 0x337   :  { %v9279_v20 = vpop.eup %9278  ;;  %9294 = vrcp.f32 %v1826_v39  ;;  %v1881_v39 = vld [vmem:[#allocation3 + $0x188] sm:$0xff] }
 0x338   :  { %v9281_v49 = vpop.eup %9280  ;;  %v1857_v28 = vmul.f32 %v9279_v20, %v9267_v60 }
 0x339   :  { %v9283_v24 = vpop.eup %9282  ;;  %v1854_v58 = vmul.f32 %v9281_v49, %v11154_v46 }
 0x33a   :  { %v9285_v52 = vpop.eup %9284  ;;  %v1858_v19 = vmul.f32 %v9283_v24, %v9277_v44  ;;  %v1886_v24 = vld [vmem:[#allocation3 + $0x1b0] sm:$0xff] }
 0x33b   :  { %v1855_v37 = vmul.f32 %v9285_v52, %v11157_v55  ;;  %v11187_v25 = vadd.f32 %v1857_v28, %v1854_v58  ;;  %v8589_v41 = vpop.f32.mrb[128].mxu0  ;;  %v9287_v45 = vpop.eup %9286  ;;  %v1896_v52 = vld [vmem:[#allocation3 + $0x200] sm:$0xff] }
 0x33c   :  { %v11189_v53 = vadd.f32 %v8589_v41, %v8164_v22  ;;  %v1710_v14 = vpop.f32.mrb[129].mxu0  ;;  %v9289_v30 = vpop.eup %9288  ;;  %v1832_v63 = vadd.f32 1.0, %v9287_v45  ;;  %v2212_v41 = vld [vmem:[#allocation3 + $0x280] sm:$0xff]  ;;  %v2215_v45 = vld [vmem:[#allocation3 + $0x298] sm:$0xff] }
 0x33d   :  { %9296 = vtanh.f32 %v11187_v25  ;;  %v11192_v46 = vadd.f32 %v1858_v19, %v1855_v37  ;;  %v11194_v57 = vadd.f32 %v8164_v22, %v1710_v14  ;;  %v8590_v15 = vpop.f32.mrb[130].mxu0  ;;  %v1911_v19 = vld [vmem:[#allocation3 + $0x278] sm:$0xff]  ;;  %v2213_v37 = vld [vmem:[#allocation3 + $0x288] sm:$0xff]  ;;  %v2214_v14 = vld [vmem:[#allocation3 + $0x290] sm:$0xff] }
 0x33e   :  { %9298 = vrcp.f32 %v1829_v10  ;;  %1738 = vmax.xlane.f32.xlu1 %v11189_v53  ;;  %v1713_v55 = vpop.f32.mrb[131].mxu0  ;;  %v1906_v10 = vld [vmem:[#allocation3 + $0x250] sm:$0xff]  ;;  %2252 = vmatprep.subr.bf16.mxu0 %v2213_v37  ;;  %v2217_v15 = vld [vmem:[#allocation3 + $0x2a8] sm:$0xff] }
 0x33f   :  { %v9291_v16 = vpop.eup %9290  ;;  %9300 = vtanh.f32 %v11192_v46  ;;  %1734 = vmax.xlane.f32.xlu0 %v11194_v57  ;;  %v11199_v23 = vadd.f32 %v8164_v22, %v1713_v55  ;;  %v1891_v22 = vld [vmem:[#allocation3 + $0x1d8] sm:$0xff]  ;;  %v2220_v55 = vld [vmem:[#allocation3 + $0x2c0] sm:$0xff] }
 0x340   :  { %v9293_v32 = vpop.eup %9292  ;;  %v1859_v50 = vmul.f32 %v9291_v16, %v9289_v30  ;;  %9302 = vrcp.f32 %v1832_v63  ;;  %v2218_v30 = vld [vmem:[#allocation3 + $0x2b0] sm:$0xff]  ;;  %v2219_v16 = vld [vmem:[#allocation3 + $0x2b8] sm:$0xff] }
 0x341   :  { %v1856_v60 = vmul.f32 %v9293_v32, %v11160_v27  ;;  %v9295_v54 = vpop.eup %9294  ;;  %v2223_v63 = vld [vmem:[#allocation3 + $0x2d8] sm:$0xff]  ;;  %v2222_v32 = vld [vmem:[#allocation3 + $0x2d0] sm:$0xff] }
 0x343   :  { %v11202_v36 = vadd.f32 %v1859_v50, %v1856_v60  ;;  %1736 = vmax.xlane.f32.xlu0 %v11199_v23  ;;  %v2225_v50 = vld [vmem:[#allocation3 + $0x2e8] sm:$0xff]  ;;  %v2224_v60 = vld [vmem:[#allocation3 + $0x2e0] sm:$0xff] }
 0x345   :  { %9304 = vtanh.f32 %v11202_v36 }
 0x347   :  { %v9297_v9 = vpop.eup %9296 }
 0x348   :  { %v9299_v40 = vpop.eup %9298  ;;  %v1866_v0 = vmul.f32 %v9297_v9, %v9295_v54  ;;  %v2228_v54 = vld [vmem:[#allocation3 + $0x300] sm:$0xff]  ;;  %v2227_v9 = vld [vmem:[#allocation3 + $0x2f8] sm:$0xff] }
 0x349   :  { %v9301_v11 = vpop.eup %9300 }
 0x34a   :  { %v1867_v44 = vmul.f32 %v9301_v11, %v9299_v40  ;;  %v9303_v49 = vpop.eup %9302  ;;  %v2230_v40 = vld [vmem:[#allocation3 + $0x310] sm:$0xff]  ;;  %v2229_v11 = vld [vmem:[#allocation3 + $0x308] sm:$0xff] }
 0x34c   :  { %v1869_v20 = vpack.c.bf16 %v1867_v44, %v1866_v0  ;;  %v2233_v0 = vld [vmem:[#allocation3 + $0x328] sm:$0xff]  ;;  %v2232_v44 = vld [vmem:[#allocation3 + $0x320] sm:$0xff] }
 0x34e   :  { %1945 = vmatmul.mubr.bf16.vlgmr.msra.gmra.mrb[12].mxu0 %v1869_v20  ;;  %1996 = vmatmul.mubr.bf16.vlgmr.msra.gmra.mrb[12].mxu1 %v1869_v20 }
 0x34f   :  { %v9305_v28 = vpop.eup %9304  ;;  %8592 = vmatpush3.bf16.msra.mxu1 %v11167_v33  ;;  %1954 = vmatprep.mubr.bf16.mxu0 %v12475_v38  ;;  %v1901_v33 = vld [vmem:[#allocation3 + $0x228] sm:$0xff] }
 0x350   :  { %8593 = vmatprep.subr.bf16.mxu1 %v1881_v39  ;;  %2005 = vmatprep.mubr.bf16.mxu1 %v12475_v38  ;;  %v1868_v27 = vmul.f32 %v9305_v28, %v9303_v49  ;;  %v2234_v49 = vld [vmem:[#allocation3 + $0x330] sm:$0xff]  ;;  %v2237_v28 = vld [vmem:[#allocation3 + $0x348] sm:$0xff] }
 0x351   :  { %2253 = vmatpush1.bf16.msra.mxu0 %v2212_v41  ;;  %v2242_v41 = vld [vmem:[#allocation3 + $0x370] sm:$0xff] }
 0x352   :  { %v1870_v58 = vpack.c.bf16 %v1868_v27, %v1868_v27  ;;  %2254 = vmatprep.subr.bf16.mxu0 %v2218_v30  ;;  %v2240_v27 = vld [vmem:[#allocation3 + $0x360] sm:$0xff] }
 0x353   :  { %8594 = vmatpush3.bf16.msra.mxu1 %v1881_v39  ;;  %v2238_v39 = vld [vmem:[#allocation3 + $0x350] sm:$0xff]  ;;  %v2248_v30 = vld [vmem:[#allocation3 + $0x3a0] sm:$0xff] }
 0x354   :  { %8595 = vmatprep.subr.bf16.mxu1 %v1886_v24 }
 0x355   :  { %2255 = vmatpush1.bf16.msra.mxu0 %v2217_v15 }
 0x356   :  { %1955 = vmatmul.mubr.bf16.gmra.mrb[132].mxu0 %v1870_v58  ;;  %2006 = vmatmul.mubr.bf16.gmra.mrb[128].mxu1 %v1870_v58 }
 0x357   :  { %8596 = vmatpush3.bf16.msra.mxu1 %v1886_v24  ;;  %8607 = vmatprep.mubr.bf16.mxu1 %v1869_v20  ;;  %v2235_v20 = vld [vmem:[#allocation3 + $0x338] sm:$0xff] }
 0x358   :  { %8597 = vmatprep.subr.bf16.mxu1 %v1891_v22  ;;  %2284 = vmatprep.mubr.bf16.mxu0 %v12475_v38 }
 0x359   :  { %2256 = vmatprep.subr.bf16.mxu0 %v2223_v63  ;;  %v2249_v63 = vld [vmem:[#allocation3 + $0x3a8] sm:$0xff] }
 0x35a   :  { %2257 = vmatpush1.bf16.msra.mxu0 %v2222_v32  ;;  %v11214_v32 = vld [vmem:[#allocation3 + $0x2a0] sm:$0xff] }
 0x35b   :  { %8598 = vmatpush3.bf16.msra.mxu1 %v1891_v22  ;;  %2258 = vmatprep.subr.bf16.mxu0 %v2228_v54  ;;  %v2243_v22 = vld [vmem:[#allocation3 + $0x378] sm:$0xff] }
 0x35c   :  { %8599 = vmatprep.subr.bf16.mxu1 %v1896_v52 }
 0x35e   :  { %2259 = vmatpush1.bf16.msra.mxu0 %v2227_v9 }
 0x35f   :  { %8600 = vmatpush3.bf16.msra.mxu1 %v1896_v52  ;;  %2260 = vmatprep.subr.bf16.mxu0 %v2233_v0 }
 0x360   :  { %8601 = vmatprep.subr.bf16.mxu1 %v1901_v33 }
 0x362   :  { %2261 = vmatpush1.bf16.msra.mxu0 %v2232_v44 }
 0x363   :  { %8602 = vmatpush3.bf16.msra.mxu1 %v1901_v33  ;;  %2262 = vmatprep.subr.bf16.mxu0 %v2238_v39 }
 0x364   :  { %8603 = vmatprep.subr.bf16.mxu1 %v1906_v10 }
 0x366   :  { %2263 = vmatpush1.bf16.msra.mxu0 %v2237_v28 }
 0x367   :  { %8604 = vmatpush3.bf16.msra.mxu1 %v1906_v10  ;;  %v2245_v10 = vld [vmem:[#allocation3 + $0x388] sm:$0xff]  ;;  %2264 = vmatprep.subr.bf16.mxu0 %v2243_v22 }
 0x368   :  { %8605 = vmatprep.subr.bf16.mxu1 %v1911_v19 }
 0x36a   :  { %2265 = vmatpush1.bf16.msra.mxu0 %v2242_v41 }
 0x36b   :  { %8606 = vmatpush3.bf16.msra.mxu1 %v1911_v19  ;;  %2266 = vmatprep.subr.bf16.mxu0 %v2248_v30 }
 0x36c   :  { %2303 = vmatprep.subr.bf16.mxu1 %v2215_v45 }
 0x36e   :  { %8608 = vmatmul.mubr.bf16.vlgmr.msra.gmra.mrb[132].mxu1 %v1870_v58  ;;  %v2239_v58 = vld [vmem:[#allocation3 + $0x358] sm:$0xff] }
 0x36f   :  { %2335 = vmatprep.mubr.bf16.mxu1 %v12475_v38  ;;  %2304 = vmatpush1.bf16.msra.mxu1 %v2214_v14  ;;  %v2244_v14 = vld [vmem:[#allocation3 + $0x380] sm:$0xff] }
 0x370   :  { %2305 = vmatprep.subr.bf16.mxu1 %v2220_v55  ;;  %v2250_v55 = vld [vmem:[#allocation3 + $0x3b0] sm:$0xff] }
 0x373   :  { %2306 = vmatpush1.bf16.msra.mxu1 %v2219_v16 }
 0x374   :  { %2307 = vmatprep.subr.bf16.mxu1 %v2225_v50 }
 0x377   :  { %2308 = vmatpush1.bf16.msra.mxu1 %v2224_v60 }
 0x378   :  { %2309 = vmatprep.subr.bf16.mxu1 %v2230_v40 }
 0x37b   :  { %2310 = vmatpush1.bf16.msra.mxu1 %v2229_v11 }
 0x37c   :  { %2311 = vmatprep.subr.bf16.mxu1 %v2235_v20 }
 0x37f   :  { %2312 = vmatpush1.bf16.msra.mxu1 %v2234_v49 }
 0x380   :  { %2313 = vmatprep.subr.bf16.mxu1 %v2240_v27 }
 0x383   :  { %2314 = vmatpush1.bf16.msra.mxu1 %v2239_v58 }
 0x384   :  { %2315 = vmatprep.subr.bf16.mxu1 %v2245_v10 }
 0x387   :  { %2316 = vmatpush1.bf16.msra.mxu1 %v2244_v14 }
 0x388   :  { %2317 = vmatprep.subr.bf16.mxu1 %v2250_v55 }
 0x38b   :  { %2318 = vmatpush1.bf16.msra.mxu1 %v2249_v63 }
 0x3cb   :  { %v1739_v24 = vpop.xlane.xlu1 %1738 }
 0x3cc   :  { %v1742_v52 = vsub.f32 %v11189_v53, %v1739_v24  ;;  %v1735_v33 = vpop.xlane.xlu0 %1734  ;;  %v2247_v53 = vld [vmem:[#allocation3 + $0x398] sm:$0xff] }
 0x3cd   :  { %v1740_v19 = vsub.f32 %v11194_v57, %v1735_v33  ;;  %2267 = vmatpush1.bf16.msra.mxu0 %v2247_v53 }
 0x3ce   :  { %v1747_v37 = vmul.f32 1.442695, %v1742_v52  ;;  %8611 = vmatprep.subr.bf16.mxu0 %v11214_v32 }
 0x3cf   :  { %v1743_v45 = vmul.f32 1.442695, %v1740_v19 }
 0x3d0   :  { %9306 = vpow2.f32 %v1747_v37  ;;  %v1737_v15 = vpop.xlane.xlu0 %1736 }
 0x3d1   :  { %v1741_v16 = vsub.f32 %v11199_v23, %v1737_v15  ;;  %9308 = vpow2.f32 %v1743_v45 }
 0x3d3   :  { %v1745_v57 = vmul.f32 1.442695, %v1741_v16 }
 0x3d5   :  { %9310 = vpow2.f32 %v1745_v57 }
 0x3da   :  { %v11217_v50 = vpop.eup %9306 }
 0x3db   :  { %1753 = vadd.xlane.f32.xlu1 %v11217_v50  ;;  %v11220_v23 = vpop.eup %9308 }
 0x3df   :  { %v11222_v60 = vpop.eup %9310  ;;  %1749 = vadd.xlane.f32.xlu1 %v11220_v23 }
 0x3e0   :  { %1751 = vadd.xlane.f32.xlu0 %v11222_v60 }
 0x421   :  { %v1946_v54 = vpop.f32.mrb[12].mxu0  ;;  %v1997_v9 = vpop.f32.mrb[12].mxu1 }
 0x422   :  { %v8971_v40 = vadd.f32 %v1946_v54, %v10622_v4  ;;  %v1948_v11 = vpop.f32.mrb[13].mxu0  ;;  %v1999_v0 = vpop.f32.mrb[13].mxu1  ;;  %v9007_v10 = vadd.f32 %v1997_v9, %v10624_v5 }
 0x423   :  { %v8972_v44 = vadd.f32 %v1948_v11, %v10626_v6  ;;  %v1950_v20 = vpop.f32.mrb[14].mxu0  ;;  %v2001_v49 = vpop.f32.mrb[14].mxu1  ;;  %v9008_v53 = vadd.f32 %v1999_v0, %v10628_v7 }
 0x424   :  { %v8176_v39 = vmul.f32 -1.442695, %v8971_v40  ;;  %v8973_v28 = vadd.f32 %v1950_v20, %v10622_v4  ;;  %v1952_v27 = vpop.f32.mrb[15].mxu0  ;;  %v2003_v24 = vpop.f32.mrb[15].mxu1  ;;  %v9009_v41 = vadd.f32 %v2001_v49, %v10624_v5  ;;  %v8178_v9 = vmul.f32 -1.442695, %v9007_v10 }
 0x425   :  { %v8177_v58 = vmul.f32 -1.442695, %v8972_v44  ;;  %v8974_v22 = vadd.f32 %v1952_v27, %v10626_v6 }
 0x426   :  { %9312 = vpow2.f32 %v8176_v39  ;;  %v8179_v52 = vmul.f32 -1.442695, %v8973_v28  ;;  %v8181_v11 = vmul.f32 -1.442695, %v9009_v41 }
 0x427   :  { %v8180_v33 = vmul.f32 -1.442695, %v8974_v22  ;;  %9314 = vpow2.f32 %v8177_v58 }
 0x428   :  { %9316 = vpow2.f32 %v8179_v52 }
 0x429   :  { %v1956_v19 = vpop.f32.mrb[132].mxu0  ;;  %v2007_v37 = vpop.f32.mrb[128].mxu1  ;;  %9318 = vpow2.f32 %v8180_v33 }
 0x42a   :  { %v2133_v45 = vadd.f32 %v1956_v19, %v10709_v61  ;;  %v1958_v14 = vpop.f32.mrb[133].mxu0  ;;  %v2009_v30 = vpop.f32.mrb[129].mxu1  ;;  %v9010_v61 = vadd.f32 %v2003_v24, %v10628_v7 }
 0x42b   :  { %v2134_v15 = vadd.f32 %v1958_v14, %v10715_v2  ;;  %v2011_v55 = vpop.f32.mrb[130].mxu1  ;;  %v1960_v16 = vpop.f32.mrb[134].mxu0  ;;  %v2135_v2 = vadd.f32 %v2007_v37, %v10712_v62  ;;  %v2136_v28 = vadd.f32 %v2009_v30, %v10718_v3 }
 0x42c   :  { %v8182_v57 = vmul.f32 -1.442695, %v2133_v45  ;;  %v2012_v63 = vpop.f32.mrb[131].mxu1  ;;  %v1961_v54 = vpop.f32.mrb[135].mxu0 }
 0x42d   :  { %v8183_v40 = vmul.f32 -1.442695, %v2134_v15  ;;  %v8184_v22 = vmul.f32 -1.442695, %v2135_v2  ;;  %v8175_v15 = vld [vmem:[%s12337_s3 + $0x1] ss:$0 sm:$0xff] }
 0x42e   :  { %9320 = vpow2.f32 %v8182_v57 }
 0x42f   :  { %9322 = vpow2.f32 %v8183_v40 }
 0x430   :  { %v9313_v44 = vpop.eup %9312  ;;  %9324 = vtanh.f32 %v9008_v53 }
 0x431   :  { %v2164_v20 = vadd.f32 1.0, %v9313_v44  ;;  %9326 = vpow2.f32 %v8178_v9  ;;  %v9315_v49 = vpop.eup %9314 }
 0x432   :  { %9328 = vpow2.f32 %v8181_v11  ;;  %v9317_v39 = vpop.eup %9316  ;;  %v2165_v0 = vadd.f32 1.0, %v9315_v49 }
 0x433   :  { %9330 = vrcp.f32 %v2164_v20  ;;  %v2167_v27 = vadd.f32 1.0, %v9317_v39  ;;  %v9319_v58 = vpop.eup %9318 }
 0x434   :  { %9332 = vtanh.f32 %v9010_v61  ;;  %v2168_v52 = vadd.f32 1.0, %v9319_v58 }
 0x435   :  { %9334 = vrcp.f32 %v2165_v0 }
 0x436   :  { %9336 = vrcp.f32 %v2167_v27 }
 0x437   :  { %9338 = vtanh.f32 %v2136_v28 }
 0x438   :  { %v9321_v24 = vpop.eup %9320  ;;  %9340 = vrcp.f32 %v2168_v52 }
 0x439   :  { %v9323_v33 = vpop.eup %9322  ;;  %v2170_v10 = vadd.f32 1.0, %v9321_v24  ;;  %9342 = vpow2.f32 %v8184_v22 }
 0x43a   :  { %v9325_v62 = vpop.eup %9324  ;;  %v2171_v19 = vadd.f32 1.0, %v9323_v33 }
 0x43b   :  { %v9327_v37 = vpop.eup %9326  ;;  %9344 = vrcp.f32 %v2170_v10 }
 0x43c   :  { %v9329_v41 = vpop.eup %9328  ;;  %9346 = vrcp.f32 %v2171_v19  ;;  %v2166_v16 = vadd.f32 1.0, %v9327_v37 }
 0x43d   :  { %v9331_v3 = vpop.eup %9330  ;;  %v2169_v11 = vadd.f32 1.0, %v9329_v41 }
 0x43e   :  { %v9333_v45 = vpop.eup %9332  ;;  %v2197_v14 = vmul.f32 %v9331_v3, %v9325_v62  ;;  %9348 = vrcp.f32 %v2166_v16  ;;  %v2231_v16 = vld [vmem:[#allocation3 + $0x318] sm:$0xff] }
 0x43f   :  { %v9335_v30 = vpop.eup %9334 }
 0x440   :  { %v9337_v55 = vpop.eup %9336  ;;  %v2194_v53 = vmul.f32 %v9335_v30, %v11187_v25  ;;  %v2221_v30 = vld [vmem:[#allocation3 + $0x2c8] sm:$0xff] }
 0x441   :  { %v9339_v57 = vpop.eup %9338  ;;  %v2198_v63 = vmul.f32 %v9337_v55, %v9333_v45  ;;  %v8609_v54 = vpop.f32.mrb[132].mxu1 }
 0x442   :  { %v9341_v9 = vpop.eup %9340  ;;  %v11242_v40 = vadd.f32 %v2197_v14, %v2194_v53  ;;  %v11244_v44 = vadd.f32 %v8609_v54, %v8175_v15  ;;  %v2048_v61 = vpop.f32.mrb[133].mxu1  ;;  %v2236_v53 = vld [vmem:[#allocation3 + $0x340] sm:$0xff] }
 0x443   :  { %v9343_v20 = vpop.eup %9342  ;;  %v2195_v2 = vmul.f32 %v9341_v9, %v11192_v46  ;;  %v8610_v49 = vpop.f32.mrb[134].mxu1  ;;  %v11247_v39 = vadd.f32 %v8175_v15, %v2048_v61 }
 0x444   :  { %v2051_v0 = vpop.f32.mrb[135].mxu1  ;;  %2077 = vmax.xlane.f32.xlu0 %v11244_v44  ;;  %9350 = vtanh.f32 %v11242_v40  ;;  %v2172_v22 = vadd.f32 1.0, %v9343_v20 }
 0x445   :  { %v9345_v25 = vpop.eup %9344  ;;  %v11251_v28 = vadd.f32 %v2198_v63, %v2195_v2  ;;  %v11253_v27 = vadd.f32 %v8175_v15, %v2051_v0  ;;  %9352 = vrcp.f32 %v2169_v11  ;;  %v2226_v15 = vld [vmem:[#allocation3 + $0x2f0] sm:$0xff]  ;;  %v2251_v11 = vld [vmem:[#allocation3 + $0x3b8] sm:$0xff] }
 0x446   :  { %v9347_v58 = vpop.eup %9346  ;;  %v2199_v52 = vmul.f32 %v9345_v25, %v9339_v57  ;;  %v2246_v63 = vld [vmem:[#allocation3 + $0x390] sm:$0xff] }
 0x447   :  { %9354 = vtanh.f32 %v11251_v28  ;;  %v2196_v46 = vmul.f32 %v9347_v58, %v11202_v36  ;;  %2075 = vmax.xlane.f32.xlu1 %v11253_v27 }
 0x448   :  { %2073 = vmax.xlane.f32.xlu0 %v11247_v39  ;;  %9356 = vrcp.f32 %v2172_v22  ;;  %v9349_v33 = vpop.eup %9348 }
 0x449   :  { %v11259_v24 = vadd.f32 %v2199_v52, %v2196_v46 }
 0x44b   :  { %9358 = vtanh.f32 %v11259_v24 }
 0x44e   :  { %v9351_v10 = vpop.eup %9350 }
 0x44f   :  { %v9353_v62 = vpop.eup %9352  ;;  %v2206_v37 = vmul.f32 %v9351_v10, %v9349_v33 }
 0x451   :  { %v9355_v19 = vpop.eup %9354 }
 0x452   :  { %v2207_v41 = vmul.f32 %v9355_v19, %v9353_v62  ;;  %v9357_v3 = vpop.eup %9356 }
 0x454   :  { %v2209_v45 = vpack.c.bf16 %v2207_v41, %v2206_v37  ;;  %v2555_v41 = vld [vmem:[#allocation3 + $0x3d8] sm:$0xff] }
 0x455   :  { %v9359_v14 = vpop.eup %9358  ;;  %2643 = vmatprep.subr.bf16.mxu1 %v2555_v41  ;;  %v2582_v41 = vld [vmem:[#allocation3 + $0x4b0] sm:$0xff] }
 0x456   :  { %2285 = vmatmul.mubr.bf16.vlgmr.msra.gmra.mrb[136].mxu0 %v2209_v45  ;;  %2336 = vmatmul.mubr.bf16.vlgmr.msra.gmra.mrb[136].mxu1 %v2209_v45  ;;  %v2208_v36 = vmul.f32 %v9359_v14, %v9357_v3  ;;  %v2553_v3 = vld [vmem:[#allocation3 + $0x3c8] sm:$0xff]  ;;  %v2552_v14 = vld [vmem:[#allocation3 + $0x3c0] sm:$0xff] }
 0x457   :  { %8612 = vmatpush3.bf16.msra.mxu0 %v11214_v32  ;;  %2294 = vmatprep.mubr.bf16.mxu0 %v12475_v38  ;;  %v2241_v32 = vld [vmem:[#allocation3 + $0x368] sm:$0xff] }
 0x458   :  { %8613 = vmatprep.subr.bf16.mxu0 %v2221_v30  ;;  %2345 = vmatprep.mubr.bf16.mxu1 %v12475_v38  ;;  %v2210_v55 = vpack.c.bf16 %v2208_v36, %v2208_v36  ;;  %v2559_v36 = vld [vmem:[#allocation3 + $0x3f8] sm:$0xff] }
 0x45b   :  { %8614 = vmatpush3.bf16.msra.mxu0 %v2221_v30  ;;  %v2558_v30 = vld [vmem:[#allocation3 + $0x3f0] sm:$0xff] }
 0x45c   :  { %8615 = vmatprep.subr.bf16.mxu0 %v2226_v15 }
 0x45e   :  { %2295 = vmatmul.mubr.bf16.gmra.mrb[140].mxu0 %v2210_v55  ;;  %2346 = vmatmul.mubr.bf16.gmra.mrb[140].mxu1 %v2210_v55 }
 0x45f   :  { %8616 = vmatpush3.bf16.msra.mxu0 %v2226_v15  ;;  %8627 = vmatprep.mubr.bf16.mxu0 %v2209_v45  ;;  %v2554_v45 = vld [vmem:[#allocation3 + $0x3d0] sm:$0xff]  ;;  %v2557_v15 = vld [vmem:[#allocation3 + $0x3e8] sm:$0xff] }
 0x460   :  { %8617 = vmatprep.subr.bf16.mxu0 %v2231_v16  ;;  %2675 = vmatprep.mubr.bf16.mxu1 %v12475_v38 }
 0x461   :  { %2644 = vmatpush1.bf16.msra.mxu1 %v2554_v45 }
 0x463   :  { %8618 = vmatpush3.bf16.msra.mxu0 %v2231_v16  ;;  %v2562_v16 = vld [vmem:[#allocation3 + $0x410] sm:$0xff] }
 0x464   :  { %8619 = vmatprep.subr.bf16.mxu0 %v2236_v53 }
 0x467   :  { %8620 = vmatpush3.bf16.msra.mxu0 %v2236_v53  ;;  %v2570_v53 = vld [vmem:[#allocation3 + $0x450] sm:$0xff] }
 0x468   :  { %v1754_v57 = vpop.xlane.xlu1 %1753  ;;  %8621 = vmatprep.subr.bf16.mxu0 %v2241_v32 }
 0x469   :  { %9360 = vrcp.f32 %v1754_v57 }
 0x46b   :  { %8622 = vmatpush3.bf16.msra.mxu0 %v2241_v32  ;;  %v2568_v32 = vld [vmem:[#allocation3 + $0x440] sm:$0xff] }
 0x46c   :  { %v1750_v54 = vpop.xlane.xlu1 %1749  ;;  %8623 = vmatprep.subr.bf16.mxu0 %v2246_v63 }
 0x46d   :  { %9362 = vrcp.f32 %v1750_v54  ;;  %v1752_v9 = vpop.xlane.xlu0 %1751 }
 0x46e   :  { %9364 = vrcp.f32 %v1752_v9 }
 0x46f   :  { %8624 = vmatpush3.bf16.msra.mxu0 %v2246_v63  ;;  %v2567_v63 = vld [vmem:[#allocation3 + $0x438] sm:$0xff] }
 0x470   :  { %8625 = vmatprep.subr.bf16.mxu0 %v2251_v11 }
 0x473   :  { %v9361_v61 = vpop.eup %9360  ;;  %8626 = vmatpush3.bf16.msra.mxu0 %v2251_v11  ;;  %v2574_v11 = vld [vmem:[#allocation3 + $0x470] sm:$0xff] }
 0x474   :  { %v1760_v20 = vmul.f32 %v9361_v61, %v1754_v57  ;;  %2592 = vmatprep.subr.bf16.mxu0 %v2553_v3  ;;  %v2569_v57 = vld [vmem:[#allocation3 + $0x448] sm:$0xff]  ;;  %v2590_v3 = vld [vmem:[#allocation3 + $0x4f0] sm:$0xff] }
 0x476   :  { %v1763_v2 = vsub.f32 2.0, %v1760_v20  ;;  %8628 = vmatmul.mubr.bf16.vlgmr.msra.gmra.mrb[144].mxu0 %v2210_v55  ;;  %v2564_v55 = vld [vmem:[#allocation3 + $0x420] sm:$0xff] }
 0x477   :  { %v9363_v49 = vpop.eup %9362  ;;  %2624 = vmatprep.mubr.bf16.mxu0 %v12475_v38  ;;  %2593 = vmatpush1.bf16.msra.mxu0 %v2552_v14  ;;  %v2572_v20 = vld [vmem:[#allocation3 + $0x460] sm:$0xff] }
 0x478   :  { %v9365_v0 = vpop.eup %9364  ;;  %v1766_v25 = vmul.f32 %v9361_v61, %v1763_v2  ;;  %v1758_v58 = vmul.f32 %v9363_v49, %v1750_v54  ;;  %2594 = vmatprep.subr.bf16.mxu0 %v2558_v30  ;;  %v2575_v54 = vld [vmem:[#allocation3 + $0x478] sm:$0xff]  ;;  %v2588_v14 = vld [vmem:[#allocation3 + $0x4e0] sm:$0xff] }
 0x479   :  { %v1759_v22 = vmul.f32 %v9365_v0, %v1752_v9  ;;  %v2573_v9 = vld [vmem:[#allocation3 + $0x468] sm:$0xff]  ;;  %v11273_v30 = vld [vmem:[#allocation3 + $0x3e0] sm:$0xff] }
 0x47a   :  { %v1769_v52 = vmul.f32 %v11217_v50, %v1766_v25  ;;  %v1761_v46 = vsub.f32 2.0, %v1758_v58  ;;  %v2560_v50 = vld [vmem:[#allocation3 + $0x400] sm:$0xff]  ;;  %v2579_v25 = vld [vmem:[#allocation3 + $0x498] sm:$0xff]  ;;  %v2577_v58 = vld [vmem:[#allocation3 + $0x488] sm:$0xff] }
 0x47b   :  { %v1762_v33 = vsub.f32 2.0, %v1759_v22  ;;  %2645 = vmatprep.subr.bf16.mxu1 %v2560_v50  ;;  %2595 = vmatpush1.bf16.msra.mxu0 %v2557_v15  ;;  %v2585_v22 = vld [vmem:[#allocation3 + $0x4c8] sm:$0xff]  ;;  %v2587_v50 = vld [vmem:[#allocation3 + $0x4d8] sm:$0xff] }
 0x47c   :  { %1772 = vst [vmem:[#allocation10 + $0x10] sm:$0xff] %v1769_v52  ;;  %v1764_v10 = vmul.f32 %v9363_v49, %v1761_v46  ;;  %2646 = vmatpush1.bf16.msra.mxu1 %v2559_v36  ;;  %v2580_v49 = vld [vmem:[#allocation3 + $0x4a0] sm:$0xff] }
 0x47d   :  { %v1765_v62 = vmul.f32 %v9365_v0, %v1762_v33  ;;  %v2578_v0 = vld [vmem:[#allocation3 + $0x490] sm:$0xff]  ;;  %v2583_v33 = vld [vmem:[#allocation3 + $0x4b8] sm:$0xff] }
 0x47e   :  { %v1767_v19 = vmul.f32 %v11220_v23, %v1764_v10  ;;  %v2565_v23 = vld [vmem:[#allocation3 + $0x428] sm:$0xff] }
 0x47f   :  { %v1768_v37 = vmul.f32 %v11222_v60, %v1765_v62  ;;  %2647 = vmatprep.subr.bf16.mxu1 %v2565_v23  ;;  %v2563_v60 = vld [vmem:[#allocation3 + $0x418] sm:$0xff] }
 0x480   :  { %1770 = vst [vmem:[#allocation10] sm:$0xff] %v1767_v19  ;;  %2596 = vmatprep.subr.bf16.mxu0 %v2563_v60  ;;  %2648 = vmatpush1.bf16.msra.mxu1 %v2564_v55 }
 0x481   :  { %1771 = vst [vmem:[#allocation10 + $0x8] sm:$0xff] %v1768_v37  ;;  %2597 = vmatpush1.bf16.msra.mxu0 %v2562_v16  ;;  %2649 = vmatprep.subr.bf16.mxu1 %v2570_v53 }
 0x482   :  { %2598 = vmatprep.subr.bf16.mxu0 %v2568_v32 }
 0x484   :  { %2650 = vmatpush1.bf16.msra.mxu1 %v2569_v57 }
 0x485   :  { %2599 = vmatpush1.bf16.msra.mxu0 %v2567_v63  ;;  %2651 = vmatprep.subr.bf16.mxu1 %v2575_v54 }
 0x486   :  { %2600 = vmatprep.subr.bf16.mxu0 %v2573_v9 }
 0x488   :  { %2652 = vmatpush1.bf16.msra.mxu1 %v2574_v11 }
 0x489   :  { %2601 = vmatpush1.bf16.msra.mxu0 %v2572_v20  ;;  %2653 = vmatprep.subr.bf16.mxu1 %v2580_v49 }
 0x48a   :  { %2602 = vmatprep.subr.bf16.mxu0 %v2578_v0 }
 0x48c   :  { %2654 = vmatpush1.bf16.msra.mxu1 %v2579_v25 }
 0x48d   :  { %2603 = vmatpush1.bf16.msra.mxu0 %v2577_v58  ;;  %2655 = vmatprep.subr.bf16.mxu1 %v2585_v22 }
 0x48e   :  { %2604 = vmatprep.subr.bf16.mxu0 %v2583_v33 }
 0x491   :  { %2605 = vmatpush1.bf16.msra.mxu0 %v2582_v41 }
 0x492   :  { %2606 = vmatprep.subr.bf16.mxu0 %v2588_v14 }
 0x495   :  { %2607 = vmatpush1.bf16.msra.mxu0 %v2587_v50 }
 0x4d1   :  { %v2078_v61 = vpop.xlane.xlu0 %2077 }
 0x4d2   :  { %v2081_v2 = vsub.f32 %v11244_v44, %v2078_v61  ;;  %v2584_v44 = vld [vmem:[#allocation3 + $0x4c0] sm:$0xff] }
 0x4d3   :  { %2656 = vmatpush1.bf16.msra.mxu1 %v2584_v44 }
 0x4d4   :  { %v2086_v52 = vmul.f32 1.442695, %v2081_v2  ;;  %v2076_v46 = vpop.xlane.xlu1 %2075  ;;  %2657 = vmatprep.subr.bf16.mxu1 %v2590_v3 }
 0x4d5   :  { %v2080_v10 = vsub.f32 %v11253_v27, %v2076_v46  ;;  %v2074_v62 = vpop.xlane.xlu0 %2073  ;;  %v2589_v27 = vld [vmem:[#allocation3 + $0x4e8] sm:$0xff] }
 0x4d6   :  { %9366 = vpow2.f32 %v2086_v52  ;;  %v2079_v19 = vsub.f32 %v11247_v39, %v2074_v62 }
 0x4d7   :  { %v2084_v37 = vmul.f32 1.442695, %v2080_v10  ;;  %2658 = vmatpush1.bf16.msra.mxu1 %v2589_v27 }
 0x4d8   :  { %v2082_v45 = vmul.f32 1.442695, %v2079_v19  ;;  %8631 = vmatprep.subr.bf16.mxu1 %v11273_v30 }
 0x4d9   :  { %9368 = vpow2.f32 %v2084_v37 }
 0x4da   :  { %9370 = vpow2.f32 %v2082_v45 }
 0x4e0   :  { %v11276_v39 = vpop.eup %9366 }
 0x4e1   :  { %2092 = vadd.xlane.f32.xlu1 %v11276_v39 }
 0x4e3   :  { %v11279_v36 = vpop.eup %9368 }
 0x4e4   :  { %v11281_v15 = vpop.eup %9370  ;;  %2090 = vadd.xlane.f32.xlu0 %v11279_v36 }
 0x4e5   :  { %2088 = vadd.xlane.f32.xlu1 %v11281_v15 }
 0x529   :  { %v2286_v23 = vpop.f32.mrb[136].mxu0  ;;  %v2337_v60 = vpop.f32.mrb[136].mxu1 }
 0x52a   :  { %v2465_v55 = vadd.f32 %v2286_v23, %v10721_v12  ;;  %v2288_v16 = vpop.f32.mrb[137].mxu0  ;;  %v2339_v53 = vpop.f32.mrb[137].mxu1  ;;  %v2467_v12 = vadd.f32 %v2337_v60, %v10724_v13 }
 0x52b   :  { %v2466_v32 = vadd.f32 %v2288_v16, %v10727_v18  ;;  %v2290_v57 = vpop.f32.mrb[138].mxu0  ;;  %v2341_v63 = vpop.f32.mrb[138].mxu1  ;;  %v2468_v46 = vadd.f32 %v2339_v53, %v10730_v21 }
 0x52c   :  { %v8187_v54 = vmul.f32 -1.442695, %v2465_v55  ;;  %v2469_v9 = vadd.f32 %v2290_v57, %v10733_v26  ;;  %v2292_v11 = vpop.f32.mrb[139].mxu0  ;;  %v2343_v61 = vpop.f32.mrb[139].mxu1  ;;  %v2471_v18 = vadd.f32 %v2341_v63, %v10736_v29  ;;  %v8189_v13 = vmul.f32 -1.442695, %v2467_v12 }
 0x52d   :  { %v8188_v20 = vmul.f32 -1.442695, %v2466_v32  ;;  %v2470_v2 = vadd.f32 %v2292_v11, %v10739_v34 }
 0x52e   :  { %9372 = vpow2.f32 %v8187_v54  ;;  %v8190_v49 = vmul.f32 -1.442695, %v2469_v9  ;;  %v8192_v41 = vmul.f32 -1.442695, %v2471_v18 }
 0x52f   :  { %v8191_v0 = vmul.f32 -1.442695, %v2470_v2  ;;  %9374 = vpow2.f32 %v8188_v20 }
 0x530   :  { %9376 = vpow2.f32 %v8190_v49 }
 0x531   :  { %v2296_v25 = vpop.f32.mrb[140].mxu0  ;;  %v2347_v58 = vpop.f32.mrb[140].mxu1  ;;  %9378 = vpow2.f32 %v8191_v0 }
 0x532   :  { %v2473_v22 = vadd.f32 %v2296_v25, %v10745_v42  ;;  %v2298_v52 = vpop.f32.mrb[141].mxu0  ;;  %v2349_v26 = vpop.f32.mrb[141].mxu1  ;;  %v2472_v42 = vadd.f32 %v2343_v61, %v10742_v35  ;;  %v2475_v27 = vadd.f32 %v2347_v58, %v10748_v43 }
 0x533   :  { %v2474_v34 = vadd.f32 %v2298_v52, %v10751_v48  ;;  %v2300_v33 = vpop.f32.mrb[142].mxu0  ;;  %v2351_v10 = vpop.f32.mrb[142].mxu1  ;;  %v2476_v60 = vadd.f32 %v2349_v26, %v10754_v51  ;;  %v8186_v51 = vld [vmem:[%s12337_s3 + $0x2] ss:$0 sm:$0xff] }
 0x534   :  { %v8193_v62 = vmul.f32 -1.442695, %v2473_v22  ;;  %v2301_v19 = vpop.f32.mrb[143].mxu0  ;;  %v2352_v44 = vpop.f32.mrb[143].mxu1  ;;  %v8195_v35 = vmul.f32 -1.442695, %v2475_v27 }
 0x535   :  { %v8194_v37 = vmul.f32 -1.442695, %v2474_v34 }
 0x536   :  { %9380 = vpow2.f32 %v8193_v62 }
 0x537   :  { %9382 = vtanh.f32 %v2468_v46 }
 0x538   :  { %v9373_v29 = vpop.eup %9372  ;;  %9384 = vpow2.f32 %v8194_v37 }
 0x539   :  { %v2504_v3 = vadd.f32 1.0, %v9373_v29  ;;  %9386 = vpow2.f32 %v8189_v13  ;;  %v9375_v21 = vpop.eup %9374 }
 0x53a   :  { %9388 = vpow2.f32 %v8192_v41  ;;  %v9377_v45 = vpop.eup %9376  ;;  %v2505_v48 = vadd.f32 1.0, %v9375_v21 }
 0x53b   :  { %9390 = vrcp.f32 %v2504_v3  ;;  %v2507_v14 = vadd.f32 1.0, %v9377_v45  ;;  %v9379_v50 = vpop.eup %9378 }
 0x53c   :  { %9392 = vtanh.f32 %v2472_v42  ;;  %v2508_v23 = vadd.f32 1.0, %v9379_v50  ;;  %v2561_v50 = vld [vmem:[#allocation3 + $0x408] sm:$0xff] }
 0x53d   :  { %9394 = vrcp.f32 %v2505_v48 }
 0x53e   :  { %9396 = vrcp.f32 %v2507_v14 }
 0x53f   :  { %9398 = vrcp.f32 %v2508_v23 }
 0x540   :  { %v9381_v55 = vpop.eup %9380  ;;  %9400 = vtanh.f32 %v2476_v60 }
 0x541   :  { %v9383_v16 = vpop.eup %9382  ;;  %v2510_v53 = vadd.f32 1.0, %v9381_v55  ;;  %v2566_v55 = vld [vmem:[#allocation3 + $0x430] sm:$0xff] }
 0x542   :  { %v9385_v32 = vpop.eup %9384 }
 0x543   :  { %v9387_v57 = vpop.eup %9386  ;;  %9402 = vrcp.f32 %v2510_v53  ;;  %v2511_v63 = vadd.f32 1.0, %v9385_v32  ;;  %v2576_v53 = vld [vmem:[#allocation3 + $0x480] sm:$0xff] }
 0x544   :  { %v9389_v54 = vpop.eup %9388  ;;  %9404 = vpow2.f32 %v8195_v35  ;;  %v2506_v2 = vadd.f32 1.0, %v9387_v57 }
 0x545   :  { %v9391_v9 = vpop.eup %9390  ;;  %9406 = vrcp.f32 %v2511_v63  ;;  %v2509_v18 = vadd.f32 1.0, %v9389_v54  ;;  %v2586_v63 = vld [vmem:[#allocation3 + $0x4d0] sm:$0xff] }
 0x546   :  { %v9393_v43 = vpop.eup %9392  ;;  %v2537_v11 = vmul.f32 %v9391_v9, %v9383_v16  ;;  %9408 = vrcp.f32 %v2506_v2  ;;  %v2571_v16 = vld [vmem:[#allocation3 + $0x458] sm:$0xff] }
 0x547   :  { %v9395_v61 = vpop.eup %9394  ;;  %v2591_v9 = vld [vmem:[#allocation3 + $0x4f8] sm:$0xff] }
 0x548   :  { %v9397_v20 = vpop.eup %9396  ;;  %v2534_v49 = vmul.f32 %v9395_v61, %v11242_v40 }
 0x549   :  { %v2538_v0 = vmul.f32 %v9397_v20, %v9393_v43  ;;  %v8629_v12 = vpop.f32.mrb[144].mxu0  ;;  %v9399_v25 = vpop.eup %9398 }
 0x54a   :  { %v11301_v58 = vadd.f32 %v2537_v11, %v2534_v49  ;;  %v11303_v22 = vadd.f32 %v8629_v12, %v8186_v51  ;;  %v2388_v52 = vpop.f32.mrb[145].mxu0  ;;  %v2535_v26 = vmul.f32 %v9399_v25, %v11251_v28  ;;  %v9401_v34 = vpop.eup %9400 }
 0x54b   :  { %v8630_v46 = vpop.f32.mrb[146].mxu0  ;;  %v11312_v13 = vadd.f32 %v8186_v51, %v2388_v52 }
 0x54c   :  { %v2391_v33 = vpop.f32.mrb[147].mxu0  ;;  %2417 = vmax.xlane.f32.xlu0 %v11303_v22  ;;  %9410 = vtanh.f32 %v11301_v58  ;;  %v11308_v40 = vadd.f32 %v2538_v0, %v2535_v26 }
 0x54d   :  { %v9403_v10 = vpop.eup %9402  ;;  %v11310_v62 = vadd.f32 %v8186_v51, %v2391_v33  ;;  %9412 = vrcp.f32 %v2509_v18  ;;  %v2892_v33 = vld [vmem:[#allocation3 + $0x8] sm:$0xff] }
 0x54e   :  { %v9405_v19 = vpop.eup %9404  ;;  %v2539_v44 = vmul.f32 %v9403_v10, %v9401_v34  ;;  %9414 = vtanh.f32 %v11308_v40  ;;  %2931 = vmatprep.subr.bf16.mxu0 %v2892_v33  ;;  %v2891_v10 = vld [vmem:[#allocation3] sm:$0xff] }
 0x54f   :  { %v9407_v37 = vpop.eup %9406  ;;  %2415 = vmax.xlane.f32.xlu1 %v11310_v62  ;;  %v2512_v41 = vadd.f32 1.0, %v9405_v19  ;;  %v2894_v19 = vld [vmem:[#allocation3 + $0x18] sm:$0xff] }
 0x550   :  { %v2536_v28 = vmul.f32 %v9407_v37, %v11259_v24  ;;  %2413 = vmax.xlane.f32.xlu0 %v11312_v13  ;;  %v9409_v42 = vpop.eup %9408  ;;  %v2897_v37 = vld [vmem:[#allocation3 + $0x30] sm:$0xff] }
 0x552   :  { %v11318_v29 = vadd.f32 %v2539_v44, %v2536_v28  ;;  %v2893_v44 = vld [vmem:[#allocation3 + $0x10] sm:$0xff]  ;;  %v2899_v28 = vld [vmem:[#allocation3 + $0x40] sm:$0xff] }
 0x554   :  { %9416 = vtanh.f32 %v11318_v29 }
 0x555   :  { %9418 = vrcp.f32 %v2512_v41  ;;  %v2898_v41 = vld [vmem:[#allocation3 + $0x38] sm:$0xff] }
 0x556   :  { %v9411_v3 = vpop.eup %9410 }
 0x557   :  { %v9413_v21 = vpop.eup %9412  ;;  %v2546_v48 = vmul.f32 %v9411_v3, %v9409_v42  ;;  %v2904_v42 = vld [vmem:[#allocation3 + $0x68] sm:$0xff]  ;;  %v2903_v3 = vld [vmem:[#allocation3 + $0x60] sm:$0xff] }
 0x558   :  { %v9415_v45 = vpop.eup %9414 }
 0x559   :  { %v2547_v14 = vmul.f32 %v9415_v45, %v9413_v21  ;;  %v2907_v21 = vld [vmem:[#allocation3 + $0x80] sm:$0xff]  ;;  %v2906_v45 = vld [vmem:[#allocation3 + $0x78] sm:$0xff] }
 0x55b   :  { %v2549_v27 = vpack.c.bf16 %v2547_v14, %v2546_v48  ;;  %v2909_v48 = vld [vmem:[#allocation3 + $0x90] sm:$0xff]  ;;  %v2908_v14 = vld [vmem:[#allocation3 + $0x88] sm:$0xff] }
 0x55d   :  { %2625 = vmatmul.mubr.bf16.vlgmr.msra.gmra.mrb[24].mxu0 %v2549_v27  ;;  %2676 = vmatmul.mubr.bf16.vlgmr.msra.gmra.mrb[24].mxu1 %v2549_v27 }
 0x55e   :  { %v9417_v23 = vpop.eup %9416  ;;  %8632 = vmatpush3.bf16.msra.mxu1 %v11273_v30  ;;  %2634 = vmatprep.mubr.bf16.mxu0 %v12475_v38  ;;  %v2581_v30 = vld [vmem:[#allocation3 + $0x4a8] sm:$0xff] }
 0x55f   :  { %v9419_v24 = vpop.eup %9418  ;;  %8633 = vmatprep.subr.bf16.mxu1 %v2561_v50  ;;  %2685 = vmatprep.mubr.bf16.mxu1 %v12475_v38 }
 0x560   :  { %v2548_v60 = vmul.f32 %v9419_v24, %v9417_v23  ;;  %2932 = vmatpush1.bf16.msra.mxu0 %v2891_v10  ;;  %v2914_v23 = vld [vmem:[#allocation3 + $0xb8] sm:$0xff] }
 0x561   :  { %2933 = vmatprep.subr.bf16.mxu0 %v2897_v37 }
 0x562   :  { %8634 = vmatpush3.bf16.msra.mxu1 %v2561_v50  ;;  %v2550_v35 = vpack.c.bf16 %v2548_v60, %v2548_v60  ;;  %v2911_v50 = vld [vmem:[#allocation3 + $0xa0] sm:$0xff]  ;;  %v2913_v60 = vld [vmem:[#allocation3 + $0xb0] sm:$0xff] }
 0x563   :  { %8635 = vmatprep.subr.bf16.mxu1 %v2566_v55 }
 0x565   :  { %2635 = vmatmul.mubr.bf16.gmra.mrb[148].mxu0 %v2550_v35  ;;  %2686 = vmatmul.mubr.bf16.gmra.mrb[144].mxu1 %v2550_v35 }
 0x566   :  { %8636 = vmatpush3.bf16.msra.mxu1 %v2566_v55  ;;  %8647 = vmatprep.mubr.bf16.mxu1 %v2549_v27  ;;  %v2912_v27 = vld [vmem:[#allocation3 + $0xa8] sm:$0xff] }
 0x567   :  { %8637 = vmatprep.subr.bf16.mxu1 %v2571_v16  ;;  %2963 = vmatprep.mubr.bf16.mxu0 %v12475_v38 }
 0x56a   :  { %8638 = vmatpush3.bf16.msra.mxu1 %v2571_v16  ;;  %v2916_v16 = vld [vmem:[#allocation3 + $0xc8] sm:$0xff] }
 0x56b   :  { %8639 = vmatprep.subr.bf16.mxu1 %v2576_v53 }
 0x56e   :  { %v2093_v32 = vpop.xlane.xlu1 %2092  ;;  %8640 = vmatpush3.bf16.msra.mxu1 %v2576_v53  ;;  %v2919_v53 = vld [vmem:[#allocation3 + $0xe0] sm:$0xff] }
 0x56f   :  { %9420 = vrcp.f32 %v2093_v32  ;;  %8641 = vmatprep.subr.bf16.mxu1 %v2581_v30 }
 0x571   :  { %v2091_v57 = vpop.xlane.xlu0 %2090 }
 0x572   :  { %9422 = vrcp.f32 %v2091_v57  ;;  %v2089_v54 = vpop.xlane.xlu1 %2088  ;;  %8642 = vmatpush3.bf16.msra.mxu1 %v2581_v30  ;;  %v2918_v30 = vld [vmem:[#allocation3 + $0xd8] sm:$0xff] }
 0x573   :  { %9424 = vrcp.f32 %v2089_v54  ;;  %8643 = vmatprep.subr.bf16.mxu1 %v2586_v63 }
 0x576   :  { %8644 = vmatpush3.bf16.msra.mxu1 %v2586_v63 }
 0x577   :  { %8645 = vmatprep.subr.bf16.mxu1 %v2591_v9 }
 0x579   :  { %v9421_v43 = vpop.eup %9420 }
 0x57a   :  { %v2099_v11 = vmul.f32 %v9421_v43, %v2093_v32  ;;  %8646 = vmatpush3.bf16.msra.mxu1 %v2591_v9  ;;  %v2922_v32 = vld [vmem:[#allocation3 + $0xf8] sm:$0xff] }
 0x57b   :  { %2982 = vmatprep.subr.bf16.mxu1 %v2894_v19 }
 0x57c   :  { %v9423_v61 = vpop.eup %9422  ;;  %v2102_v51 = vsub.f32 2.0, %v2099_v11 }
 0x57d   :  { %v9425_v20 = vpop.eup %9424  ;;  %v2098_v2 = vmul.f32 %v9423_v61, %v2091_v57  ;;  %8648 = vmatmul.mubr.bf16.vlgmr.msra.gmra.mrb[148].mxu1 %v2550_v35  ;;  %v2917_v35 = vld [vmem:[#allocation3 + $0xd0] sm:$0xff] }
 0x57e   :  { %v2105_v49 = vmul.f32 %v9421_v43, %v2102_v51  ;;  %v2097_v0 = vmul.f32 %v9425_v20, %v2089_v54  ;;  %3014 = vmatprep.mubr.bf16.mxu1 %v12475_v38  ;;  %2983 = vmatpush1.bf16.msra.mxu1 %v2893_v44  ;;  %v2924_v54 = vld [vmem:[#allocation3 + $0x108] sm:$0xff]  ;;  %v2923_v51 = vld [vmem:[#allocation3 + $0x100] sm:$0xff] }
 0x57f   :  { %v2101_v12 = vsub.f32 2.0, %v2098_v2  ;;  %2984 = vmatprep.subr.bf16.mxu1 %v2899_v28 }
 0x580   :  { %v2108_v25 = vmul.f32 %v11276_v39, %v2105_v49  ;;  %v2100_v18 = vsub.f32 2.0, %v2097_v0  ;;  %v2896_v39 = vld [vmem:[#allocation3 + $0x28] sm:$0xff]  ;;  %v2929_v49 = vld [vmem:[#allocation3 + $0x130] sm:$0xff] }
 0x581   :  { %v2104_v52 = vmul.f32 %v9423_v61, %v2101_v12  ;;  %2934 = vmatpush1.bf16.msra.mxu0 %v2896_v39  ;;  %v2928_v0 = vld [vmem:[#allocation3 + $0x128] sm:$0xff]  ;;  %v11332_v12 = vld [vmem:[#allocation3 + $0x20] sm:$0xff] }
 0x582   :  { %2112 = vst [vmem:[#allocation10 + $0x28] sm:$0xff] %v2108_v25  ;;  %v2103_v26 = vmul.f32 %v9425_v20, %v2100_v18  ;;  %2985 = vmatpush1.bf16.msra.mxu1 %v2898_v41  ;;  %v2927_v20 = vld [vmem:[#allocation3 + $0x120] sm:$0xff] }
 0x583   :  { %v2107_v46 = vmul.f32 %v11279_v36, %v2104_v52  ;;  %v2902_v36 = vld [vmem:[#allocation3 + $0x58] sm:$0xff]  ;;  %2986 = vmatprep.subr.bf16.mxu1 %v2904_v42 }
 0x584   :  { %v2106_v34 = vmul.f32 %v11281_v15, %v2103_v26  ;;  %2935 = vmatprep.subr.bf16.mxu0 %v2902_v36  ;;  %v2901_v15 = vld [vmem:[#allocation3 + $0x50] sm:$0xff] }
 0x585   :  { %2111 = vst [vmem:[#allocation10 + $0x20] sm:$0xff] %v2107_v46  ;;  %2936 = vmatpush1.bf16.msra.mxu0 %v2901_v15 }
 0x586   :  { %2110 = vst [vmem:[#allocation10 + $0x18] sm:$0xff] %v2106_v34  ;;  %2987 = vmatpush1.bf16.msra.mxu1 %v2903_v3  ;;  %2937 = vmatprep.subr.bf16.mxu0 %v2907_v21 }
 0x587   :  { %2988 = vmatprep.subr.bf16.mxu1 %v2909_v48 }
 0x589   :  { %2938 = vmatpush1.bf16.msra.mxu0 %v2906_v45 }
 0x58a   :  { %2989 = vmatpush1.bf16.msra.mxu1 %v2908_v14  ;;  %2939 = vmatprep.subr.bf16.mxu0 %v2912_v27 }
 0x58b   :  { %2990 = vmatprep.subr.bf16.mxu1 %v2914_v23 }
 0x58d   :  { %2940 = vmatpush1.bf16.msra.mxu0 %v2911_v50 }
 0x58e   :  { %2991 = vmatpush1.bf16.msra.mxu1 %v2913_v60  ;;  %2941 = vmatprep.subr.bf16.mxu0 %v2917_v35 }
 0x58f   :  { %2992 = vmatprep.subr.bf16.mxu1 %v2919_v53 }
 0x591   :  { %2942 = vmatpush1.bf16.msra.mxu0 %v2916_v16 }
 0x592   :  { %2993 = vmatpush1.bf16.msra.mxu1 %v2918_v30  ;;  %2943 = vmatprep.subr.bf16.mxu0 %v2922_v32 }
 0x593   :  { %2994 = vmatprep.subr.bf16.mxu1 %v2924_v54 }
 0x596   :  { %2995 = vmatpush1.bf16.msra.mxu1 %v2923_v51 }
 0x597   :  { %2996 = vmatprep.subr.bf16.mxu1 %v2929_v49 }
 0x59a   :  { %2997 = vmatpush1.bf16.msra.mxu1 %v2928_v0 }
 0x5d9   :  { %v2418_v24 = vpop.xlane.xlu0 %2417 }
 0x5da   :  { %v2421_v55 = vsub.f32 %v11303_v22, %v2418_v24  ;;  %v2921_v22 = vld [vmem:[#allocation3 + $0xf0] sm:$0xff] }
 0x5db   :  { %2944 = vmatpush1.bf16.msra.mxu0 %v2921_v22 }
 0x5dc   :  { %v2426_v57 = vmul.f32 1.442695, %v2421_v55  ;;  %v2416_v63 = vpop.xlane.xlu1 %2415  ;;  %2945 = vmatprep.subr.bf16.mxu0 %v2927_v20 }
 0x5dd   :  { %v2420_v9 = vsub.f32 %v11310_v62, %v2416_v63  ;;  %v2414_v43 = vpop.xlane.xlu0 %2413  ;;  %v2926_v62 = vld [vmem:[#allocation3 + $0x118] sm:$0xff] }
 0x5de   :  { %9426 = vpow2.f32 %v2426_v57  ;;  %v2419_v11 = vsub.f32 %v11312_v13, %v2414_v43 }
 0x5df   :  { %v2424_v61 = vmul.f32 1.442695, %v2420_v9  ;;  %2946 = vmatpush1.bf16.msra.mxu0 %v2926_v62 }
 0x5e0   :  { %v2422_v2 = vmul.f32 1.442695, %v2419_v11  ;;  %8651 = vmatprep.subr.bf16.mxu0 %v11332_v12 }
 0x5e1   :  { %9428 = vpow2.f32 %v2424_v61 }
 0x5e2   :  { %9430 = vpow2.f32 %v2422_v2 }
 0x5e8   :  { %v11335_v13 = vpop.eup %9426 }
 0x5e9   :  { %2432 = vadd.xlane.f32.xlu1 %v11335_v13 }
 0x5eb   :  { %v11338_v25 = vpop.eup %9428 }
 0x5ec   :  { %v11340_v18 = vpop.eup %9430  ;;  %2430 = vadd.xlane.f32.xlu0 %v11338_v25 }
 0x5ed   :  { %2428 = vadd.xlane.f32.xlu1 %v11340_v18 }
 0x630   :  { %v2626_v52 = vpop.f32.mrb[24].mxu0  ;;  %v2677_v26 = vpop.f32.mrb[24].mxu1 }
 0x631   :  { %v8975_v46 = vadd.f32 %v2626_v52, %v10622_v4  ;;  %v2628_v34 = vpop.f32.mrb[25].mxu0  ;;  %v2679_v33 = vpop.f32.mrb[25].mxu1  ;;  %v9011_v21 = vadd.f32 %v2677_v26, %v10624_v5 }
 0x632   :  { %v8976_v10 = vadd.f32 %v2628_v34, %v10626_v6  ;;  %v2630_v19 = vpop.f32.mrb[26].mxu0  ;;  %v2681_v44 = vpop.f32.mrb[26].mxu1  ;;  %v9012_v24 = vadd.f32 %v2679_v33, %v10628_v7 }
 0x633   :  { %v8198_v37 = vmul.f32 -1.442695, %v8975_v46  ;;  %v8977_v39 = vadd.f32 %v2630_v19, %v10622_v4  ;;  %v2632_v28 = vpop.f32.mrb[27].mxu0  ;;  %v2683_v41 = vpop.f32.mrb[27].mxu1  ;;  %v9013_v14 = vadd.f32 %v2681_v44, %v10624_v5  ;;  %v8200_v32 = vmul.f32 -1.442695, %v9011_v21 }
 0x634   :  { %v8199_v36 = vmul.f32 -1.442695, %v8976_v10  ;;  %v8978_v15 = vadd.f32 %v2632_v28, %v10626_v6 }
 0x635   :  { %9432 = vpow2.f32 %v8198_v37  ;;  %v8201_v42 = vmul.f32 -1.442695, %v8977_v39  ;;  %v8203_v63 = vmul.f32 -1.442695, %v9013_v14 }
 0x636   :  { %v8202_v3 = vmul.f32 -1.442695, %v8978_v15  ;;  %9434 = vpow2.f32 %v8199_v36 }
 0x637   :  { %9436 = vpow2.f32 %v8201_v42 }
 0x638   :  { %v2636_v45 = vpop.f32.mrb[148].mxu0  ;;  %v2687_v48 = vpop.f32.mrb[144].mxu1  ;;  %9438 = vpow2.f32 %v8202_v3 }
 0x639   :  { %v2813_v27 = vadd.f32 %v2636_v45, %v10757_v56  ;;  %v2638_v50 = vpop.f32.mrb[149].mxu0  ;;  %v2689_v23 = vpop.f32.mrb[145].mxu1  ;;  %v9014_v56 = vadd.f32 %v2683_v41, %v10628_v7  ;;  %v2815_v61 = vadd.f32 %v2687_v48, %v10760_v59 }
 0x63a   :  { %v2814_v60 = vadd.f32 %v2638_v50, %v10763_v1  ;;  %v2640_v55 = vpop.f32.mrb[150].mxu0  ;;  %v2691_v35 = vpop.f32.mrb[146].mxu1  ;;  %v2816_v2 = vadd.f32 %v2689_v23, %v10766_v8  ;;  %v8197_v8 = vld [vmem:[%s12337_s3 + $0x3] ss:$0 sm:$0xff] }
 0x63b   :  { %v8204_v16 = vmul.f32 -1.442695, %v2813_v27  ;;  %v2641_v53 = vpop.f32.mrb[151].mxu0  ;;  %v2692_v30 = vpop.f32.mrb[147].mxu1  ;;  %v8206_v62 = vmul.f32 -1.442695, %v2815_v61 }
 0x63c   :  { %v8205_v57 = vmul.f32 -1.442695, %v2814_v60  ;;  %v2905_v61 = vld [vmem:[#allocation3 + $0x70] sm:$0xff] }
 0x63d   :  { %9440 = vpow2.f32 %v8204_v16 }
 0x63e   :  { %9442 = vtanh.f32 %v9012_v24 }
 0x63f   :  { %v9433_v54 = vpop.eup %9432  ;;  %9444 = vpow2.f32 %v8205_v57 }
 0x640   :  { %v2844_v9 = vadd.f32 1.0, %v9433_v54  ;;  %9446 = vpow2.f32 %v8200_v32  ;;  %v9435_v43 = vpop.eup %9434 }
 0x641   :  { %9448 = vpow2.f32 %v8203_v63  ;;  %v9437_v11 = vpop.eup %9436  ;;  %v2845_v1 = vadd.f32 1.0, %v9435_v43 }
 0x642   :  { %9450 = vrcp.f32 %v2844_v9  ;;  %v2847_v22 = vadd.f32 1.0, %v9437_v11  ;;  %v9439_v51 = vpop.eup %9438  ;;  %v2900_v11 = vld [vmem:[#allocation3 + $0x48] sm:$0xff] }
 0x643   :  { %9452 = vtanh.f32 %v9014_v56  ;;  %v2848_v20 = vadd.f32 1.0, %v9439_v51 }
 0x644   :  { %9454 = vrcp.f32 %v2845_v1 }
 0x645   :  { %9456 = vrcp.f32 %v2847_v22 }
 0x646   :  { %9458 = vrcp.f32 %v2848_v20  ;;  %v2910_v20 = vld [vmem:[#allocation3 + $0x98] sm:$0xff] }
 0x647   :  { %v9441_v49 = vpop.eup %9440  ;;  %9460 = vtanh.f32 %v2816_v2  ;;  %v2915_v2 = vld [vmem:[#allocation3 + $0xc0] sm:$0xff] }
 0x648   :  { %v9443_v0 = vpop.eup %9442  ;;  %v2850_v52 = vadd.f32 1.0, %v9441_v49 }
 0x649   :  { %v9445_v26 = vpop.eup %9444 }
 0x64a   :  { %v9447_v46 = vpop.eup %9446  ;;  %9462 = vrcp.f32 %v2850_v52  ;;  %v2851_v34 = vadd.f32 1.0, %v9445_v26  ;;  %v2930_v26 = vld [vmem:[#allocation3 + $0x138] sm:$0xff] }
 0x64b   :  { %v9449_v33 = vpop.eup %9448  ;;  %9464 = vpow2.f32 %v8206_v62  ;;  %v2846_v39 = vadd.f32 1.0, %v9447_v46 }
 0x64c   :  { %v9451_v10 = vpop.eup %9450  ;;  %9466 = vrcp.f32 %v2851_v34  ;;  %v2849_v3 = vadd.f32 1.0, %v9449_v33 }
 0x64d   :  { %v9453_v59 = vpop.eup %9452  ;;  %v2877_v19 = vmul.f32 %v9451_v10, %v9443_v0  ;;  %9468 = vrcp.f32 %v2846_v39  ;;  %v2925_v0 = vld [vmem:[#allocation3 + $0x110] sm:$0xff] }
 0x64e   :  { %v9455_v44 = vpop.eup %9454 }
 0x64f   :  { %v9457_v37 = vpop.eup %9456  ;;  %v2874_v28 = vmul.f32 %v9455_v44, %v11301_v58 }
 0x650   :  { %v2878_v41 = vmul.f32 %v9457_v37, %v9453_v59  ;;  %v8649_v36 = vpop.f32.mrb[148].mxu1  ;;  %v9459_v15 = vpop.eup %9458 }
 0x651   :  { %v11360_v42 = vadd.f32 %v2877_v19, %v2874_v28  ;;  %v11362_v21 = vadd.f32 %v8649_v36, %v8197_v8  ;;  %v2728_v45 = vpop.f32.mrb[149].mxu1  ;;  %v2875_v48 = vmul.f32 %v9459_v15, %v11308_v40  ;;  %v9461_v27 = vpop.eup %9460 }
 0x652   :  { %v8650_v14 = vpop.f32.mrb[150].mxu1  ;;  %v11371_v35 = vadd.f32 %v8197_v8, %v2728_v45  ;;  %v3232_v45 = vld [vmem:[#allocation3 + $0x158] sm:$0xff] }
 0x653   :  { %v2731_v50 = vpop.f32.mrb[151].mxu1  ;;  %2757 = vmax.xlane.f32.xlu0 %v11362_v21  ;;  %9470 = vtanh.f32 %v11360_v42  ;;  %v11367_v58 = vadd.f32 %v2878_v41, %v2875_v48  ;;  %3320 = vmatprep.subr.bf16.mxu1 %v3232_v45  ;;  %v3230_v48 = vld [vmem:[#allocation3 + $0x148] sm:$0xff]  ;;  %v3231_v14 = vld [vmem:[#allocation3 + $0x150] sm:$0xff] }
 0x654   :  { %v9463_v23 = vpop.eup %9462  ;;  %v11369_v24 = vadd.f32 %v8197_v8, %v2731_v50  ;;  %9472 = vrcp.f32 %v2849_v3  ;;  %v3237_v50 = vld [vmem:[#allocation3 + $0x180] sm:$0xff] }
 0x655   :  { %v9465_v60 = vpop.eup %9464  ;;  %v2879_v55 = vmul.f32 %v9463_v23, %v9461_v27  ;;  %9474 = vtanh.f32 %v11367_v58  ;;  %v3229_v27 = vld [vmem:[#allocation3 + $0x140] sm:$0xff]  ;;  %v3236_v23 = vld [vmem:[#allocation3 + $0x178] sm:$0xff] }
 0x656   :  { %v9467_v16 = vpop.eup %9466  ;;  %2755 = vmax.xlane.f32.xlu1 %v11369_v24  ;;  %v2852_v53 = vadd.f32 1.0, %v9465_v60  ;;  %v3234_v60 = vld [vmem:[#allocation3 + $0x168] sm:$0xff] }
 0x657   :  { %v2876_v40 = vmul.f32 %v9467_v16, %v11318_v29  ;;  %2753 = vmax.xlane.f32.xlu0 %v11371_v35  ;;  %v9469_v32 = vpop.eup %9468  ;;  %v3239_v16 = vld [vmem:[#allocation3 + $0x190] sm:$0xff] }
 0x659   :  { %v11377_v30 = vadd.f32 %v2879_v55, %v2876_v40  ;;  %v3241_v55 = vld [vmem:[#allocation3 + $0x1a0] sm:$0xff]  ;;  %v3247_v40 = vld [vmem:[#allocation3 + $0x1d0] sm:$0xff] }
 0x65b   :  { %9476 = vtanh.f32 %v11377_v30 }
 0x65c   :  { %9478 = vrcp.f32 %v2852_v53  ;;  %v3245_v53 = vld [vmem:[#allocation3 + $0x1c0] sm:$0xff] }
 0x65d   :  { %v9471_v57 = vpop.eup %9470 }
 0x65e   :  { %v9473_v63 = vpop.eup %9472  ;;  %v2886_v56 = vmul.f32 %v9471_v57, %v9469_v32  ;;  %v3246_v32 = vld [vmem:[#allocation3 + $0x1c8] sm:$0xff]  ;;  %v3244_v57 = vld [vmem:[#allocation3 + $0x1b8] sm:$0xff] }
 0x65f   :  { %v9475_v54 = vpop.eup %9474 }
 0x660   :  { %v2887_v9 = vmul.f32 %v9475_v54, %v9473_v63  ;;  %v3252_v63 = vld [vmem:[#allocation3 + $0x1f8] sm:$0xff]  ;;  %v3250_v54 = vld [vmem:[#allocation3 + $0x1e8] sm:$0xff] }
 0x662   :  { %v2889_v43 = vpack.c.bf16 %v2887_v9, %v2886_v56  ;;  %v3251_v56 = vld [vmem:[#allocation3 + $0x1f0] sm:$0xff] }
 0x664   :  { %2964 = vmatmul.mubr.bf16.vlgmr.msra.gmra.mrb[152].mxu0 %v2889_v43  ;;  %3015 = vmatmul.mubr.bf16.vlgmr.msra.gmra.mrb[152].mxu1 %v2889_v43 }
 0x665   :  { %v9477_v1 = vpop.eup %9476  ;;  %8652 = vmatpush3.bf16.msra.mxu0 %v11332_v12  ;;  %2973 = vmatprep.mubr.bf16.mxu0 %v12475_v38  ;;  %v2920_v12 = vld [vmem:[#allocation3 + $0xe8] sm:$0xff] }
 0x666   :  { %v9479_v29 = vpop.eup %9478  ;;  %8653 = vmatprep.subr.bf16.mxu0 %v2900_v11  ;;  %3024 = vmatprep.mubr.bf16.mxu1 %v12475_v38 }
 0x667   :  { %v2888_v22 = vmul.f32 %v9479_v29, %v9477_v1  ;;  %3321 = vmatpush1.bf16.msra.mxu1 %v3231_v14  ;;  %v3257_v1 = vld [vmem:[#allocation3 + $0x220] sm:$0xff]  ;;  %v3255_v29 = vld [vmem:[#allocation3 + $0x210] sm:$0xff] }
 0x668   :  { %3322 = vmatprep.subr.bf16.mxu1 %v3237_v50 }
 0x669   :  { %8654 = vmatpush3.bf16.msra.mxu0 %v2900_v11  ;;  %v2890_v51 = vpack.c.bf16 %v2888_v22, %v2888_v22  ;;  %v3256_v22 = vld [vmem:[#allocation3 + $0x218] sm:$0xff] }
 0x66a   :  { %8655 = vmatprep.subr.bf16.mxu0 %v2905_v61 }
 0x66b   :  { %3323 = vmatpush1.bf16.msra.mxu1 %v3236_v23 }
 0x66c   :  { %2974 = vmatmul.mubr.bf16.gmra.mrb[156].mxu0 %v2890_v51  ;;  %3025 = vmatmul.mubr.bf16.gmra.mrb[156].mxu1 %v2890_v51 }
 0x66d   :  { %8656 = vmatpush3.bf16.msra.mxu0 %v2905_v61  ;;  %8667 = vmatprep.mubr.bf16.mxu0 %v2889_v43  ;;  %v3249_v43 = vld [vmem:[#allocation3 + $0x1e0] sm:$0xff]  ;;  %v3254_v61 = vld [vmem:[#allocation3 + $0x208] sm:$0xff] }
 0x66e   :  { %8657 = vmatprep.subr.bf16.mxu0 %v2910_v20  ;;  %3352 = vmatprep.mubr.bf16.mxu1 %v12475_v38 }
 0x671   :  { %8658 = vmatpush3.bf16.msra.mxu0 %v2910_v20 }
 0x672   :  { %8659 = vmatprep.subr.bf16.mxu0 %v2915_v2 }
 0x675   :  { %8660 = vmatpush3.bf16.msra.mxu0 %v2915_v2 }
 0x676   :  { %v2433_v49 = vpop.xlane.xlu1 %2432  ;;  %8661 = vmatprep.subr.bf16.mxu0 %v2920_v12 }
 0x677   :  { %9480 = vrcp.f32 %v2433_v49 }
 0x679   :  { %v2431_v62 = vpop.xlane.xlu0 %2430  ;;  %8662 = vmatpush3.bf16.msra.mxu0 %v2920_v12  ;;  %v3260_v12 = vld [vmem:[#allocation3 + $0x238] sm:$0xff] }
 0x67a   :  { %9482 = vrcp.f32 %v2431_v62  ;;  %v2429_v52 = vpop.xlane.xlu1 %2428  ;;  %8663 = vmatprep.subr.bf16.mxu0 %v2925_v0 }
 0x67b   :  { %9484 = vrcp.f32 %v2429_v52 }
 0x67d   :  { %8664 = vmatpush3.bf16.msra.mxu0 %v2925_v0 }
 0x67e   :  { %8665 = vmatprep.subr.bf16.mxu0 %v2930_v26 }
 0x681   :  { %v9481_v46 = vpop.eup %9480  ;;  %8666 = vmatpush3.bf16.msra.mxu0 %v2930_v26  ;;  %v3259_v26 = vld [vmem:[#allocation3 + $0x230] sm:$0xff] }
 0x682   :  { %v2439_v34 = vmul.f32 %v9481_v46, %v2433_v49  ;;  %3269 = vmatprep.subr.bf16.mxu0 %v3230_v48 }
 0x684   :  { %v9483_v33 = vpop.eup %9482  ;;  %v2442_v10 = vsub.f32 2.0, %v2439_v34  ;;  %8668 = vmatmul.mubr.bf16.vlgmr.msra.gmra.mrb[160].mxu0 %v2890_v51  ;;  %v3262_v51 = vld [vmem:[#allocation3 + $0x248] sm:$0xff] }
 0x685   :  { %v9485_v59 = vpop.eup %9484  ;;  %v2438_v19 = vmul.f32 %v9483_v33, %v2431_v62  ;;  %3301 = vmatprep.mubr.bf16.mxu0 %v12475_v38  ;;  %3270 = vmatpush1.bf16.msra.mxu0 %v3229_v27 }
 0x686   :  { %v2445_v44 = vmul.f32 %v9481_v46, %v2442_v10  ;;  %v2437_v8 = vmul.f32 %v9485_v59, %v2429_v52  ;;  %v3267_v46 = vld [vmem:[#allocation3 + $0x270] sm:$0xff]  ;;  %v3264_v10 = vld [vmem:[#allocation3 + $0x258] sm:$0xff] }
 0x687   :  { %v2441_v37 = vsub.f32 2.0, %v2438_v19 }
 0x688   :  { %v2448_v39 = vmul.f32 %v11335_v13, %v2445_v44  ;;  %v2440_v28 = vsub.f32 2.0, %v2437_v8  ;;  %v3235_v13 = vld [vmem:[#allocation3 + $0x170] sm:$0xff] }
 0x689   :  { %v2444_v41 = vmul.f32 %v9483_v33, %v2441_v37  ;;  %3271 = vmatprep.subr.bf16.mxu0 %v3235_v13  ;;  %v3265_v33 = vld [vmem:[#allocation3 + $0x260] sm:$0xff]  ;;  %v12476_v13 = vld [vmem:[#allocation20_spill] sm:$0xff] }
 0x68a   :  { %2452 = vst [vmem:[#allocation10 + $0x40] sm:$0xff] %v2448_v39  ;;  %v2443_v36 = vmul.f32 %v9485_v59, %v2440_v28  ;;  %3272 = vmatpush1.bf16.msra.mxu0 %v3234_v60  ;;  %v11391_v59 = vld [vmem:[#allocation3 + $0x160] sm:$0xff] }
 0x68b   :  { %v2447_v15 = vmul.f32 %v11338_v25, %v2444_v41  ;;  %v3242_v25 = vld [vmem:[#allocation3 + $0x1a8] sm:$0xff] }
 0x68c   :  { %v2446_v3 = vmul.f32 %v11340_v18, %v2443_v36  ;;  %3324 = vmatprep.subr.bf16.mxu1 %v3242_v25  ;;  %v3240_v18 = vld [vmem:[#allocation3 + $0x198] sm:$0xff] }
 0x68d   :  { %2451 = vst [vmem:[#allocation10 + $0x38] sm:$0xff] %v2447_v15  ;;  %3273 = vmatprep.subr.bf16.mxu0 %v3240_v18  ;;  %3325 = vmatpush1.bf16.msra.mxu1 %v3241_v55  ;;  %v12477_v18 = vld [vmem:[#allocation17_spill] sm:$0xff] }
 0x68e   :  { %2450 = vst [vmem:[#allocation10 + $0x30] sm:$0xff] %v2446_v3  ;;  %3274 = vmatpush1.bf16.msra.mxu0 %v3239_v16  ;;  %3326 = vmatprep.subr.bf16.mxu1 %v3247_v40 }
 0x68f   :  { %3275 = vmatprep.subr.bf16.mxu0 %v3245_v53  ;;  %v12479_v53 = vld [vmem:[#allocation22_spill] sm:$0xff] }
 0x691   :  { %3327 = vmatpush1.bf16.msra.mxu1 %v3246_v32 }
 0x692   :  { %3276 = vmatpush1.bf16.msra.mxu0 %v3244_v57  ;;  %3328 = vmatprep.subr.bf16.mxu1 %v3252_v63  ;;  %v12480_v63 = vld [vmem:[#allocation18_spill] sm:$0xff] }
 0x693   :  { %3277 = vmatprep.subr.bf16.mxu0 %v3250_v54 }
 0x695   :  { %3329 = vmatpush1.bf16.msra.mxu1 %v3251_v56  ;;  %v12481_v56 = vld [vmem:[#allocation24_spill] sm:$0xff] }
 0x696   :  { %3278 = vmatpush1.bf16.msra.mxu0 %v3249_v43  ;;  %3330 = vmatprep.subr.bf16.mxu1 %v3257_v1 }
 0x697   :  { %3279 = vmatprep.subr.bf16.mxu0 %v3255_v29 }
 0x699   :  { %3331 = vmatpush1.bf16.msra.mxu1 %v3256_v22 }
 0x69a   :  { %3280 = vmatpush1.bf16.msra.mxu0 %v3254_v61  ;;  %3332 = vmatprep.subr.bf16.mxu1 %v3262_v51 }
 0x69b   :  { %3281 = vmatprep.subr.bf16.mxu0 %v3260_v12  ;;  %v12482_v12 = vld [vmem:[#allocation21_spill] sm:$0xff] }
 0x69e   :  { %3282 = vmatpush1.bf16.msra.mxu0 %v3259_v26 }
 0x69f   :  { %3283 = vmatprep.subr.bf16.mxu0 %v3265_v33 }
 0x6a2   :  { %3284 = vmatpush1.bf16.msra.mxu0 %v3264_v10  ;;  %v12484_v10 = vld [vmem:[#allocation25_spill] sm:$0xff] }
 0x6e0   :  { %v2758_v9 = vpop.xlane.xlu0 %2757 }
 0x6e1   :  { %v2761_v11 = vsub.f32 %v11362_v21, %v2758_v9  ;;  %v3261_v21 = vld [vmem:[#allocation3 + $0x240] sm:$0xff] }
 0x6e2   :  { %3333 = vmatpush1.bf16.msra.mxu1 %v3261_v21 }
 0x6e3   :  { %v2766_v20 = vmul.f32 1.442695, %v2761_v11  ;;  %v2756_v2 = vpop.xlane.xlu1 %2755  ;;  %3334 = vmatprep.subr.bf16.mxu1 %v3267_v46  ;;  %v12483_v46 = vld [vmem:[#allocation23_spill] sm:$0xff] }
 0x6e4   :  { %v2760_v49 = vsub.f32 %v11369_v24, %v2756_v2  ;;  %v2754_v62 = vpop.xlane.xlu0 %2753  ;;  %v3266_v24 = vld [vmem:[#allocation3 + $0x268] sm:$0xff] }
 0x6e5   :  { %9486 = vpow2.f32 %v2766_v20  ;;  %v2759_v0 = vsub.f32 %v11371_v35, %v2754_v62 }
 0x6e6   :  { %v2764_v52 = vmul.f32 1.442695, %v2760_v49  ;;  %3335 = vmatpush1.bf16.msra.mxu1 %v3266_v24 }
 0x6e7   :  { %v2762_v34 = vmul.f32 1.442695, %v2759_v0  ;;  %8671 = vmatprep.subr.bf16.mxu1 %v11391_v59 }
 0x6e8   :  { %9488 = vpow2.f32 %v2764_v52 }
 0x6e9   :  { %9490 = vpow2.f32 %v2762_v34 }
 0x6ef   :  { %v11394_v35 = vpop.eup %9486 }
 0x6f0   :  { %2772 = vadd.xlane.f32.xlu1 %v11394_v35 }
 0x6f2   :  { %v11397_v19 = vpop.eup %9488 }
 0x6f3   :  { %v11399_v44 = vpop.eup %9490  ;;  %2770 = vadd.xlane.f32.xlu0 %v11397_v19 }
 0x6f4   :  { %2768 = vadd.xlane.f32.xlu1 %v11399_v44 }
 0x737   :  { %v2965_v8 = vpop.f32.mrb[152].mxu0  ;;  %v3016_v37 = vpop.f32.mrb[152].mxu1 }
 0x738   :  { %v3143_v39 = vadd.f32 %v2965_v8, %v10769_v17  ;;  %v2967_v28 = vpop.f32.mrb[153].mxu0  ;;  %v3018_v41 = vpop.f32.mrb[153].mxu1  ;;  %v3145_v17 = vadd.f32 %v3016_v37, %v12477_v18 }
 0x739   :  { %v3144_v36 = vadd.f32 %v2967_v28, %v10775_v31  ;;  %v2969_v15 = vpop.f32.mrb[154].mxu0  ;;  %v3020_v3 = vpop.f32.mrb[154].mxu1  ;;  %v12478_v31 = vld [vmem:[#allocation19_spill] sm:$0xff]  ;;  %v3146_v54 = vadd.f32 %v3018_v41, %v12480_v63 }
 0x73a   :  { %v8208_v45 = vmul.f32 -1.442695, %v3143_v39  ;;  %v3147_v48 = vadd.f32 %v2969_v15, %v10781_v47  ;;  %v2971_v14 = vpop.f32.mrb[155].mxu0  ;;  %v3022_v27 = vpop.f32.mrb[155].mxu1  ;;  %v3149_v40 = vadd.f32 %v3020_v3, %v12478_v31  ;;  %v8210_v61 = vmul.f32 -1.442695, %v3145_v17 }
 0x73b   :  { %v8209_v50 = vmul.f32 -1.442695, %v3144_v36  ;;  %v3148_v23 = vadd.f32 %v2971_v14, %v12476_v13  ;;  %v3150_v49 = vadd.f32 %v3022_v27, %v12482_v12  ;;  %v8207_v13 = vld [vmem:[%s12337_s3] ss:$0 sm:$0xff] }
 0x73c   :  { %9492 = vpow2.f32 %v8208_v45  ;;  %v8211_v60 = vmul.f32 -1.442695, %v3147_v48  ;;  %v8213_v20 = vmul.f32 -1.442695, %v3149_v40 }
 0x73d   :  { %v8212_v25 = vmul.f32 -1.442695, %v3148_v23  ;;  %9494 = vpow2.f32 %v8209_v50 }
 0x73e   :  { %9496 = vpow2.f32 %v8211_v60 }
 0x73f   :  { %v2975_v55 = vpop.f32.mrb[156].mxu0  ;;  %v3026_v16 = vpop.f32.mrb[156].mxu1  ;;  %9498 = vpow2.f32 %v8212_v25 }
 0x740   :  { %v3151_v32 = vadd.f32 %v2975_v55, %v12479_v53  ;;  %v2977_v57 = vpop.f32.mrb[157].mxu0  ;;  %v3028_v47 = vpop.f32.mrb[157].mxu1  ;;  %v3153_v34 = vadd.f32 %v3026_v16, %v12483_v46 }
 0x741   :  { %v3152_v9 = vadd.f32 %v2977_v57, %v12481_v56  ;;  %v2979_v43 = vpop.f32.mrb[158].mxu0  ;;  %v3030_v11 = vpop.f32.mrb[158].mxu1  ;;  %v3154_v8 = vadd.f32 %v3028_v47, %v12484_v10 }
 0x742   :  { %v8214_v1 = vmul.f32 -1.442695, %v3151_v32  ;;  %v2980_v29 = vpop.f32.mrb[159].mxu0  ;;  %v3031_v22 = vpop.f32.mrb[159].mxu1  ;;  %v8216_v39 = vmul.f32 -1.442695, %v3153_v34 }
 0x743   :  { %v8215_v51 = vmul.f32 -1.442695, %v3152_v9  ;;  %v3248_v34 = vld [vmem:[#allocation3 + $0x1d8] sm:$0xff] }
 0x744   :  { %9500 = vpow2.f32 %v8214_v1 }
 0x745   :  { %9502 = vtanh.f32 %v3146_v54 }
 0x746   :  { %v9493_v2 = vpop.eup %9492  ;;  %9504 = vpow2.f32 %v8215_v51 }
 0x747   :  { %v3182_v62 = vadd.f32 1.0, %v9493_v2  ;;  %9506 = vpow2.f32 %v8210_v61  ;;  %v9495_v0 = vpop.eup %9494 }
 0x748   :  { %9508 = vpow2.f32 %v8213_v20  ;;  %v9497_v21 = vpop.eup %9496  ;;  %v3183_v52 = vadd.f32 1.0, %v9495_v0  ;;  %v3238_v0 = vld [vmem:[#allocation3 + $0x188] sm:$0xff] }
 0x749   :  { %9510 = vrcp.f32 %v3182_v62  ;;  %v3185_v26 = vadd.f32 1.0, %v9497_v21  ;;  %v9499_v33 = vpop.eup %9498 }
 0x74a   :  { %9512 = vtanh.f32 %v3150_v49  ;;  %v3186_v24 = vadd.f32 1.0, %v9499_v33  ;;  %v3253_v33 = vld [vmem:[#allocation3 + $0x200] sm:$0xff] }
 0x74b   :  { %9514 = vrcp.f32 %v3183_v52 }
 0x74c   :  { %9516 = vrcp.f32 %v3185_v26  ;;  %v3243_v26 = vld [vmem:[#allocation3 + $0x1b0] sm:$0xff] }
 0x74d   :  { %9518 = vrcp.f32 %v3186_v24 }
 0x74e   :  { %v9501_v37 = vpop.eup %9500  ;;  %9520 = vtanh.f32 %v3154_v8  ;;  %v3263_v8 = vld [vmem:[#allocation3 + $0x250] sm:$0xff] }
 0x74f   :  { %v9503_v28 = vpop.eup %9502  ;;  %v3188_v41 = vadd.f32 1.0, %v9501_v37 }
 0x750   :  { %v9505_v36 = vpop.eup %9504 }
 0x751   :  { %v9507_v15 = vpop.eup %9506  ;;  %9522 = vrcp.f32 %v3188_v41  ;;  %v3189_v3 = vadd.f32 1.0, %v9505_v36 }
 0x752   :  { %v9509_v45 = vpop.eup %9508  ;;  %9524 = vpow2.f32 %v8216_v39  ;;  %v3184_v60 = vadd.f32 1.0, %v9507_v15  ;;  %v3268_v39 = vld [vmem:[#allocation3 + $0x278] sm:$0xff] }
 0x753   :  { %v9511_v48 = vpop.eup %9510  ;;  %9526 = vrcp.f32 %v3189_v3  ;;  %v3187_v31 = vadd.f32 1.0, %v9509_v45 }
 0x754   :  { %v9513_v14 = vpop.eup %9512  ;;  %v3215_v27 = vmul.f32 %v9511_v48, %v9503_v28  ;;  %9528 = vrcp.f32 %v3184_v60 }
 0x755   :  { %v9515_v50 = vpop.eup %9514 }
 0x756   :  { %v9517_v23 = vpop.eup %9516  ;;  %v3212_v25 = vmul.f32 %v9515_v50, %v11360_v42 }
 0x757   :  { %v3216_v18 = vmul.f32 %v9517_v23, %v9513_v14  ;;  %v8669_v17 = vpop.f32.mrb[160].mxu0  ;;  %v9519_v55 = vpop.eup %9518 }
 0x758   :  { %v11419_v16 = vadd.f32 %v3215_v27, %v3212_v25  ;;  %v11421_v40 = vadd.f32 %v8669_v17, %v8207_v13  ;;  %v3067_v53 = vpop.f32.mrb[161].mxu0  ;;  %v3213_v32 = vmul.f32 %v9519_v55, %v11367_v58  ;;  %v9521_v47 = vpop.eup %9520  ;;  %v3568_v17 = vld [vmem:[#allocation3 + $0x288] sm:$0xff]  ;;  %v3567_v55 = vld [vmem:[#allocation3 + $0x280] sm:$0xff] }
 0x759   :  { %v8670_v57 = vpop.f32.mrb[162].mxu0  ;;  %v11430_v11 = vadd.f32 %v8207_v13, %v3067_v53  ;;  %3607 = vmatprep.subr.bf16.mxu0 %v3568_v17  ;;  %v3569_v53 = vld [vmem:[#allocation3 + $0x290] sm:$0xff] }
 0x75a   :  { %v3070_v63 = vpop.f32.mrb[163].mxu0  ;;  %3095 = vmax.xlane.f32.xlu0 %v11421_v40  ;;  %9530 = vtanh.f32 %v11419_v16  ;;  %v11426_v42 = vadd.f32 %v3216_v18, %v3213_v32  ;;  %v3573_v32 = vld [vmem:[#allocation3 + $0x2b0] sm:$0xff]  ;;  %v3575_v57 = vld [vmem:[#allocation3 + $0x2c0] sm:$0xff] }
 0x75b   :  { %v9523_v54 = vpop.eup %9522  ;;  %v11428_v56 = vadd.f32 %v8207_v13, %v3070_v63  ;;  %9532 = vrcp.f32 %v3187_v31  ;;  %v3570_v31 = vld [vmem:[#allocation3 + $0x298] sm:$0xff]  ;;  %v3580_v63 = vld [vmem:[#allocation3 + $0x2e8] sm:$0xff] }
 0x75c   :  { %v9525_v9 = vpop.eup %9524  ;;  %v3217_v43 = vmul.f32 %v9523_v54, %v9521_v47  ;;  %9534 = vtanh.f32 %v11426_v42  ;;  %v3574_v47 = vld [vmem:[#allocation3 + $0x2b8] sm:$0xff]  ;;  %v3579_v54 = vld [vmem:[#allocation3 + $0x2e0] sm:$0xff] }
 0x75d   :  { %v9527_v1 = vpop.eup %9526  ;;  %3093 = vmax.xlane.f32.xlu1 %v11428_v56  ;;  %v3190_v29 = vadd.f32 1.0, %v9525_v9  ;;  %v3583_v9 = vld [vmem:[#allocation3 + $0x300] sm:$0xff] }
 0x75e   :  { %v3214_v58 = vmul.f32 %v9527_v1, %v11377_v30  ;;  %3091 = vmax.xlane.f32.xlu0 %v11430_v11  ;;  %v9529_v61 = vpop.eup %9528  ;;  %v3585_v1 = vld [vmem:[#allocation3 + $0x310] sm:$0xff] }
 0x760   :  { %v11436_v22 = vadd.f32 %v3217_v43, %v3214_v58  ;;  %v3582_v43 = vld [vmem:[#allocation3 + $0x2f8] sm:$0xff]  ;;  %v3584_v58 = vld [vmem:[#allocation3 + $0x308] sm:$0xff] }
 0x762   :  { %9536 = vtanh.f32 %v11436_v22 }
 0x763   :  { %9538 = vrcp.f32 %v3190_v29  ;;  %v3588_v29 = vld [vmem:[#allocation3 + $0x328] sm:$0xff] }
 0x764   :  { %v9531_v51 = vpop.eup %9530 }
 0x765   :  { %v9533_v20 = vpop.eup %9532  ;;  %v3224_v12 = vmul.f32 %v9531_v51, %v9529_v61  ;;  %v3587_v61 = vld [vmem:[#allocation3 + $0x320] sm:$0xff]  ;;  %v3590_v51 = vld [vmem:[#allocation3 + $0x338] sm:$0xff] }
 0x766   :  { %v9535_v2 = vpop.eup %9534 }
 0x767   :  { %v3225_v49 = vmul.f32 %v9535_v2, %v9533_v20  ;;  %v3589_v2 = vld [vmem:[#allocation3 + $0x330] sm:$0xff] }
 0x769   :  { %v3227_v62 = vpack.c.bf16 %v3225_v49, %v3224_v12  ;;  %v3593_v49 = vld [vmem:[#allocation3 + $0x350] sm:$0xff] }
 0x76b   :  { %3302 = vmatmul.mubr.bf16.vlgmr.msra.gmra.mrb[36].mxu0 %v3227_v62  ;;  %3353 = vmatmul.mubr.bf16.vlgmr.msra.gmra.mrb[36].mxu1 %v3227_v62 }
 0x76c   :  { %v9537_v21 = vpop.eup %9536  ;;  %8672 = vmatpush3.bf16.msra.mxu1 %v11391_v59  ;;  %3311 = vmatprep.mubr.bf16.mxu0 %v12475_v38  ;;  %v3258_v59 = vld [vmem:[#allocation3 + $0x228] sm:$0xff] }
 0x76d   :  { %v9539_v30 = vpop.eup %9538  ;;  %8673 = vmatprep.subr.bf16.mxu1 %v3238_v0  ;;  %3362 = vmatprep.mubr.bf16.mxu1 %v12475_v38 }
 0x76e   :  { %v3226_v52 = vmul.f32 %v9539_v30, %v9537_v21  ;;  %3608 = vmatpush1.bf16.msra.mxu0 %v3567_v55  ;;  %v3594_v21 = vld [vmem:[#allocation3 + $0x358] sm:$0xff] }
 0x76f   :  { %3609 = vmatprep.subr.bf16.mxu0 %v3573_v32  ;;  %v3598_v30 = vld [vmem:[#allocation3 + $0x378] sm:$0xff] }
 0x770   :  { %8674 = vmatpush3.bf16.msra.mxu1 %v3238_v0  ;;  %v3228_v46 = vpack.c.bf16 %v3226_v52, %v3226_v52  ;;  %v3595_v0 = vld [vmem:[#allocation3 + $0x360] sm:$0xff] }
 0x771   :  { %8675 = vmatprep.subr.bf16.mxu1 %v3243_v26 }
 0x773   :  { %3312 = vmatmul.mubr.bf16.gmra.mrb[164].mxu0 %v3228_v46  ;;  %3363 = vmatmul.mubr.bf16.gmra.mrb[160].mxu1 %v3228_v46 }
 0x774   :  { %8676 = vmatpush3.bf16.msra.mxu1 %v3243_v26  ;;  %8687 = vmatprep.mubr.bf16.mxu1 %v3227_v62  ;;  %v3592_v62 = vld [vmem:[#allocation3 + $0x348] sm:$0xff] }
 0x775   :  { %8677 = vmatprep.subr.bf16.mxu1 %v3248_v34  ;;  %3639 = vmatprep.mubr.bf16.mxu0 %v12475_v38 }
 0x778   :  { %8678 = vmatpush3.bf16.msra.mxu1 %v3248_v34 }
 0x779   :  { %8679 = vmatprep.subr.bf16.mxu1 %v3253_v33 }
 0x77c   :  { %8680 = vmatpush3.bf16.msra.mxu1 %v3253_v33 }
 0x77d   :  { %v2773_v24 = vpop.xlane.xlu1 %2772  ;;  %8681 = vmatprep.subr.bf16.mxu1 %v3258_v59 }
 0x77e   :  { %9540 = vrcp.f32 %v2773_v24 }
 0x780   :  { %v2771_v10 = vpop.xlane.xlu0 %2770  ;;  %8682 = vmatpush3.bf16.msra.mxu1 %v3258_v59 }
 0x781   :  { %9542 = vrcp.f32 %v2771_v10  ;;  %v2769_v37 = vpop.xlane.xlu1 %2768  ;;  %8683 = vmatprep.subr.bf16.mxu1 %v3263_v8 }
 0x782   :  { %9544 = vrcp.f32 %v2769_v37 }
 0x784   :  { %8684 = vmatpush3.bf16.msra.mxu1 %v3263_v8  ;;  %v3603_v8 = vld [vmem:[#allocation3 + $0x3a0] sm:$0xff] }
 0x785   :  { %8685 = vmatprep.subr.bf16.mxu1 %v3268_v39 }
 0x788   :  { %v9541_v28 = vpop.eup %9540  ;;  %8686 = vmatpush3.bf16.msra.mxu1 %v3268_v39  ;;  %v3605_v39 = vld [vmem:[#allocation3 + $0x3b0] sm:$0xff] }
 0x789   :  { %v2779_v41 = vmul.f32 %v9541_v28, %v2773_v24  ;;  %3658 = vmatprep.subr.bf16.mxu1 %v3570_v31 }
 0x78b   :  { %v9543_v36 = vpop.eup %9542  ;;  %v2782_v15 = vsub.f32 2.0, %v2779_v41  ;;  %8688 = vmatmul.mubr.bf16.vlgmr.msra.gmra.mrb[164].mxu1 %v3228_v46  ;;  %v3600_v46 = vld [vmem:[#allocation3 + $0x388] sm:$0xff]  ;;  %v11450_v41 = vld [vmem:[#allocation3 + $0x2a0] sm:$0xff] }
 0x78c   :  { %v9545_v3 = vpop.eup %9544  ;;  %v2778_v45 = vmul.f32 %v9543_v36, %v2771_v10  ;;  %3690 = vmatprep.mubr.bf16.mxu1 %v12475_v38  ;;  %3659 = vmatpush1.bf16.msra.mxu1 %v3569_v53  ;;  %v3599_v10 = vld [vmem:[#allocation3 + $0x380] sm:$0xff] }
 0x78d   :  { %v2785_v48 = vmul.f32 %v9541_v28, %v2782_v15  ;;  %v2777_v14 = vmul.f32 %v9545_v3, %v2769_v37  ;;  %3660 = vmatprep.subr.bf16.mxu1 %v3575_v57  ;;  %v3604_v28 = vld [vmem:[#allocation3 + $0x3a8] sm:$0xff] }
 0x78e   :  { %v2781_v27 = vsub.f32 2.0, %v2778_v45 }
 0x78f   :  { %v2788_v50 = vmul.f32 %v11394_v35, %v2785_v48  ;;  %v2780_v13 = vsub.f32 2.0, %v2777_v14  ;;  %v3572_v35 = vld [vmem:[#allocation3 + $0x2a8] sm:$0xff] }
 0x790   :  { %v2784_v23 = vmul.f32 %v9543_v36, %v2781_v27  ;;  %3610 = vmatpush1.bf16.msra.mxu0 %v3572_v35  ;;  %3661 = vmatpush1.bf16.msra.mxu1 %v3574_v47 }
 0x791   :  { %2792 = vst [vmem:[#allocation10 + $0x58] sm:$0xff] %v2788_v50  ;;  %v2783_v60 = vmul.f32 %v9545_v3, %v2780_v13  ;;  %3662 = vmatprep.subr.bf16.mxu1 %v3580_v63 }
 0x792   :  { %v2787_v25 = vmul.f32 %v11397_v19, %v2784_v23  ;;  %v3578_v19 = vld [vmem:[#allocation3 + $0x2d8] sm:$0xff] }
 0x793   :  { %v2786_v18 = vmul.f32 %v11399_v44, %v2783_v60  ;;  %3611 = vmatprep.subr.bf16.mxu0 %v3578_v19  ;;  %v3577_v44 = vld [vmem:[#allocation3 + $0x2d0] sm:$0xff] }
 0x794   :  { %2791 = vst [vmem:[#allocation10 + $0x50] sm:$0xff] %v2787_v25  ;;  %3612 = vmatpush1.bf16.msra.mxu0 %v3577_v44  ;;  %3663 = vmatpush1.bf16.msra.mxu1 %v3579_v54  ;;  %v12485_v44 = vld [vmem:[#allocation26_spill] sm:$0xff] }
 0x795   :  { %2790 = vst [vmem:[#allocation10 + $0x48] sm:$0xff] %v2786_v18  ;;  %3613 = vmatprep.subr.bf16.mxu0 %v3583_v9  ;;  %3664 = vmatprep.subr.bf16.mxu1 %v3585_v1  ;;  %v12486_v1 = vld [vmem:[#allocation28_spill] sm:$0xff] }
 0x798   :  { %3614 = vmatpush1.bf16.msra.mxu0 %v3582_v43  ;;  %3665 = vmatpush1.bf16.msra.mxu1 %v3584_v58 }
 0x799   :  { %3615 = vmatprep.subr.bf16.mxu0 %v3588_v29  ;;  %3666 = vmatprep.subr.bf16.mxu1 %v3590_v51 }
 0x79c   :  { %3616 = vmatpush1.bf16.msra.mxu0 %v3587_v61  ;;  %3667 = vmatpush1.bf16.msra.mxu1 %v3589_v2 }
 0x79d   :  { %3617 = vmatprep.subr.bf16.mxu0 %v3593_v49  ;;  %3668 = vmatprep.subr.bf16.mxu1 %v3595_v0 }
 0x7a0   :  { %3618 = vmatpush1.bf16.msra.mxu0 %v3592_v62  ;;  %3669 = vmatpush1.bf16.msra.mxu1 %v3594_v21 }
 0x7a1   :  { %3619 = vmatprep.subr.bf16.mxu0 %v3598_v30  ;;  %3670 = vmatprep.subr.bf16.mxu1 %v3600_v46 }
 0x7a4   :  { %3671 = vmatpush1.bf16.msra.mxu1 %v3599_v10  ;;  %v12488_v10 = vld [vmem:[#allocation29_spill] sm:$0xff] }
 0x7a5   :  { %3672 = vmatprep.subr.bf16.mxu1 %v3605_v39 }
 0x7a8   :  { %3673 = vmatpush1.bf16.msra.mxu1 %v3604_v28 }
 0x7e7   :  { %v3096_v20 = vpop.xlane.xlu0 %3095 }
 0x7e8   :  { %v3099_v12 = vsub.f32 %v11421_v40, %v3096_v20  ;;  %v3597_v40 = vld [vmem:[#allocation3 + $0x370] sm:$0xff] }
 0x7e9   :  { %3620 = vmatpush1.bf16.msra.mxu0 %v3597_v40 }
 0x7ea   :  { %v3104_v52 = vmul.f32 1.442695, %v3099_v12  ;;  %v3094_v26 = vpop.xlane.xlu1 %3093  ;;  %3621 = vmatprep.subr.bf16.mxu0 %v3603_v8 }
 0x7eb   :  { %v3098_v34 = vsub.f32 %v11428_v56, %v3094_v26  ;;  %v3092_v33 = vpop.xlane.xlu0 %3091  ;;  %v3602_v56 = vld [vmem:[#allocation3 + $0x398] sm:$0xff] }
 0x7ec   :  { %9546 = vpow2.f32 %v3104_v52  ;;  %v3097_v59 = vsub.f32 %v11430_v11, %v3092_v33  ;;  %v12487_v33 = vld [vmem:[#allocation27_spill] sm:$0xff] }
 0x7ed   :  { %v3102_v24 = vmul.f32 1.442695, %v3098_v34  ;;  %3622 = vmatpush1.bf16.msra.mxu0 %v3602_v56 }
 0x7ee   :  { %v3100_v37 = vmul.f32 1.442695, %v3097_v59  ;;  %8691 = vmatprep.subr.bf16.mxu0 %v11450_v41 }
 0x7ef   :  { %9548 = vpow2.f32 %v3102_v24 }
 0x7f0   :  { %9550 = vpow2.f32 %v3100_v37 }
 0x7f6   :  { %v11453_v11 = vpop.eup %9546 }
 0x7f7   :  { %3110 = vadd.xlane.f32.xlu1 %v11453_v11 }
 0x7f9   :  { %v11456_v36 = vpop.eup %9548 }
 0x7fa   :  { %v11458_v15 = vpop.eup %9550  ;;  %3108 = vadd.xlane.f32.xlu0 %v11456_v36 }
 0x7fb   :  { %3106 = vadd.xlane.f32.xlu1 %v11458_v15 }
 0x83e   :  { %v3303_v3 = vpop.f32.mrb[36].mxu0  ;;  %v3354_v45 = vpop.f32.mrb[36].mxu1 }
 0x83f   :  { %v8979_v48 = vadd.f32 %v3303_v3, %v10622_v4  ;;  %v3305_v14 = vpop.f32.mrb[37].mxu0  ;;  %v3356_v27 = vpop.f32.mrb[37].mxu1  ;;  %v9015_v35 = vadd.f32 %v3354_v45, %v10624_v5 }
 0x840   :  { %v8980_v50 = vadd.f32 %v3305_v14, %v10626_v6  ;;  %v3307_v13 = vpop.f32.mrb[38].mxu0  ;;  %v3358_v23 = vpop.f32.mrb[38].mxu1  ;;  %v9016_v43 = vadd.f32 %v3356_v27, %v10628_v7 }
 0x841   :  { %v8219_v60 = vmul.f32 -1.442695, %v8979_v48  ;;  %v8981_v25 = vadd.f32 %v3307_v13, %v10622_v4  ;;  %v3309_v18 = vpop.f32.mrb[39].mxu0  ;;  %v3360_v17 = vpop.f32.mrb[39].mxu1  ;;  %v9017_v19 = vadd.f32 %v3358_v23, %v10624_v5  ;;  %v8221_v12 = vmul.f32 -1.442695, %v9015_v35 }
 0x842   :  { %v8220_v55 = vmul.f32 -1.442695, %v8980_v50  ;;  %v8982_v31 = vadd.f32 %v3309_v18, %v10626_v6  ;;  %v9018_v21 = vadd.f32 %v3360_v17, %v10628_v7 }
 0x843   :  { %9552 = vpow2.f32 %v8219_v60  ;;  %v8222_v53 = vmul.f32 -1.442695, %v8981_v25  ;;  %v8224_v62 = vmul.f32 -1.442695, %v9017_v19  ;;  %v8218_v60 = vld [vmem:[%s12337_s3 + $0x1] ss:$0 sm:$0xff] }
 0x844   :  { %v8223_v32 = vmul.f32 -1.442695, %v8982_v31  ;;  %9554 = vpow2.f32 %v8220_v55 }
 0x845   :  { %9556 = vpow2.f32 %v8222_v53 }
 0x846   :  { %v3313_v57 = vpop.f32.mrb[164].mxu0  ;;  %v3364_v47 = vpop.f32.mrb[160].mxu1  ;;  %9558 = vpow2.f32 %v8223_v32 }
 0x847   :  { %v3489_v63 = vadd.f32 %v3313_v57, %v12485_v44  ;;  %v3315_v54 = vpop.f32.mrb[165].mxu0  ;;  %v3366_v9 = vpop.f32.mrb[161].mxu1  ;;  %v3491_v59 = vadd.f32 %v3364_v47, %v12487_v33 }
 0x848   :  { %v3490_v58 = vadd.f32 %v3315_v54, %v12486_v1  ;;  %v3317_v29 = vpop.f32.mrb[166].mxu0  ;;  %v3368_v61 = vpop.f32.mrb[162].mxu1  ;;  %v3492_v8 = vadd.f32 %v3366_v9, %v12488_v10 }
 0x849   :  { %v8225_v51 = vmul.f32 -1.442695, %v3489_v63  ;;  %v3318_v20 = vpop.f32.mrb[167].mxu0  ;;  %v3369_v2 = vpop.f32.mrb[163].mxu1  ;;  %v8227_v39 = vmul.f32 -1.442695, %v3491_v59 }
 0x84a   :  { %v8226_v49 = vmul.f32 -1.442695, %v3490_v58  ;;  %v3586_v59 = vld [vmem:[#allocation3 + $0x318] sm:$0xff] }
 0x84b   :  { %9560 = vpow2.f32 %v8225_v51 }
 0x84c   :  { %9562 = vtanh.f32 %v9016_v43 }
 0x84d   :  { %v9553_v0 = vpop.eup %9552  ;;  %9564 = vpow2.f32 %v8226_v49 }
 0x84e   :  { %v3520_v30 = vadd.f32 1.0, %v9553_v0  ;;  %9566 = vpow2.f32 %v8221_v12  ;;  %v9555_v52 = vpop.eup %9554 }
 0x84f   :  { %9568 = vpow2.f32 %v8224_v62  ;;  %v9557_v26 = vpop.eup %9556  ;;  %v3521_v46 = vadd.f32 1.0, %v9555_v52  ;;  %v3576_v52 = vld [vmem:[#allocation3 + $0x2c8] sm:$0xff] }
 0x850   :  { %9570 = vrcp.f32 %v3520_v30  ;;  %v3523_v34 = vadd.f32 1.0, %v9557_v26  ;;  %v9559_v40 = vpop.eup %9558 }
 0x851   :  { %9572 = vtanh.f32 %v9018_v21  ;;  %v3524_v24 = vadd.f32 1.0, %v9559_v40  ;;  %v3591_v40 = vld [vmem:[#allocation3 + $0x340] sm:$0xff] }
 0x852   :  { %9574 = vrcp.f32 %v3521_v46 }
 0x853   :  { %9576 = vrcp.f32 %v3523_v34  ;;  %v3581_v34 = vld [vmem:[#allocation3 + $0x2f0] sm:$0xff] }
 0x854   :  { %9578 = vrcp.f32 %v3524_v24 }
 0x855   :  { %v9561_v37 = vpop.eup %9560  ;;  %9580 = vtanh.f32 %v3492_v8  ;;  %v3601_v8 = vld [vmem:[#allocation3 + $0x390] sm:$0xff] }
 0x856   :  { %v9563_v56 = vpop.eup %9562  ;;  %v3526_v28 = vadd.f32 1.0, %v9561_v37 }
 0x857   :  { %v9565_v3 = vpop.eup %9564 }
 0x858   :  { %v9567_v45 = vpop.eup %9566  ;;  %9582 = vrcp.f32 %v3526_v28  ;;  %v3527_v48 = vadd.f32 1.0, %v9565_v3 }
 0x859   :  { %v9569_v14 = vpop.eup %9568  ;;  %9584 = vpow2.f32 %v8227_v39  ;;  %v3522_v18 = vadd.f32 1.0, %v9567_v45  ;;  %v3606_v39 = vld [vmem:[#allocation3 + $0x3b8] sm:$0xff] }
 0x85a   :  { %v9571_v27 = vpop.eup %9570  ;;  %9586 = vrcp.f32 %v3527_v48  ;;  %v3525_v35 = vadd.f32 1.0, %v9569_v14 }
 0x85b   :  { %v9573_v50 = vpop.eup %9572  ;;  %v3553_v13 = vmul.f32 %v9571_v27, %v9563_v56  ;;  %9588 = vrcp.f32 %v3522_v18 }
 0x85c   :  { %v9575_v23 = vpop.eup %9574 }
 0x85d   :  { %v9577_v25 = vpop.eup %9576  ;;  %v3550_v17 = vmul.f32 %v9575_v23, %v11419_v16 }
 0x85e   :  { %v3554_v55 = vmul.f32 %v9577_v25, %v9573_v50  ;;  %v8689_v31 = vpop.f32.mrb[164].mxu1  ;;  %v9579_v53 = vpop.eup %9578 }
 0x85f   :  { %v11478_v32 = vadd.f32 %v3553_v13, %v3550_v17  ;;  %v11480_v57 = vadd.f32 %v8689_v31, %v8218_v60  ;;  %v3405_v47 = vpop.f32.mrb[165].mxu1  ;;  %v3551_v19 = vmul.f32 %v9579_v53, %v11426_v42  ;;  %v9581_v63 = vpop.eup %9580  ;;  %v3908_v31 = vld [vmem:[#allocation3 + $0x3d8] sm:$0xff]  ;;  %v3906_v53 = vld [vmem:[#allocation3 + $0x3c8] sm:$0xff] }
 0x860   :  { %v8690_v44 = vpop.f32.mrb[166].mxu1  ;;  %v11489_v29 = vadd.f32 %v8218_v60, %v3405_v47  ;;  %3996 = vmatprep.subr.bf16.mxu1 %v3908_v31  ;;  %v3905_v47 = vld [vmem:[#allocation3 + $0x3c0] sm:$0xff]  ;;  %v12492_v31 = vld [vmem:[#allocation36_spill] sm:$0xff] }
 0x861   :  { %v3408_v54 = vpop.f32.mrb[167].mxu1  ;;  %3433 = vmax.xlane.f32.xlu0 %v11480_v57  ;;  %9590 = vtanh.f32 %v11478_v32  ;;  %v11485_v16 = vadd.f32 %v3554_v55, %v3551_v19  ;;  %v3913_v19 = vld [vmem:[#allocation3 + $0x400] sm:$0xff]  ;;  %v3912_v44 = vld [vmem:[#allocation3 + $0x3f8] sm:$0xff] }
 0x862   :  { %v9583_v9 = vpop.eup %9582  ;;  %v11487_v43 = vadd.f32 %v8218_v60, %v3408_v54  ;;  %9592 = vrcp.f32 %v3525_v35  ;;  %v3907_v35 = vld [vmem:[#allocation3 + $0x3d0] sm:$0xff]  ;;  %v3917_v54 = vld [vmem:[#allocation3 + $0x420] sm:$0xff] }
 0x863   :  { %v9585_v1 = vpop.eup %9584  ;;  %v3555_v58 = vmul.f32 %v9583_v9, %v9581_v63  ;;  %9594 = vtanh.f32 %v11485_v16  ;;  %v3910_v63 = vld [vmem:[#allocation3 + $0x3e8] sm:$0xff]  ;;  %v3915_v9 = vld [vmem:[#allocation3 + $0x410] sm:$0xff] }
 0x864   :  { %v9587_v61 = vpop.eup %9586  ;;  %3431 = vmax.xlane.f32.xlu1 %v11487_v43  ;;  %v3528_v51 = vadd.f32 1.0, %v9585_v1  ;;  %v3923_v1 = vld [vmem:[#allocation3 + $0x450] sm:$0xff] }
 0x865   :  { %v3552_v42 = vmul.f32 %v9587_v61, %v11436_v22  ;;  %3429 = vmax.xlane.f32.xlu0 %v11489_v29  ;;  %v9589_v2 = vpop.eup %9588  ;;  %v3922_v61 = vld [vmem:[#allocation3 + $0x448] sm:$0xff] }
 0x867   :  { %v11495_v20 = vadd.f32 %v3555_v58, %v3552_v42  ;;  %v3921_v58 = vld [vmem:[#allocation3 + $0x440] sm:$0xff]  ;;  %v3920_v42 = vld [vmem:[#allocation3 + $0x438] sm:$0xff] }
 0x869   :  { %9596 = vtanh.f32 %v11495_v20 }
 0x86a   :  { %9598 = vrcp.f32 %v3528_v51  ;;  %v3928_v51 = vld [vmem:[#allocation3 + $0x478] sm:$0xff] }
 0x86b   :  { %v9591_v12 = vpop.eup %9590 }
 0x86c   :  { %v9593_v49 = vpop.eup %9592  ;;  %v3562_v0 = vmul.f32 %v9591_v12, %v9589_v2  ;;  %v3926_v2 = vld [vmem:[#allocation3 + $0x468] sm:$0xff]  ;;  %v3927_v12 = vld [vmem:[#allocation3 + $0x470] sm:$0xff] }
 0x86d   :  { %v9595_v62 = vpop.eup %9594 }
 0x86e   :  { %v3563_v21 = vmul.f32 %v9595_v62, %v9593_v49  ;;  %v3925_v62 = vld [vmem:[#allocation3 + $0x460] sm:$0xff] }
 0x870   :  { %v3565_v30 = vpack.c.bf16 %v3563_v21, %v3562_v0  ;;  %v3933_v0 = vld [vmem:[#allocation3 + $0x4a0] sm:$0xff]  ;;  %v3931_v21 = vld [vmem:[#allocation3 + $0x490] sm:$0xff] }
 0x872   :  { %3640 = vmatmul.mubr.bf16.vlgmr.msra.gmra.mrb[168].mxu0 %v3565_v30  ;;  %3691 = vmatmul.mubr.bf16.vlgmr.msra.gmra.mrb[168].mxu1 %v3565_v30 }
 0x873   :  { %v9597_v26 = vpop.eup %9596  ;;  %8692 = vmatpush3.bf16.msra.mxu0 %v11450_v41  ;;  %3649 = vmatprep.mubr.bf16.mxu0 %v12475_v38  ;;  %v3596_v41 = vld [vmem:[#allocation3 + $0x368] sm:$0xff] }
 0x874   :  { %v9599_v22 = vpop.eup %9598  ;;  %8693 = vmatprep.subr.bf16.mxu0 %v3576_v52  ;;  %3700 = vmatprep.mubr.bf16.mxu1 %v12475_v38 }
 0x875   :  { %v3564_v46 = vmul.f32 %v9599_v22, %v9597_v26  ;;  %3997 = vmatpush1.bf16.msra.mxu1 %v3907_v35  ;;  %v3938_v26 = vld [vmem:[#allocation3 + $0x4c8] sm:$0xff]  ;;  %v3936_v22 = vld [vmem:[#allocation3 + $0x4b8] sm:$0xff] }
 0x876   :  { %3998 = vmatprep.subr.bf16.mxu1 %v3913_v19  ;;  %v12493_v19 = vld [vmem:[#allocation31_spill] sm:$0xff] }
 0x877   :  { %8694 = vmatpush3.bf16.msra.mxu0 %v3576_v52  ;;  %v3566_v33 = vpack.c.bf16 %v3564_v46, %v3564_v46  ;;  %v3930_v52 = vld [vmem:[#allocation3 + $0x488] sm:$0xff] }
 0x878   :  { %8695 = vmatprep.subr.bf16.mxu0 %v3581_v34 }
 0x879   :  { %3999 = vmatpush1.bf16.msra.mxu1 %v3912_v44 }
 0x87a   :  { %3650 = vmatmul.mubr.bf16.gmra.mrb[172].mxu0 %v3566_v33  ;;  %3701 = vmatmul.mubr.bf16.gmra.mrb[172].mxu1 %v3566_v33 }
 0x87b   :  { %8696 = vmatpush3.bf16.msra.mxu0 %v3581_v34  ;;  %8707 = vmatprep.mubr.bf16.mxu0 %v3565_v30  ;;  %v3932_v30 = vld [vmem:[#allocation3 + $0x498] sm:$0xff] }
 0x87c   :  { %8697 = vmatprep.subr.bf16.mxu0 %v3586_v59  ;;  %4028 = vmatprep.mubr.bf16.mxu1 %v12475_v38 }
 0x87f   :  { %8698 = vmatpush3.bf16.msra.mxu0 %v3586_v59  ;;  %v3935_v59 = vld [vmem:[#allocation3 + $0x4b0] sm:$0xff] }
 0x880   :  { %8699 = vmatprep.subr.bf16.mxu0 %v3591_v40 }
 0x883   :  { %8700 = vmatpush3.bf16.msra.mxu0 %v3591_v40  ;;  %v3943_v40 = vld [vmem:[#allocation3 + $0x4f0] sm:$0xff] }
 0x884   :  { %v3111_v24 = vpop.xlane.xlu1 %3110  ;;  %8701 = vmatprep.subr.bf16.mxu0 %v3596_v41 }
 0x885   :  { %9600 = vrcp.f32 %v3111_v24 }
 0x887   :  { %v3109_v10 = vpop.xlane.xlu0 %3108  ;;  %8702 = vmatpush3.bf16.msra.mxu0 %v3596_v41 }
 0x888   :  { %9602 = vrcp.f32 %v3109_v10  ;;  %v3107_v37 = vpop.xlane.xlu1 %3106  ;;  %8703 = vmatprep.subr.bf16.mxu0 %v3601_v8 }
 0x889   :  { %9604 = vrcp.f32 %v3107_v37 }
 0x88b   :  { %8704 = vmatpush3.bf16.msra.mxu0 %v3601_v8  ;;  %v3940_v8 = vld [vmem:[#allocation3 + $0x4d8] sm:$0xff] }
 0x88c   :  { %8705 = vmatprep.subr.bf16.mxu0 %v3606_v39 }
 0x88f   :  { %v9601_v56 = vpop.eup %9600  ;;  %8706 = vmatpush3.bf16.msra.mxu0 %v3606_v39 }
 0x890   :  { %v3117_v28 = vmul.f32 %v9601_v56, %v3111_v24  ;;  %3945 = vmatprep.subr.bf16.mxu0 %v3906_v53  ;;  %v3941_v24 = vld [vmem:[#allocation3 + $0x4e0] sm:$0xff] }
 0x892   :  { %v9603_v3 = vpop.eup %9602  ;;  %v3120_v45 = vsub.f32 2.0, %v3117_v28  ;;  %8708 = vmatmul.mubr.bf16.vlgmr.msra.gmra.mrb[176].mxu0 %v3566_v33  ;;  %v3937_v33 = vld [vmem:[#allocation3 + $0x4c0] sm:$0xff]  ;;  %v12489_v28 = vld [vmem:[#allocation30_spill] sm:$0xff] }
 0x893   :  { %v9605_v48 = vpop.eup %9604  ;;  %v3116_v14 = vmul.f32 %v9603_v3, %v3109_v10  ;;  %3977 = vmatprep.mubr.bf16.mxu0 %v12475_v38  ;;  %3946 = vmatpush1.bf16.msra.mxu0 %v3905_v47  ;;  %v3942_v10 = vld [vmem:[#allocation3 + $0x4e8] sm:$0xff] }
 0x894   :  { %v3123_v27 = vmul.f32 %v9601_v56, %v3120_v45  ;;  %v3115_v50 = vmul.f32 %v9605_v48, %v3107_v37  ;;  %v11509_v37 = vld [vmem:[#allocation3 + $0x3e0] sm:$0xff] }
 0x895   :  { %v3119_v13 = vsub.f32 2.0, %v3116_v14  ;;  %v12490_v14 = vld [vmem:[#allocation32_spill] sm:$0xff] }
 0x896   :  { %v3126_v23 = vmul.f32 %v11453_v11, %v3123_v27  ;;  %v3118_v60 = vsub.f32 2.0, %v3115_v50  ;;  %v3911_v11 = vld [vmem:[#allocation3 + $0x3f0] sm:$0xff] }
 0x897   :  { %v3122_v25 = vmul.f32 %v9603_v3, %v3119_v13  ;;  %3947 = vmatprep.subr.bf16.mxu0 %v3911_v11 }
 0x898   :  { %3130 = vst [vmem:[#allocation10 + $0x70] sm:$0xff] %v3126_v23  ;;  %v3121_v18 = vmul.f32 %v9605_v48, %v3118_v60  ;;  %3948 = vmatpush1.bf16.msra.mxu0 %v3910_v63  ;;  %v12491_v60 = vld [vmem:[#allocation34_spill] sm:$0xff] }
 0x899   :  { %v3125_v17 = vmul.f32 %v11456_v36, %v3122_v25  ;;  %v3918_v36 = vld [vmem:[#allocation3 + $0x428] sm:$0xff] }
 0x89a   :  { %v3124_v55 = vmul.f32 %v11458_v15, %v3121_v18  ;;  %4000 = vmatprep.subr.bf16.mxu1 %v3918_v36  ;;  %v3916_v15 = vld [vmem:[#allocation3 + $0x418] sm:$0xff]  ;;  %v12494_v36 = vld [vmem:[#allocation35_spill] sm:$0xff] }
 0x89b   :  { %3129 = vst [vmem:[#allocation10 + $0x68] sm:$0xff] %v3125_v17  ;;  %3949 = vmatprep.subr.bf16.mxu0 %v3916_v15  ;;  %4001 = vmatpush1.bf16.msra.mxu1 %v3917_v54  ;;  %v12495_v54 = vld [vmem:[#allocation38_spill] sm:$0xff] }
 0x89c   :  { %3128 = vst [vmem:[#allocation10 + $0x60] sm:$0xff] %v3124_v55  ;;  %3950 = vmatpush1.bf16.msra.mxu0 %v3915_v9  ;;  %4002 = vmatprep.subr.bf16.mxu1 %v3923_v1 }
 0x89d   :  { %3951 = vmatprep.subr.bf16.mxu0 %v3921_v58 }
 0x89f   :  { %4003 = vmatpush1.bf16.msra.mxu1 %v3922_v61  ;;  %v12496_v61 = vld [vmem:[#allocation33_spill] sm:$0xff] }
 0x8a0   :  { %3952 = vmatpush1.bf16.msra.mxu0 %v3920_v42  ;;  %4004 = vmatprep.subr.bf16.mxu1 %v3928_v51  ;;  %v12497_v51 = vld [vmem:[#allocation40_spill] sm:$0xff] }
 0x8a1   :  { %3953 = vmatprep.subr.bf16.mxu0 %v3926_v2 }
 0x8a3   :  { %4005 = vmatpush1.bf16.msra.mxu1 %v3927_v12 }
 0x8a4   :  { %3954 = vmatpush1.bf16.msra.mxu0 %v3925_v62  ;;  %4006 = vmatprep.subr.bf16.mxu1 %v3933_v0 }
 0x8a5   :  { %3955 = vmatprep.subr.bf16.mxu0 %v3931_v21 }
 0x8a7   :  { %4007 = vmatpush1.bf16.msra.mxu1 %v3932_v30 }
 0x8a8   :  { %3956 = vmatpush1.bf16.msra.mxu0 %v3930_v52  ;;  %4008 = vmatprep.subr.bf16.mxu1 %v3938_v26 }
 0x8a9   :  { %3957 = vmatprep.subr.bf16.mxu0 %v3936_v22 }
 0x8ab   :  { %4009 = vmatpush1.bf16.msra.mxu1 %v3937_v33 }
 0x8ac   :  { %3958 = vmatpush1.bf16.msra.mxu0 %v3935_v59  ;;  %4010 = vmatprep.subr.bf16.mxu1 %v3943_v40 }
 0x8ad   :  { %3959 = vmatprep.subr.bf16.mxu0 %v3941_v24 }
 0x8af   :  { %4011 = vmatpush1.bf16.msra.mxu1 %v3942_v10 }
 0x8b0   :  { %3960 = vmatpush1.bf16.msra.mxu0 %v3940_v8  ;;  %8711 = vmatprep.subr.bf16.mxu1 %v11509_v37  ;;  %v12499_v8 = vld [vmem:[#allocation39_spill] sm:$0xff] }
 0x8ee   :  { %v11506_v49 = vpop.xlane.xlu0 %3433 }
 0x8f2   :  { %v3430_v46 = vpop.xlane.xlu0 %3429 }
 0x8f3   :  { %v3435_v34 = vsub.f32 %v11489_v29, %v3430_v46 }
 0x8f5   :  { %v3438_v41 = vmul.f32 1.442695, %v3435_v34  ;;  %v12498_v34 = vld [vmem:[#allocation37_spill] sm:$0xff] }
 0x8f7   :  { %9606 = vpow2.f32 %v3438_v41 }
 0x901   :  { %v11512_v29 = vpop.eup %9606 }
 0x902   :  { %3444 = vadd.xlane.f32.xlu1 %v11512_v29 }
 0x945   :  { %v3641_v39 = vpop.f32.mrb[168].mxu0  ;;  %v3692_v56 = vpop.f32.mrb[168].mxu1 }
 0x946   :  { %v3819_v3 = vadd.f32 %v3641_v39, %v12489_v28  ;;  %v3643_v45 = vpop.f32.mrb[169].mxu0  ;;  %v3694_v48 = vpop.f32.mrb[169].mxu1  ;;  %v3821_v11 = vadd.f32 %v3692_v56, %v12493_v19 }
 0x947   :  { %v3820_v27 = vadd.f32 %v3643_v45, %v12490_v14  ;;  %v3645_v50 = vpop.f32.mrb[170].mxu0  ;;  %v3696_v13 = vpop.f32.mrb[170].mxu1  ;;  %v3822_v42 = vadd.f32 %v3694_v48, %v12496_v61 }
 0x948   :  { %v8230_v23 = vmul.f32 -1.442695, %v3819_v3  ;;  %v3823_v25 = vadd.f32 %v3645_v50, %v12491_v60  ;;  %v3647_v18 = vpop.f32.mrb[171].mxu0  ;;  %v3698_v17 = vpop.f32.mrb[171].mxu1  ;;  %v3825_v15 = vadd.f32 %v3696_v13, %v12494_v36  ;;  %v8232_v52 = vmul.f32 -1.442695, %v3821_v11 }
 0x949   :  { %v8231_v55 = vmul.f32 -1.442695, %v3820_v27  ;;  %v3824_v53 = vadd.f32 %v3647_v18, %v12492_v31  ;;  %v3826_v33 = vadd.f32 %v3698_v17, %v12498_v34  ;;  %v12500_v3 = vld [vmem:[#allocation41_spill] sm:$0xff] }
 0x94a   :  { %9608 = vpow2.f32 %v8230_v23  ;;  %v8233_v35 = vmul.f32 -1.442695, %v3823_v25  ;;  %v8235_v22 = vmul.f32 -1.442695, %v3825_v15 }
 0x94b   :  { %v8234_v47 = vmul.f32 -1.442695, %v3824_v53  ;;  %9610 = vpow2.f32 %v8231_v55  ;;  %v8229_v53 = vld [vmem:[%s12337_s3 + $0x2] ss:$0 sm:$0xff] }
 0x94c   :  { %9612 = vpow2.f32 %v8233_v35 }
 0x94d   :  { %v3651_v44 = vpop.f32.mrb[172].mxu0  ;;  %v3702_v63 = vpop.f32.mrb[172].mxu1  ;;  %9614 = vpow2.f32 %v8234_v47 }
 0x94e   :  { %v3827_v9 = vadd.f32 %v3651_v44, %v12495_v54  ;;  %v3653_v1 = vpop.f32.mrb[173].mxu0  ;;  %v3704_v58 = vpop.f32.mrb[173].mxu1  ;;  %v3829_v39 = vadd.f32 %v3702_v63, %v12499_v8  ;;  %v3919_v8 = vld [vmem:[#allocation3 + $0x430] sm:$0xff] }
 0x94f   :  { %v3828_v2 = vadd.f32 %v3653_v1, %v12497_v51  ;;  %v3655_v12 = vpop.f32.mrb[174].mxu0  ;;  %v3706_v62 = vpop.f32.mrb[174].mxu1  ;;  %v3830_v45 = vadd.f32 %v3704_v58, %v12500_v3 }
 0x950   :  { %v8236_v0 = vmul.f32 -1.442695, %v3827_v9  ;;  %v3656_v21 = vpop.f32.mrb[175].mxu0  ;;  %v3707_v30 = vpop.f32.mrb[175].mxu1  ;;  %v8238_v14 = vmul.f32 -1.442695, %v3829_v39 }
 0x951   :  { %v8237_v26 = vmul.f32 -1.442695, %v3828_v2  ;;  %v11555_v3 = vpop.xlane.xlu1 %3431 }
 0x952   :  { %9616 = vpow2.f32 %v8236_v0 }
 0x953   :  { %9618 = vtanh.f32 %v3822_v42 }
 0x954   :  { %v9609_v46 = vpop.eup %9608  ;;  %9620 = vpow2.f32 %v8237_v26 }
 0x955   :  { %v3858_v59 = vadd.f32 1.0, %v9609_v46  ;;  %9622 = vpow2.f32 %v8232_v52  ;;  %v9611_v40 = vpop.eup %9610 }
 0x956   :  { %9624 = vpow2.f32 %v8235_v22  ;;  %v9613_v41 = vpop.eup %9612  ;;  %v3859_v24 = vadd.f32 1.0, %v9611_v40 }
 0x957   :  { %9626 = vrcp.f32 %v3858_v59  ;;  %v3861_v10 = vadd.f32 1.0, %v9613_v41  ;;  %v9615_v56 = vpop.eup %9614  ;;  %v3914_v41 = vld [vmem:[#allocation3 + $0x408] sm:$0xff] }
 0x958   :  { %9628 = vtanh.f32 %v3826_v33  ;;  %v3862_v28 = vadd.f32 1.0, %v9615_v56  ;;  %v3924_v56 = vld [vmem:[#allocation3 + $0x458] sm:$0xff] }
 0x959   :  { %9630 = vrcp.f32 %v3859_v24 }
 0x95a   :  { %9632 = vrcp.f32 %v3861_v10 }
 0x95b   :  { %9634 = vrcp.f32 %v3862_v28  ;;  %v3929_v28 = vld [vmem:[#allocation3 + $0x480] sm:$0xff] }
 0x95c   :  { %v9617_v48 = vpop.eup %9616  ;;  %9636 = vtanh.f32 %v3830_v45  ;;  %v3939_v45 = vld [vmem:[#allocation3 + $0x4d0] sm:$0xff] }
 0x95d   :  { %v9619_v27 = vpop.eup %9618  ;;  %v3864_v50 = vadd.f32 1.0, %v9617_v48 }
 0x95e   :  { %v9621_v13 = vpop.eup %9620 }
 0x95f   :  { %v9623_v23 = vpop.eup %9622  ;;  %9638 = vrcp.f32 %v3864_v50  ;;  %v3865_v60 = vadd.f32 1.0, %v9621_v13 }
 0x960   :  { %v9625_v25 = vpop.eup %9624  ;;  %9640 = vpow2.f32 %v8238_v14  ;;  %v3860_v47 = vadd.f32 1.0, %v9623_v23  ;;  %v3944_v14 = vld [vmem:[#allocation3 + $0x4f8] sm:$0xff] }
 0x961   :  { %v9627_v18 = vpop.eup %9626  ;;  %9642 = vrcp.f32 %v3865_v60  ;;  %v3863_v15 = vadd.f32 1.0, %v9625_v25  ;;  %v4244_v25 = vld [vmem:[#allocation3 + $0x8] sm:$0xff] }
 0x962   :  { %v9629_v17 = vpop.eup %9628  ;;  %v3891_v55 = vmul.f32 %v9627_v18, %v9619_v27  ;;  %9644 = vrcp.f32 %v3860_v47  ;;  %4283 = vmatprep.subr.bf16.mxu0 %v4244_v25  ;;  %v4243_v18 = vld [vmem:[#allocation3] sm:$0xff]  ;;  %v4250_v47 = vld [vmem:[#allocation3 + $0x38] sm:$0xff] }
 0x963   :  { %v9631_v31 = vpop.eup %9630 }
 0x964   :  { %v9633_v35 = vpop.eup %9632  ;;  %v3888_v19 = vmul.f32 %v9631_v31, %v11478_v32  ;;  %v4249_v31 = vld [vmem:[#allocation3 + $0x30] sm:$0xff] }
 0x965   :  { %v3892_v11 = vmul.f32 %v9633_v35, %v9629_v17  ;;  %v8709_v44 = vpop.f32.mrb[176].mxu0  ;;  %v9635_v63 = vpop.eup %9634  ;;  %v4246_v17 = vld [vmem:[#allocation3 + $0x18] sm:$0xff]  ;;  %v4251_v35 = vld [vmem:[#allocation3 + $0x40] sm:$0xff] }
 0x966   :  { %v11531_v36 = vadd.f32 %v3891_v55, %v3888_v19  ;;  %v11533_v54 = vadd.f32 %v8709_v44, %v8229_v53  ;;  %v3743_v9 = vpop.f32.mrb[177].mxu0  ;;  %v3889_v1 = vmul.f32 %v9635_v63, %v11485_v16  ;;  %v9637_v61 = vpop.eup %9636  ;;  %v4245_v55 = vld [vmem:[#allocation3 + $0x10] sm:$0xff]  ;;  %v4254_v19 = vld [vmem:[#allocation3 + $0x58] sm:$0xff]  ;;  %v4255_v44 = vld [vmem:[#allocation3 + $0x60] sm:$0xff] }
 0x967   :  { %v8710_v58 = vpop.f32.mrb[178].mxu0  ;;  %v11542_v0 = vadd.f32 %v8229_v53, %v3743_v9  ;;  %v4259_v63 = vld [vmem:[#allocation3 + $0x80] sm:$0xff]  ;;  %v4261_v9 = vld [vmem:[#allocation3 + $0x90] sm:$0xff] }
 0x968   :  { %v3746_v42 = vpop.f32.mrb[179].mxu0  ;;  %3771 = vmax.xlane.f32.xlu1 %v11533_v54  ;;  %9646 = vtanh.f32 %v11531_v36  ;;  %v11538_v32 = vadd.f32 %v3892_v11, %v3889_v1  ;;  %v4256_v11 = vld [vmem:[#allocation3 + $0x68] sm:$0xff] }
 0x969   :  { %v9639_v51 = vpop.eup %9638  ;;  %v11540_v2 = vadd.f32 %v8229_v53, %v3746_v42  ;;  %9648 = vrcp.f32 %v3863_v15  ;;  %v4248_v53 = vld [vmem:[#allocation3 + $0x28] sm:$0xff]  ;;  %v4258_v15 = vld [vmem:[#allocation3 + $0x78] sm:$0xff] }
 0x96a   :  { %v9641_v12 = vpop.eup %9640  ;;  %v3893_v62 = vmul.f32 %v9639_v51, %v9637_v61  ;;  %9650 = vtanh.f32 %v11538_v32  ;;  %v4260_v1 = vld [vmem:[#allocation3 + $0x88] sm:$0xff]  ;;  %v4263_v61 = vld [vmem:[#allocation3 + $0xa0] sm:$0xff]  ;;  %v4266_v42 = vld [vmem:[#allocation3 + $0xb8] sm:$0xff] }
 0x96b   :  { %v9643_v21 = vpop.eup %9642  ;;  %3769 = vmax.xlane.f32.xlu0 %v11540_v2  ;;  %v3866_v30 = vadd.f32 1.0, %v9641_v12  ;;  %v4264_v58 = vld [vmem:[#allocation3 + $0xa8] sm:$0xff]  ;;  %v4265_v51 = vld [vmem:[#allocation3 + $0xb0] sm:$0xff] }
 0x96c   :  { %v3890_v16 = vmul.f32 %v9643_v21, %v11495_v20  ;;  %3767 = vmax.xlane.f32.xlu1 %v11542_v0  ;;  %v9645_v26 = vpop.eup %9644  ;;  %v4269_v12 = vld [vmem:[#allocation3 + $0xd0] sm:$0xff]  ;;  %v4271_v21 = vld [vmem:[#allocation3 + $0xe0] sm:$0xff] }
 0x96e   :  { %v11548_v52 = vadd.f32 %v3893_v62, %v3890_v16  ;;  %v4268_v62 = vld [vmem:[#allocation3 + $0xc8] sm:$0xff]  ;;  %v4270_v16 = vld [vmem:[#allocation3 + $0xd8] sm:$0xff] }
 0x970   :  { %9652 = vtanh.f32 %v11548_v52 }
 0x971   :  { %9654 = vrcp.f32 %v3866_v30  ;;  %v4274_v30 = vld [vmem:[#allocation3 + $0xf8] sm:$0xff] }
 0x972   :  { %v9647_v22 = vpop.eup %9646 }
 0x973   :  { %v9649_v46 = vpop.eup %9648  ;;  %v3900_v33 = vmul.f32 %v9647_v22, %v9645_v26  ;;  %v4276_v26 = vld [vmem:[#allocation3 + $0x108] sm:$0xff]  ;;  %v4273_v22 = vld [vmem:[#allocation3 + $0xf0] sm:$0xff] }
 0x974   :  { %v9651_v34 = vpop.eup %9650 }
 0x975   :  { %v3901_v59 = vmul.f32 %v9651_v34, %v9649_v46  ;;  %v4275_v46 = vld [vmem:[#allocation3 + $0x100] sm:$0xff] }
 0x976   :  { %v4279_v34 = vld [vmem:[#allocation3 + $0x120] sm:$0xff] }
 0x977   :  { %v3903_v40 = vpack.c.bf16 %v3901_v59, %v3900_v33  ;;  %v4281_v33 = vld [vmem:[#allocation3 + $0x130] sm:$0xff]  ;;  %v4278_v59 = vld [vmem:[#allocation3 + $0x118] sm:$0xff] }
 0x979   :  { %3978 = vmatmul.mubr.bf16.vlgmr.msra.gmra.mrb[48].mxu0 %v3903_v40  ;;  %4029 = vmatmul.mubr.bf16.vlgmr.msra.gmra.mrb[48].mxu1 %v3903_v40 }
 0x97a   :  { %v9653_v24 = vpop.eup %9652  ;;  %8712 = vmatpush3.bf16.msra.mxu1 %v11509_v37  ;;  %3987 = vmatprep.mubr.bf16.mxu0 %v12475_v38  ;;  %v3934_v37 = vld [vmem:[#allocation3 + $0x4a8] sm:$0xff] }
 0x97b   :  { %v9655_v20 = vpop.eup %9654  ;;  %8713 = vmatprep.subr.bf16.mxu1 %v3914_v41  ;;  %4038 = vmatprep.mubr.bf16.mxu1 %v12475_v38 }
 0x97c   :  { %v3902_v10 = vmul.f32 %v9655_v20, %v9653_v24  ;;  %4284 = vmatpush1.bf16.msra.mxu0 %v4243_v18 }
 0x97d   :  { %4285 = vmatprep.subr.bf16.mxu0 %v4249_v31  ;;  %v12501_v31 = vld [vmem:[#allocation42_spill] sm:$0xff] }
 0x97e   :  { %8714 = vmatpush3.bf16.msra.mxu1 %v3914_v41  ;;  %v3904_v39 = vpack.c.bf16 %v3902_v10, %v3902_v10  ;;  %v11559_v41 = vld [vmem:[#allocation3 + $0x20] sm:$0xff] }
 0x97f   :  { %8715 = vmatprep.subr.bf16.mxu1 %v3919_v8 }
 0x980   :  { %4286 = vmatpush1.bf16.msra.mxu0 %v4248_v53 }
 0x981   :  { %3988 = vmatmul.mubr.bf16.gmra.mrb[180].mxu0 %v3904_v39  ;;  %4039 = vmatmul.mubr.bf16.gmra.mrb[176].mxu1 %v3904_v39 }
 0x982   :  { %8716 = vmatpush3.bf16.msra.mxu1 %v3919_v8  ;;  %8727 = vmatprep.mubr.bf16.mxu1 %v3903_v40  ;;  %v4280_v40 = vld [vmem:[#allocation3 + $0x128] sm:$0xff] }
 0x983   :  { %8717 = vmatprep.subr.bf16.mxu1 %v3924_v56  ;;  %4315 = vmatprep.mubr.bf16.mxu0 %v12475_v38 }
 0x984   :  { %4287 = vmatprep.subr.bf16.mxu0 %v4254_v19 }
 0x986   :  { %8718 = vmatpush3.bf16.msra.mxu1 %v3924_v56 }
 0x987   :  { %8719 = vmatprep.subr.bf16.mxu1 %v3929_v28 }
 0x98a   :  { %8720 = vmatpush3.bf16.msra.mxu1 %v3929_v28 }
 0x98b   :  { %8721 = vmatprep.subr.bf16.mxu1 %v3934_v37 }
 0x98e   :  { %8722 = vmatpush3.bf16.msra.mxu1 %v3934_v37 }
 0x98f   :  { %v3445_v48 = vpop.xlane.xlu1 %3444  ;;  %8723 = vmatprep.subr.bf16.mxu1 %v3939_v45 }
 0x990   :  { %9656 = vrcp.f32 %v3445_v48 }
 0x992   :  { %8724 = vmatpush3.bf16.msra.mxu1 %v3939_v45 }
 0x993   :  { %8725 = vmatprep.subr.bf16.mxu1 %v3944_v14 }
 0x996   :  { %8726 = vmatpush3.bf16.msra.mxu1 %v3944_v14 }
 0x997   :  { %4334 = vmatprep.subr.bf16.mxu1 %v4246_v17 }
 0x999   :  { %8728 = vmatmul.mubr.bf16.vlgmr.msra.gmra.mrb[180].mxu1 %v3904_v39 }
 0x99a   :  { %v9657_v27 = vpop.eup %9656  ;;  %4366 = vmatprep.mubr.bf16.mxu1 %v12475_v38  ;;  %4335 = vmatpush1.bf16.msra.mxu1 %v4245_v55 }
 0x99b   :  { %v3453_v50 = vmul.f32 %v9657_v27, %v3445_v48  ;;  %4336 = vmatprep.subr.bf16.mxu1 %v4251_v35 }
 0x99d   :  { %v3456_v13 = vsub.f32 2.0, %v3453_v50 }
 0x99e   :  { %4337 = vmatpush1.bf16.msra.mxu1 %v4250_v47 }
 0x99f   :  { %v3459_v23 = vmul.f32 %v9657_v27, %v3456_v13  ;;  %4338 = vmatprep.subr.bf16.mxu1 %v4256_v11 }
 0x9a1   :  { %v3462_v60 = vmul.f32 %v11512_v29, %v3459_v23  ;;  %v4253_v29 = vld [vmem:[#allocation3 + $0x50] sm:$0xff] }
 0x9a2   :  { %4288 = vmatpush1.bf16.msra.mxu0 %v4253_v29  ;;  %4339 = vmatpush1.bf16.msra.mxu1 %v4255_v44  ;;  %v12502_v29 = vld [vmem:[#allocation44_spill] sm:$0xff] }
 0x9a3   :  { %3466 = vst [vmem:[#allocation10 + $0x78] sm:$0xff] %v3462_v60  ;;  %4289 = vmatprep.subr.bf16.mxu0 %v4259_v63  ;;  %4340 = vmatprep.subr.bf16.mxu1 %v4261_v9 }
 0x9a6   :  { %4290 = vmatpush1.bf16.msra.mxu0 %v4258_v15  ;;  %4341 = vmatpush1.bf16.msra.mxu1 %v4260_v1 }
 0x9a7   :  { %4291 = vmatprep.subr.bf16.mxu0 %v4264_v58  ;;  %4342 = vmatprep.subr.bf16.mxu1 %v4266_v42 }
 0x9aa   :  { %4292 = vmatpush1.bf16.msra.mxu0 %v4263_v61  ;;  %4343 = vmatpush1.bf16.msra.mxu1 %v4265_v51 }
 0x9ab   :  { %4293 = vmatprep.subr.bf16.mxu0 %v4269_v12  ;;  %4344 = vmatprep.subr.bf16.mxu1 %v4271_v21 }
 0x9ae   :  { %4294 = vmatpush1.bf16.msra.mxu0 %v4268_v62  ;;  %4345 = vmatpush1.bf16.msra.mxu1 %v4270_v16 }
 0x9af   :  { %4295 = vmatprep.subr.bf16.mxu0 %v4274_v30  ;;  %4346 = vmatprep.subr.bf16.mxu1 %v4276_v26 }
 0x9b2   :  { %4296 = vmatpush1.bf16.msra.mxu0 %v4273_v22  ;;  %4347 = vmatpush1.bf16.msra.mxu1 %v4275_v46  ;;  %v12503_v22 = vld [vmem:[#allocation43_spill] sm:$0xff] }
 0x9b3   :  { %4297 = vmatprep.subr.bf16.mxu0 %v4279_v34  ;;  %4348 = vmatprep.subr.bf16.mxu1 %v4281_v33 }
 0x9b6   :  { %4298 = vmatpush1.bf16.msra.mxu0 %v4278_v59  ;;  %4349 = vmatpush1.bf16.msra.mxu1 %v4280_v40  ;;  %v12504_v59 = vld [vmem:[#allocation45_spill] sm:$0xff] }
 0x9b7   :  { %8731 = vmatprep.subr.bf16.mxu0 %v11559_v41 }
 0xa4c   :  { %v3979_v24 = vpop.f32.mrb[48].mxu0  ;;  %v4030_v20 = vpop.f32.mrb[48].mxu1 }
 0xa4d   :  { %v8983_v10 = vadd.f32 %v3979_v24, %v10622_v4  ;;  %v3981_v8 = vpop.f32.mrb[49].mxu0  ;;  %v4032_v39 = vpop.f32.mrb[49].mxu1  ;;  %v9019_v25 = vadd.f32 %v4030_v20, %v10624_v5 }
 0xa4e   :  { %v8984_v56 = vadd.f32 %v3981_v8, %v10626_v6  ;;  %v3983_v28 = vpop.f32.mrb[50].mxu0  ;;  %v4034_v37 = vpop.f32.mrb[50].mxu1  ;;  %v9020_v19 = vadd.f32 %v4032_v39, %v10628_v7 }
 0xa4f   :  { %v8241_v45 = vmul.f32 -1.442695, %v8983_v10  ;;  %v8985_v48 = vadd.f32 %v3983_v28, %v10622_v4  ;;  %v3985_v14 = vpop.f32.mrb[51].mxu0  ;;  %v4036_v27 = vpop.f32.mrb[51].mxu1  ;;  %v9021_v55 = vadd.f32 %v4034_v37, %v10624_v5  ;;  %v8243_v58 = vmul.f32 -1.442695, %v9019_v25 }
 0xa50   :  { %v8242_v50 = vmul.f32 -1.442695, %v8984_v56  ;;  %v8986_v13 = vadd.f32 %v3985_v14, %v10626_v6  ;;  %v9022_v12 = vadd.f32 %v4036_v27, %v10628_v7 }
 0xa51   :  { %9658 = vpow2.f32 %v8241_v45  ;;  %v8244_v23 = vmul.f32 -1.442695, %v8985_v48  ;;  %v8246_v42 = vmul.f32 -1.442695, %v9021_v55 }
 0xa52   :  { %v8245_v60 = vmul.f32 -1.442695, %v8986_v13  ;;  %9660 = vpow2.f32 %v8242_v50  ;;  %v8240_v50 = vld [vmem:[%s12337_s3 + $0x3] ss:$0 sm:$0xff] }
 0xa53   :  { %9662 = vpow2.f32 %v8244_v23 }
 0xa54   :  { %v3989_v18 = vpop.f32.mrb[180].mxu0  ;;  %v4040_v17 = vpop.f32.mrb[176].mxu1  ;;  %9664 = vpow2.f32 %v8245_v60 }
 0xa55   :  { %v4165_v53 = vadd.f32 %v3989_v18, %v12501_v31  ;;  %v3991_v35 = vpop.f32.mrb[181].mxu0  ;;  %v4042_v47 = vpop.f32.mrb[177].mxu1  ;;  %v4167_v46 = vadd.f32 %v4040_v17, %v12503_v22  ;;  %v4252_v22 = vld [vmem:[#allocation3 + $0x48] sm:$0xff] }
 0xa56   :  { %v4166_v11 = vadd.f32 %v3991_v35, %v12502_v29  ;;  %v3993_v44 = vpop.f32.mrb[182].mxu0  ;;  %v4044_v63 = vpop.f32.mrb[178].mxu1  ;;  %v4168_v40 = vadd.f32 %v4042_v47, %v12504_v59 }
 0xa57   :  { %v8247_v15 = vmul.f32 -1.442695, %v4165_v53  ;;  %v3994_v9 = vpop.f32.mrb[183].mxu0  ;;  %v4045_v1 = vpop.f32.mrb[179].mxu1  ;;  %v8249_v20 = vmul.f32 -1.442695, %v4167_v46 }
 0xa58   :  { %v8248_v61 = vmul.f32 -1.442695, %v4166_v11 }
 0xa59   :  { %9666 = vpow2.f32 %v8247_v15 }
 0xa5a   :  { %9668 = vtanh.f32 %v9020_v19 }
 0xa5b   :  { %v9659_v51 = vpop.eup %9658  ;;  %9670 = vpow2.f32 %v8248_v61 }
 0xa5c   :  { %v4196_v62 = vadd.f32 1.0, %v9659_v51  ;;  %9672 = vpow2.f32 %v8243_v58  ;;  %v9661_v21 = vpop.eup %9660 }
 0xa5d   :  { %9674 = vpow2.f32 %v8246_v42  ;;  %v9663_v16 = vpop.eup %9662  ;;  %v4197_v30 = vadd.f32 1.0, %v9661_v21 }
 0xa5e   :  { %9676 = vrcp.f32 %v4196_v62  ;;  %v4199_v26 = vadd.f32 1.0, %v9663_v16  ;;  %v9665_v34 = vpop.eup %9664 }
 0xa5f   :  { %9678 = vtanh.f32 %v9022_v12  ;;  %v4200_v33 = vadd.f32 1.0, %v9665_v34 }
 0xa60   :  { %9680 = vrcp.f32 %v4197_v30 }
 0xa61   :  { %9682 = vrcp.f32 %v4199_v26 }
 0xa62   :  { %9684 = vrcp.f32 %v4200_v33  ;;  %v4257_v33 = vld [vmem:[#allocation3 + $0x70] sm:$0xff] }
 0xa63   :  { %v9667_v24 = vpop.eup %9666  ;;  %9686 = vtanh.f32 %v4168_v40  ;;  %v4262_v40 = vld [vmem:[#allocation3 + $0x98] sm:$0xff] }
 0xa64   :  { %v9669_v10 = vpop.eup %9668  ;;  %v4202_v8 = vadd.f32 1.0, %v9667_v24  ;;  %v4267_v24 = vld [vmem:[#allocation3 + $0xc0] sm:$0xff] }
 0xa65   :  { %v9671_v39 = vpop.eup %9670 }
 0xa66   :  { %v9673_v56 = vpop.eup %9672  ;;  %9688 = vrcp.f32 %v4202_v8  ;;  %v4203_v28 = vadd.f32 1.0, %v9671_v39  ;;  %v4584_v8 = vld [vmem:[#allocation3 + $0x158] sm:$0xff]  ;;  %v4582_v39 = vld [vmem:[#allocation3 + $0x148] sm:$0xff] }
 0xa67   :  { %v9675_v37 = vpop.eup %9674  ;;  %9690 = vpow2.f32 %v8249_v20  ;;  %v4198_v23 = vadd.f32 1.0, %v9673_v56  ;;  %v4277_v20 = vld [vmem:[#allocation3 + $0x110] sm:$0xff]  ;;  %4672 = vmatprep.subr.bf16.mxu1 %v4584_v8 }
 0xa68   :  { %v9677_v45 = vpop.eup %9676  ;;  %9692 = vrcp.f32 %v4203_v28  ;;  %v4201_v31 = vadd.f32 1.0, %v9675_v37  ;;  %v4583_v56 = vld [vmem:[#allocation3 + $0x150] sm:$0xff]  ;;  %v4581_v28 = vld [vmem:[#allocation3 + $0x140] sm:$0xff] }
 0xa69   :  { %v9679_v48 = vpop.eup %9678  ;;  %v4229_v14 = vmul.f32 %v9677_v45, %v9669_v10  ;;  %9694 = vrcp.f32 %v4198_v23  ;;  %v4282_v10 = vld [vmem:[#allocation3 + $0x138] sm:$0xff]  ;;  %v4589_v37 = vld [vmem:[#allocation3 + $0x180] sm:$0xff]  ;;  %v4587_v45 = vld [vmem:[#allocation3 + $0x170] sm:$0xff] }
 0xa6a   :  { %v9681_v27 = vpop.eup %9680  ;;  %v4591_v23 = vld [vmem:[#allocation3 + $0x190] sm:$0xff] }
 0xa6b   :  { %v9683_v13 = vpop.eup %9682  ;;  %v4226_v60 = vmul.f32 %v9681_v27, %v11531_v36  ;;  %v4594_v27 = vld [vmem:[#allocation3 + $0x1a8] sm:$0xff] }
 0xa6c   :  { %v4230_v25 = vmul.f32 %v9683_v13, %v9679_v48  ;;  %v8729_v18 = vpop.f32.mrb[180].mxu1  ;;  %v9685_v17 = vpop.eup %9684  ;;  %v4588_v48 = vld [vmem:[#allocation3 + $0x178] sm:$0xff]  ;;  %v4593_v13 = vld [vmem:[#allocation3 + $0x1a0] sm:$0xff] }
 0xa6d   :  { %v11578_v55 = vadd.f32 %v4229_v14, %v4226_v60  ;;  %v11580_v53 = vadd.f32 %v8729_v18, %v8240_v50  ;;  %v4081_v35 = vpop.f32.mrb[181].mxu1  ;;  %v4227_v47 = vmul.f32 %v9685_v17, %v11538_v32  ;;  %v9687_v29 = vpop.eup %9686  ;;  %v4586_v14 = vld [vmem:[#allocation3 + $0x168] sm:$0xff]  ;;  %v4599_v60 = vld [vmem:[#allocation3 + $0x1d0] sm:$0xff]  ;;  %v4596_v17 = vld [vmem:[#allocation3 + $0x1b8] sm:$0xff] }
 0xa6e   :  { %v8730_v19 = vpop.f32.mrb[182].mxu1  ;;  %v11589_v1 = vadd.f32 %v8240_v50, %v4081_v35  ;;  %v4598_v18 = vld [vmem:[#allocation3 + $0x1c8] sm:$0xff] }
 0xa6f   :  { %v4084_v11 = vpop.f32.mrb[183].mxu1  ;;  %4109 = vmax.xlane.f32.xlu0 %v11580_v53  ;;  %9696 = vtanh.f32 %v11578_v55  ;;  %v11585_v36 = vadd.f32 %v4230_v25, %v4227_v47  ;;  %v4597_v25 = vld [vmem:[#allocation3 + $0x1c0] sm:$0xff]  ;;  %v4602_v35 = vld [vmem:[#allocation3 + $0x1e8] sm:$0xff]  ;;  %v4603_v47 = vld [vmem:[#allocation3 + $0x1f0] sm:$0xff] }
 0xa70   :  { %v9689_v44 = vpop.eup %9688  ;;  %v11587_v63 = vadd.f32 %v8240_v50, %v4084_v11  ;;  %9698 = vrcp.f32 %v4201_v31  ;;  %v4592_v50 = vld [vmem:[#allocation3 + $0x198] sm:$0xff]  ;;  %v4601_v19 = vld [vmem:[#allocation3 + $0x1e0] sm:$0xff]  ;;  %v4607_v11 = vld [vmem:[#allocation3 + $0x210] sm:$0xff] }
 0xa71   :  { %v9691_v15 = vpop.eup %9690  ;;  %v4231_v9 = vmul.f32 %v9689_v44, %v9687_v29  ;;  %9700 = vtanh.f32 %v11585_v36  ;;  %v4604_v31 = vld [vmem:[#allocation3 + $0x1f8] sm:$0xff]  ;;  %v4609_v29 = vld [vmem:[#allocation3 + $0x220] sm:$0xff] }
 0xa72   :  { %v9693_v58 = vpop.eup %9692  ;;  %4107 = vmax.xlane.f32.xlu1 %v11587_v63  ;;  %v4204_v61 = vadd.f32 1.0, %v9691_v15  ;;  %v4608_v44 = vld [vmem:[#allocation3 + $0x218] sm:$0xff]  ;;  %v4606_v15 = vld [vmem:[#allocation3 + $0x208] sm:$0xff] }
 0xa73   :  { %v4228_v32 = vmul.f32 %v9693_v58, %v11548_v52  ;;  %4105 = vmax.xlane.f32.xlu0 %v11589_v1  ;;  %v9695_v51 = vpop.eup %9694  ;;  %v4612_v58 = vld [vmem:[#allocation3 + $0x238] sm:$0xff] }
 0xa75   :  { %v11595_v42 = vadd.f32 %v4231_v9, %v4228_v32  ;;  %v4614_v9 = vld [vmem:[#allocation3 + $0x248] sm:$0xff]  ;;  %v4613_v32 = vld [vmem:[#allocation3 + $0x240] sm:$0xff] }
 0xa77   :  { %9702 = vtanh.f32 %v11595_v42 }
 0xa78   :  { %9704 = vrcp.f32 %v4204_v61  ;;  %v4611_v61 = vld [vmem:[#allocation3 + $0x230] sm:$0xff] }
 0xa79   :  { %v9697_v12 = vpop.eup %9696 }
 0xa7a   :  { %v9699_v62 = vpop.eup %9698  ;;  %v4238_v16 = vmul.f32 %v9697_v12, %v9695_v51  ;;  %v4619_v51 = vld [vmem:[#allocation3 + $0x270] sm:$0xff]  ;;  %v4617_v12 = vld [vmem:[#allocation3 + $0x260] sm:$0xff] }
 0xa7b   :  { %v9701_v21 = vpop.eup %9700 }
 0xa7c   :  { %v4239_v30 = vmul.f32 %v9701_v21, %v9699_v62  ;;  %v4618_v62 = vld [vmem:[#allocation3 + $0x268] sm:$0xff]  ;;  %v4616_v21 = vld [vmem:[#allocation3 + $0x258] sm:$0xff] }
 0xa7e   :  { %v4241_v26 = vpack.c.bf16 %v4239_v30, %v4238_v16  ;;  %v11603_v16 = vld [vmem:[#allocation3 + $0x160] sm:$0xff] }
 0xa80   :  { %4316 = vmatmul.mubr.bf16.vlgmr.msra.gmra.mrb[184].mxu0 %v4241_v26  ;;  %4367 = vmatmul.mubr.bf16.vlgmr.msra.gmra.mrb[184].mxu1 %v4241_v26 }
 0xa81   :  { %v9703_v46 = vpop.eup %9702  ;;  %8732 = vmatpush3.bf16.msra.mxu0 %v11559_v41  ;;  %4325 = vmatprep.mubr.bf16.mxu0 %v12475_v38  ;;  %v4272_v41 = vld [vmem:[#allocation3 + $0xe8] sm:$0xff] }
 0xa82   :  { %v9705_v52 = vpop.eup %9704  ;;  %8733 = vmatprep.subr.bf16.mxu0 %v4252_v22  ;;  %4376 = vmatprep.mubr.bf16.mxu1 %v12475_v38 }
 0xa83   :  { %v4240_v34 = vmul.f32 %v9705_v52, %v9703_v46  ;;  %4673 = vmatpush1.bf16.msra.mxu1 %v4583_v56 }
 0xa84   :  { %4674 = vmatprep.subr.bf16.mxu1 %v4589_v37 }
 0xa85   :  { %8734 = vmatpush3.bf16.msra.mxu0 %v4252_v22  ;;  %v4242_v59 = vpack.c.bf16 %v4240_v34, %v4240_v34  ;;  %v12505_v22 = vld [vmem:[#allocation46_spill] sm:$0xff] }
 0xa86   :  { %8735 = vmatprep.subr.bf16.mxu0 %v4257_v33 }
 0xa87   :  { %4675 = vmatpush1.bf16.msra.mxu1 %v4588_v48 }
 0xa88   :  { %4326 = vmatmul.mubr.bf16.gmra.mrb[188].mxu0 %v4242_v59  ;;  %4377 = vmatmul.mubr.bf16.gmra.mrb[188].mxu1 %v4242_v59 }
 0xa89   :  { %8736 = vmatpush3.bf16.msra.mxu0 %v4257_v33  ;;  %8747 = vmatprep.mubr.bf16.mxu0 %v4241_v26  ;;  %v12506_v33 = vld [vmem:[#allocation48_spill] sm:$0xff] }
 0xa8a   :  { %8737 = vmatprep.subr.bf16.mxu0 %v4262_v40  ;;  %4704 = vmatprep.mubr.bf16.mxu1 %v12475_v38 }
 0xa8b   :  { %4676 = vmatprep.subr.bf16.mxu1 %v4594_v27 }
 0xa8c   :  { %4677 = vmatpush1.bf16.msra.mxu1 %v4593_v13 }
 0xa8d   :  { %8738 = vmatpush3.bf16.msra.mxu0 %v4262_v40  ;;  %4678 = vmatprep.subr.bf16.mxu1 %v4599_v60 }
 0xa8e   :  { %8739 = vmatprep.subr.bf16.mxu0 %v4267_v24 }
 0xa90   :  { %4679 = vmatpush1.bf16.msra.mxu1 %v4598_v18 }
 0xa91   :  { %8740 = vmatpush3.bf16.msra.mxu0 %v4267_v24  ;;  %4680 = vmatprep.subr.bf16.mxu1 %v4604_v31 }
 0xa92   :  { %8741 = vmatprep.subr.bf16.mxu0 %v4272_v41 }
 0xa94   :  { %4681 = vmatpush1.bf16.msra.mxu1 %v4603_v47 }
 0xa95   :  { %8742 = vmatpush3.bf16.msra.mxu0 %v4272_v41  ;;  %4682 = vmatprep.subr.bf16.mxu1 %v4609_v29 }
 0xa96   :  { %8743 = vmatprep.subr.bf16.mxu0 %v4277_v20 }
 0xa98   :  { %4683 = vmatpush1.bf16.msra.mxu1 %v4608_v44 }
 0xa99   :  { %8744 = vmatpush3.bf16.msra.mxu0 %v4277_v20  ;;  %4684 = vmatprep.subr.bf16.mxu1 %v4614_v9  ;;  %v12507_v20 = vld [vmem:[#allocation50_spill] sm:$0xff] }
 0xa9a   :  { %8745 = vmatprep.subr.bf16.mxu0 %v4282_v10 }
 0xa9c   :  { %4685 = vmatpush1.bf16.msra.mxu1 %v4613_v32 }
 0xa9d   :  { %8746 = vmatpush3.bf16.msra.mxu0 %v4282_v10  ;;  %4686 = vmatprep.subr.bf16.mxu1 %v4619_v51 }
 0xa9e   :  { %4621 = vmatprep.subr.bf16.mxu0 %v4582_v39 }
 0xaa0   :  { %8748 = vmatmul.mubr.bf16.vlgmr.msra.gmra.mrb[192].mxu0 %v4242_v59  ;;  %4687 = vmatpush1.bf16.msra.mxu1 %v4618_v62  ;;  %v12514_v62 = vld [vmem:[#allocation53_spill] sm:$0xff] }
 0xaa1   :  { %4653 = vmatprep.mubr.bf16.mxu0 %v12475_v38  ;;  %4622 = vmatpush1.bf16.msra.mxu0 %v4581_v28  ;;  %v12508_v28 = vld [vmem:[#allocation52_spill] sm:$0xff] }
 0xaa2   :  { %4623 = vmatprep.subr.bf16.mxu0 %v4587_v45  ;;  %8751 = vmatprep.subr.bf16.mxu1 %v11603_v16 }
 0xaa5   :  { %4624 = vmatpush1.bf16.msra.mxu0 %v4586_v14  ;;  %v12509_v14 = vld [vmem:[#allocation47_spill] sm:$0xff] }
 0xaa6   :  { %4625 = vmatprep.subr.bf16.mxu0 %v4592_v50 }
 0xaa9   :  { %4626 = vmatpush1.bf16.msra.mxu0 %v4591_v23  ;;  %v12510_v23 = vld [vmem:[#allocation51_spill] sm:$0xff] }
 0xaaa   :  { %4627 = vmatprep.subr.bf16.mxu0 %v4597_v25  ;;  %v12511_v25 = vld [vmem:[#allocation54_spill] sm:$0xff] }
 0xaad   :  { %4628 = vmatpush1.bf16.msra.mxu0 %v4596_v17 }
 0xaae   :  { %4629 = vmatprep.subr.bf16.mxu0 %v4602_v35  ;;  %v12512_v35 = vld [vmem:[#allocation49_spill] sm:$0xff] }
 0xab1   :  { %4630 = vmatpush1.bf16.msra.mxu0 %v4601_v19  ;;  %v12513_v19 = vld [vmem:[#allocation56_spill] sm:$0xff] }
 0xab2   :  { %4631 = vmatprep.subr.bf16.mxu0 %v4607_v11 }
 0xab5   :  { %4632 = vmatpush1.bf16.msra.mxu0 %v4606_v15 }
 0xab6   :  { %4633 = vmatprep.subr.bf16.mxu0 %v4612_v58 }
 0xab9   :  { %4634 = vmatpush1.bf16.msra.mxu0 %v4611_v61 }
 0xaba   :  { %4635 = vmatprep.subr.bf16.mxu0 %v4617_v12 }
 0xabd   :  { %4636 = vmatpush1.bf16.msra.mxu0 %v4616_v21 }
 0xb53   :  { %v4317_v30 = vpop.f32.mrb[184].mxu0  ;;  %v4368_v26 = vpop.f32.mrb[184].mxu1 }
 0xb54   :  { %v4495_v46 = vadd.f32 %v4317_v30, %v12505_v22  ;;  %v4319_v52 = vpop.f32.mrb[185].mxu0  ;;  %v4370_v34 = vpop.f32.mrb[185].mxu1  ;;  %v4497_v27 = vadd.f32 %v4368_v26, %v12509_v14 }
 0xb55   :  { %v4496_v59 = vadd.f32 %v4319_v52, %v12506_v33  ;;  %v4321_v40 = vpop.f32.mrb[186].mxu0  ;;  %v4372_v24 = vpop.f32.mrb[186].mxu1  ;;  %v4498_v47 = vadd.f32 %v4370_v34, %v12512_v35  ;;  %v12515_v34 = vld [vmem:[#allocation55_spill] sm:$0xff] }
 0xb56   :  { %v8251_v41 = vmul.f32 -1.442695, %v4495_v46  ;;  %v4499_v10 = vadd.f32 %v4321_v40, %v12507_v20  ;;  %v4323_v8 = vpop.f32.mrb[187].mxu0  ;;  %v4374_v39 = vpop.f32.mrb[187].mxu1  ;;  %v4501_v60 = vadd.f32 %v4372_v24, %v12510_v23  ;;  %v8253_v32 = vmul.f32 -1.442695, %v4497_v27 }
 0xb57   :  { %v8252_v56 = vmul.f32 -1.442695, %v4496_v59  ;;  %v4500_v37 = vadd.f32 %v4323_v8, %v12508_v28  ;;  %v4502_v21 = vadd.f32 %v4374_v39, %v12514_v62  ;;  %v12516_v24 = vld [vmem:[#allocation57_spill] sm:$0xff] }
 0xb58   :  { %9706 = vpow2.f32 %v8251_v41  ;;  %v8254_v45 = vmul.f32 -1.442695, %v4499_v10  ;;  %v8256_v51 = vmul.f32 -1.442695, %v4501_v60 }
 0xb59   :  { %v8255_v48 = vmul.f32 -1.442695, %v4500_v37  ;;  %9708 = vpow2.f32 %v8252_v56 }
 0xb5a   :  { %9710 = vpow2.f32 %v8254_v45 }
 0xb5b   :  { %v4327_v50 = vpop.f32.mrb[188].mxu0  ;;  %v4378_v13 = vpop.f32.mrb[188].mxu1  ;;  %9712 = vpow2.f32 %v8255_v48 }
 0xb5c   :  { %v4503_v18 = vadd.f32 %v4327_v50, %v12511_v25  ;;  %v4329_v17 = vpop.f32.mrb[189].mxu0  ;;  %v4380_v31 = vpop.f32.mrb[189].mxu1  ;;  %v4505_v33 = vadd.f32 %v4378_v13, %v12515_v34  ;;  %v8250_v13 = vld [vmem:[%s12337_s3] ss:$0 sm:$0xff] }
 0xb5d   :  { %v4504_v29 = vadd.f32 %v4329_v17, %v12513_v19  ;;  %v4331_v11 = vpop.f32.mrb[190].mxu0  ;;  %v4382_v44 = vpop.f32.mrb[190].mxu1  ;;  %v4506_v41 = vadd.f32 %v4380_v31, %v12516_v24 }
 0xb5e   :  { %v8257_v15 = vmul.f32 -1.442695, %v4503_v18  ;;  %v4332_v9 = vpop.f32.mrb[191].mxu0  ;;  %v4383_v58 = vpop.f32.mrb[191].mxu1  ;;  %v8259_v10 = vmul.f32 -1.442695, %v4505_v33 }
 0xb5f   :  { %v8258_v61 = vmul.f32 -1.442695, %v4504_v29 }
 0xb60   :  { %9714 = vpow2.f32 %v8257_v15 }
 0xb61   :  { %9716 = vtanh.f32 %v4498_v47 }
 0xb62   :  { %v9707_v12 = vpop.eup %9706  ;;  %9718 = vpow2.f32 %v8258_v61 }
 0xb63   :  { %v4534_v30 = vadd.f32 1.0, %v9707_v12  ;;  %9720 = vpow2.f32 %v8253_v32  ;;  %v9709_v26 = vpop.eup %9708 }
 0xb64   :  { %9722 = vpow2.f32 %v8256_v51  ;;  %v9711_v22 = vpop.eup %9710  ;;  %v4535_v46 = vadd.f32 1.0, %v9709_v26 }
 0xb65   :  { %9724 = vrcp.f32 %v4534_v30  ;;  %v4537_v52 = vadd.f32 1.0, %v9711_v22  ;;  %v9713_v59 = vpop.eup %9712 }
 0xb66   :  { %9726 = vtanh.f32 %v4502_v21  ;;  %v4538_v40 = vadd.f32 1.0, %v9713_v59 }
 0xb67   :  { %9728 = vrcp.f32 %v4535_v46 }
 0xb68   :  { %9730 = vrcp.f32 %v4537_v52 }
 0xb69   :  { %9732 = vrcp.f32 %v4538_v40  ;;  %v4590_v40 = vld [vmem:[#allocation3 + $0x188] sm:$0xff] }
 0xb6a   :  { %v9715_v20 = vpop.eup %9714  ;;  %9734 = vtanh.f32 %v4506_v41 }
 0xb6b   :  { %v9717_v8 = vpop.eup %9716  ;;  %v4540_v39 = vadd.f32 1.0, %v9715_v20  ;;  %v4595_v20 = vld [vmem:[#allocation3 + $0x1b0] sm:$0xff] }
 0xb6c   :  { %v9719_v56 = vpop.eup %9718 }
 0xb6d   :  { %v9721_v28 = vpop.eup %9720  ;;  %9736 = vrcp.f32 %v4540_v39  ;;  %v4541_v37 = vadd.f32 1.0, %v9719_v56  ;;  %v4605_v39 = vld [vmem:[#allocation3 + $0x200] sm:$0xff]  ;;  %v4615_v56 = vld [vmem:[#allocation3 + $0x250] sm:$0xff] }
 0xb6e   :  { %v9723_v45 = vpop.eup %9722  ;;  %9738 = vpow2.f32 %v8259_v10  ;;  %v4536_v60 = vadd.f32 1.0, %v9721_v28  ;;  %v4620_v28 = vld [vmem:[#allocation3 + $0x278] sm:$0xff] }
 0xb6f   :  { %v9725_v48 = vpop.eup %9724  ;;  %9740 = vrcp.f32 %v4541_v37  ;;  %v4539_v47 = vadd.f32 1.0, %v9723_v45  ;;  %v4920_v37 = vld [vmem:[#allocation3 + $0x288] sm:$0xff]  ;;  %v4919_v45 = vld [vmem:[#allocation3 + $0x280] sm:$0xff] }
 0xb70   :  { %v9727_v14 = vpop.eup %9726  ;;  %v4567_v27 = vmul.f32 %v9725_v48, %v9717_v8  ;;  %9742 = vrcp.f32 %v4536_v60  ;;  %v4600_v8 = vld [vmem:[#allocation3 + $0x1d8] sm:$0xff]  ;;  %4959 = vmatprep.subr.bf16.mxu0 %v4920_v37 }
 0xb71   :  { %v9729_v50 = vpop.eup %9728  ;;  %v4922_v48 = vld [vmem:[#allocation3 + $0x298] sm:$0xff] }
 0xb72   :  { %v9731_v23 = vpop.eup %9730  ;;  %v4564_v25 = vmul.f32 %v9729_v50, %v11578_v55  ;;  %v4924_v50 = vld [vmem:[#allocation3 + $0x2a8] sm:$0xff]  ;;  %v4930_v60 = vld [vmem:[#allocation3 + $0x2d8] sm:$0xff] }
 0xb73   :  { %v4568_v18 = vmul.f32 %v9731_v23, %v9727_v14  ;;  %v8749_v17 = vpop.f32.mrb[192].mxu0  ;;  %v9733_v31 = vpop.eup %9732  ;;  %v4921_v14 = vld [vmem:[#allocation3 + $0x290] sm:$0xff]  ;;  %v4926_v23 = vld [vmem:[#allocation3 + $0x2b8] sm:$0xff] }
 0xb74   :  { %v11622_v35 = vadd.f32 %v4567_v27, %v4564_v25  ;;  %v11624_v19 = vadd.f32 %v8749_v17, %v8250_v13  ;;  %v4419_v29 = vpop.f32.mrb[193].mxu0  ;;  %v4565_v11 = vmul.f32 %v9733_v31, %v11585_v36  ;;  %v9735_v15 = vpop.eup %9734  ;;  %v4925_v27 = vld [vmem:[#allocation3 + $0x2b0] sm:$0xff]  ;;  %v4931_v17 = vld [vmem:[#allocation3 + $0x2e0] sm:$0xff] }
 0xb75   :  { %v8750_v44 = vpop.f32.mrb[194].mxu0  ;;  %v11633_v12 = vadd.f32 %v8250_v13, %v4419_v29  ;;  %v4929_v25 = vld [vmem:[#allocation3 + $0x2d0] sm:$0xff]  ;;  %v4935_v31 = vld [vmem:[#allocation3 + $0x300] sm:$0xff] }
 0xb76   :  { %v4422_v9 = vpop.f32.mrb[195].mxu0  ;;  %4447 = vmax.xlane.f32.xlu1 %v11624_v19  ;;  %9744 = vtanh.f32 %v11622_v35  ;;  %v11629_v55 = vadd.f32 %v4568_v18, %v4565_v11  ;;  %v4932_v18 = vld [vmem:[#allocation3 + $0x2e8] sm:$0xff]  ;;  %v4937_v29 = vld [vmem:[#allocation3 + $0x310] sm:$0xff] }
 0xb77   :  { %v9737_v58 = vpop.eup %9736  ;;  %v11631_v32 = vadd.f32 %v8250_v13, %v4422_v9  ;;  %9746 = vrcp.f32 %v4539_v47  ;;  %v4927_v13 = vld [vmem:[#allocation3 + $0x2c0] sm:$0xff]  ;;  %v4934_v47 = vld [vmem:[#allocation3 + $0x2f8] sm:$0xff]  ;;  %v4936_v11 = vld [vmem:[#allocation3 + $0x308] sm:$0xff] }
 0xb78   :  { %v9739_v61 = vpop.eup %9738  ;;  %v4569_v51 = vmul.f32 %v9737_v58, %v9735_v15  ;;  %9748 = vtanh.f32 %v11629_v55  ;;  %v4940_v44 = vld [vmem:[#allocation3 + $0x328] sm:$0xff]  ;;  %v4939_v15 = vld [vmem:[#allocation3 + $0x320] sm:$0xff]  ;;  %v4942_v9 = vld [vmem:[#allocation3 + $0x338] sm:$0xff] }
 0xb79   :  { %v9741_v62 = vpop.eup %9740  ;;  %4445 = vmax.xlane.f32.xlu0 %v11631_v32  ;;  %v4542_v21 = vadd.f32 1.0, %v9739_v61  ;;  %v4941_v58 = vld [vmem:[#allocation3 + $0x330] sm:$0xff] }
 0xb7a   :  { %v4566_v36 = vmul.f32 %v9741_v62, %v11595_v42  ;;  %4443 = vmax.xlane.f32.xlu1 %v11633_v12  ;;  %v9743_v26 = vpop.eup %9742  ;;  %v4945_v61 = vld [vmem:[#allocation3 + $0x350] sm:$0xff]  ;;  %v4947_v62 = vld [vmem:[#allocation3 + $0x360] sm:$0xff] }
 0xb7c   :  { %v11639_v30 = vadd.f32 %v4569_v51, %v4566_v36  ;;  %v4944_v51 = vld [vmem:[#allocation3 + $0x348] sm:$0xff]  ;;  %v4946_v36 = vld [vmem:[#allocation3 + $0x358] sm:$0xff] }
 0xb7e   :  { %9750 = vtanh.f32 %v11639_v30 }
 0xb7f   :  { %9752 = vrcp.f32 %v4542_v21  ;;  %v4950_v21 = vld [vmem:[#allocation3 + $0x378] sm:$0xff] }
 0xb80   :  { %v9745_v22 = vpop.eup %9744 }
 0xb81   :  { %v9747_v46 = vpop.eup %9746  ;;  %v4576_v34 = vmul.f32 %v9745_v22, %v9743_v26  ;;  %v4952_v26 = vld [vmem:[#allocation3 + $0x388] sm:$0xff]  ;;  %v4949_v22 = vld [vmem:[#allocation3 + $0x370] sm:$0xff] }
 0xb82   :  { %v9749_v52 = vpop.eup %9748 }
 0xb83   :  { %v4577_v33 = vmul.f32 %v9749_v52, %v9747_v46  ;;  %v4951_v46 = vld [vmem:[#allocation3 + $0x380] sm:$0xff] }
 0xb84   :  { %v4955_v52 = vld [vmem:[#allocation3 + $0x3a0] sm:$0xff] }
 0xb85   :  { %v4579_v59 = vpack.c.bf16 %v4577_v33, %v4576_v34  ;;  %v4957_v34 = vld [vmem:[#allocation3 + $0x3b0] sm:$0xff]  ;;  %v4954_v33 = vld [vmem:[#allocation3 + $0x398] sm:$0xff] }
 0xb87   :  { %4654 = vmatmul.mubr.bf16.vlgmr.msra.gmra.mrb[60].mxu0 %v4579_v59  ;;  %4705 = vmatmul.mubr.bf16.vlgmr.msra.gmra.mrb[60].mxu1 %v4579_v59 }
 0xb88   :  { %v9751_v24 = vpop.eup %9750  ;;  %8752 = vmatpush3.bf16.msra.mxu1 %v11603_v16  ;;  %4663 = vmatprep.mubr.bf16.mxu0 %v12475_v38  ;;  %v4610_v16 = vld [vmem:[#allocation3 + $0x228] sm:$0xff] }
 0xb89   :  { %v9753_v42 = vpop.eup %9752  ;;  %8753 = vmatprep.subr.bf16.mxu1 %v4590_v40  ;;  %4714 = vmatprep.mubr.bf16.mxu1 %v12475_v38 }
 0xb8a   :  { %v4578_v41 = vmul.f32 %v9753_v42, %v9751_v24  ;;  %4960 = vmatpush1.bf16.msra.mxu0 %v4919_v45 }
 0xb8b   :  { %4961 = vmatprep.subr.bf16.mxu0 %v4925_v27 }
 0xb8c   :  { %8754 = vmatpush3.bf16.msra.mxu1 %v4590_v40  ;;  %v4580_v10 = vpack.c.bf16 %v4578_v41, %v4578_v41  ;;  %v11647_v40 = vld [vmem:[#allocation3 + $0x2a0] sm:$0xff] }
 0xb8d   :  { %8755 = vmatprep.subr.bf16.mxu1 %v4595_v20 }
 0xb8e   :  { %4962 = vmatpush1.bf16.msra.mxu0 %v4924_v50 }
 0xb8f   :  { %4664 = vmatmul.mubr.bf16.gmra.mrb[196].mxu0 %v4580_v10  ;;  %4715 = vmatmul.mubr.bf16.gmra.mrb[192].mxu1 %v4580_v10 }
 0xb90   :  { %8756 = vmatpush3.bf16.msra.mxu1 %v4595_v20  ;;  %8767 = vmatprep.mubr.bf16.mxu1 %v4579_v59  ;;  %v4956_v59 = vld [vmem:[#allocation3 + $0x3a8] sm:$0xff] }
 0xb91   :  { %8757 = vmatprep.subr.bf16.mxu1 %v4600_v8  ;;  %4991 = vmatprep.mubr.bf16.mxu0 %v12475_v38 }
 0xb92   :  { %4963 = vmatprep.subr.bf16.mxu0 %v4930_v60 }
 0xb93   :  { %4964 = vmatpush1.bf16.msra.mxu0 %v4929_v25 }
 0xb94   :  { %8758 = vmatpush3.bf16.msra.mxu1 %v4600_v8  ;;  %4965 = vmatprep.subr.bf16.mxu0 %v4935_v31 }
 0xb95   :  { %8759 = vmatprep.subr.bf16.mxu1 %v4605_v39 }
 0xb97   :  { %4966 = vmatpush1.bf16.msra.mxu0 %v4934_v47 }
 0xb98   :  { %8760 = vmatpush3.bf16.msra.mxu1 %v4605_v39  ;;  %4967 = vmatprep.subr.bf16.mxu0 %v4940_v44 }
 0xb99   :  { %8761 = vmatprep.subr.bf16.mxu1 %v4610_v16 }
 0xb9b   :  { %4968 = vmatpush1.bf16.msra.mxu0 %v4939_v15 }
 0xb9c   :  { %8762 = vmatpush3.bf16.msra.mxu1 %v4610_v16  ;;  %4969 = vmatprep.subr.bf16.mxu0 %v4945_v61 }
 0xb9d   :  { %8763 = vmatprep.subr.bf16.mxu1 %v4615_v56 }
 0xb9f   :  { %4970 = vmatpush1.bf16.msra.mxu0 %v4944_v51 }
 0xba0   :  { %8764 = vmatpush3.bf16.msra.mxu1 %v4615_v56  ;;  %4971 = vmatprep.subr.bf16.mxu0 %v4950_v21 }
 0xba1   :  { %8765 = vmatprep.subr.bf16.mxu1 %v4620_v28 }
 0xba3   :  { %4972 = vmatpush1.bf16.msra.mxu0 %v4949_v22 }
 0xba4   :  { %8766 = vmatpush3.bf16.msra.mxu1 %v4620_v28  ;;  %4973 = vmatprep.subr.bf16.mxu0 %v4955_v52 }
 0xba5   :  { %5010 = vmatprep.subr.bf16.mxu1 %v4922_v48 }
 0xba7   :  { %8768 = vmatmul.mubr.bf16.vlgmr.msra.gmra.mrb[196].mxu1 %v4580_v10  ;;  %4974 = vmatpush1.bf16.msra.mxu0 %v4954_v33 }
 0xba8   :  { %5042 = vmatprep.mubr.bf16.mxu1 %v12475_v38  ;;  %5011 = vmatpush1.bf16.msra.mxu1 %v4921_v14 }
 0xba9   :  { %5012 = vmatprep.subr.bf16.mxu1 %v4927_v13  ;;  %8771 = vmatprep.subr.bf16.mxu0 %v11647_v40 }
 0xbac   :  { %5013 = vmatpush1.bf16.msra.mxu1 %v4926_v23 }
 0xbad   :  { %5014 = vmatprep.subr.bf16.mxu1 %v4932_v18  ;;  %v12517_v18 = vld [vmem:[#allocation58_spill] sm:$0xff] }
 0xbb0   :  { %5015 = vmatpush1.bf16.msra.mxu1 %v4931_v17 }
 0xbb1   :  { %5016 = vmatprep.subr.bf16.mxu1 %v4937_v29 }
 0xbb4   :  { %5017 = vmatpush1.bf16.msra.mxu1 %v4936_v11  ;;  %v12518_v11 = vld [vmem:[#allocation60_spill] sm:$0xff] }
 0xbb5   :  { %5018 = vmatprep.subr.bf16.mxu1 %v4942_v9 }
 0xbb8   :  { %5019 = vmatpush1.bf16.msra.mxu1 %v4941_v58 }
 0xbb9   :  { %5020 = vmatprep.subr.bf16.mxu1 %v4947_v62 }
 0xbbc   :  { %5021 = vmatpush1.bf16.msra.mxu1 %v4946_v36 }
 0xbbd   :  { %5022 = vmatprep.subr.bf16.mxu1 %v4952_v26 }
 0xbc0   :  { %5023 = vmatpush1.bf16.msra.mxu1 %v4951_v46 }
 0xbc1   :  { %5024 = vmatprep.subr.bf16.mxu1 %v4957_v34 }
 0xbc4   :  { %5025 = vmatpush1.bf16.msra.mxu1 %v4956_v59 }
 0xc5a   :  { %v4655_v24 = vpop.f32.mrb[60].mxu0  ;;  %v4706_v42 = vpop.f32.mrb[60].mxu1 }
 0xc5b   :  { %v8987_v41 = vadd.f32 %v4655_v24, %v10622_v4  ;;  %v4657_v20 = vpop.f32.mrb[61].mxu0  ;;  %v4708_v10 = vpop.f32.mrb[61].mxu1  ;;  %v9023_v13 = vadd.f32 %v4706_v42, %v10624_v5  ;;  %v12519_v24 = vld [vmem:[#allocation59_spill] sm:$0xff] }
 0xc5c   :  { %v8988_v8 = vadd.f32 %v4657_v20, %v10626_v6  ;;  %v4659_v39 = vpop.f32.mrb[62].mxu0  ;;  %v4710_v16 = vpop.f32.mrb[62].mxu1  ;;  %v9024_v29 = vadd.f32 %v4708_v10, %v10628_v7  ;;  %v12520_v10 = vld [vmem:[#allocation61_spill] sm:$0xff] }
 0xc5d   :  { %v8262_v56 = vmul.f32 -1.442695, %v8987_v41  ;;  %v8989_v28 = vadd.f32 %v4659_v39, %v10622_v4  ;;  %v4661_v37 = vpop.f32.mrb[63].mxu0  ;;  %v4712_v45 = vpop.f32.mrb[63].mxu1  ;;  %v9025_v25 = vadd.f32 %v4710_v16, %v10624_v5  ;;  %v8264_v62 = vmul.f32 -1.442695, %v9023_v13 }
 0xc5e   :  { %v8263_v48 = vmul.f32 -1.442695, %v8988_v8  ;;  %v8990_v14 = vadd.f32 %v4661_v37, %v10626_v6  ;;  %v9026_v22 = vadd.f32 %v4712_v45, %v10628_v7 }
 0xc5f   :  { %9754 = vpow2.f32 %v8262_v56  ;;  %v8265_v27 = vmul.f32 -1.442695, %v8989_v28  ;;  %v8267_v21 = vmul.f32 -1.442695, %v9025_v25 }
 0xc60   :  { %v8266_v50 = vmul.f32 -1.442695, %v8990_v14  ;;  %9756 = vpow2.f32 %v8263_v48 }
 0xc61   :  { %9758 = vpow2.f32 %v8265_v27 }
 0xc62   :  { %v4665_v23 = vpop.f32.mrb[196].mxu0  ;;  %v4716_v60 = vpop.f32.mrb[192].mxu1  ;;  %9760 = vpow2.f32 %v8266_v50 }
 0xc63   :  { %v4841_v17 = vadd.f32 %v4665_v23, %v12517_v18  ;;  %v4667_v31 = vpop.f32.mrb[197].mxu0  ;;  %v4718_v47 = vpop.f32.mrb[193].mxu1  ;;  %v4843_v42 = vadd.f32 %v4716_v60, %v12519_v24  ;;  %v8261_v60 = vld [vmem:[%s12337_s3 + $0x1] ss:$0 sm:$0xff] }
 0xc64   :  { %v4842_v44 = vadd.f32 %v4667_v31, %v12518_v11  ;;  %v4669_v15 = vpop.f32.mrb[198].mxu0  ;;  %v4720_v9 = vpop.f32.mrb[194].mxu1  ;;  %v4844_v8 = vadd.f32 %v4718_v47, %v12520_v10 }
 0xc65   :  { %v8268_v58 = vmul.f32 -1.442695, %v4841_v17  ;;  %v4670_v61 = vpop.f32.mrb[199].mxu0  ;;  %v4721_v51 = vpop.f32.mrb[195].mxu1  ;;  %v8270_v16 = vmul.f32 -1.442695, %v4843_v42 }
 0xc66   :  { %v8269_v36 = vmul.f32 -1.442695, %v4842_v44 }
 0xc67   :  { %9762 = vpow2.f32 %v8268_v58 }
 0xc68   :  { %9764 = vtanh.f32 %v9024_v29 }
 0xc69   :  { %v9755_v26 = vpop.eup %9754  ;;  %9766 = vpow2.f32 %v8269_v36 }
 0xc6a   :  { %v4872_v46 = vadd.f32 1.0, %v9755_v26  ;;  %9768 = vpow2.f32 %v8264_v62  ;;  %v9757_v52 = vpop.eup %9756 }
 0xc6b   :  { %9770 = vpow2.f32 %v8267_v21  ;;  %v9759_v34 = vpop.eup %9758  ;;  %v4873_v33 = vadd.f32 1.0, %v9757_v52 }
 0xc6c   :  { %9772 = vrcp.f32 %v4872_v46  ;;  %v4875_v59 = vadd.f32 1.0, %v9759_v34  ;;  %v9761_v41 = vpop.eup %9760 }
 0xc6d   :  { %9774 = vtanh.f32 %v9026_v22  ;;  %v4876_v20 = vadd.f32 1.0, %v9761_v41 }
 0xc6e   :  { %9776 = vrcp.f32 %v4873_v33 }
 0xc6f   :  { %9778 = vrcp.f32 %v4875_v59 }
 0xc70   :  { %9780 = vrcp.f32 %v4876_v20 }
 0xc71   :  { %v9763_v39 = vpop.eup %9762  ;;  %9782 = vtanh.f32 %v4844_v8 }
 0xc72   :  { %v9765_v56 = vpop.eup %9764  ;;  %v4878_v28 = vadd.f32 1.0, %v9763_v39  ;;  %v4928_v39 = vld [vmem:[#allocation3 + $0x2c8] sm:$0xff] }
 0xc73   :  { %v9767_v37 = vpop.eup %9766 }
 0xc74   :  { %v9769_v45 = vpop.eup %9768  ;;  %9784 = vrcp.f32 %v4878_v28  ;;  %v4879_v48 = vadd.f32 1.0, %v9767_v37  ;;  %v4933_v28 = vld [vmem:[#allocation3 + $0x2f0] sm:$0xff] }
 0xc75   :  { %v9771_v14 = vpop.eup %9770  ;;  %9786 = vpow2.f32 %v8270_v16  ;;  %v4874_v18 = vadd.f32 1.0, %v9769_v45  ;;  %v4938_v45 = vld [vmem:[#allocation3 + $0x318] sm:$0xff] }
 0xc76   :  { %v9773_v27 = vpop.eup %9772  ;;  %9788 = vrcp.f32 %v4879_v48  ;;  %v4877_v44 = vadd.f32 1.0, %v9771_v14  ;;  %v4943_v48 = vld [vmem:[#allocation3 + $0x340] sm:$0xff]  ;;  %v4953_v14 = vld [vmem:[#allocation3 + $0x390] sm:$0xff] }
 0xc77   :  { %v9775_v50 = vpop.eup %9774  ;;  %v4905_v13 = vmul.f32 %v9773_v27, %v9765_v56  ;;  %9790 = vrcp.f32 %v4874_v18  ;;  %v4958_v27 = vld [vmem:[#allocation3 + $0x3b8] sm:$0xff]  ;;  %v5263_v18 = vld [vmem:[#allocation3 + $0x3f0] sm:$0xff] }
 0xc78   :  { %v9777_v23 = vpop.eup %9776 }
 0xc79   :  { %v9779_v25 = vpop.eup %9778  ;;  %v4902_v17 = vmul.f32 %v9777_v23, %v11622_v35  ;;  %v5259_v23 = vld [vmem:[#allocation3 + $0x3d0] sm:$0xff] }
 0xc7a   :  { %v4906_v31 = vmul.f32 %v9779_v25, %v9775_v50  ;;  %v8769_v47 = vpop.f32.mrb[196].mxu1  ;;  %v9781_v29 = vpop.eup %9780  ;;  %v5260_v50 = vld [vmem:[#allocation3 + $0x3d8] sm:$0xff]  ;;  %v5265_v25 = vld [vmem:[#allocation3 + $0x400] sm:$0xff] }
 0xc7b   :  { %v11666_v11 = vadd.f32 %v4905_v13, %v4902_v17  ;;  %v11668_v15 = vadd.f32 %v8769_v47, %v8261_v60  ;;  %v4757_v9 = vpop.f32.mrb[197].mxu1  ;;  %v4903_v58 = vmul.f32 %v9781_v29, %v11629_v55  ;;  %v9783_v51 = vpop.eup %9782  ;;  %5348 = vmatprep.subr.bf16.mxu1 %v5260_v50  ;;  %v5258_v13 = vld [vmem:[#allocation3 + $0x3c8] sm:$0xff]  ;;  %v5264_v17 = vld [vmem:[#allocation3 + $0x3f8] sm:$0xff] }
 0xc7c   :  { %v8770_v61 = vpop.f32.mrb[198].mxu1  ;;  %v11677_v46 = vadd.f32 %v8261_v60, %v4757_v9  ;;  %v5270_v47 = vld [vmem:[#allocation3 + $0x428] sm:$0xff]  ;;  %v5268_v29 = vld [vmem:[#allocation3 + $0x418] sm:$0xff]  ;;  %v5267_v9 = vld [vmem:[#allocation3 + $0x410] sm:$0xff] }
 0xc7d   :  { %v4760_v62 = vpop.f32.mrb[199].mxu1  ;;  %4785 = vmax.xlane.f32.xlu0 %v11668_v15  ;;  %9792 = vtanh.f32 %v11666_v11  ;;  %v11673_v35 = vadd.f32 %v4906_v31, %v4903_v58  ;;  %v5262_v31 = vld [vmem:[#allocation3 + $0x3e8] sm:$0xff]  ;;  %v5275_v58 = vld [vmem:[#allocation3 + $0x450] sm:$0xff]  ;;  %v5273_v61 = vld [vmem:[#allocation3 + $0x440] sm:$0xff] }
 0xc7e   :  { %v9785_v36 = vpop.eup %9784  ;;  %v11675_v21 = vadd.f32 %v8261_v60, %v4760_v62  ;;  %9794 = vrcp.f32 %v4877_v44  ;;  %v5257_v60 = vld [vmem:[#allocation3 + $0x3c0] sm:$0xff]  ;;  %v5272_v62 = vld [vmem:[#allocation3 + $0x438] sm:$0xff] }
 0xc7f   :  { %v9787_v26 = vpop.eup %9786  ;;  %v4907_v22 = vmul.f32 %v9785_v36, %v9783_v51  ;;  %9796 = vtanh.f32 %v11673_v35  ;;  %v5269_v44 = vld [vmem:[#allocation3 + $0x420] sm:$0xff]  ;;  %v5274_v51 = vld [vmem:[#allocation3 + $0x448] sm:$0xff]  ;;  %v5280_v36 = vld [vmem:[#allocation3 + $0x478] sm:$0xff] }
 0xc80   :  { %v9789_v52 = vpop.eup %9788  ;;  %4783 = vmax.xlane.f32.xlu1 %v11675_v21  ;;  %v4880_v34 = vadd.f32 1.0, %v9787_v26  ;;  %v5278_v26 = vld [vmem:[#allocation3 + $0x468] sm:$0xff] }
 0xc81   :  { %v4904_v55 = vmul.f32 %v9789_v52, %v11639_v30  ;;  %4781 = vmax.xlane.f32.xlu0 %v11677_v46  ;;  %v9791_v59 = vpop.eup %9790  ;;  %v5277_v52 = vld [vmem:[#allocation3 + $0x460] sm:$0xff] }
 0xc83   :  { %v11683_v33 = vadd.f32 %v4907_v22, %v4904_v55  ;;  %v5279_v22 = vld [vmem:[#allocation3 + $0x470] sm:$0xff]  ;;  %v5285_v55 = vld [vmem:[#allocation3 + $0x4a0] sm:$0xff] }
 0xc85   :  { %9798 = vtanh.f32 %v11683_v33 }
 0xc86   :  { %9800 = vrcp.f32 %v4880_v34  ;;  %v5283_v34 = vld [vmem:[#allocation3 + $0x490] sm:$0xff] }
 0xc87   :  { %v9793_v24 = vpop.eup %9792 }
 0xc88   :  { %v9795_v42 = vpop.eup %9794  ;;  %v4914_v20 = vmul.f32 %v9793_v24, %v9791_v59  ;;  %v5284_v59 = vld [vmem:[#allocation3 + $0x498] sm:$0xff]  ;;  %v5282_v24 = vld [vmem:[#allocation3 + $0x488] sm:$0xff] }
 0xc89   :  { %v9797_v41 = vpop.eup %9796 }
 0xc8a   :  { %v4915_v10 = vmul.f32 %v9797_v41, %v9795_v42  ;;  %v5290_v42 = vld [vmem:[#allocation3 + $0x4c8] sm:$0xff]  ;;  %v5288_v41 = vld [vmem:[#allocation3 + $0x4b8] sm:$0xff] }
 0xc8c   :  { %v4917_v8 = vpack.c.bf16 %v4915_v10, %v4914_v20  ;;  %v5289_v20 = vld [vmem:[#allocation3 + $0x4c0] sm:$0xff]  ;;  %v5287_v10 = vld [vmem:[#allocation3 + $0x4b0] sm:$0xff] }
 0xc8e   :  { %4992 = vmatmul.mubr.bf16.vlgmr.msra.gmra.mrb[200].mxu0 %v4917_v8  ;;  %5043 = vmatmul.mubr.bf16.vlgmr.msra.gmra.mrb[200].mxu1 %v4917_v8 }
 0xc8f   :  { %v9799_v16 = vpop.eup %9798  ;;  %8772 = vmatpush3.bf16.msra.mxu0 %v11647_v40  ;;  %5001 = vmatprep.mubr.bf16.mxu0 %v12475_v38  ;;  %v4948_v40 = vld [vmem:[#allocation3 + $0x368] sm:$0xff] }
 0xc90   :  { %v9801_v30 = vpop.eup %9800  ;;  %8773 = vmatprep.subr.bf16.mxu0 %v4928_v39  ;;  %5052 = vmatprep.mubr.bf16.mxu1 %v12475_v38 }
 0xc91   :  { %v4916_v56 = vmul.f32 %v9801_v30, %v9799_v16  ;;  %5349 = vmatpush1.bf16.msra.mxu1 %v5259_v23  ;;  %v5294_v16 = vld [vmem:[#allocation3 + $0x4e8] sm:$0xff]  ;;  %v5292_v30 = vld [vmem:[#allocation3 + $0x4d8] sm:$0xff] }
 0xc92   :  { %5350 = vmatprep.subr.bf16.mxu1 %v5265_v25  ;;  %v12523_v25 = vld [vmem:[#allocation66_spill] sm:$0xff] }
 0xc93   :  { %8774 = vmatpush3.bf16.msra.mxu0 %v4928_v39  ;;  %v4918_v37 = vpack.c.bf16 %v4916_v56, %v4916_v56  ;;  %v5293_v39 = vld [vmem:[#allocation3 + $0x4e0] sm:$0xff] }
 0xc94   :  { %8775 = vmatprep.subr.bf16.mxu0 %v4933_v28  ;;  %v11691_v56 = vld [vmem:[#allocation3 + $0x3e0] sm:$0xff] }
 0xc95   :  { %5351 = vmatpush1.bf16.msra.mxu1 %v5264_v17 }
 0xc96   :  { %5002 = vmatmul.mubr.bf16.gmra.mrb[204].mxu0 %v4918_v37  ;;  %5053 = vmatmul.mubr.bf16.gmra.mrb[204].mxu1 %v4918_v37 }
 0xc97   :  { %8776 = vmatpush3.bf16.msra.mxu0 %v4933_v28  ;;  %8787 = vmatprep.mubr.bf16.mxu0 %v4917_v8  ;;  %v5295_v8 = vld [vmem:[#allocation3 + $0x4f0] sm:$0xff] }
 0xc98   :  { %8777 = vmatprep.subr.bf16.mxu0 %v4938_v45  ;;  %5380 = vmatprep.mubr.bf16.mxu1 %v12475_v38 }
 0xc99   :  { %5352 = vmatprep.subr.bf16.mxu1 %v5270_v47 }
 0xc9a   :  { %5353 = vmatpush1.bf16.msra.mxu1 %v5269_v44 }
 0xc9b   :  { %8778 = vmatpush3.bf16.msra.mxu0 %v4938_v45  ;;  %5354 = vmatprep.subr.bf16.mxu1 %v5275_v58  ;;  %v12521_v45 = vld [vmem:[#allocation62_spill] sm:$0xff] }
 0xc9c   :  { %8779 = vmatprep.subr.bf16.mxu0 %v4943_v48 }
 0xc9e   :  { %5355 = vmatpush1.bf16.msra.mxu1 %v5274_v51 }
 0xc9f   :  { %8780 = vmatpush3.bf16.msra.mxu0 %v4943_v48  ;;  %5356 = vmatprep.subr.bf16.mxu1 %v5280_v36 }
 0xca0   :  { %8781 = vmatprep.subr.bf16.mxu0 %v4948_v40 }
 0xca2   :  { %5357 = vmatpush1.bf16.msra.mxu1 %v5279_v22 }
 0xca3   :  { %8782 = vmatpush3.bf16.msra.mxu0 %v4948_v40  ;;  %5358 = vmatprep.subr.bf16.mxu1 %v5285_v55 }
 0xca4   :  { %8783 = vmatprep.subr.bf16.mxu0 %v4953_v14 }
 0xca6   :  { %5359 = vmatpush1.bf16.msra.mxu1 %v5284_v59 }
 0xca7   :  { %8784 = vmatpush3.bf16.msra.mxu0 %v4953_v14  ;;  %5360 = vmatprep.subr.bf16.mxu1 %v5290_v42 }
 0xca8   :  { %8785 = vmatprep.subr.bf16.mxu0 %v4958_v27 }
 0xcaa   :  { %5361 = vmatpush1.bf16.msra.mxu1 %v5289_v20 }
 0xcab   :  { %8786 = vmatpush3.bf16.msra.mxu0 %v4958_v27  ;;  %5362 = vmatprep.subr.bf16.mxu1 %v5295_v8  ;;  %v12522_v27 = vld [vmem:[#allocation64_spill] sm:$0xff] }
 0xcac   :  { %5297 = vmatprep.subr.bf16.mxu0 %v5258_v13 }
 0xcae   :  { %8788 = vmatmul.mubr.bf16.vlgmr.msra.gmra.mrb[208].mxu0 %v4918_v37  ;;  %5363 = vmatpush1.bf16.msra.mxu1 %v5294_v16 }
 0xcaf   :  { %5329 = vmatprep.mubr.bf16.mxu0 %v12475_v38  ;;  %5298 = vmatpush1.bf16.msra.mxu0 %v5257_v60 }
 0xcb0   :  { %5299 = vmatprep.subr.bf16.mxu0 %v5263_v18  ;;  %8791 = vmatprep.subr.bf16.mxu1 %v11691_v56 }
 0xcb3   :  { %5300 = vmatpush1.bf16.msra.mxu0 %v5262_v31 }
 0xcb4   :  { %5301 = vmatprep.subr.bf16.mxu0 %v5268_v29  ;;  %v12524_v29 = vld [vmem:[#allocation68_spill] sm:$0xff] }
 0xcb7   :  { %5302 = vmatpush1.bf16.msra.mxu0 %v5267_v9 }
 0xcb8   :  { %5303 = vmatprep.subr.bf16.mxu0 %v5273_v61  ;;  %v12525_v61 = vld [vmem:[#allocation63_spill] sm:$0xff] }
 0xcbb   :  { %5304 = vmatpush1.bf16.msra.mxu0 %v5272_v62 }
 0xcbc   :  { %5305 = vmatprep.subr.bf16.mxu0 %v5278_v26  ;;  %v12526_v26 = vld [vmem:[#allocation67_spill] sm:$0xff] }
 0xcbf   :  { %5306 = vmatpush1.bf16.msra.mxu0 %v5277_v52  ;;  %v12527_v52 = vld [vmem:[#allocation70_spill] sm:$0xff] }
 0xcc0   :  { %5307 = vmatprep.subr.bf16.mxu0 %v5283_v34 }
 0xcc3   :  { %5308 = vmatpush1.bf16.msra.mxu0 %v5282_v24  ;;  %v12528_v24 = vld [vmem:[#allocation65_spill] sm:$0xff] }
 0xcc4   :  { %5309 = vmatprep.subr.bf16.mxu0 %v5288_v41  ;;  %v12529_v41 = vld [vmem:[#allocation72_spill] sm:$0xff] }
 0xcc7   :  { %5310 = vmatpush1.bf16.msra.mxu0 %v5287_v10 }
 0xcc8   :  { %5311 = vmatprep.subr.bf16.mxu0 %v5293_v39 }
 0xccb   :  { %5312 = vmatpush1.bf16.msra.mxu0 %v5292_v30 }
 0xd61   :  { %v4993_v28 = vpop.f32.mrb[200].mxu0  ;;  %v5044_v37 = vpop.f32.mrb[200].mxu1 }
 0xd62   :  { %v5171_v48 = vadd.f32 %v4993_v28, %v12521_v45  ;;  %v4995_v40 = vpop.f32.mrb[201].mxu0  ;;  %v5046_v14 = vpop.f32.mrb[201].mxu1  ;;  %v5173_v51 = vadd.f32 %v5044_v37, %v12525_v61 }
 0xd63   :  { %v5172_v50 = vadd.f32 %v4995_v40, %v12522_v27  ;;  %v4997_v13 = vpop.f32.mrb[202].mxu0  ;;  %v5048_v23 = vpop.f32.mrb[202].mxu1  ;;  %v5174_v42 = vadd.f32 %v5046_v14, %v12528_v24  ;;  %v12530_v40 = vld [vmem:[#allocation69_spill] sm:$0xff] }
 0xd64   :  { %v8273_v60 = vmul.f32 -1.442695, %v5171_v48  ;;  %v5175_v18 = vadd.f32 %v4997_v13, %v12523_v25  ;;  %v4999_v17 = vpop.f32.mrb[203].mxu0  ;;  %v5050_v31 = vpop.f32.mrb[203].mxu1  ;;  %v5177_v22 = vadd.f32 %v5048_v23, %v12526_v26  ;;  %v8275_v28 = vmul.f32 -1.442695, %v5173_v51 }
 0xd65   :  { %v8274_v47 = vmul.f32 -1.442695, %v5172_v50  ;;  %v5176_v44 = vadd.f32 %v4999_v17, %v12524_v29  ;;  %v5178_v27 = vadd.f32 %v5050_v31, %v12530_v40  ;;  %v12531_v25 = vld [vmem:[#allocation71_spill] sm:$0xff]  ;;  %v12532_v29 = vld [vmem:[#allocation73_spill] sm:$0xff] }
 0xd66   :  { %9802 = vpow2.f32 %v8273_v60  ;;  %v8276_v9 = vmul.f32 -1.442695, %v5175_v18  ;;  %v8278_v45 = vmul.f32 -1.442695, %v5177_v22 }
 0xd67   :  { %v8277_v58 = vmul.f32 -1.442695, %v5176_v44  ;;  %9804 = vpow2.f32 %v8274_v47 }
 0xd68   :  { %9806 = vpow2.f32 %v8276_v9 }
 0xd69   :  { %v5003_v62 = vpop.f32.mrb[204].mxu0  ;;  %v5054_v36 = vpop.f32.mrb[204].mxu1  ;;  %9808 = vpow2.f32 %v8277_v58 }
 0xd6a   :  { %v5179_v55 = vadd.f32 %v5003_v62, %v12527_v52  ;;  %v5005_v34 = vpop.f32.mrb[205].mxu0  ;;  %v5056_v59 = vpop.f32.mrb[205].mxu1  ;;  %v5181_v18 = vadd.f32 %v5054_v36, %v12531_v25 }
 0xd6b   :  { %v5180_v20 = vadd.f32 %v5005_v34, %v12529_v41  ;;  %v5007_v10 = vpop.f32.mrb[206].mxu0  ;;  %v5058_v8 = vpop.f32.mrb[206].mxu1  ;;  %v5182_v44 = vadd.f32 %v5056_v59, %v12532_v29  ;;  %v8272_v59 = vld [vmem:[%s12337_s3 + $0x2] ss:$0 sm:$0xff] }
 0xd6c   :  { %v8279_v39 = vmul.f32 -1.442695, %v5179_v55  ;;  %v5008_v16 = vpop.f32.mrb[207].mxu0  ;;  %v5059_v30 = vpop.f32.mrb[207].mxu1  ;;  %v8281_v31 = vmul.f32 -1.442695, %v5181_v18 }
 0xd6d   :  { %v8280_v37 = vmul.f32 -1.442695, %v5180_v20 }
 0xd6e   :  { %9810 = vpow2.f32 %v8279_v39 }
 0xd6f   :  { %9812 = vtanh.f32 %v5174_v42 }
 0xd70   :  { %v9803_v48 = vpop.eup %9802  ;;  %9814 = vpow2.f32 %v8280_v37 }
 0xd71   :  { %v5210_v50 = vadd.f32 1.0, %v9803_v48  ;;  %9816 = vpow2.f32 %v8275_v28  ;;  %v9805_v14 = vpop.eup %9804 }
 0xd72   :  { %9818 = vpow2.f32 %v8278_v45  ;;  %v9807_v13 = vpop.eup %9806  ;;  %v5211_v23 = vadd.f32 1.0, %v9805_v14 }
 0xd73   :  { %9820 = vrcp.f32 %v5210_v50  ;;  %v5213_v60 = vadd.f32 1.0, %v9807_v13  ;;  %v9809_v17 = vpop.eup %9808 }
 0xd74   :  { %9822 = vtanh.f32 %v5178_v27  ;;  %v5214_v47 = vadd.f32 1.0, %v9809_v17 }
 0xd75   :  { %9824 = vrcp.f32 %v5211_v23 }
 0xd76   :  { %9826 = vrcp.f32 %v5213_v60 }
 0xd77   :  { %9828 = vrcp.f32 %v5214_v47 }
 0xd78   :  { %v9811_v9 = vpop.eup %9810  ;;  %9830 = vtanh.f32 %v5182_v44 }
 0xd79   :  { %v9813_v58 = vpop.eup %9812  ;;  %v5216_v61 = vadd.f32 1.0, %v9811_v9 }
 0xd7a   :  { %v9815_v51 = vpop.eup %9814 }
 0xd7b   :  { %v9817_v62 = vpop.eup %9816  ;;  %9832 = vrcp.f32 %v5216_v61  ;;  %v5217_v26 = vadd.f32 1.0, %v9815_v51  ;;  %v5266_v61 = vld [vmem:[#allocation3 + $0x408] sm:$0xff] }
 0xd7c   :  { %v9819_v22 = vpop.eup %9818  ;;  %9834 = vpow2.f32 %v8281_v31  ;;  %v5212_v42 = vadd.f32 1.0, %v9817_v62 }
 0xd7d   :  { %v9821_v52 = vpop.eup %9820  ;;  %9836 = vrcp.f32 %v5217_v26  ;;  %v5215_v16 = vadd.f32 1.0, %v9819_v22  ;;  %v5271_v26 = vld [vmem:[#allocation3 + $0x430] sm:$0xff] }
 0xd7e   :  { %v9823_v36 = vpop.eup %9822  ;;  %v5243_v55 = vmul.f32 %v9821_v52, %v9813_v58  ;;  %9838 = vrcp.f32 %v5212_v42  ;;  %v5276_v52 = vld [vmem:[#allocation3 + $0x458] sm:$0xff] }
 0xd7f   :  { %v9825_v34 = vpop.eup %9824  ;;  %v5598_v42 = vld [vmem:[#allocation3 + $0x18] sm:$0xff] }
 0xd80   :  { %v9827_v24 = vpop.eup %9826  ;;  %v5240_v41 = vmul.f32 %v9825_v34, %v11666_v11  ;;  %v5296_v34 = vld [vmem:[#allocation3 + $0x4f8] sm:$0xff] }
 0xd81   :  { %v5244_v20 = vmul.f32 %v9827_v24, %v9823_v36  ;;  %v8789_v10 = vpop.f32.mrb[208].mxu0  ;;  %v9829_v8 = vpop.eup %9828  ;;  %v5281_v36 = vld [vmem:[#allocation3 + $0x480] sm:$0xff] }
 0xd82   :  { %v11710_v39 = vadd.f32 %v5243_v55, %v5240_v41  ;;  %v11712_v30 = vadd.f32 %v8789_v10, %v8272_v59  ;;  %v5095_v28 = vpop.f32.mrb[209].mxu0  ;;  %v5241_v37 = vmul.f32 %v9829_v8, %v11673_v35  ;;  %v9831_v48 = vpop.eup %9830  ;;  %v5291_v55 = vld [vmem:[#allocation3 + $0x4d0] sm:$0xff]  ;;  %v5595_v24 = vld [vmem:[#allocation3] sm:$0xff]  ;;  %v5600_v10 = vld [vmem:[#allocation3 + $0x28] sm:$0xff] }
 0xd83   :  { %v8790_v45 = vpop.f32.mrb[210].mxu0  ;;  %v11721_v23 = vadd.f32 %v8272_v59, %v5095_v28  ;;  %v5597_v41 = vld [vmem:[#allocation3 + $0x10] sm:$0xff]  ;;  %v5603_v8 = vld [vmem:[#allocation3 + $0x40] sm:$0xff]  ;;  %v5606_v28 = vld [vmem:[#allocation3 + $0x58] sm:$0xff] }
 0xd84   :  { %v5098_v40 = vpop.f32.mrb[211].mxu0  ;;  %5123 = vmax.xlane.f32.xlu1 %v11712_v30  ;;  %9840 = vtanh.f32 %v11710_v39  ;;  %v11717_v11 = vadd.f32 %v5244_v20, %v5241_v37  ;;  %v5601_v20 = vld [vmem:[#allocation3 + $0x30] sm:$0xff]  ;;  %v5608_v45 = vld [vmem:[#allocation3 + $0x68] sm:$0xff] }
 0xd85   :  { %v9833_v27 = vpop.eup %9832  ;;  %v11719_v50 = vadd.f32 %v8272_v59, %v5098_v40  ;;  %9842 = vrcp.f32 %v5215_v16  ;;  %v5596_v59 = vld [vmem:[#allocation3 + $0x8] sm:$0xff]  ;;  %v5602_v16 = vld [vmem:[#allocation3 + $0x38] sm:$0xff]  ;;  %v5605_v37 = vld [vmem:[#allocation3 + $0x50] sm:$0xff] }
 0xd86   :  { %v9835_v14 = vpop.eup %9834  ;;  %v5245_v13 = vmul.f32 %v9833_v27, %v9831_v48  ;;  %9844 = vtanh.f32 %v11717_v11  ;;  %5635 = vmatprep.subr.bf16.mxu0 %v5596_v59  ;;  %v5607_v48 = vld [vmem:[#allocation3 + $0x60] sm:$0xff]  ;;  %v5610_v27 = vld [vmem:[#allocation3 + $0x78] sm:$0xff] }
 0xd87   :  { %v9837_v60 = vpop.eup %9836  ;;  %5121 = vmax.xlane.f32.xlu0 %v11719_v50  ;;  %v5218_v25 = vadd.f32 1.0, %v9835_v14  ;;  %v5611_v40 = vld [vmem:[#allocation3 + $0x80] sm:$0xff]  ;;  %v5613_v14 = vld [vmem:[#allocation3 + $0x90] sm:$0xff] }
 0xd88   :  { %v5242_v35 = vmul.f32 %v9837_v60, %v11683_v33  ;;  %5119 = vmax.xlane.f32.xlu1 %v11721_v23  ;;  %v9839_v17 = vpop.eup %9838  ;;  %v5616_v60 = vld [vmem:[#allocation3 + $0xa8] sm:$0xff] }
 0xd8a   :  { %v11727_v18 = vadd.f32 %v5245_v13, %v5242_v35  ;;  %v5612_v13 = vld [vmem:[#allocation3 + $0x88] sm:$0xff]  ;;  %v5615_v35 = vld [vmem:[#allocation3 + $0xa0] sm:$0xff] }
 0xd8c   :  { %9846 = vtanh.f32 %v11727_v18 }
 0xd8d   :  { %9848 = vrcp.f32 %v5218_v25  ;;  %v5618_v25 = vld [vmem:[#allocation3 + $0xb8] sm:$0xff] }
 0xd8e   :  { %v9841_v47 = vpop.eup %9840 }
 0xd8f   :  { %v9843_v29 = vpop.eup %9842  ;;  %v5252_v9 = vmul.f32 %v9841_v47, %v9839_v17  ;;  %v5617_v17 = vld [vmem:[#allocation3 + $0xb0] sm:$0xff] }
 0xd90   :  { %v9845_v44 = vpop.eup %9844  ;;  %v5621_v47 = vld [vmem:[#allocation3 + $0xd0] sm:$0xff] }
 0xd91   :  { %v5253_v31 = vmul.f32 %v9845_v44, %v9843_v29  ;;  %v5620_v29 = vld [vmem:[#allocation3 + $0xc8] sm:$0xff]  ;;  %v5623_v44 = vld [vmem:[#allocation3 + $0xe0] sm:$0xff] }
 0xd93   :  { %v5255_v58 = vpack.c.bf16 %v5253_v31, %v5252_v9  ;;  %v5622_v9 = vld [vmem:[#allocation3 + $0xd8] sm:$0xff] }
 0xd94   :  { %v5626_v31 = vld [vmem:[#allocation3 + $0xf8] sm:$0xff] }
 0xd95   :  { %5330 = vmatmul.mubr.bf16.vlgmr.msra.gmra.mrb[72].mxu0 %v5255_v58  ;;  %5381 = vmatmul.mubr.bf16.vlgmr.msra.gmra.mrb[72].mxu1 %v5255_v58 }
 0xd96   :  { %v9847_v51 = vpop.eup %9846  ;;  %8792 = vmatpush3.bf16.msra.mxu1 %v11691_v56  ;;  %5339 = vmatprep.mubr.bf16.mxu0 %v12475_v38  ;;  %v5286_v56 = vld [vmem:[#allocation3 + $0x4a8] sm:$0xff] }
 0xd97   :  { %v9849_v33 = vpop.eup %9848  ;;  %8793 = vmatprep.subr.bf16.mxu1 %v5266_v61  ;;  %5390 = vmatprep.mubr.bf16.mxu1 %v12475_v38 }
 0xd98   :  { %v5254_v62 = vmul.f32 %v9849_v33, %v9847_v51  ;;  %5636 = vmatpush1.bf16.msra.mxu0 %v5595_v24  ;;  %v5627_v51 = vld [vmem:[#allocation3 + $0x100] sm:$0xff] }
 0xd99   :  { %5637 = vmatprep.subr.bf16.mxu0 %v5601_v20  ;;  %v5631_v33 = vld [vmem:[#allocation3 + $0x120] sm:$0xff] }
 0xd9a   :  { %8794 = vmatpush3.bf16.msra.mxu1 %v5266_v61  ;;  %v5256_v22 = vpack.c.bf16 %v5254_v62, %v5254_v62  ;;  %v5625_v61 = vld [vmem:[#allocation3 + $0xf0] sm:$0xff] }
 0xd9b   :  { %8795 = vmatprep.subr.bf16.mxu1 %v5271_v26  ;;  %v5633_v62 = vld [vmem:[#allocation3 + $0x130] sm:$0xff] }
 0xd9c   :  { %5638 = vmatpush1.bf16.msra.mxu0 %v5600_v10 }
 0xd9d   :  { %5340 = vmatmul.mubr.bf16.gmra.mrb[212].mxu0 %v5256_v22  ;;  %5391 = vmatmul.mubr.bf16.gmra.mrb[208].mxu1 %v5256_v22 }
 0xd9e   :  { %8796 = vmatpush3.bf16.msra.mxu1 %v5271_v26  ;;  %8807 = vmatprep.mubr.bf16.mxu1 %v5255_v58  ;;  %v5628_v58 = vld [vmem:[#allocation3 + $0x108] sm:$0xff]  ;;  %v5630_v26 = vld [vmem:[#allocation3 + $0x118] sm:$0xff] }
 0xd9f   :  { %8797 = vmatprep.subr.bf16.mxu1 %v5276_v52  ;;  %5667 = vmatprep.mubr.bf16.mxu0 %v12475_v38 }
 0xda0   :  { %5639 = vmatprep.subr.bf16.mxu0 %v5606_v28 }
 0xda1   :  { %5640 = vmatpush1.bf16.msra.mxu0 %v5605_v37 }
 0xda2   :  { %8798 = vmatpush3.bf16.msra.mxu1 %v5276_v52  ;;  %5641 = vmatprep.subr.bf16.mxu0 %v5611_v40  ;;  %v11735_v52 = vld [vmem:[#allocation3 + $0x20] sm:$0xff] }
 0xda3   :  { %8799 = vmatprep.subr.bf16.mxu1 %v5281_v36 }
 0xda5   :  { %5642 = vmatpush1.bf16.msra.mxu0 %v5610_v27 }
 0xda6   :  { %8800 = vmatpush3.bf16.msra.mxu1 %v5281_v36  ;;  %5643 = vmatprep.subr.bf16.mxu0 %v5616_v60  ;;  %v12533_v60 = vld [vmem:[#allocation74_spill] sm:$0xff] }
 0xda7   :  { %8801 = vmatprep.subr.bf16.mxu1 %v5286_v56 }
 0xda9   :  { %5644 = vmatpush1.bf16.msra.mxu0 %v5615_v35 }
 0xdaa   :  { %8802 = vmatpush3.bf16.msra.mxu1 %v5286_v56  ;;  %5645 = vmatprep.subr.bf16.mxu0 %v5621_v47 }
 0xdab   :  { %8803 = vmatprep.subr.bf16.mxu1 %v5291_v55 }
 0xdad   :  { %5646 = vmatpush1.bf16.msra.mxu0 %v5620_v29  ;;  %v12534_v29 = vld [vmem:[#allocation76_spill] sm:$0xff] }
 0xdae   :  { %8804 = vmatpush3.bf16.msra.mxu1 %v5291_v55  ;;  %5647 = vmatprep.subr.bf16.mxu0 %v5626_v31 }
 0xdaf   :  { %8805 = vmatprep.subr.bf16.mxu1 %v5296_v34 }
 0xdb1   :  { %5648 = vmatpush1.bf16.msra.mxu0 %v5625_v61 }
 0xdb2   :  { %8806 = vmatpush3.bf16.msra.mxu1 %v5296_v34  ;;  %5649 = vmatprep.subr.bf16.mxu0 %v5631_v33 }
 0xdb3   :  { %5686 = vmatprep.subr.bf16.mxu1 %v5598_v42 }
 0xdb5   :  { %8808 = vmatmul.mubr.bf16.vlgmr.msra.gmra.mrb[212].mxu1 %v5256_v22  ;;  %v5632_v22 = vld [vmem:[#allocation3 + $0x128] sm:$0xff]  ;;  %5650 = vmatpush1.bf16.msra.mxu0 %v5630_v26 }
 0xdb6   :  { %5718 = vmatprep.mubr.bf16.mxu1 %v12475_v38  ;;  %5687 = vmatpush1.bf16.msra.mxu1 %v5597_v41 }
 0xdb7   :  { %5688 = vmatprep.subr.bf16.mxu1 %v5603_v8  ;;  %8811 = vmatprep.subr.bf16.mxu0 %v11735_v52 }
 0xdba   :  { %5689 = vmatpush1.bf16.msra.mxu1 %v5602_v16 }
 0xdbb   :  { %5690 = vmatprep.subr.bf16.mxu1 %v5608_v45 }
 0xdbe   :  { %5691 = vmatpush1.bf16.msra.mxu1 %v5607_v48 }
 0xdbf   :  { %5692 = vmatprep.subr.bf16.mxu1 %v5613_v14 }
 0xdc2   :  { %5693 = vmatpush1.bf16.msra.mxu1 %v5612_v13 }
 0xdc3   :  { %5694 = vmatprep.subr.bf16.mxu1 %v5618_v25 }
 0xdc6   :  { %5695 = vmatpush1.bf16.msra.mxu1 %v5617_v17 }
 0xdc7   :  { %5696 = vmatprep.subr.bf16.mxu1 %v5623_v44 }
 0xdca   :  { %5697 = vmatpush1.bf16.msra.mxu1 %v5622_v9 }
 0xdcb   :  { %5698 = vmatprep.subr.bf16.mxu1 %v5628_v58 }
 0xdce   :  { %5699 = vmatpush1.bf16.msra.mxu1 %v5627_v51 }
 0xdcf   :  { %5700 = vmatprep.subr.bf16.mxu1 %v5633_v62 }
 0xdd2   :  { %5701 = vmatpush1.bf16.msra.mxu1 %v5632_v22 }
 0xe68   :  { %v5331_v36 = vpop.f32.mrb[72].mxu0  ;;  %v5382_v56 = vpop.f32.mrb[72].mxu1 }
 0xe69   :  { %v8991_v55 = vadd.f32 %v5331_v36, %v10622_v4  ;;  %v5333_v34 = vpop.f32.mrb[73].mxu0  ;;  %v5384_v59 = vpop.f32.mrb[73].mxu1  ;;  %v9027_v40 = vadd.f32 %v5382_v56, %v10624_v5 }
 0xe6a   :  { %v8992_v24 = vadd.f32 %v5333_v34, %v10626_v6  ;;  %v5335_v42 = vpop.f32.mrb[74].mxu0  ;;  %v5386_v41 = vpop.f32.mrb[74].mxu1  ;;  %v9028_v47 = vadd.f32 %v5384_v59, %v10628_v7 }
 0xe6b   :  { %v8284_v20 = vmul.f32 -1.442695, %v8991_v55  ;;  %v8993_v10 = vadd.f32 %v5335_v42, %v10622_v4  ;;  %v5337_v8 = vpop.f32.mrb[75].mxu0  ;;  %v5388_v16 = vpop.f32.mrb[75].mxu1  ;;  %v9029_v13 = vadd.f32 %v5386_v41, %v10624_v5  ;;  %v8286_v33 = vmul.f32 -1.442695, %v9027_v40 }
 0xe6c   :  { %v8285_v28 = vmul.f32 -1.442695, %v8992_v24  ;;  %v8994_v37 = vadd.f32 %v5337_v8, %v10626_v6  ;;  %v9030_v36 = vadd.f32 %v5388_v16, %v10628_v7  ;;  %v12535_v42 = vld [vmem:[#allocation75_spill] sm:$0xff]  ;;  %v12536_v8 = vld [vmem:[#allocation77_spill] sm:$0xff] }
 0xe6d   :  { %9850 = vpow2.f32 %v8284_v20  ;;  %v8287_v45 = vmul.f32 -1.442695, %v8993_v10  ;;  %v8289_v26 = vmul.f32 -1.442695, %v9029_v13 }
 0xe6e   :  { %v8288_v48 = vmul.f32 -1.442695, %v8994_v37  ;;  %9852 = vpow2.f32 %v8285_v28 }
 0xe6f   :  { %9854 = vpow2.f32 %v8287_v45 }
 0xe70   :  { %v5341_v27 = vpop.f32.mrb[212].mxu0  ;;  %v5392_v14 = vpop.f32.mrb[208].mxu1  ;;  %9856 = vpow2.f32 %v8288_v48 }
 0xe71   :  { %v5517_v35 = vadd.f32 %v5341_v27, %v12533_v60  ;;  %v5343_v25 = vpop.f32.mrb[213].mxu0  ;;  %v5394_v17 = vpop.f32.mrb[209].mxu1  ;;  %v5519_v41 = vadd.f32 %v5392_v14, %v12535_v42 }
 0xe72   :  { %v5518_v44 = vadd.f32 %v5343_v25, %v12534_v29  ;;  %v5345_v9 = vpop.f32.mrb[214].mxu0  ;;  %v5396_v31 = vpop.f32.mrb[210].mxu1  ;;  %v5520_v28 = vadd.f32 %v5394_v17, %v12536_v8  ;;  %v8283_v17 = vld [vmem:[%s12337_s3 + $0x3] ss:$0 sm:$0xff] }
 0xe73   :  { %v8290_v58 = vmul.f32 -1.442695, %v5517_v35  ;;  %v5346_v61 = vpop.f32.mrb[215].mxu0  ;;  %v5397_v51 = vpop.f32.mrb[211].mxu1  ;;  %v8292_v16 = vmul.f32 -1.442695, %v5519_v41 }
 0xe74   :  { %v8291_v62 = vmul.f32 -1.442695, %v5518_v44 }
 0xe75   :  { %9858 = vpow2.f32 %v8290_v58 }
 0xe76   :  { %9860 = vtanh.f32 %v9028_v47 }
 0xe77   :  { %v9851_v22 = vpop.eup %9850  ;;  %9862 = vpow2.f32 %v8291_v62 }
 0xe78   :  { %v5548_v56 = vadd.f32 1.0, %v9851_v22  ;;  %9864 = vpow2.f32 %v8286_v33  ;;  %v9853_v55 = vpop.eup %9852 }
 0xe79   :  { %9866 = vpow2.f32 %v8289_v26  ;;  %v9855_v34 = vpop.eup %9854  ;;  %v5549_v59 = vadd.f32 1.0, %v9853_v55 }
 0xe7a   :  { %9868 = vrcp.f32 %v5548_v56  ;;  %v5551_v24 = vadd.f32 1.0, %v9855_v34  ;;  %v9857_v20 = vpop.eup %9856 }
 0xe7b   :  { %9870 = vtanh.f32 %v9030_v36  ;;  %v5552_v10 = vadd.f32 1.0, %v9857_v20 }
 0xe7c   :  { %9872 = vrcp.f32 %v5549_v59 }
 0xe7d   :  { %9874 = vrcp.f32 %v5551_v24 }
 0xe7e   :  { %9876 = vrcp.f32 %v5552_v10 }
 0xe7f   :  { %v9859_v37 = vpop.eup %9858  ;;  %9878 = vtanh.f32 %v5520_v28 }
 0xe80   :  { %v9861_v45 = vpop.eup %9860  ;;  %v5554_v48 = vadd.f32 1.0, %v9859_v37 }
 0xe81   :  { %v9863_v40 = vpop.eup %9862 }
 0xe82   :  { %v9865_v27 = vpop.eup %9864  ;;  %9880 = vrcp.f32 %v5554_v48  ;;  %v5555_v13 = vadd.f32 1.0, %v9863_v40 }
 0xe83   :  { %v9867_v60 = vpop.eup %9866  ;;  %9882 = vpow2.f32 %v8292_v16  ;;  %v5550_v44 = vadd.f32 1.0, %v9865_v27 }
 0xe84   :  { %v9869_v35 = vpop.eup %9868  ;;  %9884 = vrcp.f32 %v5555_v13  ;;  %v5553_v33 = vadd.f32 1.0, %v9867_v60  ;;  %v5604_v13 = vld [vmem:[#allocation3 + $0x48] sm:$0xff] }
 0xe85   :  { %v9871_v14 = vpop.eup %9870  ;;  %v5581_v25 = vmul.f32 %v9869_v35, %v9861_v45  ;;  %9886 = vrcp.f32 %v5550_v44  ;;  %v5634_v44 = vld [vmem:[#allocation3 + $0x138] sm:$0xff] }
 0xe86   :  { %v9873_v47 = vpop.eup %9872 }
 0xe87   :  { %v9875_v29 = vpop.eup %9874  ;;  %v5578_v9 = vmul.f32 %v9873_v47, %v11710_v39  ;;  %v5614_v47 = vld [vmem:[#allocation3 + $0x98] sm:$0xff] }
 0xe88   :  { %v5582_v31 = vmul.f32 %v9875_v29, %v9871_v14  ;;  %v8809_v58 = vpop.f32.mrb[212].mxu1  ;;  %v9877_v61 = vpop.eup %9876  ;;  %v5609_v14 = vld [vmem:[#allocation3 + $0x70] sm:$0xff] }
 0xe89   :  { %v11754_v51 = vadd.f32 %v5581_v25, %v5578_v9  ;;  %v11756_v62 = vadd.f32 %v8809_v58, %v8283_v17  ;;  %v5433_v26 = vpop.f32.mrb[213].mxu1  ;;  %v5579_v22 = vmul.f32 %v9877_v61, %v11717_v11  ;;  %v9879_v56 = vpop.eup %9878  ;;  %v5629_v29 = vld [vmem:[#allocation3 + $0x110] sm:$0xff]  ;;  %v5936_v9 = vld [vmem:[#allocation3 + $0x158] sm:$0xff]  ;;  %v5933_v61 = vld [vmem:[#allocation3 + $0x140] sm:$0xff] }
 0xe8a   :  { %v8810_v36 = vpop.f32.mrb[214].mxu1  ;;  %v11765_v41 = vadd.f32 %v8283_v17, %v5433_v26  ;;  %6024 = vmatprep.subr.bf16.mxu1 %v5936_v9  ;;  %v5935_v58 = vld [vmem:[#allocation3 + $0x150] sm:$0xff] }
 0xe8b   :  { %v5436_v55 = vpop.f32.mrb[215].mxu1  ;;  %5461 = vmax.xlane.f32.xlu0 %v11756_v62  ;;  %9888 = vtanh.f32 %v11754_v51  ;;  %v11761_v39 = vadd.f32 %v5582_v31, %v5579_v22  ;;  %v5934_v31 = vld [vmem:[#allocation3 + $0x148] sm:$0xff]  ;;  %v5939_v26 = vld [vmem:[#allocation3 + $0x170] sm:$0xff]  ;;  %v5940_v22 = vld [vmem:[#allocation3 + $0x178] sm:$0xff] }
 0xe8c   :  { %v9881_v34 = vpop.eup %9880  ;;  %v11763_v59 = vadd.f32 %v8283_v17, %v5436_v55  ;;  %9890 = vrcp.f32 %v5553_v33  ;;  %v5619_v17 = vld [vmem:[#allocation3 + $0xc0] sm:$0xff]  ;;  %v5938_v36 = vld [vmem:[#allocation3 + $0x168] sm:$0xff]  ;;  %v5944_v55 = vld [vmem:[#allocation3 + $0x198] sm:$0xff] }
 0xe8d   :  { %v9883_v24 = vpop.eup %9882  ;;  %v5583_v42 = vmul.f32 %v9881_v34, %v9879_v56  ;;  %9892 = vtanh.f32 %v11761_v39  ;;  %v5941_v33 = vld [vmem:[#allocation3 + $0x180] sm:$0xff]  ;;  %v5946_v56 = vld [vmem:[#allocation3 + $0x1a8] sm:$0xff] }
 0xe8e   :  { %v9885_v20 = vpop.eup %9884  ;;  %5459 = vmax.xlane.f32.xlu1 %v11763_v59  ;;  %v5556_v10 = vadd.f32 1.0, %v9883_v24  ;;  %v5945_v34 = vld [vmem:[#allocation3 + $0x1a0] sm:$0xff]  ;;  %v5943_v24 = vld [vmem:[#allocation3 + $0x190] sm:$0xff] }
 0xe8f   :  { %v5580_v11 = vmul.f32 %v9885_v20, %v11727_v18  ;;  %5457 = vmax.xlane.f32.xlu0 %v11765_v41  ;;  %v9887_v28 = vpop.eup %9886  ;;  %v5949_v20 = vld [vmem:[#allocation3 + $0x1c0] sm:$0xff] }
 0xe91   :  { %v11771_v8 = vadd.f32 %v5583_v42, %v5580_v11  ;;  %v5951_v42 = vld [vmem:[#allocation3 + $0x1d0] sm:$0xff]  ;;  %v5950_v11 = vld [vmem:[#allocation3 + $0x1c8] sm:$0xff] }
 0xe93   :  { %9894 = vtanh.f32 %v11771_v8 }
 0xe94   :  { %9896 = vrcp.f32 %v5556_v10  ;;  %v5948_v10 = vld [vmem:[#allocation3 + $0x1b8] sm:$0xff] }
 0xe95   :  { %v9889_v37 = vpop.eup %9888 }
 0xe96   :  { %v9891_v16 = vpop.eup %9890  ;;  %v5590_v48 = vmul.f32 %v9889_v37, %v9887_v28  ;;  %v5956_v28 = vld [vmem:[#allocation3 + $0x1f8] sm:$0xff]  ;;  %v5954_v37 = vld [vmem:[#allocation3 + $0x1e8] sm:$0xff] }
 0xe97   :  { %v9893_v45 = vpop.eup %9892 }
 0xe98   :  { %v5591_v40 = vmul.f32 %v9893_v45, %v9891_v16  ;;  %v5955_v16 = vld [vmem:[#allocation3 + $0x1f0] sm:$0xff]  ;;  %v5953_v45 = vld [vmem:[#allocation3 + $0x1e0] sm:$0xff] }
 0xe9a   :  { %v5593_v27 = vpack.c.bf16 %v5591_v40, %v5590_v48  ;;  %v5961_v48 = vld [vmem:[#allocation3 + $0x220] sm:$0xff]  ;;  %v5959_v40 = vld [vmem:[#allocation3 + $0x210] sm:$0xff] }
 0xe9c   :  { %5668 = vmatmul.mubr.bf16.vlgmr.msra.gmra.mrb[216].mxu0 %v5593_v27  ;;  %5719 = vmatmul.mubr.bf16.vlgmr.msra.gmra.mrb[216].mxu1 %v5593_v27 }
 0xe9d   :  { %v9895_v60 = vpop.eup %9894  ;;  %8812 = vmatpush3.bf16.msra.mxu0 %v11735_v52  ;;  %5677 = vmatprep.mubr.bf16.mxu0 %v12475_v38  ;;  %v5624_v52 = vld [vmem:[#allocation3 + $0xe8] sm:$0xff] }
 0xe9e   :  { %v9897_v18 = vpop.eup %9896  ;;  %8813 = vmatprep.subr.bf16.mxu0 %v5604_v13  ;;  %5728 = vmatprep.mubr.bf16.mxu1 %v12475_v38 }
 0xe9f   :  { %v5592_v35 = vmul.f32 %v9897_v18, %v9895_v60  ;;  %6025 = vmatpush1.bf16.msra.mxu1 %v5935_v58  ;;  %v5966_v60 = vld [vmem:[#allocation3 + $0x248] sm:$0xff]  ;;  %v5964_v18 = vld [vmem:[#allocation3 + $0x238] sm:$0xff] }
 0xea0   :  { %6026 = vmatprep.subr.bf16.mxu1 %v5941_v33 }
 0xea1   :  { %8814 = vmatpush3.bf16.msra.mxu0 %v5604_v13  ;;  %v5594_v25 = vpack.c.bf16 %v5592_v35, %v5592_v35  ;;  %v5958_v13 = vld [vmem:[#allocation3 + $0x208] sm:$0xff]  ;;  %v5965_v35 = vld [vmem:[#allocation3 + $0x240] sm:$0xff] }
 0xea2   :  { %8815 = vmatprep.subr.bf16.mxu0 %v5609_v14 }
 0xea3   :  { %6027 = vmatpush1.bf16.msra.mxu1 %v5940_v22 }
 0xea4   :  { %5678 = vmatmul.mubr.bf16.gmra.mrb[220].mxu0 %v5594_v25  ;;  %5729 = vmatmul.mubr.bf16.gmra.mrb[220].mxu1 %v5594_v25 }
 0xea5   :  { %8816 = vmatpush3.bf16.msra.mxu0 %v5609_v14  ;;  %8827 = vmatprep.mubr.bf16.mxu0 %v5593_v27  ;;  %v5960_v27 = vld [vmem:[#allocation3 + $0x218] sm:$0xff]  ;;  %v5963_v14 = vld [vmem:[#allocation3 + $0x230] sm:$0xff] }
 0xea6   :  { %8817 = vmatprep.subr.bf16.mxu0 %v5614_v47  ;;  %6056 = vmatprep.mubr.bf16.mxu1 %v12475_v38 }
 0xea7   :  { %6028 = vmatprep.subr.bf16.mxu1 %v5946_v56 }
 0xea8   :  { %6029 = vmatpush1.bf16.msra.mxu1 %v5945_v34  ;;  %v12539_v34 = vld [vmem:[#allocation82_spill] sm:$0xff] }
 0xea9   :  { %8818 = vmatpush3.bf16.msra.mxu0 %v5614_v47  ;;  %6030 = vmatprep.subr.bf16.mxu1 %v5951_v42  ;;  %v5969_v47 = vld [vmem:[#allocation3 + $0x260] sm:$0xff] }
 0xeaa   :  { %8819 = vmatprep.subr.bf16.mxu0 %v5619_v17 }
 0xeac   :  { %6031 = vmatpush1.bf16.msra.mxu1 %v5950_v11 }
 0xead   :  { %8820 = vmatpush3.bf16.msra.mxu0 %v5619_v17  ;;  %6032 = vmatprep.subr.bf16.mxu1 %v5956_v28  ;;  %v5970_v17 = vld [vmem:[#allocation3 + $0x268] sm:$0xff] }
 0xeae   :  { %8821 = vmatprep.subr.bf16.mxu0 %v5624_v52 }
 0xeb0   :  { %6033 = vmatpush1.bf16.msra.mxu1 %v5955_v16 }
 0xeb1   :  { %8822 = vmatpush3.bf16.msra.mxu0 %v5624_v52  ;;  %6034 = vmatprep.subr.bf16.mxu1 %v5961_v48  ;;  %v5968_v52 = vld [vmem:[#allocation3 + $0x258] sm:$0xff] }
 0xeb2   :  { %8823 = vmatprep.subr.bf16.mxu0 %v5629_v29 }
 0xeb4   :  { %6035 = vmatpush1.bf16.msra.mxu1 %v5960_v27 }
 0xeb5   :  { %8824 = vmatpush3.bf16.msra.mxu0 %v5629_v29  ;;  %6036 = vmatprep.subr.bf16.mxu1 %v5966_v60  ;;  %v11779_v29 = vld [vmem:[#allocation3 + $0x160] sm:$0xff] }
 0xeb6   :  { %8825 = vmatprep.subr.bf16.mxu0 %v5634_v44 }
 0xeb8   :  { %6037 = vmatpush1.bf16.msra.mxu1 %v5965_v35 }
 0xeb9   :  { %8826 = vmatpush3.bf16.msra.mxu0 %v5634_v44 }
 0xeba   :  { %5973 = vmatprep.subr.bf16.mxu0 %v5934_v31  ;;  %v12537_v31 = vld [vmem:[#allocation78_spill] sm:$0xff] }
 0xebc   :  { %8828 = vmatmul.mubr.bf16.vlgmr.msra.gmra.mrb[224].mxu0 %v5594_v25  ;;  %v5971_v25 = vld [vmem:[#allocation3 + $0x270] sm:$0xff] }
 0xebd   :  { %6005 = vmatprep.mubr.bf16.mxu0 %v12475_v38  ;;  %5974 = vmatpush1.bf16.msra.mxu0 %v5933_v61 }
 0xebe   :  { %5975 = vmatprep.subr.bf16.mxu0 %v5939_v26  ;;  %6038 = vmatprep.subr.bf16.mxu1 %v5971_v25  ;;  %v12538_v26 = vld [vmem:[#allocation80_spill] sm:$0xff] }
 0xebf   :  { %6039 = vmatpush1.bf16.msra.mxu1 %v5970_v17 }
 0xec0   :  { %8831 = vmatprep.subr.bf16.mxu1 %v11779_v29 }
 0xec1   :  { %5976 = vmatpush1.bf16.msra.mxu0 %v5938_v36 }
 0xec2   :  { %5977 = vmatprep.subr.bf16.mxu0 %v5944_v55 }
 0xec5   :  { %5978 = vmatpush1.bf16.msra.mxu0 %v5943_v24 }
 0xec6   :  { %5979 = vmatprep.subr.bf16.mxu0 %v5949_v20 }
 0xec9   :  { %5980 = vmatpush1.bf16.msra.mxu0 %v5948_v10  ;;  %v12540_v10 = vld [vmem:[#allocation84_spill] sm:$0xff] }
 0xeca   :  { %5981 = vmatprep.subr.bf16.mxu0 %v5954_v37 }
 0xecd   :  { %5982 = vmatpush1.bf16.msra.mxu0 %v5953_v45  ;;  %v12541_v45 = vld [vmem:[#allocation79_spill] sm:$0xff] }
 0xece   :  { %5983 = vmatprep.subr.bf16.mxu0 %v5959_v40 }
 0xed1   :  { %5984 = vmatpush1.bf16.msra.mxu0 %v5958_v13  ;;  %v12542_v13 = vld [vmem:[#allocation83_spill] sm:$0xff] }
 0xed2   :  { %5985 = vmatprep.subr.bf16.mxu0 %v5964_v18  ;;  %v12543_v18 = vld [vmem:[#allocation86_spill] sm:$0xff] }
 0xed5   :  { %5986 = vmatpush1.bf16.msra.mxu0 %v5963_v14 }
 0xed6   :  { %5987 = vmatprep.subr.bf16.mxu0 %v5969_v47  ;;  %v12544_v47 = vld [vmem:[#allocation81_spill] sm:$0xff] }
 0xed9   :  { %5988 = vmatpush1.bf16.msra.mxu0 %v5968_v52  ;;  %v12545_v52 = vld [vmem:[#allocation88_spill] sm:$0xff] }
 0xf6f   :  { %v5669_v44 = vpop.f32.mrb[216].mxu0  ;;  %v5720_v9 = vpop.f32.mrb[216].mxu1 }
 0xf70   :  { %v5847_v58 = vadd.f32 %v5669_v44, %v12537_v31  ;;  %v5671_v61 = vpop.f32.mrb[217].mxu0  ;;  %v5722_v33 = vpop.f32.mrb[217].mxu1  ;;  %v5849_v48 = vadd.f32 %v5720_v9, %v12541_v45 }
 0xf71   :  { %v5848_v22 = vadd.f32 %v5671_v61, %v12538_v26  ;;  %v5673_v36 = vpop.f32.mrb[218].mxu0  ;;  %v5724_v56 = vpop.f32.mrb[218].mxu1  ;;  %v5850_v17 = vadd.f32 %v5722_v33, %v12544_v47 }
 0xf72   :  { %v8294_v55 = vmul.f32 -1.442695, %v5847_v58  ;;  %v5851_v24 = vadd.f32 %v5673_v36, %v12539_v34  ;;  %v5675_v42 = vpop.f32.mrb[219].mxu0  ;;  %v5726_v20 = vpop.f32.mrb[219].mxu1  ;;  %v5853_v60 = vadd.f32 %v5724_v56, %v12542_v13  ;;  %v8296_v9 = vmul.f32 -1.442695, %v5849_v48 }
 0xf73   :  { %v8295_v11 = vmul.f32 -1.442695, %v5848_v22  ;;  %v5852_v28 = vadd.f32 %v5675_v42, %v12540_v10  ;;  %v12546_v34 = vld [vmem:[#allocation85_spill] sm:$0xff] }
 0xf74   :  { %9898 = vpow2.f32 %v8294_v55  ;;  %v8297_v37 = vmul.f32 -1.442695, %v5851_v24  ;;  %v8299_v55 = vmul.f32 -1.442695, %v5853_v60  ;;  %v5854_v24 = vadd.f32 %v5726_v20, %v12546_v34 }
 0xf75   :  { %v8298_v16 = vmul.f32 -1.442695, %v5852_v28  ;;  %9900 = vpow2.f32 %v8295_v11 }
 0xf76   :  { %9902 = vpow2.f32 %v8297_v37  ;;  %v12547_v37 = vld [vmem:[#allocation87_spill] sm:$0xff] }
 0xf77   :  { %v5679_v40 = vpop.f32.mrb[220].mxu0  ;;  %v5730_v27 = vpop.f32.mrb[220].mxu1  ;;  %9904 = vpow2.f32 %v8298_v16 }
 0xf78   :  { %v5855_v35 = vadd.f32 %v5679_v40, %v12543_v18  ;;  %v5681_v14 = vpop.f32.mrb[221].mxu0  ;;  %v5732_v25 = vpop.f32.mrb[221].mxu1  ;;  %v5857_v16 = vadd.f32 %v5730_v27, %v12547_v37  ;;  %v12548_v40 = vld [vmem:[#allocation89_spill] sm:$0xff] }
 0xf79   :  { %v5856_v44 = vadd.f32 %v5681_v14, %v12545_v52  ;;  %v5683_v31 = vpop.f32.mrb[222].mxu0  ;;  %v5734_v58 = vpop.f32.mrb[222].mxu1  ;;  %v5858_v13 = vadd.f32 %v5732_v25, %v12548_v40  ;;  %v8293_v25 = vld [vmem:[%s12337_s3] ss:$0 sm:$0xff] }
 0xf7a   :  { %v8300_v61 = vmul.f32 -1.442695, %v5855_v35  ;;  %v5684_v26 = vpop.f32.mrb[223].mxu0  ;;  %v5735_v22 = vpop.f32.mrb[223].mxu1  ;;  %v8302_v20 = vmul.f32 -1.442695, %v5857_v16 }
 0xf7b   :  { %v8301_v36 = vmul.f32 -1.442695, %v5856_v44 }
 0xf7c   :  { %9906 = vpow2.f32 %v8300_v61 }
 0xf7d   :  { %9908 = vtanh.f32 %v5850_v17 }
 0xf7e   :  { %v9899_v56 = vpop.eup %9898  ;;  %9910 = vpow2.f32 %v8301_v36 }
 0xf7f   :  { %v5886_v42 = vadd.f32 1.0, %v9899_v56  ;;  %9912 = vpow2.f32 %v8296_v9  ;;  %v9901_v33 = vpop.eup %9900 }
 0xf80   :  { %9914 = vpow2.f32 %v8299_v55  ;;  %v9903_v11 = vpop.eup %9902  ;;  %v5887_v10 = vadd.f32 1.0, %v9901_v33 }
 0xf81   :  { %9916 = vrcp.f32 %v5886_v42  ;;  %v5889_v28 = vadd.f32 1.0, %v9903_v11  ;;  %v9905_v45 = vpop.eup %9904 }
 0xf82   :  { %9918 = vtanh.f32 %v5854_v24  ;;  %v5890_v48 = vadd.f32 1.0, %v9905_v45 }
 0xf83   :  { %9920 = vrcp.f32 %v5887_v10 }
 0xf84   :  { %9922 = vrcp.f32 %v5889_v28 }
 0xf85   :  { %9924 = vrcp.f32 %v5890_v48 }
 0xf86   :  { %v9907_v60 = vpop.eup %9906  ;;  %9926 = vtanh.f32 %v5858_v13 }
 0xf87   :  { %v9909_v18 = vpop.eup %9908  ;;  %v5892_v35 = vadd.f32 1.0, %v9907_v60 }
 0xf88   :  { %v9911_v14 = vpop.eup %9910 }
 0xf89   :  { %v9913_v47 = vpop.eup %9912  ;;  %9928 = vrcp.f32 %v5892_v35  ;;  %v5893_v17 = vadd.f32 1.0, %v9911_v14 }
 0xf8a   :  { %v9915_v52 = vpop.eup %9914  ;;  %9930 = vpow2.f32 %v8302_v20  ;;  %v5888_v26 = vadd.f32 1.0, %v9913_v47 }
 0xf8b   :  { %v9917_v44 = vpop.eup %9916  ;;  %9932 = vrcp.f32 %v5893_v17  ;;  %v5891_v34 = vadd.f32 1.0, %v9915_v52 }
 0xf8c   :  { %v9919_v27 = vpop.eup %9918  ;;  %v5919_v31 = vmul.f32 %v9917_v44, %v9909_v18  ;;  %9934 = vrcp.f32 %v5888_v26  ;;  %v5952_v26 = vld [vmem:[#allocation3 + $0x1d8] sm:$0xff] }
 0xf8d   :  { %v9921_v58 = vpop.eup %9920 }
 0xf8e   :  { %v9923_v61 = vpop.eup %9922  ;;  %v5916_v22 = vmul.f32 %v9921_v58, %v11754_v51 }
 0xf8f   :  { %v5920_v9 = vmul.f32 %v9923_v61, %v9919_v27  ;;  %v8829_v36 = vpop.f32.mrb[224].mxu0  ;;  %v9925_v55 = vpop.eup %9924  ;;  %v5942_v27 = vld [vmem:[#allocation3 + $0x188] sm:$0xff] }
 0xf90   :  { %v11798_v56 = vadd.f32 %v5919_v31, %v5916_v22  ;;  %v11800_v24 = vadd.f32 %v8829_v36, %v8293_v25  ;;  %v5771_v42 = vpop.f32.mrb[225].mxu0  ;;  %v5917_v33 = vmul.f32 %v9925_v55, %v11761_v39  ;;  %v9927_v10 = vpop.eup %9926  ;;  %v5957_v22 = vld [vmem:[#allocation3 + $0x200] sm:$0xff]  ;;  %v5972_v36 = vld [vmem:[#allocation3 + $0x278] sm:$0xff]  ;;  %v6272_v55 = vld [vmem:[#allocation3 + $0x288] sm:$0xff] }
 0xf91   :  { %v8830_v11 = vpop.f32.mrb[226].mxu0  ;;  %v11809_v40 = vadd.f32 %v8293_v25, %v5771_v42  ;;  %6311 = vmatprep.subr.bf16.mxu0 %v6272_v55  ;;  %v6274_v42 = vld [vmem:[#allocation3 + $0x298] sm:$0xff]  ;;  %v6308_v55 = vld [vmem:[#allocation3 + $0x3a8] sm:$0xff] }
 0xf92   :  { %v5774_v28 = vpop.f32.mrb[227].mxu0  ;;  %5799 = vmax.xlane.f32.xlu1 %v11800_v24  ;;  %9936 = vtanh.f32 %v11798_v56  ;;  %v11805_v51 = vadd.f32 %v5920_v9, %v5917_v33  ;;  %v5967_v9 = vld [vmem:[#allocation3 + $0x250] sm:$0xff] }
 0xf93   :  { %v9929_v37 = vpop.eup %9928  ;;  %v11807_v16 = vadd.f32 %v8293_v25, %v5774_v28  ;;  %9938 = vrcp.f32 %v5891_v34  ;;  %v5947_v25 = vld [vmem:[#allocation3 + $0x1b0] sm:$0xff]  ;;  %v6271_v34 = vld [vmem:[#allocation3 + $0x280] sm:$0xff] }
 0xf94   :  { %v9931_v45 = vpop.eup %9930  ;;  %v5921_v48 = vmul.f32 %v9929_v37, %v9927_v10  ;;  %9940 = vtanh.f32 %v11805_v51  ;;  %v6273_v33 = vld [vmem:[#allocation3 + $0x290] sm:$0xff]  ;;  %v6276_v10 = vld [vmem:[#allocation3 + $0x2a8] sm:$0xff]  ;;  %v6279_v28 = vld [vmem:[#allocation3 + $0x2c0] sm:$0xff] }
 0xf95   :  { %v9933_v13 = vpop.eup %9932  ;;  %5797 = vmax.xlane.f32.xlu0 %v11807_v16  ;;  %v5894_v60 = vadd.f32 1.0, %v9931_v45  ;;  %v6277_v11 = vld [vmem:[#allocation3 + $0x2b0] sm:$0xff]  ;;  %v6278_v37 = vld [vmem:[#allocation3 + $0x2b8] sm:$0xff] }
 0xf96   :  { %v5918_v39 = vmul.f32 %v9933_v13, %v11771_v8  ;;  %5795 = vmax.xlane.f32.xlu1 %v11809_v40  ;;  %v9935_v18 = vpop.eup %9934  ;;  %v6282_v45 = vld [vmem:[#allocation3 + $0x2d8] sm:$0xff]  ;;  %v6284_v13 = vld [vmem:[#allocation3 + $0x2e8] sm:$0xff] }
 0xf98   :  { %v11815_v20 = vadd.f32 %v5921_v48, %v5918_v39  ;;  %v6281_v48 = vld [vmem:[#allocation3 + $0x2d0] sm:$0xff]  ;;  %v6283_v39 = vld [vmem:[#allocation3 + $0x2e0] sm:$0xff] }
 0xf9a   :  { %9942 = vtanh.f32 %v11815_v20 }
 0xf9b   :  { %9944 = vrcp.f32 %v5894_v60  ;;  %v6287_v60 = vld [vmem:[#allocation3 + $0x300] sm:$0xff] }
 0xf9c   :  { %v9937_v35 = vpop.eup %9936 }
 0xf9d   :  { %v9939_v14 = vpop.eup %9938  ;;  %v5928_v17 = vmul.f32 %v9937_v35, %v9935_v18  ;;  %v6286_v18 = vld [vmem:[#allocation3 + $0x2f8] sm:$0xff]  ;;  %v6289_v35 = vld [vmem:[#allocation3 + $0x310] sm:$0xff] }
 0xf9e   :  { %v9941_v47 = vpop.eup %9940 }
 0xf9f   :  { %v5929_v52 = vmul.f32 %v9941_v47, %v9939_v14  ;;  %v6288_v14 = vld [vmem:[#allocation3 + $0x308] sm:$0xff] }
 0xfa0   :  { %v6292_v47 = vld [vmem:[#allocation3 + $0x328] sm:$0xff] }
 0xfa1   :  { %v5931_v44 = vpack.c.bf16 %v5929_v52, %v5928_v17  ;;  %v6291_v17 = vld [vmem:[#allocation3 + $0x320] sm:$0xff]  ;;  %v6294_v52 = vld [vmem:[#allocation3 + $0x338] sm:$0xff] }
 0xfa3   :  { %6006 = vmatmul.mubr.bf16.vlgmr.msra.gmra.mrb[84].mxu0 %v5931_v44  ;;  %6057 = vmatmul.mubr.bf16.vlgmr.msra.gmra.mrb[84].mxu1 %v5931_v44 }
 0xfa4   :  { %v9943_v31 = vpop.eup %9942  ;;  %8832 = vmatpush3.bf16.msra.mxu1 %v11779_v29  ;;  %6015 = vmatprep.mubr.bf16.mxu0 %v12475_v38  ;;  %v5962_v29 = vld [vmem:[#allocation3 + $0x228] sm:$0xff] }
 0xfa5   :  { %v9945_v8 = vpop.eup %9944  ;;  %8833 = vmatprep.subr.bf16.mxu1 %v5942_v27  ;;  %6066 = vmatprep.mubr.bf16.mxu1 %v12475_v38 }
 0xfa6   :  { %v5930_v58 = vmul.f32 %v9945_v8, %v9943_v31  ;;  %6312 = vmatpush1.bf16.msra.mxu0 %v6271_v34  ;;  %v6296_v31 = vld [vmem:[#allocation3 + $0x348] sm:$0xff]  ;;  %v6299_v8 = vld [vmem:[#allocation3 + $0x360] sm:$0xff] }
 0xfa7   :  { %6313 = vmatprep.subr.bf16.mxu0 %v6277_v11  ;;  %v11823_v34 = vld [vmem:[#allocation3 + $0x2a0] sm:$0xff] }
 0xfa8   :  { %8834 = vmatpush3.bf16.msra.mxu1 %v5942_v27  ;;  %v5932_v61 = vpack.c.bf16 %v5930_v58, %v5930_v58  ;;  %v6297_v27 = vld [vmem:[#allocation3 + $0x350] sm:$0xff]  ;;  %v6298_v58 = vld [vmem:[#allocation3 + $0x358] sm:$0xff] }
 0xfa9   :  { %8835 = vmatprep.subr.bf16.mxu1 %v5947_v25 }
 0xfaa   :  { %6314 = vmatpush1.bf16.msra.mxu0 %v6276_v10 }
 0xfab   :  { %6016 = vmatmul.mubr.bf16.gmra.mrb[228].mxu0 %v5932_v61  ;;  %6067 = vmatmul.mubr.bf16.gmra.mrb[224].mxu1 %v5932_v61 }
 0xfac   :  { %8836 = vmatpush3.bf16.msra.mxu1 %v5947_v25  ;;  %8847 = vmatprep.mubr.bf16.mxu1 %v5931_v44  ;;  %v6293_v44 = vld [vmem:[#allocation3 + $0x330] sm:$0xff]  ;;  %v6302_v25 = vld [vmem:[#allocation3 + $0x378] sm:$0xff] }
 0xfad   :  { %8837 = vmatprep.subr.bf16.mxu1 %v5952_v26  ;;  %6343 = vmatprep.mubr.bf16.mxu0 %v12475_v38 }
 0xfae   :  { %6315 = vmatprep.subr.bf16.mxu0 %v6282_v45 }
 0xfaf   :  { %6316 = vmatpush1.bf16.msra.mxu0 %v6281_v48 }
 0xfb0   :  { %8838 = vmatpush3.bf16.msra.mxu1 %v5952_v26  ;;  %6317 = vmatprep.subr.bf16.mxu0 %v6287_v60  ;;  %v6301_v26 = vld [vmem:[#allocation3 + $0x370] sm:$0xff] }
 0xfb1   :  { %8839 = vmatprep.subr.bf16.mxu1 %v5957_v22 }
 0xfb3   :  { %6318 = vmatpush1.bf16.msra.mxu0 %v6286_v18 }
 0xfb4   :  { %8840 = vmatpush3.bf16.msra.mxu1 %v5957_v22  ;;  %6319 = vmatprep.subr.bf16.mxu0 %v6292_v47  ;;  %v6303_v22 = vld [vmem:[#allocation3 + $0x380] sm:$0xff] }
 0xfb5   :  { %8841 = vmatprep.subr.bf16.mxu1 %v5962_v29 }
 0xfb7   :  { %6320 = vmatpush1.bf16.msra.mxu0 %v6291_v17 }
 0xfb8   :  { %8842 = vmatpush3.bf16.msra.mxu1 %v5962_v29  ;;  %6321 = vmatprep.subr.bf16.mxu0 %v6297_v27  ;;  %v6307_v29 = vld [vmem:[#allocation3 + $0x3a0] sm:$0xff] }
 0xfb9   :  { %8843 = vmatprep.subr.bf16.mxu1 %v5967_v9 }
 0xfbb   :  { %6322 = vmatpush1.bf16.msra.mxu0 %v6296_v31 }
 0xfbc   :  { %8844 = vmatpush3.bf16.msra.mxu1 %v5967_v9  ;;  %6323 = vmatprep.subr.bf16.mxu0 %v6302_v25  ;;  %v6309_v9 = vld [vmem:[#allocation3 + $0x3b0] sm:$0xff] }
 0xfbd   :  { %8845 = vmatprep.subr.bf16.mxu1 %v5972_v36 }
 0xfbf   :  { %6324 = vmatpush1.bf16.msra.mxu0 %v6301_v26 }
 0xfc0   :  { %8846 = vmatpush3.bf16.msra.mxu1 %v5972_v36  ;;  %6325 = vmatprep.subr.bf16.mxu0 %v6307_v29  ;;  %v6306_v36 = vld [vmem:[#allocation3 + $0x398] sm:$0xff] }
 0xfc1   :  { %6362 = vmatprep.subr.bf16.mxu1 %v6274_v42 }
 0xfc3   :  { %8848 = vmatmul.mubr.bf16.vlgmr.msra.gmra.mrb[228].mxu1 %v5932_v61  ;;  %v6304_v61 = vld [vmem:[#allocation3 + $0x388] sm:$0xff]  ;;  %6326 = vmatpush1.bf16.msra.mxu0 %v6306_v36 }
 0xfc4   :  { %6394 = vmatprep.mubr.bf16.mxu1 %v12475_v38  ;;  %6363 = vmatpush1.bf16.msra.mxu1 %v6273_v33 }
 0xfc5   :  { %6364 = vmatprep.subr.bf16.mxu1 %v6279_v28  ;;  %8851 = vmatprep.subr.bf16.mxu0 %v11823_v34 }
 0xfc8   :  { %6365 = vmatpush1.bf16.msra.mxu1 %v6278_v37 }
 0xfc9   :  { %6366 = vmatprep.subr.bf16.mxu1 %v6284_v13 }
 0xfcc   :  { %6367 = vmatpush1.bf16.msra.mxu1 %v6283_v39 }
 0xfcd   :  { %6368 = vmatprep.subr.bf16.mxu1 %v6289_v35 }
 0xfd0   :  { %6369 = vmatpush1.bf16.msra.mxu1 %v6288_v14 }
 0xfd1   :  { %6370 = vmatprep.subr.bf16.mxu1 %v6294_v52 }
 0xfd4   :  { %6371 = vmatpush1.bf16.msra.mxu1 %v6293_v44 }
 0xfd5   :  { %6372 = vmatprep.subr.bf16.mxu1 %v6299_v8  ;;  %v12549_v8 = vld [vmem:[#allocation90_spill] sm:$0xff] }
 0xfd8   :  { %6373 = vmatpush1.bf16.msra.mxu1 %v6298_v58 }
 0xfd9   :  { %6374 = vmatprep.subr.bf16.mxu1 %v6304_v61 }
 0xfdc   :  { %6375 = vmatpush1.bf16.msra.mxu1 %v6303_v22  ;;  %v12550_v22 = vld [vmem:[#allocation92_spill] sm:$0xff] }
 0xfdd   :  { %6376 = vmatprep.subr.bf16.mxu1 %v6309_v9 }
 0xfe0   :  { %6377 = vmatpush1.bf16.msra.mxu1 %v6308_v55 }
0x1076   :  { %v6007_v42 = vpop.f32.mrb[84].mxu0  ;;  %v6058_v33 = vpop.f32.mrb[84].mxu1 }
0x1077   :  { %v8995_v11 = vadd.f32 %v6007_v42, %v10622_v4  ;;  %v6009_v10 = vpop.f32.mrb[85].mxu0  ;;  %v6060_v28 = vpop.f32.mrb[85].mxu1  ;;  %v9031_v52 = vadd.f32 %v6058_v33, %v10624_v5 }
0x1078   :  { %v8996_v37 = vadd.f32 %v6009_v10, %v10626_v6  ;;  %v6011_v45 = vpop.f32.mrb[86].mxu0  ;;  %v6062_v48 = vpop.f32.mrb[86].mxu1  ;;  %v9032_v26 = vadd.f32 %v6060_v28, %v10628_v7 }
0x1079   :  { %v8305_v13 = vmul.f32 -1.442695, %v8995_v11  ;;  %v8997_v39 = vadd.f32 %v6011_v45, %v10622_v4  ;;  %v6013_v60 = vpop.f32.mrb[87].mxu0  ;;  %v6064_v18 = vpop.f32.mrb[87].mxu1  ;;  %v9033_v31 = vadd.f32 %v6062_v48, %v10624_v5  ;;  %v8307_v33 = vmul.f32 -1.442695, %v9031_v52 }
0x107a   :  { %v8306_v35 = vmul.f32 -1.442695, %v8996_v37  ;;  %v8998_v14 = vadd.f32 %v6013_v60, %v10626_v6  ;;  %v9034_v48 = vadd.f32 %v6064_v18, %v10628_v7 }
0x107b   :  { %9946 = vpow2.f32 %v8305_v13  ;;  %v8308_v47 = vmul.f32 -1.442695, %v8997_v39  ;;  %v8310_v37 = vmul.f32 -1.442695, %v9033_v31 }
0x107c   :  { %v8309_v17 = vmul.f32 -1.442695, %v8998_v14  ;;  %9948 = vpow2.f32 %v8306_v35  ;;  %v12551_v14 = vld [vmem:[#allocation91_spill] sm:$0xff] }
0x107d   :  { %9950 = vpow2.f32 %v8308_v47 }
0x107e   :  { %v6017_v44 = vpop.f32.mrb[228].mxu0  ;;  %v6068_v27 = vpop.f32.mrb[224].mxu1  ;;  %9952 = vpow2.f32 %v8309_v17 }
0x107f   :  { %v6193_v58 = vadd.f32 %v6017_v44, %v12549_v8  ;;  %v6019_v25 = vpop.f32.mrb[229].mxu0  ;;  %v6070_v61 = vpop.f32.mrb[225].mxu1  ;;  %v6195_v47 = vadd.f32 %v6068_v27, %v12551_v14  ;;  %v12552_v44 = vld [vmem:[#allocation93_spill] sm:$0xff] }
0x1080   :  { %v6194_v29 = vadd.f32 %v6019_v25, %v12550_v22  ;;  %v6021_v9 = vpop.f32.mrb[230].mxu0  ;;  %v6072_v36 = vpop.f32.mrb[226].mxu1  ;;  %v6196_v31 = vadd.f32 %v6070_v61, %v12552_v44  ;;  %v8304_v61 = vld [vmem:[%s12337_s3 + $0x1] ss:$0 sm:$0xff] }
0x1081   :  { %v8311_v55 = vmul.f32 -1.442695, %v6193_v58  ;;  %v6022_v42 = vpop.f32.mrb[231].mxu0  ;;  %v6073_v11 = vpop.f32.mrb[227].mxu1  ;;  %v8313_v18 = vmul.f32 -1.442695, %v6195_v47 }
0x1082   :  { %v8312_v10 = vmul.f32 -1.442695, %v6194_v29 }
0x1083   :  { %9954 = vpow2.f32 %v8311_v55 }
0x1084   :  { %9956 = vtanh.f32 %v9032_v26 }
0x1085   :  { %v9947_v45 = vpop.eup %9946  ;;  %9958 = vpow2.f32 %v8312_v10 }
0x1086   :  { %v6224_v13 = vadd.f32 1.0, %v9947_v45  ;;  %9960 = vpow2.f32 %v8307_v33  ;;  %v9949_v28 = vpop.eup %9948 }
0x1087   :  { %9962 = vpow2.f32 %v8310_v37  ;;  %v9951_v39 = vpop.eup %9950  ;;  %v6225_v60 = vadd.f32 1.0, %v9949_v28 }
0x1088   :  { %9964 = vrcp.f32 %v6224_v13  ;;  %v6227_v35 = vadd.f32 1.0, %v9951_v39  ;;  %v9953_v17 = vpop.eup %9952 }
0x1089   :  { %9966 = vtanh.f32 %v9034_v48  ;;  %v6228_v52 = vadd.f32 1.0, %v9953_v17 }
0x108a   :  { %9968 = vrcp.f32 %v6225_v60 }
0x108b   :  { %9970 = vrcp.f32 %v6227_v35 }
0x108c   :  { %9972 = vrcp.f32 %v6228_v52 }
0x108d   :  { %v9955_v8 = vpop.eup %9954  ;;  %9974 = vtanh.f32 %v6196_v31 }
0x108e   :  { %v9957_v58 = vpop.eup %9956  ;;  %v6230_v25 = vadd.f32 1.0, %v9955_v8 }
0x108f   :  { %v9959_v26 = vpop.eup %9958 }
0x1090   :  { %v9961_v22 = vpop.eup %9960  ;;  %9976 = vrcp.f32 %v6230_v25  ;;  %v6231_v29 = vadd.f32 1.0, %v9959_v26 }
0x1091   :  { %v9963_v9 = vpop.eup %9962  ;;  %9978 = vpow2.f32 %v8313_v18  ;;  %v6226_v33 = vadd.f32 1.0, %v9961_v22 }
0x1092   :  { %v9965_v36 = vpop.eup %9964  ;;  %9980 = vrcp.f32 %v6231_v29  ;;  %v6229_v28 = vadd.f32 1.0, %v9963_v9 }
0x1093   :  { %v9967_v27 = vpop.eup %9966  ;;  %v6257_v55 = vmul.f32 %v9965_v36, %v9957_v58  ;;  %9982 = vrcp.f32 %v6226_v33 }
0x1094   :  { %v9969_v42 = vpop.eup %9968 }
0x1095   :  { %v9971_v11 = vpop.eup %9970  ;;  %v6254_v10 = vmul.f32 %v9969_v42, %v11798_v56 }
0x1096   :  { %v6258_v37 = vmul.f32 %v9971_v11, %v9967_v27  ;;  %v8849_v45 = vpop.f32.mrb[228].mxu1  ;;  %v9973_v48 = vpop.eup %9972 }
0x1097   :  { %v11842_v13 = vadd.f32 %v6257_v55, %v6254_v10  ;;  %v11844_v39 = vadd.f32 %v8849_v45, %v8304_v61  ;;  %v6109_v60 = vpop.f32.mrb[229].mxu1  ;;  %v6255_v35 = vmul.f32 %v9973_v48, %v11805_v51  ;;  %v9975_v47 = vpop.eup %9974  ;;  %v6285_v10 = vld [vmem:[#allocation3 + $0x2f0] sm:$0xff]  ;;  %v6290_v45 = vld [vmem:[#allocation3 + $0x318] sm:$0xff]  ;;  %v6295_v48 = vld [vmem:[#allocation3 + $0x340] sm:$0xff] }
0x1098   :  { %v8850_v14 = vpop.f32.mrb[230].mxu1  ;;  %v11853_v18 = vadd.f32 %v8304_v61, %v6109_v60  ;;  %v6310_v60 = vld [vmem:[#allocation3 + $0x3b8] sm:$0xff] }
0x1099   :  { %v6112_v17 = vpop.f32.mrb[231].mxu1  ;;  %6137 = vmax.xlane.f32.xlu0 %v11844_v39  ;;  %9984 = vtanh.f32 %v11842_v13  ;;  %v11849_v56 = vadd.f32 %v6258_v37, %v6255_v35  ;;  %v6612_v35 = vld [vmem:[#allocation3 + $0x3d8] sm:$0xff]  ;;  %v6610_v14 = vld [vmem:[#allocation3 + $0x3c8] sm:$0xff] }
0x109a   :  { %v9977_v52 = vpop.eup %9976  ;;  %v11851_v44 = vadd.f32 %v8304_v61, %v6112_v17  ;;  %9986 = vrcp.f32 %v6229_v28  ;;  %v6280_v61 = vld [vmem:[#allocation3 + $0x2c8] sm:$0xff]  ;;  %v6305_v28 = vld [vmem:[#allocation3 + $0x390] sm:$0xff]  ;;  %6700 = vmatprep.subr.bf16.mxu1 %v6612_v35  ;;  %v6609_v17 = vld [vmem:[#allocation3 + $0x3c0] sm:$0xff] }
0x109b   :  { %v9979_v31 = vpop.eup %9978  ;;  %v6259_v8 = vmul.f32 %v9977_v52, %v9975_v47  ;;  %9988 = vtanh.f32 %v11849_v56  ;;  %v6611_v47 = vld [vmem:[#allocation3 + $0x3d0] sm:$0xff]  ;;  %v6617_v52 = vld [vmem:[#allocation3 + $0x400] sm:$0xff] }
0x109c   :  { %v9981_v58 = vpop.eup %9980  ;;  %6135 = vmax.xlane.f32.xlu1 %v11851_v44  ;;  %v6232_v25 = vadd.f32 1.0, %v9979_v31  ;;  %v6615_v31 = vld [vmem:[#allocation3 + $0x3f0] sm:$0xff] }
0x109d   :  { %v6256_v51 = vmul.f32 %v9981_v58, %v11815_v20  ;;  %6133 = vmax.xlane.f32.xlu0 %v11853_v18  ;;  %v9983_v22 = vpop.eup %9982  ;;  %v6614_v58 = vld [vmem:[#allocation3 + $0x3e8] sm:$0xff]  ;;  %v6647_v35 = vld [vmem:[#allocation3 + $0x4f0] sm:$0xff] }
0x109f   :  { %v11859_v26 = vadd.f32 %v6259_v8, %v6256_v51  ;;  %v6616_v8 = vld [vmem:[#allocation3 + $0x3f8] sm:$0xff]  ;;  %v6622_v51 = vld [vmem:[#allocation3 + $0x428] sm:$0xff] }
0x10a1   :  { %9990 = vtanh.f32 %v11859_v26 }
0x10a2   :  { %9992 = vrcp.f32 %v6232_v25  ;;  %v6620_v25 = vld [vmem:[#allocation3 + $0x418] sm:$0xff] }
0x10a3   :  { %v9985_v29 = vpop.eup %9984 }
0x10a4   :  { %v9987_v9 = vpop.eup %9986  ;;  %v6266_v27 = vmul.f32 %v9985_v29, %v9983_v22  ;;  %v6621_v22 = vld [vmem:[#allocation3 + $0x420] sm:$0xff]  ;;  %v6619_v29 = vld [vmem:[#allocation3 + $0x410] sm:$0xff] }
0x10a5   :  { %v9989_v36 = vpop.eup %9988 }
0x10a6   :  { %v6267_v55 = vmul.f32 %v9989_v36, %v9987_v9  ;;  %v6627_v9 = vld [vmem:[#allocation3 + $0x450] sm:$0xff]  ;;  %v6625_v36 = vld [vmem:[#allocation3 + $0x440] sm:$0xff] }
0x10a8   :  { %v6269_v42 = vpack.c.bf16 %v6267_v55, %v6266_v27  ;;  %v6626_v27 = vld [vmem:[#allocation3 + $0x448] sm:$0xff]  ;;  %v6624_v55 = vld [vmem:[#allocation3 + $0x438] sm:$0xff] }
0x10aa   :  { %6344 = vmatmul.mubr.bf16.vlgmr.msra.gmra.mrb[232].mxu0 %v6269_v42  ;;  %6395 = vmatmul.mubr.bf16.vlgmr.msra.gmra.mrb[232].mxu1 %v6269_v42 }
0x10ab   :  { %v9991_v11 = vpop.eup %9990  ;;  %8852 = vmatpush3.bf16.msra.mxu0 %v11823_v34  ;;  %6353 = vmatprep.mubr.bf16.mxu0 %v12475_v38  ;;  %v6300_v34 = vld [vmem:[#allocation3 + $0x368] sm:$0xff] }
0x10ac   :  { %v9993_v20 = vpop.eup %9992  ;;  %8853 = vmatprep.subr.bf16.mxu0 %v6280_v61  ;;  %6404 = vmatprep.mubr.bf16.mxu1 %v12475_v38 }
0x10ad   :  { %v6268_v33 = vmul.f32 %v9993_v20, %v9991_v11  ;;  %6701 = vmatpush1.bf16.msra.mxu1 %v6611_v47  ;;  %v6631_v11 = vld [vmem:[#allocation3 + $0x470] sm:$0xff]  ;;  %v6629_v20 = vld [vmem:[#allocation3 + $0x460] sm:$0xff]  ;;  %v6646_v47 = vld [vmem:[#allocation3 + $0x4e8] sm:$0xff] }
0x10ae   :  { %6702 = vmatprep.subr.bf16.mxu1 %v6617_v52  ;;  %v11867_v52 = vld [vmem:[#allocation3 + $0x3e0] sm:$0xff] }
0x10af   :  { %8854 = vmatpush3.bf16.msra.mxu0 %v6280_v61  ;;  %v6270_v37 = vpack.c.bf16 %v6268_v33, %v6268_v33  ;;  %v6630_v61 = vld [vmem:[#allocation3 + $0x468] sm:$0xff]  ;;  %v6637_v33 = vld [vmem:[#allocation3 + $0x4a0] sm:$0xff] }
0x10b0   :  { %8855 = vmatprep.subr.bf16.mxu0 %v6285_v10 }
0x10b1   :  { %6703 = vmatpush1.bf16.msra.mxu1 %v6616_v8 }
0x10b2   :  { %6354 = vmatmul.mubr.bf16.gmra.mrb[236].mxu0 %v6270_v37  ;;  %6405 = vmatmul.mubr.bf16.gmra.mrb[236].mxu1 %v6270_v37 }
0x10b3   :  { %8856 = vmatpush3.bf16.msra.mxu0 %v6285_v10  ;;  %8867 = vmatprep.mubr.bf16.mxu0 %v6269_v42  ;;  %v6632_v42 = vld [vmem:[#allocation3 + $0x478] sm:$0xff]  ;;  %v6635_v10 = vld [vmem:[#allocation3 + $0x490] sm:$0xff] }
0x10b4   :  { %8857 = vmatprep.subr.bf16.mxu0 %v6290_v45  ;;  %6732 = vmatprep.mubr.bf16.mxu1 %v12475_v38 }
0x10b5   :  { %6704 = vmatprep.subr.bf16.mxu1 %v6622_v51 }
0x10b6   :  { %6705 = vmatpush1.bf16.msra.mxu1 %v6621_v22 }
0x10b7   :  { %8858 = vmatpush3.bf16.msra.mxu0 %v6290_v45  ;;  %6706 = vmatprep.subr.bf16.mxu1 %v6627_v9  ;;  %v6634_v45 = vld [vmem:[#allocation3 + $0x488] sm:$0xff] }
0x10b8   :  { %8859 = vmatprep.subr.bf16.mxu0 %v6295_v48 }
0x10ba   :  { %6707 = vmatpush1.bf16.msra.mxu1 %v6626_v27 }
0x10bb   :  { %8860 = vmatpush3.bf16.msra.mxu0 %v6295_v48  ;;  %6708 = vmatprep.subr.bf16.mxu1 %v6632_v42  ;;  %v6642_v48 = vld [vmem:[#allocation3 + $0x4c8] sm:$0xff]  ;;  %v12555_v42 = vld [vmem:[#allocation98_spill] sm:$0xff] }
0x10bc   :  { %8861 = vmatprep.subr.bf16.mxu0 %v6300_v34 }
0x10be   :  { %6709 = vmatpush1.bf16.msra.mxu1 %v6631_v11 }
0x10bf   :  { %8862 = vmatpush3.bf16.msra.mxu0 %v6300_v34  ;;  %6710 = vmatprep.subr.bf16.mxu1 %v6637_v33  ;;  %v6640_v34 = vld [vmem:[#allocation3 + $0x4b8] sm:$0xff] }
0x10c0   :  { %8863 = vmatprep.subr.bf16.mxu0 %v6305_v28 }
0x10c3   :  { %8864 = vmatpush3.bf16.msra.mxu0 %v6305_v28  ;;  %v6641_v28 = vld [vmem:[#allocation3 + $0x4c0] sm:$0xff] }
0x10c4   :  { %8865 = vmatprep.subr.bf16.mxu0 %v6310_v60 }
0x10c7   :  { %8866 = vmatpush3.bf16.msra.mxu0 %v6310_v60  ;;  %v6639_v60 = vld [vmem:[#allocation3 + $0x4b0] sm:$0xff] }
0x10c8   :  { %6649 = vmatprep.subr.bf16.mxu0 %v6610_v14  ;;  %v6645_v14 = vld [vmem:[#allocation3 + $0x4e0] sm:$0xff] }
0x10ca   :  { %8868 = vmatmul.mubr.bf16.vlgmr.msra.gmra.mrb[240].mxu0 %v6270_v37  ;;  %v6636_v37 = vld [vmem:[#allocation3 + $0x498] sm:$0xff] }
0x10cb   :  { %6681 = vmatprep.mubr.bf16.mxu0 %v12475_v38  ;;  %6650 = vmatpush1.bf16.msra.mxu0 %v6609_v17  ;;  %v6644_v17 = vld [vmem:[#allocation3 + $0x4d8] sm:$0xff] }
0x10cc   :  { %6651 = vmatprep.subr.bf16.mxu0 %v6615_v31  ;;  %6711 = vmatpush1.bf16.msra.mxu1 %v6636_v37 }
0x10cd   :  { %6712 = vmatprep.subr.bf16.mxu1 %v6642_v48 }
0x10cf   :  { %6652 = vmatpush1.bf16.msra.mxu0 %v6614_v58  ;;  %v12553_v58 = vld [vmem:[#allocation94_spill] sm:$0xff] }
0x10d0   :  { %6653 = vmatprep.subr.bf16.mxu0 %v6620_v25  ;;  %6713 = vmatpush1.bf16.msra.mxu1 %v6641_v28 }
0x10d1   :  { %6714 = vmatprep.subr.bf16.mxu1 %v6647_v35 }
0x10d3   :  { %6654 = vmatpush1.bf16.msra.mxu0 %v6619_v29  ;;  %v12554_v29 = vld [vmem:[#allocation96_spill] sm:$0xff] }
0x10d4   :  { %6655 = vmatprep.subr.bf16.mxu0 %v6625_v36  ;;  %6715 = vmatpush1.bf16.msra.mxu1 %v6646_v47 }
0x10d5   :  { %8871 = vmatprep.subr.bf16.mxu1 %v11867_v52 }
0x10d7   :  { %6656 = vmatpush1.bf16.msra.mxu0 %v6624_v55 }
0x10d8   :  { %6657 = vmatprep.subr.bf16.mxu0 %v6630_v61 }
0x10db   :  { %6658 = vmatpush1.bf16.msra.mxu0 %v6629_v20 }
0x10dc   :  { %6659 = vmatprep.subr.bf16.mxu0 %v6635_v10  ;;  %v12556_v10 = vld [vmem:[#allocation100_spill] sm:$0xff] }
0x10df   :  { %6660 = vmatpush1.bf16.msra.mxu0 %v6634_v45 }
0x10e0   :  { %6661 = vmatprep.subr.bf16.mxu0 %v6640_v34  ;;  %v12557_v34 = vld [vmem:[#allocation95_spill] sm:$0xff] }
0x10e3   :  { %6662 = vmatpush1.bf16.msra.mxu0 %v6639_v60 }
0x10e4   :  { %6663 = vmatprep.subr.bf16.mxu0 %v6645_v14  ;;  %v12558_v14 = vld [vmem:[#allocation99_spill] sm:$0xff] }
0x10e7   :  { %6664 = vmatpush1.bf16.msra.mxu0 %v6644_v17  ;;  %v12559_v17 = vld [vmem:[#allocation102_spill] sm:$0xff] }
0x117d   :  { %v6345_v31 = vpop.f32.mrb[232].mxu0  ;;  %v6396_v8 = vpop.f32.mrb[232].mxu1 }
0x117e   :  { %v6523_v51 = vadd.f32 %v6345_v31, %v12553_v58  ;;  %v6347_v25 = vpop.f32.mrb[233].mxu0  ;;  %v6398_v22 = vpop.f32.mrb[233].mxu1  ;;  %v6525_v28 = vadd.f32 %v6396_v8, %v12557_v34 }
0x117f   :  { %v6524_v9 = vadd.f32 %v6347_v25, %v12554_v29  ;;  %v6349_v36 = vpop.f32.mrb[234].mxu0  ;;  %v6400_v27 = vpop.f32.mrb[234].mxu1  ;;  %v12560_v25 = vld [vmem:[#allocation97_spill] sm:$0xff] }
0x1180   :  { %v8316_v55 = vmul.f32 -1.442695, %v6523_v51  ;;  %v6527_v61 = vadd.f32 %v6349_v36, %v12555_v42  ;;  %v6351_v11 = vpop.f32.mrb[235].mxu0  ;;  %v6402_v20 = vpop.f32.mrb[235].mxu1  ;;  %v6529_v47 = vadd.f32 %v6400_v27, %v12558_v14  ;;  %v6526_v29 = vadd.f32 %v6398_v22, %v12560_v25  ;;  %v12564_v25 = vld [vmem:[#allocation105_spill] sm:$0xff] }
0x1181   :  { %v8317_v33 = vmul.f32 -1.442695, %v6524_v9  ;;  %v6528_v37 = vadd.f32 %v6351_v11, %v12556_v10  ;;  %v12561_v9 = vld [vmem:[#allocation104_spill] sm:$0xff]  ;;  %v8318_v8 = vmul.f32 -1.442695, %v6525_v28 }
0x1182   :  { %9994 = vpow2.f32 %v8316_v55  ;;  %v8319_v45 = vmul.f32 -1.442695, %v6527_v61 }
0x1183   :  { %v8320_v48 = vmul.f32 -1.442695, %v6528_v37  ;;  %9996 = vpow2.f32 %v8317_v33  ;;  %v8321_v37 = vmul.f32 -1.442695, %v6529_v47 }
0x1184   :  { %9998 = vpow2.f32 %v8319_v45  ;;  %v12562_v45 = vld [vmem:[#allocation101_spill] sm:$0xff] }
0x1185   :  { %v6355_v60 = vpop.f32.mrb[236].mxu0  ;;  %v6406_v35 = vpop.f32.mrb[236].mxu1  ;;  %10000 = vpow2.f32 %v8320_v48  ;;  %v6530_v34 = vadd.f32 %v6402_v20, %v12562_v45 }
0x1186   :  { %v6531_v31 = vadd.f32 %v6355_v60, %v12559_v17  ;;  %v6357_v58 = vpop.f32.mrb[237].mxu0  ;;  %v6408_v51 = vpop.f32.mrb[237].mxu1 }
0x1187   :  { %v6532_v36 = vadd.f32 %v6357_v58, %v12561_v9  ;;  %v6359_v55 = vpop.f32.mrb[238].mxu0  ;;  %v6410_v42 = vpop.f32.mrb[238].mxu1 }
0x1188   :  { %v8322_v61 = vmul.f32 -1.442695, %v6531_v31  ;;  %v6360_v11 = vpop.f32.mrb[239].mxu0  ;;  %v6411_v33 = vpop.f32.mrb[239].mxu1  ;;  %v12563_v31 = vld [vmem:[#allocation103_spill] sm:$0xff] }
0x1189   :  { %v8323_v10 = vmul.f32 -1.442695, %v6532_v36  ;;  %v6533_v58 = vadd.f32 %v6406_v35, %v12563_v31 }
0x118a   :  { %10002 = vpow2.f32 %v8322_v61 }
0x118b   :  { %10004 = vtanh.f32 %v6526_v29  ;;  %v6534_v29 = vadd.f32 %v6408_v51, %v12564_v25  ;;  %v8324_v20 = vmul.f32 -1.442695, %v6533_v58  ;;  %v8315_v51 = vld [vmem:[%s12337_s3 + $0x2] ss:$0 sm:$0xff] }
0x118c   :  { %v9995_v27 = vpop.eup %9994  ;;  %10006 = vpow2.f32 %v8323_v10 }
0x118d   :  { %v6562_v60 = vadd.f32 1.0, %v9995_v27  ;;  %10008 = vpow2.f32 %v8318_v8  ;;  %v9997_v22 = vpop.eup %9996 }
0x118e   :  { %10010 = vpow2.f32 %v8321_v37  ;;  %v9999_v48 = vpop.eup %9998  ;;  %v6563_v14 = vadd.f32 1.0, %v9997_v22 }
0x118f   :  { %10012 = vrcp.f32 %v6562_v60  ;;  %v6565_v17 = vadd.f32 1.0, %v9999_v48  ;;  %v10001_v28 = vpop.eup %10000 }
0x1190   :  { %10014 = vtanh.f32 %v6530_v34  ;;  %v6566_v47 = vadd.f32 1.0, %v10001_v28 }
0x1191   :  { %10016 = vrcp.f32 %v6563_v14 }
0x1192   :  { %10018 = vrcp.f32 %v6565_v17 }
0x1193   :  { %10020 = vrcp.f32 %v6566_v47 }
0x1194   :  { %v10003_v9 = vpop.eup %10002  ;;  %10022 = vtanh.f32 %v6534_v29 }
0x1195   :  { %v10005_v36 = vpop.eup %10004  ;;  %v6568_v55 = vadd.f32 1.0, %v10003_v9 }
0x1196   :  { %v10007_v42 = vpop.eup %10006 }
0x1197   :  { %v10009_v61 = vpop.eup %10008  ;;  %10024 = vrcp.f32 %v6568_v55  ;;  %v6569_v11 = vadd.f32 1.0, %v10007_v42 }
0x1198   :  { %v10011_v33 = vpop.eup %10010  ;;  %10026 = vpow2.f32 %v8324_v20  ;;  %v6564_v45 = vadd.f32 1.0, %v10009_v61 }
0x1199   :  { %v10013_v8 = vpop.eup %10012  ;;  %10028 = vrcp.f32 %v6569_v11  ;;  %v6567_v17 = vadd.f32 1.0, %v10011_v33 }
0x119a   :  { %v10015_v35 = vpop.eup %10014  ;;  %v6595_v10 = vmul.f32 %v10013_v8, %v10005_v36  ;;  %10030 = vrcp.f32 %v6564_v45 }
0x119b   :  { %v10017_v37 = vpop.eup %10016 }
0x119c   :  { %v10019_v27 = vpop.eup %10018  ;;  %v6592_v34 = vmul.f32 %v10017_v37, %v11842_v13 }
0x119d   :  { %v6596_v60 = vmul.f32 %v10019_v27, %v10015_v35  ;;  %v8869_v22 = vpop.f32.mrb[240].mxu0  ;;  %v10021_v48 = vpop.eup %10020 }
0x119e   :  { %v11886_v14 = vadd.f32 %v6595_v10, %v6592_v34  ;;  %v11888_v31 = vadd.f32 %v8869_v22, %v8315_v51  ;;  %v6447_v58 = vpop.f32.mrb[241].mxu0  ;;  %v6593_v28 = vmul.f32 %v10021_v48, %v11849_v56  ;;  %v10023_v25 = vpop.eup %10022  ;;  %v6618_v34 = vld [vmem:[#allocation3 + $0x408] sm:$0xff]  ;;  %v6623_v48 = vld [vmem:[#allocation3 + $0x430] sm:$0xff] }
0x119f   :  { %v8870_v47 = vpop.f32.mrb[242].mxu0  ;;  %v11897_v42 = vadd.f32 %v8315_v51, %v6447_v58  ;;  %v6628_v58 = vld [vmem:[#allocation3 + $0x458] sm:$0xff] }
0x11a0   :  { %12565 = vst [vmem:[#allocation20_spill] sm:$0xff] %v11888_v31  ;;  %v6450_v29 = vpop.f32.mrb[243].mxu0  ;;  %6475 = vmax.xlane.f32.xlu1 %v11888_v31  ;;  %10032 = vtanh.f32 %v11886_v14  ;;  %v11893_v13 = vadd.f32 %v6596_v60, %v6593_v28  ;;  %v6633_v28 = vld [vmem:[#allocation3 + $0x480] sm:$0xff]  ;;  %v6643_v47 = vld [vmem:[#allocation3 + $0x4d0] sm:$0xff] }
0x11a1   :  { %v10025_v9 = vpop.eup %10024  ;;  %v11895_v20 = vadd.f32 %v8315_v51, %v6450_v29  ;;  %10034 = vrcp.f32 %v6567_v17  ;;  %v6948_v29 = vld [vmem:[#allocation3 + $0x8] sm:$0xff] }
0x11a2   :  { %v10027_v36 = vpop.eup %10026  ;;  %v6597_v55 = vmul.f32 %v10025_v9, %v10023_v25  ;;  %10036 = vtanh.f32 %v11893_v13  ;;  %v6648_v25 = vld [vmem:[#allocation3 + $0x4f8] sm:$0xff]  ;;  %6987 = vmatprep.subr.bf16.mxu0 %v6948_v29  ;;  %v6947_v9 = vld [vmem:[#allocation3] sm:$0xff]  ;;  %v6980_v29 = vld [vmem:[#allocation3 + $0x108] sm:$0xff] }
0x11a3   :  { %v10029_v61 = vpop.eup %10028  ;;  %6473 = vmax.xlane.f32.xlu0 %v11895_v20  ;;  %v6570_v11 = vadd.f32 1.0, %v10027_v36  ;;  %v6950_v36 = vld [vmem:[#allocation3 + $0x18] sm:$0xff] }
0x11a4   :  { %v6594_v56 = vmul.f32 %v10029_v61, %v11859_v26  ;;  %6471 = vmax.xlane.f32.xlu1 %v11897_v42  ;;  %v10031_v8 = vpop.eup %10030  ;;  %v6953_v61 = vld [vmem:[#allocation3 + $0x30] sm:$0xff] }
0x11a6   :  { %v11903_v33 = vadd.f32 %v6597_v55, %v6594_v56  ;;  %v6949_v55 = vld [vmem:[#allocation3 + $0x10] sm:$0xff]  ;;  %v6952_v56 = vld [vmem:[#allocation3 + $0x28] sm:$0xff] }
0x11a8   :  { %10038 = vtanh.f32 %v11903_v33 }
0x11a9   :  { %10040 = vrcp.f32 %v6570_v11  ;;  %v6955_v11 = vld [vmem:[#allocation3 + $0x40] sm:$0xff] }
0x11aa   :  { %v10033_v35 = vpop.eup %10032 }
0x11ab   :  { %v10035_v10 = vpop.eup %10034  ;;  %v6604_v51 = vmul.f32 %v10033_v35, %v10031_v8  ;;  %v6954_v8 = vld [vmem:[#allocation3 + $0x38] sm:$0xff] }
0x11ac   :  { %v10037_v37 = vpop.eup %10036  ;;  %v6958_v35 = vld [vmem:[#allocation3 + $0x58] sm:$0xff] }
0x11ad   :  { %v6605_v27 = vmul.f32 %v10037_v37, %v10035_v10  ;;  %v6957_v10 = vld [vmem:[#allocation3 + $0x50] sm:$0xff]  ;;  %v6960_v37 = vld [vmem:[#allocation3 + $0x68] sm:$0xff] }
0x11af   :  { %v6607_v45 = vpack.c.bf16 %v6605_v27, %v6604_v51  ;;  %v6959_v51 = vld [vmem:[#allocation3 + $0x60] sm:$0xff] }
0x11b0   :  { %v6963_v27 = vld [vmem:[#allocation3 + $0x80] sm:$0xff] }
0x11b1   :  { %6682 = vmatmul.mubr.bf16.vlgmr.msra.gmra.mrb[96].mxu0 %v6607_v45  ;;  %6733 = vmatmul.mubr.bf16.vlgmr.msra.gmra.mrb[96].mxu1 %v6607_v45 }
0x11b2   :  { %v10039_v60 = vpop.eup %10038  ;;  %8872 = vmatpush3.bf16.msra.mxu1 %v11867_v52  ;;  %6691 = vmatprep.mubr.bf16.mxu0 %v12475_v38  ;;  %v6638_v52 = vld [vmem:[#allocation3 + $0x4a8] sm:$0xff] }
0x11b3   :  { %v10041_v26 = vpop.eup %10040  ;;  %8873 = vmatprep.subr.bf16.mxu1 %v6618_v34  ;;  %6742 = vmatprep.mubr.bf16.mxu1 %v12475_v38 }
0x11b4   :  { %v6606_v22 = vmul.f32 %v10041_v26, %v10039_v60  ;;  %6988 = vmatpush1.bf16.msra.mxu0 %v6947_v9  ;;  %v6964_v60 = vld [vmem:[#allocation3 + $0x88] sm:$0xff]  ;;  %v6977_v9 = vld [vmem:[#allocation3 + $0xf0] sm:$0xff] }
0x11b5   :  { %6989 = vmatprep.subr.bf16.mxu0 %v6953_v61  ;;  %v6968_v26 = vld [vmem:[#allocation3 + $0xa8] sm:$0xff]  ;;  %v6985_v61 = vld [vmem:[#allocation3 + $0x130] sm:$0xff] }
0x11b6   :  { %8874 = vmatpush3.bf16.msra.mxu1 %v6618_v34  ;;  %v6608_v17 = vpack.c.bf16 %v6606_v22, %v6606_v22  ;;  %v6965_v34 = vld [vmem:[#allocation3 + $0x90] sm:$0xff]  ;;  %v6967_v22 = vld [vmem:[#allocation3 + $0xa0] sm:$0xff] }
0x11b7   :  { %8875 = vmatprep.subr.bf16.mxu1 %v6623_v48 }
0x11b8   :  { %6990 = vmatpush1.bf16.msra.mxu0 %v6952_v56  ;;  %v6982_v56 = vld [vmem:[#allocation3 + $0x118] sm:$0xff] }
0x11b9   :  { %6692 = vmatmul.mubr.bf16.gmra.mrb[244].mxu0 %v6608_v17  ;;  %6743 = vmatmul.mubr.bf16.gmra.mrb[240].mxu1 %v6608_v17 }
0x11ba   :  { %8876 = vmatpush3.bf16.msra.mxu1 %v6623_v48  ;;  %8887 = vmatprep.mubr.bf16.mxu1 %v6607_v45  ;;  %v6962_v45 = vld [vmem:[#allocation3 + $0x78] sm:$0xff] }
0x11bb   :  { %8877 = vmatprep.subr.bf16.mxu1 %v6628_v58  ;;  %7019 = vmatprep.mubr.bf16.mxu0 %v12475_v38  ;;  %v6970_v48 = vld [vmem:[#allocation3 + $0xb8] sm:$0xff] }
0x11bc   :  { %6991 = vmatprep.subr.bf16.mxu0 %v6958_v35 }
0x11bd   :  { %6992 = vmatpush1.bf16.msra.mxu0 %v6957_v10 }
0x11be   :  { %8878 = vmatpush3.bf16.msra.mxu1 %v6628_v58  ;;  %6993 = vmatprep.subr.bf16.mxu0 %v6963_v27  ;;  %v6973_v58 = vld [vmem:[#allocation3 + $0xd0] sm:$0xff] }
0x11bf   :  { %8879 = vmatprep.subr.bf16.mxu1 %v6633_v28 }
0x11c1   :  { %6994 = vmatpush1.bf16.msra.mxu0 %v6962_v45 }
0x11c2   :  { %8880 = vmatpush3.bf16.msra.mxu1 %v6633_v28  ;;  %6995 = vmatprep.subr.bf16.mxu0 %v6968_v26  ;;  %v6972_v28 = vld [vmem:[#allocation3 + $0xc8] sm:$0xff] }
0x11c3   :  { %8881 = vmatprep.subr.bf16.mxu1 %v6638_v52 }
0x11c5   :  { %6996 = vmatpush1.bf16.msra.mxu0 %v6967_v22 }
0x11c6   :  { %8882 = vmatpush3.bf16.msra.mxu1 %v6638_v52  ;;  %v6975_v52 = vld [vmem:[#allocation3 + $0xe0] sm:$0xff]  ;;  %6997 = vmatprep.subr.bf16.mxu0 %v6973_v58 }
0x11c7   :  { %8883 = vmatprep.subr.bf16.mxu1 %v6643_v47 }
0x11c9   :  { %6998 = vmatpush1.bf16.msra.mxu0 %v6972_v28 }
0x11ca   :  { %8884 = vmatpush3.bf16.msra.mxu1 %v6643_v47  ;;  %v6974_v47 = vld [vmem:[#allocation3 + $0xd8] sm:$0xff] }
0x11cb   :  { %8885 = vmatprep.subr.bf16.mxu1 %v6648_v25 }
0x11ce   :  { %8886 = vmatpush3.bf16.msra.mxu1 %v6648_v25  ;;  %v6978_v25 = vld [vmem:[#allocation3 + $0xf8] sm:$0xff] }
0x11cf   :  { %7038 = vmatprep.subr.bf16.mxu1 %v6950_v36  ;;  %6999 = vmatprep.subr.bf16.mxu0 %v6978_v25  ;;  %v6979_v36 = vld [vmem:[#allocation3 + $0x100] sm:$0xff] }
0x11d0   :  { %7000 = vmatpush1.bf16.msra.mxu0 %v6977_v9 }
0x11d1   :  { %8888 = vmatmul.mubr.bf16.vlgmr.msra.gmra.mrb[244].mxu1 %v6608_v17  ;;  %v6969_v17 = vld [vmem:[#allocation3 + $0xb0] sm:$0xff] }
0x11d2   :  { %7070 = vmatprep.mubr.bf16.mxu1 %v12475_v38  ;;  %7039 = vmatpush1.bf16.msra.mxu1 %v6949_v55  ;;  %v6983_v55 = vld [vmem:[#allocation3 + $0x120] sm:$0xff] }
0x11d3   :  { %7040 = vmatprep.subr.bf16.mxu1 %v6955_v11  ;;  %7001 = vmatprep.subr.bf16.mxu0 %v6983_v55  ;;  %v6984_v11 = vld [vmem:[#allocation3 + $0x128] sm:$0xff]  ;;  %v12566_v55 = vld [vmem:[#allocation106_spill] sm:$0xff] }
0x11d4   :  { %7002 = vmatpush1.bf16.msra.mxu0 %v6982_v56 }
0x11d6   :  { %7041 = vmatpush1.bf16.msra.mxu1 %v6954_v8  ;;  %v11911_v8 = vld [vmem:[#allocation3 + $0x20] sm:$0xff] }
0x11d7   :  { %7042 = vmatprep.subr.bf16.mxu1 %v6960_v37  ;;  %8891 = vmatprep.subr.bf16.mxu0 %v11911_v8 }
0x11da   :  { %7043 = vmatpush1.bf16.msra.mxu1 %v6959_v51 }
0x11db   :  { %7044 = vmatprep.subr.bf16.mxu1 %v6965_v34 }
0x11de   :  { %7045 = vmatpush1.bf16.msra.mxu1 %v6964_v60 }
0x11df   :  { %7046 = vmatprep.subr.bf16.mxu1 %v6970_v48 }
0x11e2   :  { %7047 = vmatpush1.bf16.msra.mxu1 %v6969_v17 }
0x11e3   :  { %7048 = vmatprep.subr.bf16.mxu1 %v6975_v52 }
0x11e6   :  { %7049 = vmatpush1.bf16.msra.mxu1 %v6974_v47 }
0x11e7   :  { %7050 = vmatprep.subr.bf16.mxu1 %v6980_v29 }
0x11ea   :  { %7051 = vmatpush1.bf16.msra.mxu1 %v6979_v36 }
0x11eb   :  { %7052 = vmatprep.subr.bf16.mxu1 %v6985_v61 }
0x11ee   :  { %7053 = vmatpush1.bf16.msra.mxu1 %v6984_v11 }
0x1284   :  { %v6683_v35 = vpop.f32.mrb[96].mxu0  ;;  %v6734_v10 = vpop.f32.mrb[96].mxu1 }
0x1285   :  { %v8999_v37 = vadd.f32 %v6683_v35, %v10622_v4  ;;  %v6685_v51 = vpop.f32.mrb[97].mxu0  ;;  %v6736_v27 = vpop.f32.mrb[97].mxu1  ;;  %v9035_v25 = vadd.f32 %v6734_v10, %v10624_v5 }
0x1286   :  { %v9000_v45 = vadd.f32 %v6685_v51, %v10626_v6  ;;  %v6687_v34 = vpop.f32.mrb[98].mxu0  ;;  %v6738_v60 = vpop.f32.mrb[98].mxu1  ;;  %v9036_v35 = vadd.f32 %v6736_v27, %v10628_v7 }
0x1287   :  { %v8327_v26 = vmul.f32 -1.442695, %v8999_v37  ;;  %v9001_v22 = vadd.f32 %v6687_v34, %v10622_v4  ;;  %v6689_v48 = vpop.f32.mrb[99].mxu0  ;;  %v6740_v17 = vpop.f32.mrb[99].mxu1  ;;  %v9037_v36 = vadd.f32 %v6738_v60, %v10624_v5  ;;  %v12567_v37 = vld [vmem:[#allocation108_spill] sm:$0xff] }
0x1288   :  { %v8328_v58 = vmul.f32 -1.442695, %v9000_v45  ;;  %v9002_v28 = vadd.f32 %v6689_v48, %v10626_v6  ;;  %v8329_v10 = vmul.f32 -1.442695, %v9035_v25 }
0x1289   :  { %10042 = vpow2.f32 %v8327_v26  ;;  %v8330_v52 = vmul.f32 -1.442695, %v9001_v22 }
0x128a   :  { %v8331_v47 = vmul.f32 -1.442695, %v9002_v28  ;;  %10044 = vpow2.f32 %v8328_v58  ;;  %v8332_v28 = vmul.f32 -1.442695, %v9037_v36 }
0x128b   :  { %10046 = vpow2.f32 %v8330_v52  ;;  %v9038_v52 = vadd.f32 %v6740_v17, %v10628_v7 }
0x128c   :  { %v6693_v29 = vpop.f32.mrb[244].mxu0  ;;  %v6744_v9 = vpop.f32.mrb[240].mxu1  ;;  %10048 = vpow2.f32 %v8331_v47 }
0x128d   :  { %v6869_v61 = vadd.f32 %v6693_v29, %v12566_v55  ;;  %v6695_v56 = vpop.f32.mrb[245].mxu0  ;;  %v6746_v11 = vpop.f32.mrb[241].mxu1 }
0x128e   :  { %v6870_v51 = vadd.f32 %v6695_v56, %v12567_v37  ;;  %v6697_v45 = vpop.f32.mrb[246].mxu0  ;;  %v6748_v34 = vpop.f32.mrb[242].mxu1 }
0x128f   :  { %v8333_v26 = vmul.f32 -1.442695, %v6869_v61  ;;  %v6698_v22 = vpop.f32.mrb[247].mxu0  ;;  %v6749_v48 = vpop.f32.mrb[243].mxu1  ;;  %v12568_v61 = vld [vmem:[#allocation107_spill] sm:$0xff] }
0x1290   :  { %v8334_v58 = vmul.f32 -1.442695, %v6870_v51  ;;  %v6871_v37 = vadd.f32 %v6744_v9, %v12568_v61 }
0x1291   :  { %10050 = vpow2.f32 %v8333_v26 }
0x1292   :  { %10052 = vtanh.f32 %v9036_v35  ;;  %v12569_v35 = vld [vmem:[#allocation109_spill] sm:$0xff]  ;;  %v8335_v17 = vmul.f32 -1.442695, %v6871_v37 }
0x1293   :  { %v10043_v60 = vpop.eup %10042  ;;  %10054 = vpow2.f32 %v8334_v58  ;;  %v6872_v51 = vadd.f32 %v6746_v11, %v12569_v35  ;;  %v8326_v11 = vld [vmem:[%s12337_s3 + $0x3] ss:$0 sm:$0xff] }
0x1294   :  { %v6900_v29 = vadd.f32 1.0, %v10043_v60  ;;  %10056 = vpow2.f32 %v8329_v10  ;;  %v10045_v27 = vpop.eup %10044 }
0x1295   :  { %10058 = vpow2.f32 %v8332_v28  ;;  %v10047_v47 = vpop.eup %10046  ;;  %v6901_v55 = vadd.f32 1.0, %v10045_v27 }
0x1296   :  { %10060 = vrcp.f32 %v6900_v29  ;;  %v6903_v56 = vadd.f32 1.0, %v10047_v47  ;;  %v10049_v25 = vpop.eup %10048 }
0x1297   :  { %10062 = vtanh.f32 %v9038_v52  ;;  %v6904_v36 = vadd.f32 1.0, %v10049_v25 }
0x1298   :  { %10064 = vrcp.f32 %v6901_v55 }
0x1299   :  { %10066 = vrcp.f32 %v6903_v56 }
0x129a   :  { %10068 = vrcp.f32 %v6904_v36 }
0x129b   :  { %v10051_v45 = vpop.eup %10050  ;;  %10070 = vtanh.f32 %v6872_v51 }
0x129c   :  { %v10053_v34 = vpop.eup %10052  ;;  %v6906_v26 = vadd.f32 1.0, %v10051_v45 }
0x129d   :  { %v10055_v22 = vpop.eup %10054 }
0x129e   :  { %v10057_v48 = vpop.eup %10056  ;;  %10072 = vrcp.f32 %v6906_v26  ;;  %v6907_v10 = vadd.f32 1.0, %v10055_v22 }
0x129f   :  { %v10059_v58 = vpop.eup %10058  ;;  %10074 = vpow2.f32 %v8335_v17  ;;  %v6902_v27 = vadd.f32 1.0, %v10057_v48 }
0x12a0   :  { %v10061_v28 = vpop.eup %10060  ;;  %10076 = vrcp.f32 %v6907_v10  ;;  %v6905_v25 = vadd.f32 1.0, %v10059_v58 }
0x12a1   :  { %v10063_v9 = vpop.eup %10062  ;;  %v6933_v60 = vmul.f32 %v10061_v28, %v10053_v34  ;;  %10078 = vrcp.f32 %v6902_v27 }
0x12a2   :  { %v10065_v52 = vpop.eup %10064 }
0x12a3   :  { %v10067_v29 = vpop.eup %10066  ;;  %v6930_v47 = vmul.f32 %v10065_v52, %v11886_v14 }
0x12a4   :  { %v6934_v55 = vmul.f32 %v10067_v29, %v10063_v9  ;;  %v8889_v56 = vpop.f32.mrb[244].mxu1  ;;  %v10069_v61 = vpop.eup %10068 }
0x12a5   :  { %v11930_v37 = vadd.f32 %v6933_v60, %v6930_v47  ;;  %v11932_v36 = vadd.f32 %v8889_v56, %v8326_v11  ;;  %v6785_v35 = vpop.f32.mrb[245].mxu1  ;;  %v6931_v51 = vmul.f32 %v10069_v61, %v11893_v13  ;;  %v10071_v17 = vpop.eup %10070  ;;  %v6956_v61 = vld [vmem:[#allocation3 + $0x48] sm:$0xff] }
0x12a6   :  { %v8890_v45 = vpop.f32.mrb[246].mxu1  ;;  %v11941_v58 = vadd.f32 %v8326_v11, %v6785_v35 }
0x12a7   :  { %12570 = vst [vmem:[#allocation17_spill] sm:$0xff] %v11932_v36  ;;  %v6788_v34 = vpop.f32.mrb[247].mxu1  ;;  %6813 = vmax.xlane.f32.xlu0 %v11932_v36  ;;  %10080 = vtanh.f32 %v11930_v37  ;;  %v11937_v14 = vadd.f32 %v6934_v55, %v6931_v51  ;;  %v6961_v51 = vld [vmem:[#allocation3 + $0x70] sm:$0xff]  ;;  %v12579_v36 = vld [vmem:[#allocation118_spill] sm:$0xff] }
0x12a8   :  { %v10073_v26 = vpop.eup %10072  ;;  %v11939_v22 = vadd.f32 %v8326_v11, %v6788_v34  ;;  %10082 = vrcp.f32 %v6905_v25  ;;  %12572 = vst [vmem:[#allocation22_spill] sm:$0xff] %v11941_v58  ;;  %v6971_v34 = vld [vmem:[#allocation3 + $0xc0] sm:$0xff] }
0x12a9   :  { %v10075_v48 = vpop.eup %10074  ;;  %v6935_v10 = vmul.f32 %v10073_v26, %v10071_v17  ;;  %10084 = vtanh.f32 %v11937_v14  ;;  %v6966_v17 = vld [vmem:[#allocation3 + $0x98] sm:$0xff]  ;;  %v6981_v26 = vld [vmem:[#allocation3 + $0x110] sm:$0xff] }
0x12aa   :  { %12571 = vst [vmem:[#allocation19_spill] sm:$0xff] %v11939_v22  ;;  %v10077_v28 = vpop.eup %10076  ;;  %6811 = vmax.xlane.f32.xlu1 %v11939_v22  ;;  %v6908_v9 = vadd.f32 1.0, %v10075_v48  ;;  %v6986_v48 = vld [vmem:[#allocation3 + $0x138] sm:$0xff] }
0x12ab   :  { %v6932_v13 = vmul.f32 %v10077_v28, %v11903_v33  ;;  %6809 = vmax.xlane.f32.xlu0 %v11941_v58  ;;  %v10079_v52 = vpop.eup %10078  ;;  %v7286_v28 = vld [vmem:[#allocation3 + $0x148] sm:$0xff] }
0x12ad   :  { %v11947_v60 = vadd.f32 %v6935_v10, %v6932_v13  ;;  %v7288_v10 = vld [vmem:[#allocation3 + $0x158] sm:$0xff]  ;;  %v7287_v13 = vld [vmem:[#allocation3 + $0x150] sm:$0xff] }
0x12ae   :  { %7376 = vmatprep.subr.bf16.mxu1 %v7288_v10  ;;  %v7312_v10 = vld [vmem:[#allocation3 + $0x218] sm:$0xff] }
0x12af   :  { %10086 = vtanh.f32 %v11947_v60 }
0x12b0   :  { %10088 = vrcp.f32 %v6908_v9  ;;  %v7285_v9 = vld [vmem:[#allocation3 + $0x140] sm:$0xff] }
0x12b1   :  { %v10081_v29 = vpop.eup %10080 }
0x12b2   :  { %v10083_v27 = vpop.eup %10082  ;;  %v6942_v47 = vmul.f32 %v10081_v29, %v10079_v52  ;;  %v7293_v52 = vld [vmem:[#allocation3 + $0x180] sm:$0xff]  ;;  %v7291_v29 = vld [vmem:[#allocation3 + $0x170] sm:$0xff] }
0x12b3   :  { %v10085_v11 = vpop.eup %10084 }
0x12b4   :  { %v6943_v55 = vmul.f32 %v10085_v11, %v10083_v27  ;;  %v7292_v27 = vld [vmem:[#allocation3 + $0x178] sm:$0xff]  ;;  %v7290_v11 = vld [vmem:[#allocation3 + $0x168] sm:$0xff] }
0x12b6   :  { %v6945_v56 = vpack.c.bf16 %v6943_v55, %v6942_v47  ;;  %v7298_v47 = vld [vmem:[#allocation3 + $0x1a8] sm:$0xff]  ;;  %v7296_v55 = vld [vmem:[#allocation3 + $0x198] sm:$0xff] }
0x12b8   :  { %7020 = vmatmul.mubr.bf16.vlgmr.msra.gmra.mrb[248].mxu0 %v6945_v56  ;;  %7071 = vmatmul.mubr.bf16.vlgmr.msra.gmra.mrb[248].mxu1 %v6945_v56 }
0x12b9   :  { %v10087_v25 = vpop.eup %10086  ;;  %8892 = vmatpush3.bf16.msra.mxu0 %v11911_v8  ;;  %7029 = vmatprep.mubr.bf16.mxu0 %v12475_v38  ;;  %v6976_v8 = vld [vmem:[#allocation3 + $0xe8] sm:$0xff] }
0x12ba   :  { %v10089_v33 = vpop.eup %10088  ;;  %8893 = vmatprep.subr.bf16.mxu0 %v6956_v61  ;;  %7080 = vmatprep.mubr.bf16.mxu1 %v12475_v38 }
0x12bb   :  { %v6944_v35 = vmul.f32 %v10089_v33, %v10087_v25  ;;  %7377 = vmatpush1.bf16.msra.mxu1 %v7287_v13  ;;  %v7303_v25 = vld [vmem:[#allocation3 + $0x1d0] sm:$0xff]  ;;  %v7301_v33 = vld [vmem:[#allocation3 + $0x1c0] sm:$0xff]  ;;  %v7318_v13 = vld [vmem:[#allocation3 + $0x248] sm:$0xff] }
0x12bc   :  { %7378 = vmatprep.subr.bf16.mxu1 %v7293_v52  ;;  %v7317_v52 = vld [vmem:[#allocation3 + $0x240] sm:$0xff] }
0x12bd   :  { %8894 = vmatpush3.bf16.msra.mxu0 %v6956_v61  ;;  %v6946_v45 = vpack.c.bf16 %v6944_v35, %v6944_v35  ;;  %v7295_v61 = vld [vmem:[#allocation3 + $0x190] sm:$0xff]  ;;  %v7302_v35 = vld [vmem:[#allocation3 + $0x1c8] sm:$0xff] }
0x12be   :  { %8895 = vmatprep.subr.bf16.mxu0 %v6961_v51 }
0x12bf   :  { %7379 = vmatpush1.bf16.msra.mxu1 %v7292_v27  ;;  %v7323_v27 = vld [vmem:[#allocation3 + $0x270] sm:$0xff] }
0x12c0   :  { %7030 = vmatmul.mubr.bf16.gmra.mrb[252].mxu0 %v6946_v45  ;;  %7081 = vmatmul.mubr.bf16.gmra.mrb[252].mxu1 %v6946_v45 }
0x12c1   :  { %8896 = vmatpush3.bf16.msra.mxu0 %v6961_v51  ;;  %8907 = vmatprep.mubr.bf16.mxu0 %v6945_v56  ;;  %v7297_v56 = vld [vmem:[#allocation3 + $0x1a0] sm:$0xff]  ;;  %v7300_v51 = vld [vmem:[#allocation3 + $0x1b8] sm:$0xff] }
0x12c2   :  { %8897 = vmatprep.subr.bf16.mxu0 %v6966_v17  ;;  %7408 = vmatprep.mubr.bf16.mxu1 %v12475_v38 }
0x12c3   :  { %7380 = vmatprep.subr.bf16.mxu1 %v7298_v47  ;;  %v7322_v47 = vld [vmem:[#allocation3 + $0x268] sm:$0xff] }
0x12c4   :  { %7381 = vmatpush1.bf16.msra.mxu1 %v7297_v56  ;;  %v11955_v56 = vld [vmem:[#allocation3 + $0x160] sm:$0xff] }
0x12c5   :  { %8898 = vmatpush3.bf16.msra.mxu0 %v6966_v17  ;;  %7382 = vmatprep.subr.bf16.mxu1 %v7303_v25  ;;  %v7306_v17 = vld [vmem:[#allocation3 + $0x1e8] sm:$0xff] }
0x12c6   :  { %8899 = vmatprep.subr.bf16.mxu0 %v6971_v34 }
0x12c8   :  { %7383 = vmatpush1.bf16.msra.mxu1 %v7302_v35 }
0x12c9   :  { %8900 = vmatpush3.bf16.msra.mxu0 %v6971_v34  ;;  %v7307_v34 = vld [vmem:[#allocation3 + $0x1f0] sm:$0xff] }
0x12ca   :  { %8901 = vmatprep.subr.bf16.mxu0 %v6976_v8 }
0x12cd   :  { %8902 = vmatpush3.bf16.msra.mxu0 %v6976_v8  ;;  %v7305_v8 = vld [vmem:[#allocation3 + $0x1e0] sm:$0xff] }
0x12ce   :  { %8903 = vmatprep.subr.bf16.mxu0 %v6981_v26 }
0x12d1   :  { %8904 = vmatpush3.bf16.msra.mxu0 %v6981_v26  ;;  %v7313_v26 = vld [vmem:[#allocation3 + $0x220] sm:$0xff] }
0x12d2   :  { %8905 = vmatprep.subr.bf16.mxu0 %v6986_v48 }
0x12d5   :  { %8906 = vmatpush3.bf16.msra.mxu0 %v6986_v48  ;;  %v7311_v48 = vld [vmem:[#allocation3 + $0x210] sm:$0xff] }
0x12d6   :  { %7325 = vmatprep.subr.bf16.mxu0 %v7286_v28  ;;  %v7310_v28 = vld [vmem:[#allocation3 + $0x208] sm:$0xff] }
0x12d8   :  { %8908 = vmatmul.mubr.bf16.vlgmr.msra.gmra.mrb[0].mxu0 %v6946_v45  ;;  %v7308_v45 = vld [vmem:[#allocation3 + $0x1f8] sm:$0xff] }
0x12d9   :  { %7357 = vmatprep.mubr.bf16.mxu0 %v12475_v38  ;;  %7326 = vmatpush1.bf16.msra.mxu0 %v7285_v9  ;;  %v7316_v9 = vld [vmem:[#allocation3 + $0x238] sm:$0xff] }
0x12da   :  { %7327 = vmatprep.subr.bf16.mxu0 %v7291_v29  ;;  %7384 = vmatprep.subr.bf16.mxu1 %v7308_v45  ;;  %v7315_v29 = vld [vmem:[#allocation3 + $0x230] sm:$0xff] }
0x12db   :  { %7385 = vmatpush1.bf16.msra.mxu1 %v7307_v34 }
0x12dc   :  { %7386 = vmatprep.subr.bf16.mxu1 %v7313_v26 }
0x12dd   :  { %7328 = vmatpush1.bf16.msra.mxu0 %v7290_v11  ;;  %v7321_v11 = vld [vmem:[#allocation3 + $0x260] sm:$0xff] }
0x12de   :  { %7329 = vmatprep.subr.bf16.mxu0 %v7296_v55  ;;  %v7320_v55 = vld [vmem:[#allocation3 + $0x258] sm:$0xff] }
0x12df   :  { %7387 = vmatpush1.bf16.msra.mxu1 %v7312_v10  ;;  %v12575_v10 = vld [vmem:[#allocation114_spill] sm:$0xff] }
0x12e0   :  { %7388 = vmatprep.subr.bf16.mxu1 %v7318_v13 }
0x12e1   :  { %7330 = vmatpush1.bf16.msra.mxu0 %v7295_v61 }
0x12e2   :  { %7331 = vmatprep.subr.bf16.mxu0 %v7301_v33  ;;  %v12573_v33 = vld [vmem:[#allocation110_spill] sm:$0xff] }
0x12e3   :  { %7389 = vmatpush1.bf16.msra.mxu1 %v7317_v52 }
0x12e4   :  { %7390 = vmatprep.subr.bf16.mxu1 %v7323_v27 }
0x12e5   :  { %7332 = vmatpush1.bf16.msra.mxu0 %v7300_v51 }
0x12e6   :  { %7333 = vmatprep.subr.bf16.mxu0 %v7306_v17  ;;  %v12574_v17 = vld [vmem:[#allocation112_spill] sm:$0xff] }
0x12e7   :  { %7391 = vmatpush1.bf16.msra.mxu1 %v7322_v47 }
0x12e8   :  { %8911 = vmatprep.subr.bf16.mxu1 %v11955_v56 }
0x12e9   :  { %7334 = vmatpush1.bf16.msra.mxu0 %v7305_v8 }
0x12ea   :  { %7335 = vmatprep.subr.bf16.mxu0 %v7311_v48 }
0x12ed   :  { %7336 = vmatpush1.bf16.msra.mxu0 %v7310_v28 }
0x12ee   :  { %7337 = vmatprep.subr.bf16.mxu0 %v7316_v9 }
0x12f1   :  { %7338 = vmatpush1.bf16.msra.mxu0 %v7315_v29  ;;  %v12576_v29 = vld [vmem:[#allocation116_spill] sm:$0xff] }
0x12f2   :  { %7339 = vmatprep.subr.bf16.mxu0 %v7321_v11 }
0x12f5   :  { %7340 = vmatpush1.bf16.msra.mxu0 %v7320_v55  ;;  %v12577_v55 = vld [vmem:[#allocation111_spill] sm:$0xff] }
0x138b   :  { %v7021_v61 = vpop.f32.mrb[248].mxu0  ;;  %v7072_v25 = vpop.f32.mrb[248].mxu1 }
0x138c   :  { %v7199_v35 = vadd.f32 %v7021_v61, %v12573_v33  ;;  %v7023_v51 = vpop.f32.mrb[249].mxu0  ;;  %v7074_v45 = vpop.f32.mrb[249].mxu1  ;;  %v7201_v61 = vadd.f32 %v7072_v25, %v12577_v55 }
0x138d   :  { %v7200_v34 = vadd.f32 %v7023_v51, %v12574_v17  ;;  %v7025_v8 = vpop.f32.mrb[250].mxu0  ;;  %v7076_v26 = vpop.f32.mrb[250].mxu1  ;;  %v12578_v51 = vld [vmem:[#allocation115_spill] sm:$0xff] }
0x138e   :  { %v8337_v48 = vmul.f32 -1.442695, %v7199_v35  ;;  %v7203_v28 = vadd.f32 %v7025_v8, %v12575_v10  ;;  %v7027_v13 = vpop.f32.mrb[251].mxu0  ;;  %v7078_v9 = vpop.f32.mrb[251].mxu1  ;;  %v7205_v17 = vadd.f32 %v7076_v26, %v12578_v51  ;;  %v12580_v10 = vld [vmem:[#allocation113_spill] sm:$0xff] }
0x138f   :  { %v8338_v52 = vmul.f32 -1.442695, %v7200_v34  ;;  %v7204_v27 = vadd.f32 %v7027_v13, %v12576_v29  ;;  %v7202_v58 = vadd.f32 %v7074_v45, %v12580_v10  ;;  %v12581_v34 = vld [vmem:[#allocation120_spill] sm:$0xff]  ;;  %v8339_v25 = vmul.f32 -1.442695, %v7201_v61  ;;  %v12582_v51 = vld [vmem:[#allocation117_spill] sm:$0xff] }
0x1390   :  { %10090 = vpow2.f32 %v8337_v48  ;;  %v8340_v11 = vmul.f32 -1.442695, %v7203_v28  ;;  %v8342_v55 = vmul.f32 -1.442695, %v7205_v17 }
0x1391   :  { %v8341_v47 = vmul.f32 -1.442695, %v7204_v27  ;;  %10092 = vpow2.f32 %v8338_v52 }
0x1392   :  { %10094 = vpow2.f32 %v8340_v11 }
0x1393   :  { %v7031_v33 = vpop.f32.mrb[252].mxu0  ;;  %v7082_v22 = vpop.f32.mrb[252].mxu1  ;;  %10096 = vpow2.f32 %v8341_v47 }
0x1394   :  { %v7207_v35 = vadd.f32 %v7031_v33, %v12579_v36  ;;  %v7033_v31 = vpop.f32.mrb[253].mxu0  ;;  %v7084_v8 = vpop.f32.mrb[253].mxu1  ;;  %v7206_v36 = vadd.f32 %v7078_v9, %v12582_v51 }
0x1395   :  { %v7208_v13 = vadd.f32 %v7033_v31, %v12581_v34  ;;  %v7035_v48 = vpop.f32.mrb[254].mxu0  ;;  %v7086_v28 = vpop.f32.mrb[254].mxu1 }
0x1396   :  { %v8343_v29 = vmul.f32 -1.442695, %v7207_v35  ;;  %v7036_v52 = vpop.f32.mrb[255].mxu0  ;;  %v7087_v27 = vpop.f32.mrb[255].mxu1  ;;  %v12583_v35 = vld [vmem:[#allocation119_spill] sm:$0xff] }
0x1397   :  { %v8344_v11 = vmul.f32 -1.442695, %v7208_v13  ;;  %v7209_v34 = vadd.f32 %v7082_v22, %v12583_v35 }
0x1398   :  { %10098 = vpow2.f32 %v8343_v29 }
0x1399   :  { %10100 = vtanh.f32 %v7202_v58  ;;  %v12584_v58 = vld [vmem:[#allocation121_spill] sm:$0xff]  ;;  %v8345_v9 = vmul.f32 -1.442695, %v7209_v34 }
0x139a   :  { %v10091_v26 = vpop.eup %10090  ;;  %10102 = vpow2.f32 %v8344_v11  ;;  %v7210_v13 = vadd.f32 %v7084_v8, %v12584_v58  ;;  %v8336_v8 = vld [vmem:[%s12337_s3] ss:$0 sm:$0xff] }
0x139b   :  { %v7238_v33 = vadd.f32 1.0, %v10091_v26  ;;  %10104 = vpow2.f32 %v8339_v25  ;;  %v10093_v45 = vpop.eup %10092 }
0x139c   :  { %10106 = vpow2.f32 %v8342_v55  ;;  %v10095_v47 = vpop.eup %10094  ;;  %v7239_v31 = vadd.f32 1.0, %v10093_v45 }
0x139d   :  { %10108 = vrcp.f32 %v7238_v33  ;;  %v7241_v10 = vadd.f32 1.0, %v10095_v47  ;;  %v10097_v61 = vpop.eup %10096 }
0x139e   :  { %10110 = vtanh.f32 %v7206_v36  ;;  %v7242_v17 = vadd.f32 1.0, %v10097_v61 }
0x139f   :  { %10112 = vrcp.f32 %v7239_v31 }
0x13a0   :  { %10114 = vrcp.f32 %v7241_v10 }
0x13a1   :  { %10116 = vrcp.f32 %v7242_v17 }
0x13a2   :  { %v10099_v48 = vpop.eup %10098  ;;  %10118 = vtanh.f32 %v7210_v13 }
0x13a3   :  { %v10101_v28 = vpop.eup %10100  ;;  %v7244_v29 = vadd.f32 1.0, %v10099_v48 }
0x13a4   :  { %v10103_v52 = vpop.eup %10102 }
0x13a5   :  { %v10105_v27 = vpop.eup %10104  ;;  %10120 = vrcp.f32 %v7244_v29  ;;  %v7245_v25 = vadd.f32 1.0, %v10103_v52 }
0x13a6   :  { %v10107_v11 = vpop.eup %10106  ;;  %10122 = vpow2.f32 %v8345_v9  ;;  %v7240_v33 = vadd.f32 1.0, %v10105_v27 }
0x13a7   :  { %v10109_v55 = vpop.eup %10108  ;;  %10124 = vrcp.f32 %v7245_v25  ;;  %v7243_v34 = vadd.f32 1.0, %v10107_v11 }
0x13a8   :  { %v10111_v22 = vpop.eup %10110  ;;  %v7271_v26 = vmul.f32 %v10109_v55, %v10101_v28  ;;  %10126 = vrcp.f32 %v7240_v33 }
0x13a9   :  { %v10113_v51 = vpop.eup %10112 }
0x13aa   :  { %v10115_v36 = vpop.eup %10114  ;;  %v7268_v45 = vmul.f32 %v10113_v51, %v11930_v37 }
0x13ab   :  { %v7272_v47 = vmul.f32 %v10115_v36, %v10111_v22  ;;  %v8909_v31 = vpop.f32.mrb[0].mxu0  ;;  %v10117_v10 = vpop.eup %10116 }
0x13ac   :  { %v11974_v35 = vadd.f32 %v7271_v26, %v7268_v45  ;;  %v11976_v61 = vadd.f32 %v8909_v31, %v8336_v8  ;;  %v7123_v17 = vpop.f32.mrb[1].mxu0  ;;  %v7269_v58 = vmul.f32 %v10117_v10, %v11937_v14  ;;  %v10119_v48 = vpop.eup %10118  ;;  %v7294_v31 = vld [vmem:[#allocation3 + $0x188] sm:$0xff] }
0x13ad   :  { %v8910_v13 = vpop.f32.mrb[2].mxu0  ;;  %v11985_v25 = vadd.f32 %v8336_v8, %v7123_v17  ;;  %v7299_v17 = vld [vmem:[#allocation3 + $0x1b0] sm:$0xff] }
0x13ae   :  { %v7126_v9 = vpop.f32.mrb[3].mxu0  ;;  %7151 = vmax.xlane.f32.xlu1 %v11976_v61  ;;  %10128 = vtanh.f32 %v11974_v35  ;;  %v11981_v37 = vadd.f32 %v7272_v47, %v7269_v58  ;;  %v7304_v13 = vld [vmem:[#allocation3 + $0x1d8] sm:$0xff] }
0x13af   :  { %v10121_v28 = vpop.eup %10120  ;;  %v11983_v29 = vadd.f32 %v8336_v8, %v7126_v9  ;;  %10130 = vrcp.f32 %v7243_v34  ;;  %v7319_v9 = vld [vmem:[#allocation3 + $0x250] sm:$0xff] }
0x13b0   :  { %v10123_v52 = vpop.eup %10122  ;;  %v7273_v27 = vmul.f32 %v10121_v28, %v10119_v48  ;;  %10132 = vtanh.f32 %v11981_v37  ;;  %v7309_v48 = vld [vmem:[#allocation3 + $0x200] sm:$0xff]  ;;  %v7324_v28 = vld [vmem:[#allocation3 + $0x278] sm:$0xff] }
0x13b1   :  { %v10125_v11 = vpop.eup %10124  ;;  %7149 = vmax.xlane.f32.xlu0 %v11983_v29  ;;  %v7246_v55 = vadd.f32 1.0, %v10123_v52  ;;  %v7624_v52 = vld [vmem:[#allocation3 + $0x288] sm:$0xff] }
0x13b2   :  { %v7270_v14 = vmul.f32 %v10125_v11, %v11947_v60  ;;  %7147 = vmax.xlane.f32.xlu1 %v11985_v25  ;;  %v10127_v26 = vpop.eup %10126  ;;  %7663 = vmatprep.subr.bf16.mxu0 %v7624_v52  ;;  %v7626_v11 = vld [vmem:[#allocation3 + $0x298] sm:$0xff] }
0x13b3   :  { %v7650_v52 = vld [vmem:[#allocation3 + $0x358] sm:$0xff] }
0x13b4   :  { %v11991_v22 = vadd.f32 %v7273_v27, %v7270_v14  ;;  %v7623_v27 = vld [vmem:[#allocation3 + $0x280] sm:$0xff]  ;;  %v7625_v14 = vld [vmem:[#allocation3 + $0x290] sm:$0xff] }
0x13b6   :  { %10134 = vtanh.f32 %v11991_v22 }
0x13b7   :  { %10136 = vrcp.f32 %v7246_v55  ;;  %v7629_v55 = vld [vmem:[#allocation3 + $0x2b0] sm:$0xff] }
0x13b8   :  { %v10129_v51 = vpop.eup %10128 }
0x13b9   :  { %v10131_v36 = vpop.eup %10130  ;;  %v7280_v33 = vmul.f32 %v10129_v51, %v10127_v26  ;;  %v7628_v26 = vld [vmem:[#allocation3 + $0x2a8] sm:$0xff]  ;;  %v7631_v51 = vld [vmem:[#allocation3 + $0x2c0] sm:$0xff] }
0x13ba   :  { %v10133_v8 = vpop.eup %10132 }
0x13bb   :  { %v7281_v45 = vmul.f32 %v10133_v8, %v10131_v36  ;;  %v7630_v36 = vld [vmem:[#allocation3 + $0x2b8] sm:$0xff] }
0x13bc   :  { %v7634_v8 = vld [vmem:[#allocation3 + $0x2d8] sm:$0xff] }
0x13bd   :  { %v7283_v47 = vpack.c.bf16 %v7281_v45, %v7280_v33  ;;  %v7633_v33 = vld [vmem:[#allocation3 + $0x2d0] sm:$0xff]  ;;  %v7636_v45 = vld [vmem:[#allocation3 + $0x2e8] sm:$0xff] }
0x13bf   :  { %7358 = vmatmul.mubr.bf16.vlgmr.msra.gmra.mrb[108].mxu0 %v7283_v47  ;;  %7409 = vmatmul.mubr.bf16.vlgmr.msra.gmra.mrb[108].mxu1 %v7283_v47 }
0x13c0   :  { %v10135_v10 = vpop.eup %10134  ;;  %8912 = vmatpush3.bf16.msra.mxu1 %v11955_v56  ;;  %7367 = vmatprep.mubr.bf16.mxu0 %v12475_v38  ;;  %v7314_v56 = vld [vmem:[#allocation3 + $0x228] sm:$0xff] }
0x13c1   :  { %v10137_v60 = vpop.eup %10136  ;;  %8913 = vmatprep.subr.bf16.mxu1 %v7294_v31  ;;  %7418 = vmatprep.mubr.bf16.mxu1 %v12475_v38 }
0x13c2   :  { %v7282_v34 = vmul.f32 %v10137_v60, %v10135_v10  ;;  %7664 = vmatpush1.bf16.msra.mxu0 %v7623_v27  ;;  %v7638_v10 = vld [vmem:[#allocation3 + $0x2f8] sm:$0xff]  ;;  %v7641_v60 = vld [vmem:[#allocation3 + $0x310] sm:$0xff] }
0x13c3   :  { %7665 = vmatprep.subr.bf16.mxu0 %v7629_v55  ;;  %v7654_v27 = vld [vmem:[#allocation3 + $0x378] sm:$0xff]  ;;  %v7655_v55 = vld [vmem:[#allocation3 + $0x380] sm:$0xff] }
0x13c4   :  { %8914 = vmatpush3.bf16.msra.mxu1 %v7294_v31  ;;  %v7284_v58 = vpack.c.bf16 %v7282_v34, %v7282_v34  ;;  %v7639_v31 = vld [vmem:[#allocation3 + $0x300] sm:$0xff]  ;;  %v7640_v34 = vld [vmem:[#allocation3 + $0x308] sm:$0xff] }
0x13c5   :  { %8915 = vmatprep.subr.bf16.mxu1 %v7299_v17 }
0x13c6   :  { %7666 = vmatpush1.bf16.msra.mxu0 %v7628_v26  ;;  %v7659_v26 = vld [vmem:[#allocation3 + $0x3a0] sm:$0xff] }
0x13c7   :  { %7368 = vmatmul.mubr.bf16.gmra.mrb[4].mxu0 %v7284_v58  ;;  %7419 = vmatmul.mubr.bf16.gmra.mrb[0].mxu1 %v7284_v58 }
0x13c8   :  { %8916 = vmatpush3.bf16.msra.mxu1 %v7299_v17  ;;  %8927 = vmatprep.mubr.bf16.mxu1 %v7283_v47  ;;  %v7635_v47 = vld [vmem:[#allocation3 + $0x2e0] sm:$0xff]  ;;  %v7644_v17 = vld [vmem:[#allocation3 + $0x328] sm:$0xff] }
0x13c9   :  { %8917 = vmatprep.subr.bf16.mxu1 %v7304_v13  ;;  %7695 = vmatprep.mubr.bf16.mxu0 %v12475_v38 }
0x13ca   :  { %7667 = vmatprep.subr.bf16.mxu0 %v7634_v8  ;;  %v7660_v8 = vld [vmem:[#allocation3 + $0x3a8] sm:$0xff] }
0x13cb   :  { %7668 = vmatpush1.bf16.msra.mxu0 %v7633_v33  ;;  %v11999_v33 = vld [vmem:[#allocation3 + $0x2a0] sm:$0xff] }
0x13cc   :  { %8918 = vmatpush3.bf16.msra.mxu1 %v7304_v13  ;;  %7669 = vmatprep.subr.bf16.mxu0 %v7639_v31  ;;  %v7646_v13 = vld [vmem:[#allocation3 + $0x338] sm:$0xff] }
0x13cd   :  { %8919 = vmatprep.subr.bf16.mxu1 %v7309_v48 }
0x13cf   :  { %7670 = vmatpush1.bf16.msra.mxu0 %v7638_v10 }
0x13d0   :  { %8920 = vmatpush3.bf16.msra.mxu1 %v7309_v48  ;;  %7671 = vmatprep.subr.bf16.mxu0 %v7644_v17  ;;  %v7645_v48 = vld [vmem:[#allocation3 + $0x330] sm:$0xff] }
0x13d1   :  { %8921 = vmatprep.subr.bf16.mxu1 %v7314_v56 }
0x13d4   :  { %8922 = vmatpush3.bf16.msra.mxu1 %v7314_v56  ;;  %v7649_v56 = vld [vmem:[#allocation3 + $0x350] sm:$0xff] }
0x13d5   :  { %8923 = vmatprep.subr.bf16.mxu1 %v7319_v9 }
0x13d8   :  { %8924 = vmatpush3.bf16.msra.mxu1 %v7319_v9  ;;  %v7648_v9 = vld [vmem:[#allocation3 + $0x348] sm:$0xff] }
0x13d9   :  { %8925 = vmatprep.subr.bf16.mxu1 %v7324_v28 }
0x13dc   :  { %8926 = vmatpush3.bf16.msra.mxu1 %v7324_v28  ;;  %v7651_v28 = vld [vmem:[#allocation3 + $0x360] sm:$0xff] }
0x13dd   :  { %7714 = vmatprep.subr.bf16.mxu1 %v7626_v11  ;;  %v7656_v11 = vld [vmem:[#allocation3 + $0x388] sm:$0xff] }
0x13df   :  { %8928 = vmatmul.mubr.bf16.vlgmr.msra.gmra.mrb[4].mxu1 %v7284_v58  ;;  %v7643_v58 = vld [vmem:[#allocation3 + $0x320] sm:$0xff] }
0x13e0   :  { %7746 = vmatprep.mubr.bf16.mxu1 %v12475_v38  ;;  %7715 = vmatpush1.bf16.msra.mxu1 %v7625_v14  ;;  %v7653_v14 = vld [vmem:[#allocation3 + $0x370] sm:$0xff] }
0x13e1   :  { %7716 = vmatprep.subr.bf16.mxu1 %v7631_v51  ;;  %7672 = vmatpush1.bf16.msra.mxu0 %v7643_v58  ;;  %v7661_v51 = vld [vmem:[#allocation3 + $0x3b0] sm:$0xff] }
0x13e2   :  { %7673 = vmatprep.subr.bf16.mxu0 %v7649_v56 }
0x13e4   :  { %7717 = vmatpush1.bf16.msra.mxu1 %v7630_v36  ;;  %v7658_v36 = vld [vmem:[#allocation3 + $0x398] sm:$0xff] }
0x13e5   :  { %7718 = vmatprep.subr.bf16.mxu1 %v7636_v45  ;;  %7674 = vmatpush1.bf16.msra.mxu0 %v7648_v9 }
0x13e6   :  { %7675 = vmatprep.subr.bf16.mxu0 %v7654_v27 }
0x13e8   :  { %7719 = vmatpush1.bf16.msra.mxu1 %v7635_v47 }
0x13e9   :  { %7720 = vmatprep.subr.bf16.mxu1 %v7641_v60  ;;  %7676 = vmatpush1.bf16.msra.mxu0 %v7653_v14 }
0x13ea   :  { %7677 = vmatprep.subr.bf16.mxu0 %v7659_v26 }
0x13ec   :  { %7721 = vmatpush1.bf16.msra.mxu1 %v7640_v34 }
0x13ed   :  { %7722 = vmatprep.subr.bf16.mxu1 %v7646_v13  ;;  %7678 = vmatpush1.bf16.msra.mxu0 %v7658_v36  ;;  %v12585_v36 = vld [vmem:[#allocation122_spill] sm:$0xff] }
0x13ee   :  { %8931 = vmatprep.subr.bf16.mxu0 %v11999_v33 }
0x13f0   :  { %7723 = vmatpush1.bf16.msra.mxu1 %v7645_v48 }
0x13f1   :  { %7724 = vmatprep.subr.bf16.mxu1 %v7651_v28 }
0x13f4   :  { %7725 = vmatpush1.bf16.msra.mxu1 %v7650_v52 }
0x13f5   :  { %7726 = vmatprep.subr.bf16.mxu1 %v7656_v11 }
0x13f8   :  { %7727 = vmatpush1.bf16.msra.mxu1 %v7655_v55 }
0x13f9   :  { %7728 = vmatprep.subr.bf16.mxu1 %v7661_v51 }
0x13fc   :  { %7729 = vmatpush1.bf16.msra.mxu1 %v7660_v8 }
0x1492   :  { %v7359_v45 = vpop.f32.mrb[108].mxu0  ;;  %v7410_v47 = vpop.f32.mrb[108].mxu1 }
0x1493   :  { %v9003_v31 = vadd.f32 %v7359_v45, %v10622_v4  ;;  %v7361_v10 = vpop.f32.mrb[109].mxu0  ;;  %v7412_v60 = vpop.f32.mrb[109].mxu1  ;;  %v9039_v14 = vadd.f32 %v7410_v47, %v10624_v5 }
0x1494   :  { %v9004_v34 = vadd.f32 %v7361_v10, %v10626_v6  ;;  %v7363_v17 = vpop.f32.mrb[110].mxu0  ;;  %v7414_v58 = vpop.f32.mrb[110].mxu1  ;;  %v12586_v10 = vld [vmem:[#allocation124_spill] sm:$0xff] }
0x1495   :  { %v8348_v13 = vmul.f32 -1.442695, %v9003_v31  ;;  %v9005_v48 = vadd.f32 %v7363_v17, %v10622_v4  ;;  %v7365_v56 = vpop.f32.mrb[111].mxu0  ;;  %v7416_v9 = vpop.f32.mrb[111].mxu1  ;;  %v9041_v51 = vadd.f32 %v7414_v58, %v10624_v5  ;;  %v9040_v31 = vadd.f32 %v7412_v60, %v10628_v7 }
0x1496   :  { %v8349_v28 = vmul.f32 -1.442695, %v9004_v34  ;;  %v9006_v52 = vadd.f32 %v7365_v56, %v10626_v6  ;;  %v8350_v47 = vmul.f32 -1.442695, %v9039_v14  ;;  %v9042_v58 = vadd.f32 %v7416_v9, %v10628_v7 }
0x1497   :  { %10138 = vpow2.f32 %v8348_v13  ;;  %v8351_v27 = vmul.f32 -1.442695, %v9005_v48 }
0x1498   :  { %v8352_v11 = vmul.f32 -1.442695, %v9006_v52  ;;  %10140 = vpow2.f32 %v8349_v28  ;;  %v8353_v52 = vmul.f32 -1.442695, %v9041_v51 }
0x1499   :  { %10142 = vpow2.f32 %v8351_v27 }
0x149a   :  { %v7369_v55 = vpop.f32.mrb[4].mxu0  ;;  %v7420_v26 = vpop.f32.mrb[0].mxu1  ;;  %10144 = vpow2.f32 %v8352_v11 }
0x149b   :  { %v7545_v8 = vadd.f32 %v7369_v55, %v12585_v36  ;;  %v7371_v45 = vpop.f32.mrb[5].mxu0  ;;  %v7422_v4 = vpop.f32.mrb[1].mxu1 }
0x149c   :  { %v7546_v6 = vadd.f32 %v7371_v45, %v12586_v10  ;;  %v7373_v34 = vpop.f32.mrb[6].mxu0  ;;  %v7424_v17 = vpop.f32.mrb[2].mxu1 }
0x149d   :  { %v8354_v13 = vmul.f32 -1.442695, %v7545_v8  ;;  %v7374_v48 = vpop.f32.mrb[7].mxu0  ;;  %v7425_v56 = vpop.f32.mrb[3].mxu1  ;;  %v12587_v8 = vld [vmem:[#allocation123_spill] sm:$0xff] }
0x149e   :  { %v8355_v28 = vmul.f32 -1.442695, %v7546_v6  ;;  %v7547_v45 = vadd.f32 %v7420_v26, %v12587_v8 }
0x149f   :  { %10146 = vpow2.f32 %v8354_v13 }
0x14a0   :  { %10148 = vtanh.f32 %v9040_v31  ;;  %v12588_v31 = vld [vmem:[#allocation125_spill] sm:$0xff]  ;;  %v8356_v7 = vmul.f32 -1.442695, %v7547_v45 }
0x14a1   :  { %v10139_v5 = vpop.eup %10138  ;;  %10150 = vpow2.f32 %v8355_v28  ;;  %v7548_v10 = vadd.f32 %v7422_v4, %v12588_v31  ;;  %v8347_v4 = vld [vmem:[%s12337_s3 + $0x1] ss:$0 sm:$0xff] }
0x14a2   :  { %v7576_v27 = vadd.f32 1.0, %v10139_v5  ;;  %10152 = vpow2.f32 %v8350_v47  ;;  %v10141_v60 = vpop.eup %10140 }
0x14a3   :  { %10154 = vpow2.f32 %v8353_v52  ;;  %v10143_v11 = vpop.eup %10142  ;;  %v7577_v55 = vadd.f32 1.0, %v10141_v60 }
0x14a4   :  { %10156 = vrcp.f32 %v7576_v27  ;;  %v7579_v36 = vadd.f32 1.0, %v10143_v11  ;;  %v10145_v14 = vpop.eup %10144 }
0x14a5   :  { %10158 = vtanh.f32 %v9042_v58  ;;  %v7580_v51 = vadd.f32 1.0, %v10145_v14 }
0x14a6   :  { %10160 = vrcp.f32 %v7577_v55 }
0x14a7   :  { %10162 = vrcp.f32 %v7579_v36 }
0x14a8   :  { %10164 = vrcp.f32 %v7580_v51 }
0x14a9   :  { %v10147_v6 = vpop.eup %10146  ;;  %10166 = vtanh.f32 %v7548_v10 }
0x14aa   :  { %v10149_v9 = vpop.eup %10148  ;;  %v7582_v34 = vadd.f32 1.0, %v10147_v6 }
0x14ab   :  { %v10151_v17 = vpop.eup %10150 }
0x14ac   :  { %v10153_v13 = vpop.eup %10152  ;;  %10168 = vrcp.f32 %v7582_v34  ;;  %v7583_v48 = vadd.f32 1.0, %v10151_v17 }
0x14ad   :  { %v10155_v56 = vpop.eup %10154  ;;  %10170 = vpow2.f32 %v8356_v7  ;;  %v7578_v58 = vadd.f32 1.0, %v10153_v13 }
0x14ae   :  { %v10157_v47 = vpop.eup %10156  ;;  %10172 = vrcp.f32 %v7583_v48  ;;  %v7581_v8 = vadd.f32 1.0, %v10155_v56 }
0x14af   :  { %v10159_v26 = vpop.eup %10158  ;;  %v7609_v28 = vmul.f32 %v10157_v47, %v10149_v9  ;;  %10174 = vrcp.f32 %v7578_v58 }
0x14b0   :  { %v10161_v52 = vpop.eup %10160 }
0x14b1   :  { %v10163_v5 = vpop.eup %10162  ;;  %v7606_v27 = vmul.f32 %v10161_v52, %v11974_v35 }
0x14b2   :  { %v7610_v60 = vmul.f32 %v10163_v5, %v10159_v26  ;;  %v8929_v11 = vpop.f32.mrb[4].mxu1  ;;  %v10165_v55 = vpop.eup %10164 }
0x14b3   :  { %v12018_v36 = vadd.f32 %v7609_v28, %v7606_v27  ;;  %v12020_v45 = vadd.f32 %v8929_v11, %v8347_v4  ;;  %v7461_v14 = vpop.f32.mrb[5].mxu1  ;;  %v7607_v51 = vmul.f32 %v10165_v55, %v11981_v37  ;;  %v10167_v10 = vpop.eup %10166 }
0x14b4   :  { %v8930_v31 = vpop.f32.mrb[6].mxu1  ;;  %v12029_v13 = vadd.f32 %v8347_v4, %v7461_v14 }
0x14b5   :  { %v7464_v6 = vpop.f32.mrb[7].mxu1  ;;  %7489 = vmax.xlane.f32.xlu0 %v12020_v45  ;;  %10176 = vtanh.f32 %v12018_v36  ;;  %v12025_v35 = vadd.f32 %v7610_v60, %v7607_v51  ;;  %v7632_v60 = vld [vmem:[#allocation3 + $0x2c8] sm:$0xff]  ;;  %v7642_v51 = vld [vmem:[#allocation3 + $0x318] sm:$0xff]  ;;  %v7647_v31 = vld [vmem:[#allocation3 + $0x340] sm:$0xff] }
0x14b6   :  { %v10169_v7 = vpop.eup %10168  ;;  %v12027_v9 = vadd.f32 %v8347_v4, %v7464_v6  ;;  %10178 = vrcp.f32 %v7581_v8  ;;  %v7637_v8 = vld [vmem:[#allocation3 + $0x2f0] sm:$0xff]  ;;  %v7961_v6 = vld [vmem:[#allocation3 + $0x3e0] sm:$0xff] }
0x14b7   :  { %v10171_v34 = vpop.eup %10170  ;;  %v7611_v17 = vmul.f32 %v10169_v7, %v10167_v10  ;;  %10180 = vtanh.f32 %v12025_v35  ;;  %v7657_v10 = vld [vmem:[#allocation3 + $0x390] sm:$0xff]  ;;  %8951 = vmatprep.subr.bf16.mxu1 %v7961_v6  ;;  %v7962_v7 = vld [vmem:[#allocation3 + $0x408] sm:$0xff] }
0x14b8   :  { %v10173_v48 = vpop.eup %10172  ;;  %7487 = vmax.xlane.f32.xlu1 %v12027_v9  ;;  %v7584_v56 = vadd.f32 1.0, %v10171_v34  ;;  %v7963_v34 = vld [vmem:[#allocation3 + $0x430] sm:$0xff] }
0x14b9   :  { %v7608_v37 = vmul.f32 %v10173_v48, %v11991_v22  ;;  %7485 = vmax.xlane.f32.xlu0 %v12029_v13  ;;  %v10175_v26 = vpop.eup %10174  ;;  %v7965_v48 = vld [vmem:[#allocation3 + $0x480] sm:$0xff] }
0x14bb   :  { %v12035_v47 = vadd.f32 %v7611_v17, %v7608_v37  ;;  %v7964_v17 = vld [vmem:[#allocation3 + $0x458] sm:$0xff]  ;;  %v7966_v37 = vld [vmem:[#allocation3 + $0x4a8] sm:$0xff] }
0x14bd   :  { %10182 = vtanh.f32 %v12035_v47 }
0x14be   :  { %10184 = vrcp.f32 %v7584_v56  ;;  %v7967_v56 = vld [vmem:[#allocation3 + $0x4d0] sm:$0xff] }
0x14bf   :  { %v10177_v28 = vpop.eup %10176 }
0x14c0   :  { %v10179_v52 = vpop.eup %10178  ;;  %v7618_v5 = vmul.f32 %v10177_v28, %v10175_v26  ;;  %v7968_v26 = vld [vmem:[#allocation3 + $0x4f8] sm:$0xff] }
0x14c1   :  { %v10181_v4 = vpop.eup %10180 }
0x14c2   :  { %v7619_v58 = vmul.f32 %v10181_v4, %v10179_v52  ;;  %v12589_v4 = vld [vmem:[#allocation126_spill] sm:$0xff] }
0x14c4   :  { %v7621_v27 = vpack.c.bf16 %v7619_v58, %v7618_v5 }
0x14c6   :  { %7696 = vmatmul.mubr.bf16.vlgmr.msra.gmra.mrb[8].mxu0 %v7621_v27  ;;  %7747 = vmatmul.mubr.bf16.vlgmr.msra.gmra.mrb[8].mxu1 %v7621_v27 }
0x14c7   :  { %v10183_v11 = vpop.eup %10182  ;;  %8932 = vmatpush3.bf16.msra.mxu0 %v11999_v33  ;;  %7705 = vmatprep.mubr.bf16.mxu0 %v12475_v38  ;;  %v7652_v33 = vld [vmem:[#allocation3 + $0x368] sm:$0xff] }
0x14c8   :  { %v10185_v22 = vpop.eup %10184  ;;  %8933 = vmatprep.subr.bf16.mxu0 %v7632_v60  ;;  %7756 = vmatprep.mubr.bf16.mxu1 %v12475_v38  ;;  %v7662_v38 = vld [vmem:[#allocation3 + $0x3b8] sm:$0xff] }
0x14c9   :  { %v7620_v55 = vmul.f32 %v10185_v22, %v10183_v11  ;;  %8952 = vmatpush3.bf16.msra.mxu1 %v7961_v6 }
0x14ca   :  { %8953 = vmatprep.subr.bf16.mxu1 %v7962_v7 }
0x14cb   :  { %8934 = vmatpush3.bf16.msra.mxu0 %v7632_v60  ;;  %v7622_v14 = vpack.c.bf16 %v7620_v55, %v7620_v55  ;;  %v12590_v60 = vld [vmem:[#allocation128_spill] sm:$0xff] }
0x14cc   :  { %8935 = vmatprep.subr.bf16.mxu0 %v7637_v8 }
0x14cd   :  { %8954 = vmatpush3.bf16.msra.mxu1 %v7962_v7 }
0x14ce   :  { %7706 = vmatmul.mubr.bf16.gmra.mrb[16].mxu0 %v7622_v14  ;;  %7757 = vmatmul.mubr.bf16.gmra.mrb[16].mxu1 %v7622_v14 }
0x14cf   :  { %8936 = vmatpush3.bf16.msra.mxu0 %v7637_v8  ;;  %8947 = vmatprep.mubr.bf16.mxu0 %v7621_v27 }
0x14d0   :  { %8937 = vmatprep.subr.bf16.mxu0 %v7642_v51  ;;  %8955 = vmatprep.subr.bf16.mxu1 %v7963_v34 }
0x14d1   :  { %8956 = vmatpush3.bf16.msra.mxu1 %v7963_v34 }
0x14d2   :  { %8957 = vmatprep.subr.bf16.mxu1 %v7964_v17 }
0x14d3   :  { %8938 = vmatpush3.bf16.msra.mxu0 %v7642_v51 }
0x14d4   :  { %8939 = vmatprep.subr.bf16.mxu0 %v7647_v31 }
0x14d5   :  { %8958 = vmatpush3.bf16.msra.mxu1 %v7964_v17  ;;  %v12593_v17 = vld [vmem:[#allocation127_spill] sm:$0xff] }
0x14d6   :  { %8959 = vmatprep.subr.bf16.mxu1 %v7965_v48 }
0x14d7   :  { %8940 = vmatpush3.bf16.msra.mxu0 %v7647_v31 }
0x14d8   :  { %8941 = vmatprep.subr.bf16.mxu0 %v7652_v33 }
0x14d9   :  { %8960 = vmatpush3.bf16.msra.mxu1 %v7965_v48 }
0x14da   :  { %8961 = vmatprep.subr.bf16.mxu1 %v7966_v37 }
0x14db   :  { %8942 = vmatpush3.bf16.msra.mxu0 %v7652_v33 }
0x14dc   :  { %8943 = vmatprep.subr.bf16.mxu0 %v7657_v10 }
0x14dd   :  { %8962 = vmatpush3.bf16.msra.mxu1 %v7966_v37 }
0x14de   :  { %8963 = vmatprep.subr.bf16.mxu1 %v7967_v56 }
0x14df   :  { %8944 = vmatpush3.bf16.msra.mxu0 %v7657_v10 }
0x14e0   :  { %8945 = vmatprep.subr.bf16.mxu0 %v7662_v38 }
0x14e1   :  { %8964 = vmatpush3.bf16.msra.mxu1 %v7967_v56 }
0x14e2   :  { %8965 = vmatprep.subr.bf16.mxu1 %v7968_v26 }
0x14e3   :  { %8946 = vmatpush3.bf16.msra.mxu0 %v7662_v38  ;;  %v12592_v38 = vld [vmem:[#allocation132_spill] sm:$0xff] }
0x14e5   :  { %8966 = vmatpush3.bf16.msra.mxu1 %v7968_v26  ;;  %v12594_v26 = vld [vmem:[#allocation131_spill] sm:$0xff] }
0x14e6   :  { %8948 = vmatmul.mubr.bf16.vlgmr.msra.gmra.mrb[20].mxu0 %v7622_v14  ;;  %v12591_v14 = vld [vmem:[#allocation130_spill] sm:$0xff] }
0x1599   :  { %v7697_v28 = vpop.f32.mrb[8].mxu0  ;;  %v7748_v52 = vpop.f32.mrb[8].mxu1 }
0x159a   :  { %v7875_v5 = vadd.f32 %v7697_v28, %v12589_v4  ;;  %v7699_v58 = vpop.f32.mrb[9].mxu0  ;;  %v7750_v27 = vpop.f32.mrb[9].mxu1  ;;  %v7877_v48 = vadd.f32 %v7748_v52, %v12593_v17  ;;  %v12595_v4 = vld [vmem:[#allocation134_spill] sm:$0xff] }
0x159b   :  { %v7876_v11 = vadd.f32 %v7699_v58, %v12590_v60  ;;  %v7701_v22 = vpop.f32.mrb[10].mxu0  ;;  %v7752_v55 = vpop.f32.mrb[10].mxu1 }
0x159c   :  { %v8359_v8 = vmul.f32 -1.442695, %v7875_v5  ;;  %v7879_v51 = vadd.f32 %v7701_v22, %v12591_v14  ;;  %v7703_v31 = vpop.f32.mrb[11].mxu0  ;;  %v7754_v33 = vpop.f32.mrb[11].mxu1  ;;  %v7881_v28 = vadd.f32 %v7752_v55, %v12594_v26  ;;  %v12596_v22 = vld [vmem:[#allocation129_spill] sm:$0xff] }
0x159d   :  { %v8360_v10 = vmul.f32 -1.442695, %v7876_v11  ;;  %v7880_v6 = vadd.f32 %v7703_v31, %v12592_v38  ;;  %v7878_v14 = vadd.f32 %v7750_v27, %v12596_v22  ;;  %v12597_v11 = vld [vmem:[#allocation136_spill] sm:$0xff]  ;;  %v8361_v52 = vmul.f32 -1.442695, %v7877_v48  ;;  %v12598_v26 = vld [vmem:[#allocation133_spill] sm:$0xff] }
0x159e   :  { %10186 = vpow2.f32 %v8359_v8  ;;  %v8362_v7 = vmul.f32 -1.442695, %v7879_v51  ;;  %v8364_v17 = vmul.f32 -1.442695, %v7881_v28  ;;  %v12600_v28 = vld [vmem:[#allocation137_spill] sm:$0xff] }
0x159f   :  { %v8363_v34 = vmul.f32 -1.442695, %v7880_v6  ;;  %10188 = vpow2.f32 %v8360_v10 }
0x15a0   :  { %10190 = vpow2.f32 %v8362_v7 }
0x15a1   :  { %v7707_v37 = vpop.f32.mrb[16].mxu0  ;;  %v7758_v56 = vpop.f32.mrb[16].mxu1  ;;  %10192 = vpow2.f32 %v8363_v34  ;;  %v12599_v34 = vld [vmem:[#allocation135_spill] sm:$0xff] }
0x15a2   :  { %v7883_v5 = vadd.f32 %v7707_v37, %v12595_v4  ;;  %v7709_v58 = vpop.f32.mrb[17].mxu0  ;;  %v7760_v60 = vpop.f32.mrb[17].mxu1  ;;  %v7882_v37 = vadd.f32 %v7754_v33, %v12598_v26 }
0x15a3   :  { %v7884_v31 = vadd.f32 %v7709_v58, %v12597_v11  ;;  %v7711_v8 = vpop.f32.mrb[18].mxu0  ;;  %v7762_v51 = vpop.f32.mrb[18].mxu1  ;;  %v7885_v58 = vadd.f32 %v7758_v56, %v12599_v34 }
0x15a4   :  { %v8365_v38 = vmul.f32 -1.442695, %v7883_v5  ;;  %v7712_v10 = vpop.f32.mrb[19].mxu0  ;;  %v7763_v6 = vpop.f32.mrb[19].mxu1 }
0x15a5   :  { %v8366_v7 = vmul.f32 -1.442695, %v7884_v31  ;;  %v7886_v31 = vadd.f32 %v7760_v60, %v12600_v28  ;;  %v8367_v8 = vmul.f32 -1.442695, %v7885_v58 }
0x15a6   :  { %10194 = vpow2.f32 %v8365_v38 }
0x15a7   :  { %10196 = vtanh.f32 %v7878_v14 }
0x15a8   :  { %v10187_v55 = vpop.eup %10186  ;;  %10198 = vpow2.f32 %v8366_v7 }
0x15a9   :  { %v7914_v4 = vadd.f32 1.0, %v10187_v55  ;;  %10200 = vpow2.f32 %v8361_v52  ;;  %v10189_v27 = vpop.eup %10188 }
0x15aa   :  { %10202 = vpow2.f32 %v8364_v17  ;;  %v10191_v22 = vpop.eup %10190  ;;  %v7915_v5 = vadd.f32 1.0, %v10189_v27 }
0x15ab   :  { %10204 = vrcp.f32 %v7914_v4  ;;  %v7917_v11 = vadd.f32 1.0, %v10191_v22  ;;  %v10193_v48 = vpop.eup %10192 }
0x15ac   :  { %10206 = vtanh.f32 %v7882_v37  ;;  %v7918_v14 = vadd.f32 1.0, %v10193_v48  ;;  %v8358_v37 = vld [vmem:[%s12337_s3 + $0x2] ss:$0 sm:$0xff] }
0x15ad   :  { %10208 = vrcp.f32 %v7915_v5 }
0x15ae   :  { %10210 = vrcp.f32 %v7917_v11 }
0x15af   :  { %10212 = vrcp.f32 %v7918_v14 }
0x15b0   :  { %v10195_v33 = vpop.eup %10194  ;;  %10214 = vtanh.f32 %v7886_v31 }
0x15b1   :  { %v10197_v51 = vpop.eup %10196  ;;  %v7920_v38 = vadd.f32 1.0, %v10195_v33  ;;  %10216 = vpow2.f32 %v8367_v8 }
0x15b2   :  { %v10199_v10 = vpop.eup %10198 }
0x15b3   :  { %v10201_v56 = vpop.eup %10200  ;;  %10218 = vrcp.f32 %v7920_v38  ;;  %v7921_v6 = vadd.f32 1.0, %v10199_v10 }
0x15b4   :  { %v10203_v52 = vpop.eup %10202  ;;  %v7916_v60 = vadd.f32 1.0, %v10201_v56 }
0x15b5   :  { %v10205_v7 = vpop.eup %10204  ;;  %10220 = vrcp.f32 %v7921_v6  ;;  %v7919_v11 = vadd.f32 1.0, %v10203_v52 }
0x15b6   :  { %v10207_v17 = vpop.eup %10206  ;;  %v7947_v55 = vmul.f32 %v10205_v7, %v10197_v51  ;;  %10222 = vrcp.f32 %v7916_v60 }
0x15b7   :  { %v10209_v26 = vpop.eup %10208 }
0x15b8   :  { %v10211_v4 = vpop.eup %10210  ;;  %v7944_v27 = vmul.f32 %v10209_v26, %v12018_v36 }
0x15b9   :  { %v7948_v34 = vmul.f32 %v10211_v4, %v10207_v17  ;;  %v8949_v58 = vpop.f32.mrb[20].mxu0  ;;  %v10213_v22 = vpop.eup %10212 }
0x15ba   :  { %v7950_v5 = vadd.f32 %v7947_v55, %v7944_v27  ;;  %v12057_v48 = vadd.f32 %v8949_v58, %v8358_v37  ;;  %v7799_v28 = vpop.f32.mrb[21].mxu0  ;;  %v10215_v31 = vpop.eup %10214  ;;  %v7945_v14 = vmul.f32 %v10213_v22, %v12025_v35 }
0x15bb   :  { %v8950_v8 = vpop.f32.mrb[22].mxu0  ;;  %v10217_v33 = vpop.eup %10216  ;;  %v12063_v6 = vadd.f32 %v8358_v37, %v7799_v28 }
0x15bc   :  { %10224 = vtanh.f32 %v7950_v5  ;;  %v7802_v51 = vpop.f32.mrb[23].mxu0  ;;  %7827 = vmax.xlane.f32.xlu1 %v12057_v48  ;;  %v7951_v36 = vadd.f32 %v7948_v34, %v7945_v14  ;;  %v7922_v7 = vadd.f32 1.0, %v10217_v33  ;;  %v3772_v28 = vpop.xlane.xlu1 %3771 }
0x15bd   :  { %v10219_v38 = vpop.eup %10218  ;;  %v12061_v10 = vadd.f32 %v8358_v37, %v7802_v51  ;;  %10226 = vrcp.f32 %v7919_v11 }
0x15be   :  { %v7949_v56 = vmul.f32 %v10219_v38, %v10215_v31  ;;  %10228 = vtanh.f32 %v7951_v36  ;;  %v3437_v36 = vsub.f32 %v11480_v57, %v11506_v49 }
0x15bf   :  { %v10221_v52 = vpop.eup %10220  ;;  %7825 = vmax.xlane.f32.xlu0 %v12061_v10  ;;  %10230 = vrcp.f32 %v7922_v7 }
0x15c0   :  { %v7946_v35 = vmul.f32 %v10221_v52, %v12035_v47  ;;  %7823 = vmax.xlane.f32.xlu1 %v12063_v6  ;;  %v10223_v55 = vpop.eup %10222  ;;  %v3770_v47 = vpop.xlane.xlu0 %3769  ;;  %v3442_v7 = vmul.f32 1.442695, %v3437_v36 }
0x15c1   :  { %v3768_v14 = vpop.xlane.xlu1 %3767 }
0x15c2   :  { %v7952_v17 = vadd.f32 %v7949_v56, %v7946_v35  ;;  %v3436_v56 = vsub.f32 %v11487_v43, %v11555_v3  ;;  %v3774_v35 = vsub.f32 %v11540_v2, %v3770_v47  ;;  %v3775_v43 = vsub.f32 %v11533_v54, %v3772_v28 }
0x15c4   :  { %10232 = vtanh.f32 %v7952_v17  ;;  %v4110_v31 = vpop.xlane.xlu0 %4109 }
0x15c5   :  { %v4108_v8 = vpop.xlane.xlu1 %4107  ;;  %10234 = vpow2.f32 %v3442_v7 }
0x15c6   :  { %v10225_v26 = vpop.eup %10224  ;;  %v4112_v54 = vsub.f32 %v11587_v63, %v4108_v8 }
0x15c7   :  { %v7956_v60 = vmul.f32 %v10225_v26, %v10223_v55  ;;  %v10227_v4 = vpop.eup %10226  ;;  %v3440_v55 = vmul.f32 1.442695, %v3436_v56  ;;  %v3773_v26 = vsub.f32 %v11542_v0, %v3768_v14 }
0x15c8   :  { %v10229_v27 = vpop.eup %10228  ;;  %v4106_v33 = vpop.xlane.xlu0 %4105 }
0x15c9   :  { %v7957_v34 = vmul.f32 %v10229_v27, %v10227_v4  ;;  %v10231_v58 = vpop.eup %10230  ;;  %v12068_v51 = vpop.xlane.xlu1 %4447  ;;  %v3778_v4 = vmul.f32 1.442695, %v3774_v35  ;;  %v4111_v57 = vsub.f32 %v11589_v1, %v4106_v33  ;;  %10236 = vpow2.f32 %v3440_v55 }
0x15ca   :  { %v3776_v3 = vmul.f32 1.442695, %v3773_v26  ;;  %v3780_v1 = vmul.f32 1.442695, %v3775_v43 }
0x15cb   :  { %v7959_v37 = vpack.c.bf16 %v7957_v34, %v7956_v60  ;;  %v8369_v60 = vld [vmem:[%s12337_s3 + $0x3] ss:$0 sm:$0xff]  ;;  %10238 = vpow2.f32 %v3778_v4  ;;  %s10499_s3 = smov [#allocation10]  }
0x15cc   :  { %v4446_v38 = vpop.xlane.xlu0 %4445  ;;  %10240 = vpow2.f32 %v3776_v3  ;;  %s8072_s19 = sshll.u32 %s10499_s3, 4  ;;  %s8073_s19 = int_to_ptr.vmem [resolvable:$true] %s8072_s19 }
0x15cd   :  { %8967 = vmatprep.mubr.bf16.mxu1 %v7959_v37  ;;  %v4444_v17 = vpop.xlane.xlu1 %4443  ;;  %s10454_s20 = scalar_lea.vmem %s8073_s19, 7680  ;;  %p10459_p3 = scmp.lt.s32.totalorder %s8073_s19, %s8073_s19 }
0x15ce   :  { %v10233_v22 = vpop.eup %10232  ;;  %v4449_v36 = vsub.f32 %v11633_v12, %v4444_v17  ;;  %p10455_p2 = scmp.ne.s32.totalorder %s8073_s19, %s10454_s20  ;;  %p10460_p4 = scmp.lt.s32.totalorder %s10454_s20, %s10454_s20 }
0x15cf   :  { %v7958_v5 = vmul.f32 %v10233_v22, %v10231_v58  ;;  %v4113_v58 = vsub.f32 %v11580_v53, %v4110_v31  ;;  %v4114_v22 = vmul.f32 1.442695, %v4111_v57  ;;  %v4450_v53 = vsub.f32 %v11631_v32, %v4446_v38  ;;  %v12102_v63 = vpop.eup %10234 }
0x15d0   :  { %v12074_v52 = vpop.xlane.xlu0 %4785  ;;  %v4116_v31 = vmul.f32 1.442695, %v4112_v54  ;;  %v4451_v32 = vsub.f32 %v11624_v19, %v12068_v51  ;;  %v4452_v12 = vmul.f32 1.442695, %v4449_v36  ;;  %p10461_p5 = por %p10460_p4, %p10459_p3 }
0x15d1   :  { %v7960_v11 = vpack.c.bf16 %v7958_v5, %v7958_v5  ;;  %v12082_v49 = vpop.xlane.xlu1 %4783  ;;  %v4118_v33 = vmul.f32 1.442695, %v4113_v58  ;;  %10242 = vpow2.f32 %v4114_v22  ;;  %v4454_v35 = vmul.f32 1.442695, %v4450_v53 }
0x15d2   :  { %10244 = vpow2.f32 %v3780_v1  ;;  %v4789_v4 = vsub.f32 %v11668_v15, %v12074_v52  ;;  %v4456_v57 = vmul.f32 1.442695, %v4451_v32  ;;  %v4788_v19 = vsub.f32 %v11675_v21, %v12082_v49  ;;  %p10462_p6 = pnand %p10461_p5, %p10455_p2 }
0x15d3   :  { %8968 = vmatmul.mubr.bf16.vlgmr.msra.gmra.mrb[20].mxu1 %v7960_v11  ;;  %v12104_v7 = vpop.eup %10236  ;;  %10246 = vpow2.f32 %v4118_v33 }
0x15d4   :  { %v4782_v27 = vpop.xlane.xlu0 %4781  ;;  %10248 = vpow2.f32 %v4116_v31  ;;  %v4792_v52 = vmul.f32 1.442695, %v4788_v19 }
0x15d5   :  { %v12088_v5 = vpop.xlane.xlu1 %5123  ;;  %v4787_v55 = vsub.f32 %v11677_v46, %v4782_v27  ;;  %v12111_v38 = vpop.eup %10238  ;;  %10250 = vpow2.f32 %v4454_v35 }
0x15d6   :  { %v12113_v26 = vpop.eup %10240  ;;  %10252 = vpow2.f32 %v4452_v12 }
0x15d7   :  { %v4790_v46 = vmul.f32 1.442695, %v4787_v55 }
0x15d8   :  { %v5122_v28 = vpop.xlane.xlu0 %5121 }
0x15d9   :  { %v5120_v8 = vpop.xlane.xlu1 %5119  ;;  %10254 = vpow2.f32 %v4790_v46  ;;  %v5126_v15 = vsub.f32 %v11719_v50, %v5122_v28  ;;  %v5127_v50 = vsub.f32 %v11712_v30, %v12088_v5 }
0x15da   :  { %10256 = vpow2.f32 %v4456_v57 }
0x15db   :  { %v12121_v51 = vpop.eup %10242  ;;  %v5130_v58 = vmul.f32 1.442695, %v5126_v15  ;;  %v5132_v53 = vmul.f32 1.442695, %v5127_v50 }
0x15dc   :  { %v12100_v56 = vpop.xlane.xlu0 %5461  ;;  %v12125_v3 = vpop.eup %10244 }
0x15dd   :  { %v5460_v17 = vpop.xlane.xlu1 %5459  ;;  %v12131_v21 = vpop.eup %10246  ;;  %v5465_v28 = vsub.f32 %v11756_v62, %v12100_v56 }
0x15de   :  { %v12133_v49 = vpop.eup %10248  ;;  %v5464_v31 = vsub.f32 %v11763_v59, %v5460_v17 }
0x15e0   :  { %v5468_v56 = vmul.f32 1.442695, %v5464_v31 }
0x15e1   :  { %v12123_v43 = vpop.xlane.xlu1 %5799 }
0x16a6   :  { %v8969_v2 = vpop.f32.mrb[20].mxu1 }
0x16a7   :  { %v12085_v34 = vadd.f32 %v8969_v2, %v8369_v60  ;;  %v8003_v37 = vpop.f32.mrb[21].mxu1  ;;  %v4794_v2 = vmul.f32 1.442695, %v4789_v4 }
0x16a8   :  { %v8970_v0 = vpop.f32.mrb[22].mxu1  ;;  %v12094_v14 = vadd.f32 %v8369_v60, %v8003_v37  ;;  %v5125_v37 = vsub.f32 %v11721_v23, %v5120_v8  ;;  %v12140_v23 = vpop.eup %10250  ;;  %v5470_v8 = vmul.f32 1.442695, %v5465_v28 }
0x16a9   :  { %v8006_v11 = vpop.f32.mrb[23].mxu1  ;;  %8031 = vmax.xlane.f32.xlu0 %v12085_v34  ;;  %10258 = vpow2.f32 %v4794_v2  ;;  %v12142_v54 = vpop.eup %10252 }
0x16aa   :  { %v12092_v47 = vadd.f32 %v8369_v60, %v8006_v11  ;;  %v5458_v60 = vpop.xlane.xlu0 %5457  ;;  %v5796_v11 = vpop.xlane.xlu1 %5795  ;;  %10260 = vpow2.f32 %v4792_v52  ;;  %v5128_v1 = vmul.f32 1.442695, %v5125_v37 }
0x16ab   :  { %v5463_v22 = vsub.f32 %v11765_v41, %v5458_v60  ;;  %10262 = vpow2.f32 %v5130_v58  ;;  %v12149_v5 = vpop.eup %10254  ;;  %v5801_v55 = vsub.f32 %v11809_v40, %v5796_v11 }
0x16ac   :  { %8029 = vmax.xlane.f32.xlu1 %v12092_v47  ;;  %10264 = vpow2.f32 %v5128_v1  ;;  %v12151_v36 = vpop.eup %10256 }
0x16ad   :  { %8027 = vmax.xlane.f32.xlu0 %v12094_v14  ;;  %v5466_v33 = vmul.f32 1.442695, %v5463_v22  ;;  %v5804_v4 = vmul.f32 1.442695, %v5801_v55 }
0x16ae   :  { %v5798_v27 = vpop.xlane.xlu0 %5797  ;;  %v6136_v41 = vpop.xlane.xlu1 %6135 }
0x16af   :  { %10266 = vpow2.f32 %v5466_v33  ;;  %v5802_v35 = vsub.f32 %v11807_v16, %v5798_v27  ;;  %v5803_v16 = vsub.f32 %v11800_v24, %v12123_v43  ;;  %v6140_v15 = vsub.f32 %v11851_v44, %v6136_v41  ;;  %v12601_v33 = vld [vmem:[#allocation22_spill] sm:$0xff] }
0x16b0   :  { %3448 = vadd.xlane.f32.xlu1 %v12102_v63  ;;  %10268 = vpow2.f32 %v5132_v53 }
0x16b1   :  { %3446 = vadd.xlane.f32.xlu0 %v12104_v7  ;;  %10270 = vpow2.f32 %v5470_v8  ;;  %v5806_v17 = vmul.f32 1.442695, %v5802_v35  ;;  %v12603_v35 = vld [vmem:[#allocation17_spill] sm:$0xff] }
0x16b2   :  { %v6138_v0 = vpop.xlane.xlu0 %6137  ;;  %v6476_v62 = vpop.xlane.xlu1 %6475  ;;  %10272 = vpow2.f32 %v5468_v56 }
0x16b3   :  { %v12157_v59 = vpop.eup %10258  ;;  %10274 = vpow2.f32 %v5806_v17  ;;  %v6141_v27 = vsub.f32 %v11844_v39, %v6138_v0  ;;  %v6144_v39 = vmul.f32 1.442695, %v6140_v15 }
0x16b4   :  { %3784 = vadd.xlane.f32.xlu1 %v12111_v38  ;;  %v12159_v12 = vpop.eup %10260  ;;  %10276 = vpow2.f32 %v5804_v4 }
0x16b5   :  { %3782 = vadd.xlane.f32.xlu0 %v12113_v26  ;;  %v12166_v40 = vpop.eup %10262  ;;  %v6146_v58 = vmul.f32 1.442695, %v6141_v27 }
0x16b6   :  { %v6134_v30 = vpop.xlane.xlu0 %6133  ;;  %v6472_v57 = vpop.xlane.xlu1 %6471 }
0x16b7   :  { %v6139_v60 = vsub.f32 %v11853_v18, %v6134_v30  ;;  %v12168_v19 = vpop.eup %10264  ;;  %v5808_v18 = vmul.f32 1.442695, %v5803_v16  ;;  %v6477_v0 = vsub.f32 %v11897_v42, %v6472_v57 }
0x16b8   :  { %4120 = vadd.xlane.f32.xlu1 %v12121_v51 }
0x16b9   :  { %3786 = vadd.xlane.f32.xlu0 %v12125_v3  ;;  %v6142_v2 = vmul.f32 1.442695, %v6139_v60  ;;  %v12174_v24 = vpop.eup %10266  ;;  %v6480_v31 = vmul.f32 1.442695, %v6477_v0  ;;  %v12604_v60 = vld [vmem:[#allocation19_spill] sm:$0xff] }
0x16ba   :  { %v6474_v32 = vpop.xlane.xlu0 %6473  ;;  %v6812_v43 = vpop.xlane.xlu1 %6811 }
0x16bb   :  { %v12176_v52 = vpop.eup %10268  ;;  %10278 = vpow2.f32 %v6142_v2  ;;  %v6478_v22 = vsub.f32 %v11895_v20, %v6474_v32  ;;  %v12602_v20 = vld [vmem:[#allocation20_spill] sm:$0xff]  ;;  %v6816_v16 = vsub.f32 %v12604_v60, %v6812_v43 }
0x16bc   :  { %4124 = vadd.xlane.f32.xlu1 %v12131_v21  ;;  %10280 = vpow2.f32 %v5808_v18  ;;  %v12182_v11 = vpop.eup %10270  ;;  %v6479_v53 = vsub.f32 %v12602_v20, %v6476_v62 }
0x16bd   :  { %4122 = vadd.xlane.f32.xlu0 %v12133_v49  ;;  %v12184_v50 = vpop.eup %10272  ;;  %10282 = vpow2.f32 %v6146_v58  ;;  %v6482_v28 = vmul.f32 1.442695, %v6478_v22 }
0x16be   :  { %v6814_v46 = vpop.xlane.xlu0 %6813  ;;  %v7152_v44 = vpop.xlane.xlu1 %7151  ;;  %10284 = vpow2.f32 %v6144_v39  ;;  %v6484_v17 = vmul.f32 1.442695, %v6479_v53 }
0x16bf   :  { %v12190_v30 = vpop.eup %10274  ;;  %10286 = vpow2.f32 %v6482_v28  ;;  %v6817_v56 = vsub.f32 %v12603_v35, %v6814_v46  ;;  %v6820_v46 = vmul.f32 1.442695, %v6816_v16 }
0x16c0   :  { %4460 = vadd.xlane.f32.xlu1 %v12140_v23  ;;  %v12192_v42 = vpop.eup %10276  ;;  %10288 = vpow2.f32 %v6480_v31 }
0x16c1   :  { %4458 = vadd.xlane.f32.xlu0 %v12142_v54  ;;  %v6822_v57 = vmul.f32 1.442695, %v6817_v56 }
0x16c2   :  { %v6810_v37 = vpop.xlane.xlu0 %6809  ;;  %v7148_v32 = vpop.xlane.xlu1 %7147 }
0x16c3   :  { %v6815_v41 = vsub.f32 %v12601_v33, %v6810_v37  ;;  %v7153_v18 = vsub.f32 %v11985_v25, %v7148_v32 }
0x16c4   :  { %4796 = vadd.xlane.f32.xlu1 %v12149_v5 }
0x16c5   :  { %4462 = vadd.xlane.f32.xlu0 %v12151_v36  ;;  %v6818_v55 = vmul.f32 1.442695, %v6815_v41  ;;  %v12198_v62 = vpop.eup %10278  ;;  %v7156_v0 = vmul.f32 1.442695, %v7153_v18 }
0x16c6   :  { %v7150_v1 = vpop.xlane.xlu0 %7149  ;;  %v12200_v4 = vpop.eup %10280 }
0x16c7   :  { %10290 = vpow2.f32 %v6818_v55  ;;  %v7154_v27 = vsub.f32 %v11983_v29, %v7150_v1  ;;  %v7488_v2 = vpop.xlane.xlu1 %7487  ;;  %v12206_v37 = vpop.eup %10282  ;;  %v7155_v29 = vsub.f32 %v11976_v61, %v7152_v44 }
0x16c8   :  { %4800 = vadd.xlane.f32.xlu1 %v12157_v59  ;;  %10292 = vpow2.f32 %v6484_v17  ;;  %v12208_v43 = vpop.eup %10284  ;;  %v7492_v41 = vsub.f32 %v12027_v9, %v7488_v2 }
0x16c9   :  { %4798 = vadd.xlane.f32.xlu0 %v12159_v12  ;;  %10294 = vpow2.f32 %v6822_v57  ;;  %v7158_v58 = vmul.f32 1.442695, %v7154_v27  ;;  %v12214_v1 = vpop.eup %10286 }
0x16ca   :  { %v7490_v8 = vpop.xlane.xlu0 %7489  ;;  %10296 = vpow2.f32 %v6820_v46  ;;  %v12216_v25 = vpop.eup %10288 }
0x16cb   :  { %v7828_v39 = vpop.xlane.xlu1 %7827  ;;  %10298 = vpow2.f32 %v7158_v58  ;;  %v7493_v28 = vsub.f32 %v12020_v45, %v7490_v8  ;;  %v7496_v45 = vmul.f32 1.442695, %v7492_v41 }
0x16cc   :  { %5136 = vadd.xlane.f32.xlu1 %v12166_v40  ;;  %10300 = vpow2.f32 %v7156_v0  ;;  %v7831_v32 = vsub.f32 %v12057_v48, %v7828_v39 }
0x16cd   :  { %5134 = vadd.xlane.f32.xlu0 %v12168_v19  ;;  %v7498_v31 = vmul.f32 1.442695, %v7493_v28 }
0x16ce   :  { %v7486_v15 = vpop.xlane.xlu0 %7485 }
0x16cf   :  { %v7491_v22 = vsub.f32 %v12029_v13, %v7486_v15  ;;  %v7160_v13 = vmul.f32 1.442695, %v7155_v29  ;;  %v7824_v61 = vpop.xlane.xlu1 %7823 }
0x16d0   :  { %5472 = vadd.xlane.f32.xlu1 %v12174_v24  ;;  %v7829_v8 = vsub.f32 %v12063_v6, %v7824_v61  ;;  %v7836_v6 = vmul.f32 1.442695, %v7831_v32 }
0x16d1   :  { %5138 = vadd.xlane.f32.xlu0 %v12176_v52  ;;  %v7494_v33 = vmul.f32 1.442695, %v7491_v22  ;;  %v12222_v53 = vpop.eup %10290 }
0x16d2   :  { %v7826_v20 = vpop.xlane.xlu0 %7825  ;;  %v12224_v44 = vpop.eup %10292 }
0x16d3   :  { %10302 = vpow2.f32 %v7494_v33  ;;  %v7830_v35 = vsub.f32 %v12061_v10, %v7826_v20  ;;  %v12230_v56 = vpop.eup %10294  ;;  %v7832_v10 = vmul.f32 1.442695, %v7829_v8 }
0x16d4   :  { %5476 = vadd.xlane.f32.xlu1 %v12182_v11  ;;  %10304 = vpow2.f32 %v7160_v13  ;;  %v12232_v9 = vpop.eup %10296 }
0x16d5   :  { %5474 = vadd.xlane.f32.xlu0 %v12184_v50  ;;  %10306 = vpow2.f32 %v7498_v31  ;;  %v7834_v55 = vmul.f32 1.442695, %v7830_v35  ;;  %v12237_v17 = vpop.eup %10298 }
0x16d6   :  { %10308 = vpow2.f32 %v7496_v45  ;;  %v12239_v60 = vpop.eup %10300 }
0x16d7   :  { %10310 = vpow2.f32 %v7834_v55 }
0x16d8   :  { %5812 = vadd.xlane.f32.xlu1 %v12190_v30  ;;  %10312 = vpow2.f32 %v7832_v10 }
0x16d9   :  { %5810 = vadd.xlane.f32.xlu0 %v12192_v42  ;;  %10314 = vpow2.f32 %v7836_v6 }
0x16dc   :  { %6148 = vadd.xlane.f32.xlu1 %v12198_v62 }
0x16dd   :  { %5814 = vadd.xlane.f32.xlu0 %v12200_v4  ;;  %v12243_v16 = vpop.eup %10302 }
0x16de   :  { %v12245_v57 = vpop.eup %10304 }
0x16df   :  { %12605 = vst [vmem:[#allocation18_spill] sm:$0xff] %v12245_v57  ;;  %v12249_v48 = vpop.eup %10306 }
0x16e0   :  { %6152 = vadd.xlane.f32.xlu1 %v12206_v37  ;;  %12606 = vst [vmem:[#allocation24_spill] sm:$0xff] %v12249_v48  ;;  %v12251_v27 = vpop.eup %10308 }
0x16e1   :  { %6150 = vadd.xlane.f32.xlu0 %v12208_v43  ;;  %12607 = vst [vmem:[#allocation21_spill] sm:$0xff] %v12251_v27  ;;  %v12255_v2 = vpop.eup %10310 }
0x16e2   :  { %12608 = vst [vmem:[#allocation23_spill] sm:$0xff] %v12255_v2  ;;  %v12257_v46 = vpop.eup %10312 }
0x16e3   :  { %12609 = vst [vmem:[#allocation25_spill] sm:$0xff] %v12257_v46  ;;  %v12261_v18 = vpop.eup %10314 }
0x16e4   :  { %6488 = vadd.xlane.f32.xlu1 %v12214_v1  ;;  %12610 = vst [vmem:[#allocation26_spill] sm:$0xff] %v12261_v18 }
0x16e5   :  { %6486 = vadd.xlane.f32.xlu0 %v12216_v25 }
0x16e8   :  { %6824 = vadd.xlane.f32.xlu1 %v12222_v53 }
0x16e9   :  { %6490 = vadd.xlane.f32.xlu0 %v12224_v44 }
0x16ec   :  { %6828 = vadd.xlane.f32.xlu1 %v12230_v56 }
0x16ed   :  { %6826 = vadd.xlane.f32.xlu0 %v12232_v9 }
0x16f0   :  { %7164 = vadd.xlane.f32.xlu1 %v12237_v17 }
0x16f1   :  { %7162 = vadd.xlane.f32.xlu0 %v12239_v60 }
0x16f4   :  { %7500 = vadd.xlane.f32.xlu1 %v12243_v16 }
0x16f5   :  { %7166 = vadd.xlane.f32.xlu0 %v12245_v57 }
0x16f8   :  { %7504 = vadd.xlane.f32.xlu1 %v12249_v48 }
0x16f9   :  { %7502 = vadd.xlane.f32.xlu0 %v12251_v27 }
0x16fc   :  { %7840 = vadd.xlane.f32.xlu1 %v12255_v2 }
0x16fd   :  { %7838 = vadd.xlane.f32.xlu0 %v12257_v46 }
0x1701   :  { %7842 = vadd.xlane.f32.xlu0 %v12261_v18 }
0x1736   :  { %v8032_v15 = vpop.xlane.xlu0 %8031 }
0x1737   :  { %v8035_v58 = vsub.f32 %v12085_v34, %v8032_v15 }
0x1739   :  { %v8040_v22 = vmul.f32 1.442695, %v8035_v58  ;;  %v8030_v39 = vpop.xlane.xlu1 %8029 }
0x173a   :  { %v8034_v29 = vsub.f32 %v12092_v47, %v8030_v39  ;;  %v8028_v0 = vpop.xlane.xlu0 %8027 }
0x173b   :  { %v8033_v28 = vsub.f32 %v12094_v14, %v8028_v0  ;;  %10316 = vpow2.f32 %v8040_v22 }
0x173c   :  { %v8038_v33 = vmul.f32 1.442695, %v8034_v29 }
0x173d   :  { %v8036_v13 = vmul.f32 1.442695, %v8033_v28  ;;  %v3449_v41 = vpop.xlane.xlu1 %3448 }
0x173e   :  { %10318 = vpow2.f32 %v8038_v33  ;;  %v3447_v20 = vpop.xlane.xlu0 %3446 }
0x173f   :  { %10320 = vpow2.f32 %v8036_v13 }
0x1740   :  { %10322 = vrcp.f32 %v3449_v41 }
0x1741   :  { %10324 = vrcp.f32 %v3447_v20  ;;  %v3785_v61 = vpop.xlane.xlu1 %3784 }
0x1742   :  { %10326 = vrcp.f32 %v3785_v61  ;;  %v3783_v31 = vpop.xlane.xlu0 %3782 }
0x1743   :  { %10328 = vrcp.f32 %v3783_v31 }
0x1745   :  { %v4121_v34 = vpop.xlane.xlu1 %4120  ;;  %v12267_v47 = vpop.eup %10316 }
0x1746   :  { %10330 = vrcp.f32 %v4121_v34  ;;  %v3787_v35 = vpop.xlane.xlu0 %3786 }
0x1747   :  { %10332 = vrcp.f32 %v3787_v35 }
0x1748   :  { %v12269_v14 = vpop.eup %10318 }
0x1749   :  { %12611 = vst [vmem:[#allocation28_spill] sm:$0xff] %v12269_v14  ;;  %v12271_v45 = vpop.eup %10320  ;;  %8044 = vadd.xlane.f32.xlu0 %v12269_v14  ;;  %v4125_v8 = vpop.xlane.xlu1 %4124 }
0x174a   :  { %12612 = vst [vmem:[#allocation27_spill] sm:$0xff] %v12271_v45  ;;  %v10323_v55 = vpop.eup %10322  ;;  %10334 = vrcp.f32 %v4125_v8  ;;  %8042 = vadd.xlane.f32.xlu1 %v12271_v45  ;;  %v4123_v32 = vpop.xlane.xlu0 %4122 }
0x174b   :  { %v10325_v10 = vpop.eup %10324  ;;  %v3455_v6 = vmul.f32 %v10323_v55, %v3449_v41  ;;  %10336 = vrcp.f32 %v4123_v32 }
0x174c   :  { %v10327_v15 = vpop.eup %10326  ;;  %v3454_v58 = vmul.f32 %v10325_v10, %v3447_v20 }
0x174d   :  { %v10329_v22 = vpop.eup %10328  ;;  %v3458_v39 = vsub.f32 2.0, %v3455_v6  ;;  %v3792_v29 = vmul.f32 %v10327_v15, %v3785_v61  ;;  %v4461_v0 = vpop.xlane.xlu1 %4460 }
0x174e   :  { %v3457_v28 = vsub.f32 2.0, %v3454_v58  ;;  %v3791_v33 = vmul.f32 %v10329_v22, %v3783_v31  ;;  %10338 = vrcp.f32 %v4461_v0  ;;  %8046 = vadd.xlane.f32.xlu1 %v12267_v47  ;;  %v4459_v13 = vpop.xlane.xlu0 %4458 }
0x174f   :  { %v3461_v14 = vmul.f32 %v10323_v55, %v3458_v39  ;;  %v3795_v18 = vsub.f32 2.0, %v3792_v29  ;;  %10340 = vrcp.f32 %v4459_v13 }
0x1750   :  { %v10331_v45 = vpop.eup %10330  ;;  %v3460_v46 = vmul.f32 %v10325_v10, %v3457_v28  ;;  %v3794_v2 = vsub.f32 2.0, %v3791_v33 }
0x1751   :  { %v10333_v41 = vpop.eup %10332  ;;  %v3464_v27 = vmul.f32 %v12102_v63, %v3461_v14  ;;  %v3798_v20 = vmul.f32 %v10327_v15, %v3795_v18  ;;  %v4129_v48 = vmul.f32 %v10331_v45, %v4121_v34  ;;  %v4797_v6 = vpop.xlane.xlu1 %4796 }
0x1752   :  { %v3463_v61 = vmul.f32 %v12104_v7, %v3460_v46  ;;  %v3797_v58 = vmul.f32 %v10329_v22, %v3794_v2  ;;  %v3793_v31 = vmul.f32 %v10333_v41, %v3787_v35  ;;  %10342 = vrcp.f32 %v4797_v6  ;;  %v4463_v57 = vpop.xlane.xlu0 %4462 }
0x1753   :  { %3468 = vst [vmem:[#allocation10 + $0x88] sm:$0xff] %v3464_v27  ;;  %v3801_v55 = vmul.f32 %v12111_v38, %v3798_v20  ;;  %v4132_v39 = vsub.f32 2.0, %v4129_v48  ;;  %10344 = vrcp.f32 %v4463_v57 }
0x1754   :  { %v10335_v29 = vpop.eup %10334  ;;  %3467 = vst [vmem:[#allocation10 + $0x80] sm:$0xff] %v3463_v61  ;;  %v3800_v10 = vmul.f32 %v12113_v26, %v3797_v58  ;;  %v3796_v28 = vsub.f32 2.0, %v3793_v31 }
0x1755   :  { %v10337_v63 = vpop.eup %10336  ;;  %3805 = vst [vmem:[#allocation10 + $0x98] sm:$0xff] %v3801_v55  ;;  %v4135_v18 = vmul.f32 %v10331_v45, %v4132_v39  ;;  %v4131_v34 = vmul.f32 %v10335_v29, %v4125_v8  ;;  %v4801_v14 = vpop.xlane.xlu1 %4800 }
0x1756   :  { %3804 = vst [vmem:[#allocation10 + $0x90] sm:$0xff] %v3800_v10  ;;  %v3799_v7 = vmul.f32 %v10333_v41, %v3796_v28  ;;  %v4130_v2 = vmul.f32 %v10337_v63, %v4123_v32  ;;  %10346 = vrcp.f32 %v4801_v14  ;;  %v4799_v46 = vpop.xlane.xlu0 %4798 }
0x1757   :  { %v4138_v27 = vmul.f32 %v12121_v51, %v4135_v18  ;;  %v4134_v38 = vsub.f32 2.0, %v4131_v34  ;;  %10348 = vrcp.f32 %v4799_v46 }
0x1758   :  { %v10339_v48 = vpop.eup %10338  ;;  %v3802_v35 = vmul.f32 %v12125_v3, %v3799_v7  ;;  %v4133_v15 = vsub.f32 2.0, %v4130_v2 }
0x1759   :  { %v10341_v26 = vpop.eup %10340  ;;  %4142 = vst [vmem:[#allocation10 + $0xa8] sm:$0xff] %v4138_v27  ;;  %v4137_v22 = vmul.f32 %v10335_v29, %v4134_v38  ;;  %v4468_v33 = vmul.f32 %v10339_v48, %v4461_v0  ;;  %v5137_v45 = vpop.xlane.xlu1 %5136 }
0x175a   :  { %3806 = vst [vmem:[#allocation10 + $0xa0] sm:$0xff] %v3802_v35  ;;  %v4136_v8 = vmul.f32 %v10337_v63, %v4133_v15  ;;  %v4467_v20 = vmul.f32 %v10341_v26, %v4459_v13  ;;  %10350 = vrcp.f32 %v5137_v45  ;;  %v5135_v32 = vpop.xlane.xlu0 %5134 }
0x175b   :  { %v4140_v41 = vmul.f32 %v12131_v21, %v4137_v22  ;;  %v4471_v61 = vsub.f32 2.0, %v4468_v33  ;;  %10352 = vrcp.f32 %v5135_v32 }
0x175c   :  { %v10343_v51 = vpop.eup %10342  ;;  %v4139_v58 = vmul.f32 %v12133_v49, %v4136_v8  ;;  %v4470_v31 = vsub.f32 2.0, %v4467_v20 }
0x175d   :  { %v10345_v3 = vpop.eup %10344  ;;  %4144 = vst [vmem:[#allocation10 + $0xb8] sm:$0xff] %v4140_v41  ;;  %v4474_v55 = vmul.f32 %v10339_v48, %v4471_v61  ;;  %v4805_v39 = vmul.f32 %v10343_v51, %v4797_v6  ;;  %v5473_v29 = vpop.xlane.xlu1 %5472 }
0x175e   :  { %4143 = vst [vmem:[#allocation10 + $0xb0] sm:$0xff] %v4139_v58  ;;  %v4473_v0 = vmul.f32 %v10341_v26, %v4470_v31  ;;  %v4469_v10 = vmul.f32 %v10345_v3, %v4463_v57  ;;  %10354 = vrcp.f32 %v5473_v29  ;;  %v5139_v13 = vpop.xlane.xlu0 %5138 }
0x175f   :  { %v4477_v28 = vmul.f32 %v12140_v23, %v4474_v55  ;;  %v4808_v63 = vsub.f32 2.0, %v4805_v39  ;;  %10356 = vrcp.f32 %v5139_v13 }
0x1760   :  { %v10347_v21 = vpop.eup %10346  ;;  %v4476_v18 = vmul.f32 %v12142_v54, %v4473_v0  ;;  %v4472_v34 = vsub.f32 2.0, %v4469_v10 }
0x1761   :  { %v10349_v49 = vpop.eup %10348  ;;  %4481 = vst [vmem:[#allocation10 + $0xc8] sm:$0xff] %v4477_v28  ;;  %v4811_v7 = vmul.f32 %v10343_v51, %v4808_v63  ;;  %v4807_v2 = vmul.f32 %v10347_v21, %v4801_v14  ;;  %v5477_v27 = vpop.xlane.xlu1 %5476 }
0x1762   :  { %4480 = vst [vmem:[#allocation10 + $0xc0] sm:$0xff] %v4476_v18  ;;  %v4475_v6 = vmul.f32 %v10345_v3, %v4472_v34  ;;  %v4806_v38 = vmul.f32 %v10349_v49, %v4799_v46  ;;  %10358 = vrcp.f32 %v5477_v27  ;;  %v5475_v57 = vpop.xlane.xlu0 %5474 }
0x1763   :  { %v4814_v48 = vmul.f32 %v12149_v5, %v4811_v7  ;;  %v4810_v35 = vsub.f32 2.0, %v4807_v2  ;;  %10360 = vrcp.f32 %v5475_v57 }
0x1764   :  { %v10351_v23 = vpop.eup %10350  ;;  %v4478_v15 = vmul.f32 %v12151_v36, %v4475_v6  ;;  %v4809_v26 = vsub.f32 2.0, %v4806_v38 }
0x1765   :  { %v10353_v54 = vpop.eup %10352  ;;  %4818 = vst [vmem:[#allocation10 + $0xd8] sm:$0xff] %v4814_v48  ;;  %v4813_v22 = vmul.f32 %v10347_v21, %v4810_v35  ;;  %v5144_v33 = vmul.f32 %v10351_v23, %v5137_v45  ;;  %v5813_v8 = vpop.xlane.xlu1 %5812 }
0x1766   :  { %4482 = vst [vmem:[#allocation10 + $0xd0] sm:$0xff] %v4478_v15  ;;  %v4812_v14 = vmul.f32 %v10349_v49, %v4809_v26  ;;  %v5143_v20 = vmul.f32 %v10353_v54, %v5135_v32  ;;  %10362 = vrcp.f32 %v5813_v8  ;;  %v5811_v46 = vpop.xlane.xlu0 %5810 }
0x1767   :  { %v4816_v41 = vmul.f32 %v12157_v59, %v4813_v22  ;;  %v5147_v61 = vsub.f32 2.0, %v5144_v33  ;;  %10364 = vrcp.f32 %v5811_v46 }
0x1768   :  { %v10355_v5 = vpop.eup %10354  ;;  %v4815_v51 = vmul.f32 %v12159_v12, %v4812_v14  ;;  %v5146_v58 = vsub.f32 2.0, %v5143_v20 }
0x1769   :  { %v10357_v36 = vpop.eup %10356  ;;  %4820 = vst [vmem:[#allocation10 + $0xe8] sm:$0xff] %v4816_v41  ;;  %v5150_v31 = vmul.f32 %v10351_v23, %v5147_v61  ;;  %v5481_v3 = vmul.f32 %v10355_v5, %v5473_v29  ;;  %v6149_v55 = vpop.xlane.xlu1 %6148 }
0x176a   :  { %4819 = vst [vmem:[#allocation10 + $0xe0] sm:$0xff] %v4815_v51  ;;  %v5149_v45 = vmul.f32 %v10353_v54, %v5146_v58  ;;  %v5145_v39 = vmul.f32 %v10357_v36, %v5139_v13  ;;  %10366 = vrcp.f32 %v6149_v55  ;;  %v5815_v32 = vpop.xlane.xlu0 %5814 }
0x176b   :  { %v5153_v0 = vmul.f32 %v12166_v40, %v5150_v31  ;;  %v5484_v10 = vsub.f32 2.0, %v5481_v3  ;;  %10368 = vrcp.f32 %v5815_v32 }
0x176c   :  { %v10359_v59 = vpop.eup %10358  ;;  %v5152_v28 = vmul.f32 %v12168_v19, %v5149_v45  ;;  %v5148_v63 = vsub.f32 2.0, %v5145_v39 }
0x176d   :  { %v10361_v12 = vpop.eup %10360  ;;  %5157 = vst [vmem:[#allocation10 + $0xf8] sm:$0xff] %v5153_v0  ;;  %v5487_v21 = vmul.f32 %v10355_v5, %v5484_v10  ;;  %v5483_v18 = vmul.f32 %v10359_v59, %v5477_v27  ;;  %v6153_v34 = vpop.xlane.xlu1 %6152 }
0x176e   :  { %5156 = vst [vmem:[#allocation10 + $0xf0] sm:$0xff] %v5152_v28  ;;  %v5151_v29 = vmul.f32 %v10357_v36, %v5148_v63  ;;  %v5482_v49 = vmul.f32 %v10361_v12, %v5475_v57  ;;  %10370 = vrcp.f32 %v6153_v34  ;;  %v6151_v13 = vpop.xlane.xlu0 %6150 }
0x176f   :  { %v5490_v7 = vmul.f32 %v12174_v24, %v5487_v21  ;;  %v5486_v2 = vsub.f32 2.0, %v5483_v18  ;;  %10372 = vrcp.f32 %v6151_v13 }
0x1770   :  { %v10363_v40 = vpop.eup %10362  ;;  %v5154_v6 = vmul.f32 %v12176_v52, %v5151_v29  ;;  %v5485_v38 = vsub.f32 2.0, %v5482_v49 }
0x1771   :  { %v10365_v19 = vpop.eup %10364  ;;  %5494 = vst [vmem:[#allocation10 + $0x108] sm:$0xff] %v5490_v7  ;;  %v5489_v48 = vmul.f32 %v10359_v59, %v5486_v2  ;;  %v5820_v35 = vmul.f32 %v10363_v40, %v5813_v8  ;;  %v6489_v23 = vpop.xlane.xlu1 %6488 }
0x1772   :  { %5158 = vst [vmem:[#allocation10 + $0x100] sm:$0xff] %v5154_v6  ;;  %v5488_v27 = vmul.f32 %v10361_v12, %v5485_v38  ;;  %v5819_v15 = vmul.f32 %v10365_v19, %v5811_v46  ;;  %10374 = vrcp.f32 %v6489_v23  ;;  %v6487_v57 = vpop.xlane.xlu0 %6486 }
0x1773   :  { %v5492_v26 = vmul.f32 %v12182_v11, %v5489_v48  ;;  %v5823_v54 = vsub.f32 2.0, %v5820_v35  ;;  %10376 = vrcp.f32 %v6487_v57 }
0x1774   :  { %v10367_v24 = vpop.eup %10366  ;;  %v5491_v22 = vmul.f32 %v12184_v50, %v5488_v27  ;;  %v5822_v33 = vsub.f32 2.0, %v5819_v15 }
0x1775   :  { %v10369_v52 = vpop.eup %10368  ;;  %5496 = vst [vmem:[#allocation10 + $0x118] sm:$0xff] %v5492_v26  ;;  %v5826_v14 = vmul.f32 %v10363_v40, %v5823_v54  ;;  %v6157_v20 = vmul.f32 %v10367_v24, %v6149_v55  ;;  %v6825_v41 = vpop.xlane.xlu1 %6824 }
0x1776   :  { %5495 = vst [vmem:[#allocation10 + $0x110] sm:$0xff] %v5491_v22  ;;  %v5825_v8 = vmul.f32 %v10365_v19, %v5822_v33  ;;  %v5821_v61 = vmul.f32 %v10369_v52, %v5815_v32  ;;  %10378 = vrcp.f32 %v6825_v41  ;;  %v6491_v46 = vpop.xlane.xlu0 %6490 }
0x1777   :  { %v5829_v5 = vmul.f32 %v12190_v30, %v5826_v14  ;;  %v6160_v51 = vsub.f32 2.0, %v6157_v20  ;;  %10380 = vrcp.f32 %v6491_v46 }
0x1778   :  { %v10371_v11 = vpop.eup %10370  ;;  %v5828_v58 = vmul.f32 %v12192_v42, %v5825_v8  ;;  %v5824_v36 = vsub.f32 2.0, %v5821_v61 }
0x1779   :  { %v10373_v50 = vpop.eup %10372  ;;  %5833 = vst [vmem:[#allocation10 + $0x128] sm:$0xff] %v5829_v5  ;;  %v6163_v31 = vmul.f32 %v10367_v24, %v6160_v51  ;;  %v6159_v3 = vmul.f32 %v10371_v11, %v6153_v34  ;;  %v6829_v45 = vpop.xlane.xlu1 %6828 }
0x177a   :  { %5832 = vst [vmem:[#allocation10 + $0x120] sm:$0xff] %v5828_v58  ;;  %v5827_v55 = vmul.f32 %v10369_v52, %v5824_v36  ;;  %v6158_v39 = vmul.f32 %v10373_v50, %v6151_v13  ;;  %10382 = vrcp.f32 %v6829_v45  ;;  %v6827_v32 = vpop.xlane.xlu0 %6826 }
0x177b   :  { %v6166_v0 = vmul.f32 %v12198_v62, %v6163_v31  ;;  %v6162_v10 = vsub.f32 2.0, %v6159_v3  ;;  %10384 = vrcp.f32 %v6827_v32 }
0x177c   :  { %v10375_v30 = vpop.eup %10374  ;;  %v5830_v59 = vmul.f32 %v12200_v4, %v5827_v55  ;;  %v6161_v28 = vsub.f32 2.0, %v6158_v39 }
0x177d   :  { %v10377_v42 = vpop.eup %10376  ;;  %6170 = vst [vmem:[#allocation10 + $0x138] sm:$0xff] %v6166_v0  ;;  %v6165_v63 = vmul.f32 %v10371_v11, %v6162_v10  ;;  %v6496_v12 = vmul.f32 %v10375_v30, %v6489_v23  ;;  %v7165_v21 = vpop.xlane.xlu1 %7164 }
0x177e   :  { %5834 = vst [vmem:[#allocation10 + $0x130] sm:$0xff] %v5830_v59  ;;  %v6164_v18 = vmul.f32 %v10373_v50, %v6161_v28  ;;  %v6495_v34 = vmul.f32 %v10377_v42, %v6487_v57  ;;  %10386 = vrcp.f32 %v7165_v21  ;;  %v7163_v29 = vpop.xlane.xlu0 %7162 }
0x177f   :  { %v6168_v49 = vmul.f32 %v12206_v37, %v6165_v63  ;;  %v6499_v13 = vsub.f32 2.0, %v6496_v12  ;;  %10388 = vrcp.f32 %v7163_v29 }
0x1780   :  { %v10379_v62 = vpop.eup %10378  ;;  %v6167_v7 = vmul.f32 %v12208_v43, %v6164_v18  ;;  %v6498_v2 = vsub.f32 2.0, %v6495_v34 }
0x1781   :  { %v10381_v4 = vpop.eup %10380  ;;  %6172 = vst [vmem:[#allocation10 + $0x148] sm:$0xff] %v6168_v49  ;;  %v6502_v40 = vmul.f32 %v10375_v30, %v6499_v13  ;;  %v6833_v6 = vmul.f32 %v10379_v62, %v6825_v41  ;;  %v7501_v38 = vpop.xlane.xlu1 %7500  ;;  %v12613_v49 = vld [vmem:[#allocation18_spill] sm:$0xff] }
0x1782   :  { %6171 = vst [vmem:[#allocation10 + $0x140] sm:$0xff] %v6167_v7  ;;  %v6501_v19 = vmul.f32 %v10377_v42, %v6498_v2  ;;  %v6497_v48 = vmul.f32 %v10381_v4, %v6491_v46  ;;  %10390 = vrcp.f32 %v7501_v38  ;;  %v7167_v35 = vpop.xlane.xlu0 %7166 }
0x1783   :  { %v6505_v23 = vmul.f32 %v12214_v1, %v6502_v40  ;;  %v6836_v27 = vsub.f32 2.0, %v6833_v6  ;;  %10392 = vrcp.f32 %v7167_v35  ;;  %v12614_v40 = vld [vmem:[#allocation24_spill] sm:$0xff] }
0x1784   :  { %v10383_v37 = vpop.eup %10382  ;;  %v6504_v15 = vmul.f32 %v12216_v25, %v6501_v19  ;;  %v6500_v57 = vsub.f32 2.0, %v6497_v48  ;;  %v12615_v19 = vld [vmem:[#allocation21_spill] sm:$0xff] }
0x1785   :  { %v10385_v43 = vpop.eup %10384  ;;  %6509 = vst [vmem:[#allocation10 + $0x158] sm:$0xff] %v6505_v23  ;;  %v6839_v26 = vmul.f32 %v10379_v62, %v6836_v27  ;;  %v6835_v54 = vmul.f32 %v10383_v37, %v6829_v45  ;;  %v7505_v24 = vpop.xlane.xlu1 %7504 }
0x1786   :  { %6508 = vst [vmem:[#allocation10 + $0x150] sm:$0xff] %v6504_v15  ;;  %v6503_v22 = vmul.f32 %v10381_v4, %v6500_v57  ;;  %v6834_v33 = vmul.f32 %v10385_v43, %v6827_v32  ;;  %10394 = vrcp.f32 %v7505_v24  ;;  %v7503_v52 = vpop.xlane.xlu0 %7502  ;;  %v12616_v15 = vld [vmem:[#allocation23_spill] sm:$0xff] }
0x1787   :  { %v6842_v14 = vmul.f32 %v12222_v53, %v6839_v26  ;;  %v6838_v20 = vsub.f32 2.0, %v6835_v54  ;;  %10396 = vrcp.f32 %v7503_v52 }
0x1788   :  { %v10387_v1 = vpop.eup %10386  ;;  %v6506_v41 = vmul.f32 %v12224_v44, %v6503_v22  ;;  %v6837_v8 = vsub.f32 2.0, %v6834_v33  ;;  %v12618_v22 = vld [vmem:[#allocation26_spill] sm:$0xff] }
0x1789   :  { %v10389_v25 = vpop.eup %10388  ;;  %6846 = vst [vmem:[#allocation10 + $0x168] sm:$0xff] %v6842_v14  ;;  %v6841_v61 = vmul.f32 %v10383_v37, %v6838_v20  ;;  %v7172_v46 = vmul.f32 %v10387_v1, %v7165_v21  ;;  %v7841_v5 = vpop.xlane.xlu1 %7840 }
0x178a   :  { %6510 = vst [vmem:[#allocation10 + $0x160] sm:$0xff] %v6506_v41  ;;  %v6840_v51 = vmul.f32 %v10385_v43, %v6837_v8  ;;  %v7171_v11 = vmul.f32 %v10389_v25, %v7163_v29  ;;  %10398 = vrcp.f32 %v7841_v5  ;;  %v7839_v58 = vpop.xlane.xlu0 %7838  ;;  %v12617_v43 = vld [vmem:[#allocation25_spill] sm:$0xff] }
0x178b   :  { %v6844_v36 = vmul.f32 %v12230_v56, %v6841_v61  ;;  %v7175_v50 = vsub.f32 2.0, %v7172_v46  ;;  %10400 = vrcp.f32 %v7839_v58 }
0x178c   :  { %v10391_v53 = vpop.eup %10390  ;;  %v6843_v31 = vmul.f32 %v12232_v9, %v6840_v51  ;;  %v7174_v3 = vsub.f32 2.0, %v7171_v11 }
0x178d   :  { %v10393_v44 = vpop.eup %10392  ;;  %6848 = vst [vmem:[#allocation10 + $0x178] sm:$0xff] %v6844_v36  ;;  %v7178_v45 = vmul.f32 %v10387_v1, %v7175_v50  ;;  %v7509_v55 = vmul.f32 %v10391_v53, %v7501_v38  ;;  %v12619_v36 = vld [vmem:[#allocation28_spill] sm:$0xff] }
0x178e   :  { %6847 = vst [vmem:[#allocation10 + $0x170] sm:$0xff] %v6843_v31  ;;  %v7177_v39 = vmul.f32 %v10389_v25, %v7174_v3  ;;  %v7173_v32 = vmul.f32 %v10393_v44, %v7167_v35  ;;  %v7843_v0 = vpop.xlane.xlu0 %7842 }
0x178f   :  { %v7181_v10 = vmul.f32 %v12237_v17, %v7178_v45  ;;  %v7512_v30 = vsub.f32 2.0, %v7509_v55  ;;  %10402 = vrcp.f32 %v7843_v0 }
0x1790   :  { %v10395_v59 = vpop.eup %10394  ;;  %v7180_v56 = vmul.f32 %v12239_v60, %v7177_v39  ;;  %v7176_v28 = vsub.f32 2.0, %v7173_v32 }
0x1791   :  { %v10397_v42 = vpop.eup %10396  ;;  %7185 = vst [vmem:[#allocation10 + $0x188] sm:$0xff] %v7181_v10  ;;  %v7515_v9 = vmul.f32 %v10391_v53, %v7512_v30  ;;  %v7511_v63 = vmul.f32 %v10395_v59, %v7505_v24  ;;  %v12620_v53 = vld [vmem:[#allocation27_spill] sm:$0xff] }
0x1792   :  { %7184 = vst [vmem:[#allocation10 + $0x180] sm:$0xff] %v7180_v56  ;;  %v7179_v12 = vmul.f32 %v10393_v44, %v7176_v28  ;;  %v7510_v21 = vmul.f32 %v10397_v42, %v7503_v52 }
0x1793   :  { %v7518_v18 = vmul.f32 %v12243_v16, %v7515_v9  ;;  %v7514_v34 = vsub.f32 2.0, %v7511_v63 }
0x1794   :  { %v10399_v29 = vpop.eup %10398  ;;  %v7182_v13 = vmul.f32 %v12613_v49, %v7179_v12  ;;  %v7513_v17 = vsub.f32 2.0, %v7510_v21 }
0x1795   :  { %v10401_v62 = vpop.eup %10400  ;;  %7522 = vst [vmem:[#allocation10 + $0x198] sm:$0xff] %v7518_v18  ;;  %v7517_v7 = vmul.f32 %v10395_v59, %v7514_v34  ;;  %v7848_v2 = vmul.f32 %v10399_v29, %v7841_v5 }
0x1796   :  { %7186 = vst [vmem:[#allocation10 + $0x190] sm:$0xff] %v7182_v13  ;;  %v7516_v60 = vmul.f32 %v10397_v42, %v7513_v17  ;;  %v7847_v4 = vmul.f32 %v10401_v62, %v7839_v58 }
0x1797   :  { %v7520_v6 = vmul.f32 %v12614_v40, %v7517_v7  ;;  %v7851_v38 = vsub.f32 2.0, %v7848_v2 }
0x1798   :  { %v7519_v48 = vmul.f32 %v12615_v19, %v7516_v60  ;;  %v7850_v35 = vsub.f32 2.0, %v7847_v4 }
0x1799   :  { %v10403_v23 = vpop.eup %10402  ;;  %7524 = vst [vmem:[#allocation10 + $0x1a8] sm:$0xff] %v7520_v6  ;;  %v7854_v16 = vmul.f32 %v10399_v29, %v7851_v38 }
0x179a   :  { %7523 = vst [vmem:[#allocation10 + $0x1a0] sm:$0xff] %v7519_v48  ;;  %v7853_v27 = vmul.f32 %v10401_v62, %v7850_v35  ;;  %v7849_v37 = vmul.f32 %v10403_v23, %v7843_v0 }
0x179b   :  { %v7857_v57 = vmul.f32 %v12616_v15, %v7854_v16 }
0x179c   :  { %v7856_v26 = vmul.f32 %v12617_v43, %v7853_v27  ;;  %v7852_v54 = vsub.f32 2.0, %v7849_v37 }
0x179d   :  { %7861 = vst [vmem:[#allocation10 + $0x1b8] sm:$0xff] %v7857_v57 }
0x179e   :  { %7860 = vst [vmem:[#allocation10 + $0x1b0] sm:$0xff] %v7856_v26  ;;  %v7855_v24 = vmul.f32 %v10403_v23, %v7852_v54 }
0x17a0   :  { %v7858_v33 = vmul.f32 %v12618_v22, %v7855_v24 }
0x17a2   :  { %7862 = vst [vmem:[#allocation10 + $0x1c0] sm:$0xff] %v7858_v33 }
0x17d6   :  { %v8045_v52 = vpop.xlane.xlu0 %8044 }
0x17d7   :  { %10404 = vrcp.f32 %v8045_v52  ;;  %v8043_v14 = vpop.xlane.xlu1 %8042 }
0x17d8   :  { %10406 = vrcp.f32 %v8043_v14 }
0x17db   :  { %v8047_v20 = vpop.xlane.xlu1 %8046 }
0x17dc   :  { %10408 = vrcp.f32 %v8047_v20 }
0x17e1   :  { %v10405_v1 = vpop.eup %10404 }
0x17e2   :  { %v10407_v41 = vpop.eup %10406  ;;  %v8052_v8 = vmul.f32 %v10405_v1, %v8045_v52 }
0x17e3   :  { %v8051_v25 = vmul.f32 %v10407_v41, %v8043_v14 }
0x17e4   :  { %v8055_v61 = vsub.f32 2.0, %v8052_v8 }
0x17e5   :  { %v8054_v46 = vsub.f32 2.0, %v8051_v25 }
0x17e6   :  { %v10409_v5 = vpop.eup %10408  ;;  %v8058_v51 = vmul.f32 %v10405_v1, %v8055_v61 }
0x17e7   :  { %v8057_v11 = vmul.f32 %v10407_v41, %v8054_v46  ;;  %v8053_v58 = vmul.f32 %v10409_v5, %v8047_v20 }
0x17e8   :  { %v8061_v50 = vmul.f32 %v12619_v36, %v8058_v51 }
0x17e9   :  { %v8060_v31 = vmul.f32 %v12620_v53, %v8057_v11  ;;  %v8056_v3 = vsub.f32 2.0, %v8053_v58 }
0x17ea   :  { %8065 = vst [vmem:[#allocation10 + $0x1d0] sm:$0xff] %v8061_v50 }
0x17eb   :  { %8064 = vst [vmem:[#allocation10 + $0x1c8] sm:$0xff] %v8060_v31  ;;  %v8059_v44 = vmul.f32 %v10409_v5, %v8056_v3 }
0x17ed   :  { %v8062_v45 = vmul.f32 %v12267_v47, %v8059_v44 }
0x17ef   :  { %8066 = vst [vmem:[#allocation10 + $0x1d8] sm:$0xff] %v8062_v45 }
0x17f0   :  { %10465 = shalt.err (!%p10462_p6)
}
0x17f1   :  { %s10466_s1 = scalar_lea.hbm %s12339_s5, 7680 }
0x17f2   :  { %p10467_p7 = scmp.ne.s32.totalorder %s12339_s5, %s10466_s1  ;;  %p10470_p8 = scmp.lt.u32.totalorder %s10466_s1, %s12339_s5 }
0x17f4   :  { %p10472_p9 = pnand %p10470_p8, %p10467_p7 }
0x17f6   :  { %10475 = shalt.err (!%p10472_p9)
}
0x17f7   :  { %s10500_s30 = smov 8  }
0x17f8   :  { %8078 = dma.vmem_to_hbm [thread:$0]  %s8073_s19, 7680, %s12339_s5, [#allocation7], %s10493_s23, %s10493_s23, %s10500_s30  }
0x17f9   :  { %10482 = dma.done.wait [#allocation7], 7680  }
0x17fa   :  { %10483 = vsyncadd [#allocation7], 4294959616 }
0x17fb   :  { %8082 = vsyncpa [#allocation6], 1 }
0x17fc   :  { %8083 = vsyncpa [#allocation9], 1 }
0x17fd   :  { %8084 = vsyncpa [#allocation7], 1 }
0x17fe   :  { %8085 = vsyncmov [#allocation4] }
0x1801   :  { %s8086_s8 = vpop.sfrf %8085 }
0x1802   :  { %p8370_p10 = scmp.ne.s32.totalorder %s8086_s8, 0 }
0x1804   :  { %8090 = shalt.err (%p8370_p10)  }

</bundles_post_ra>
